<compile_context>
chip_gen: v5e
topology: v5e:2x2
jax: 0.10.0
libtpu: 0.0.40
codegen_flags: <defaults>
</compile_context>

<pallas_src>
import math

import jax
import jax.numpy as jnp
from jax.experimental import pallas as pl
from jax.experimental.pallas import tpu as pltpu


def _make_kernel(B, C, K, L, H, F):
    D = C
    KL = K * L
    M = B * KL            # total tokens = (B*K) attention rows x L steps
    N = B * K             # independent attention rows
    dh = D // H
    f32, bf16 = jnp.float32, jnp.bfloat16
    c_gelu = math.sqrt(2.0 / math.pi)

    def layer_norm(x, g, b):
        mu = jnp.mean(x, axis=-1, keepdims=True)
        var = jnp.mean((x - mu) ** 2, axis=-1, keepdims=True)
        return (x - mu) * jax.lax.rsqrt(var + 1e-5) * g + b

    def to_heads(t):       # (M, D) -> (H*N, L, dh): one lane-aware relayout
        return pltpu.einshape("mhd->hmd", t.reshape(M, H, dh)).reshape(H * N, L, dh)

    def kernel(q_ref, v_ref, w_in_ref, wo_ref, w1_ref, w2_ref, bias_ref, o_ref):
        # (B, C, K*L) -> (B*K*L, C): caller layout folded into the kernel.
        xq = jnp.swapaxes(q_ref[...], 1, 2).reshape(M, D).astype(f32)
        xv = jnp.swapaxes(v_ref[...], 1, 2).reshape(M, D).astype(f32)

        bias = bias_ref[...]                        # (8, max(3D, F)) f32
        b_in = bias[0:1, :3 * D]
        b1 = bias[1:2, :F]
        bo = bias[2:3, :D]
        b2 = bias[3:4, :D]
        ln1w, ln1b = bias[4:5, :D], bias[5:6, :D]
        ln2w, ln2b = bias[6:7, :D], bias[7:8, :D]

        # Fused Q/K/V in-projection: ONE matmul against the host-built
        # block-diagonal (2D, 3D) weight. Query scale already folded into Wq/bq.
        xcat = jnp.concatenate([xq, xv], axis=-1).astype(bf16)        # (M, 2D)
        proj = jnp.dot(xcat, w_in_ref[...], preferred_element_type=f32) + b_in
        qp = proj[:, :D]                   # already scaled by 1/sqrt(dh)
        kp = proj[:, D:2 * D]
        vp = proj[:, 2 * D:]

        # Head-major batched layout (batch = H*N), one relayout per tensor.
        q_h = to_heads(qp).astype(bf16)
        k_h = to_heads(kp).astype(bf16)
        v_h = to_heads(vp).astype(bf16)

        # Batched scaled-dot-product attention (softmax/exp kept in f32).
        s = jnp.einsum('bqd,bkd->bqk', q_h, k_h, preferred_element_type=f32)
        s = s - jnp.max(s, axis=-1, keepdims=True)
        e = jnp.exp(s)
        p = e * pl.reciprocal(jnp.sum(e, axis=-1, keepdims=True), approx=True)
        ctx = jnp.einsum('bqk,bkd->bqd', p.astype(bf16), v_h,
                         preferred_element_type=f32)                  # (H*N, L, dh)

        # Merge heads back and apply a single (M, D) @ (D, D) output projection.
        ctx_md = pltpu.einshape("hmd->mhd", ctx.reshape(H, M, dh)).reshape(M, D)
        attn = jnp.dot(ctx_md.astype(bf16), wo_ref[...],
                       preferred_element_type=f32) + bo               # (M, D)

        # Residual + LayerNorm 1 (f32).
        src = layer_norm(xv + attn, ln1w, ln1b)

        # Feed-forward: Linear -> GELU -> Linear.
        h1 = jnp.dot(src.astype(bf16), w1_ref[...], preferred_element_type=f32) + b1
        # TODO(synk): PyTorch F.gelu is exact erf-GELU; tanh approximation used
        # (max abs deviation ~3e-4) to stay on guaranteed Mosaic lowerings.
        h1 = 0.5 * h1 * (1.0 + jnp.tanh(c_gelu * (h1 + 0.044715 * h1 * h1 * h1)))
        h2 = jnp.dot(h1.astype(bf16), w2_ref[...], preferred_element_type=f32) + b2

        # Residual + LayerNorm 2 (f32).
        out = layer_norm(src + h2, ln2w, ln2b)                        # (M, D)

        # Write directly in the caller's (B, C, K*L) layout: no wrapper transposes.
        o_ref[...] = jnp.swapaxes(out.reshape(B, KL, D), 1, 2).astype(o_ref.dtype)

    return kernel


def temporal_learning_forward(y, base_shape, packed, nheads, itp_y=None, is_cross=True):
    """JAX equivalent of TemporalLearning.forward (eval mode): one pallas_call,
    zero surrounding XLA transpose/reshape launches."""
    B, C, K, L = base_shape
    if L == 1:
        return y
    q_src = itp_y if is_cross else y
    KL = K * L
    F = packed["w1"].shape[1]

    def full(a):
        return pl.BlockSpec(a.shape, lambda i, _a=a: (0,) * _a.ndim)

    out = pl.pallas_call(
        _make_kernel(B, C, K, L, nheads, F),
        grid=(1,),
        in_specs=[
            pl.BlockSpec((B, C, KL), lambda i: (0, 0, 0)),   # query/key source
            pl.BlockSpec((B, C, KL), lambda i: (0, 0, 0)),   # value / residual source
            full(packed["w_in"]),                            # fused block-diag in-proj (bf16)
            full(packed["wo"]),                              # out-proj (bf16)
            full(packed["w1"]),                              # FFN W1 (bf16)
            full(packed["w2"]),                              # FFN W2 (bf16)
            full(packed["bias"]),                            # packed biases / LN affine (f32)
        ],
        out_specs=pl.BlockSpec((B, C, KL), lambda i: (0, 0, 0)),
        out_shape=jax.ShapeDtypeStruct((B, C, KL), y.dtype),
    )(q_src, y, packed["w_in"], packed["wo"], packed["w1"], packed["w2"], packed["bias"])
    return out


def init_params(key, channels, dim_feedforward=64):
    """Deterministic synthetic parameters matching the PyTorch module shapes."""
    D, F = channels, dim_feedforward
    ks = jax.random.split(key, 8)
    in_proj_w = jax.random.normal(ks[0], (3 * D, D), jnp.float32) / math.sqrt(D)
    in_proj_b = 0.01 * jax.random.normal(ks[1], (3 * D,), jnp.float32)
    out_proj_w = jax.random.normal(ks[2], (D, D), jnp.float32) / math.sqrt(D)
    out_proj_b = 0.01 * jax.random.normal(ks[3], (D,), jnp.float32)
    lin1_w = jax.random.normal(ks[4], (F, D), jnp.float32) / math.sqrt(D)
    lin1_b = 0.01 * jax.random.normal(ks[5], (F,), jnp.float32)
    lin2_w = jax.random.normal(ks[6], (D, F), jnp.float32) / math.sqrt(F)
    lin2_b = 0.01 * jax.random.normal(ks[7], (D,), jnp.float32)
    return {
        # PyTorch Linear computes x @ W.T + b -> pre-transpose once here.
        # w_qkv columns: [0:D]=Wq.T, [D:2D]=Wk.T, [2D:3D]=Wv.T
        "w_qkv": in_proj_w.T, "b_qkv": in_proj_b,
        "wo": out_proj_w.T, "bo": out_proj_b,
        "w1": lin1_w.T, "b1": lin1_b,
        "w2": lin2_w.T, "b2": lin2_b,
        "ln1w": jnp.ones((D,), jnp.float32), "ln1b": jnp.zeros((D,), jnp.float32),
        "ln2w": jnp.ones((D,), jnp.float32), "ln2b": jnp.zeros((D,), jnp.float32),
    }


def pack_params(p, nheads):
    """One-time host packing into kernel-ready form: bf16 weights, block-diagonal
    fused QKV in-projection with the query scale folded in, and one packed f32
    (8, max(3D,F)) array holding all biases + LayerNorm affine parameters."""
    D = p["wo"].shape[0]
    F = p["w1"].shape[1]
    dh = D // nheads
    scale = 1.0 / math.sqrt(dh)

    # Block-diagonal fused in-projection: [x_q | x_v] @ w_in = [q*scale | k | v].
    w_in = jnp.zeros((2 * D, 3 * D), jnp.float32)
    w_in = w_in.at[:D, :D].set(p["w_qkv"][:, :D] * scale)       # Wq.T (pre-scaled)
    w_in = w_in.at[:D, D:2 * D].set(p["w_qkv"][:, D:2 * D])     # Wk.T
    w_in = w_in.at[D:, 2 * D:].set(p["w_qkv"][:, 2 * D:])       # Wv.T
    b_in = jnp.concatenate([p["b_qkv"][:D] * scale, p["b_qkv"][D:]])

    PW = max(3 * D, F)

    def row(vec):
        vec = jnp.asarray(vec, jnp.float32).reshape(1, -1)
        return jnp.pad(vec, ((0, 0), (0, PW - vec.shape[1])))

    bias_pack = jnp.concatenate(
        [row(b_in), row(p["b1"]), row(p["bo"]), row(p["b2"]),
         row(p["ln1w"]), row(p["ln1b"]), row(p["ln2w"]), row(p["ln2b"])], axis=0)

    return {
        "w_in": w_in.astype(jnp.bfloat16),
        "wo": p["wo"].astype(jnp.bfloat16),
        "w1": p["w1"].astype(jnp.bfloat16),
        "w2": p["w2"].astype(jnp.bfloat16),
        "bias": bias_pack,
    }


if __name__ == "__main__":
    B, C, K, L = 2, 32, 4, 8       # channels=32, K spatial nodes, L time steps
    nheads = 4
    key = jax.random.PRNGKey(0)
    ky, kitp, kp = jax.random.split(key, 3)
    y = jax.random.normal(ky, (B, C, K * L), jnp.float32)
    itp_y = jax.random.normal(kitp, (B, C, K * L), jnp.float32)
    packed = pack_params(init_params(kp, C), nheads)

    out = temporal_learning_forward(y, (B, C, K, L), packed, nheads,
                                    itp_y=itp_y, is_cross=True)
    out = jax.block_until_ready(out)
    assert out.shape == (B, C, K * L)
    assert bool(jnp.all(jnp.isfinite(out)))
    print("KERNEL_OK")
</pallas_src>

<mosaic_0001>
module attributes {stable_mosaic.version = 11 : i64} {
  func.func @kernel(%arg0: i32, %arg1: memref<2x32x32xf32, #tpu.memory_space<vmem>>, %arg2: memref<2x32x32xf32, #tpu.memory_space<vmem>>, %arg3: memref<64x96xbf16, #tpu.memory_space<vmem>>, %arg4: memref<32x32xbf16, #tpu.memory_space<vmem>>, %arg5: memref<32x64xbf16, #tpu.memory_space<vmem>>, %arg6: memref<64x32xbf16, #tpu.memory_space<vmem>>, %arg7: memref<8x96xf32, #tpu.memory_space<vmem>>, %arg8: memref<2x32x32xf32, #tpu.memory_space<vmem>>) attributes {dimension_semantics = [#tpu.dimension_semantics<arbitrary>], iteration_bounds = array<i64: 1>, scalar_prefetch = 0 : i64, scratch_operands = 0 : i64, tpu.core_type = #tpu.core_type<tc>, window_params = [{pipeline_mode = #tpu.pipeline_mode<synchronous>, transform_indices = @transform_0, window_bounds = array<i64: 2, 32, 32>}, {pipeline_mode = #tpu.pipeline_mode<synchronous>, transform_indices = @transform_1, window_bounds = array<i64: 2, 32, 32>}, {pipeline_mode = #tpu.pipeline_mode<synchronous>, transform_indices = @transform_2, window_bounds = array<i64: 64, 96>}, {pipeline_mode = #tpu.pipeline_mode<synchronous>, transform_indices = @transform_3, window_bounds = array<i64: 32, 32>}, {pipeline_mode = #tpu.pipeline_mode<synchronous>, transform_indices = @transform_4, window_bounds = array<i64: 32, 64>}, {pipeline_mode = #tpu.pipeline_mode<synchronous>, transform_indices = @transform_5, window_bounds = array<i64: 64, 32>}, {pipeline_mode = #tpu.pipeline_mode<synchronous>, transform_indices = @transform_6, window_bounds = array<i64: 8, 96>}, {pipeline_mode = #tpu.pipeline_mode<synchronous>, transform_indices = @transform_7, window_bounds = array<i64: 2, 32, 32>}]} {
    %c0 = arith.constant 0 : index
    %c0_0 = arith.constant 0 : index
    %c0_1 = arith.constant 0 : index
    %0 = vector.load %arg1[%c0, %c0_0, %c0_1] : memref<2x32x32xf32, #tpu.memory_space<vmem>>, vector<2x32x32xf32>
    %1 = tpu.transpose %0, [0, 2, 1] : vector<2x32x32xf32> -> vector<2x32x32xf32>
    %2 = vector.shape_cast %1 : vector<2x32x32xf32> to vector<64x32xf32>
    %c0_2 = arith.constant 0 : index
    %c0_3 = arith.constant 0 : index
    %c0_4 = arith.constant 0 : index
    %3 = vector.load %arg2[%c0_2, %c0_3, %c0_4] : memref<2x32x32xf32, #tpu.memory_space<vmem>>, vector<2x32x32xf32>
    %4 = tpu.transpose %3, [0, 2, 1] : vector<2x32x32xf32> -> vector<2x32x32xf32>
    %5 = vector.shape_cast %4 : vector<2x32x32xf32> to vector<64x32xf32>
    %c0_5 = arith.constant 0 : index
    %c0_6 = arith.constant 0 : index
    %6 = vector.load %arg7[%c0_5, %c0_6] : memref<8x96xf32, #tpu.memory_space<vmem>>, vector<8x96xf32>
    %7 = vector.extract_strided_slice %6 {offsets = [0, 0], sizes = [1, 96], strides = [1, 1]} : vector<8x96xf32> to vector<1x96xf32>
    %8 = vector.extract_strided_slice %6 {offsets = [1, 0], sizes = [1, 64], strides = [1, 1]} : vector<8x96xf32> to vector<1x64xf32>
    %9 = vector.extract_strided_slice %6 {offsets = [2, 0], sizes = [1, 32], strides = [1, 1]} : vector<8x96xf32> to vector<1x32xf32>
    %10 = vector.extract_strided_slice %6 {offsets = [3, 0], sizes = [1, 32], strides = [1, 1]} : vector<8x96xf32> to vector<1x32xf32>
    %11 = vector.extract_strided_slice %6 {offsets = [4, 0], sizes = [1, 32], strides = [1, 1]} : vector<8x96xf32> to vector<1x32xf32>
    %12 = vector.extract_strided_slice %6 {offsets = [5, 0], sizes = [1, 32], strides = [1, 1]} : vector<8x96xf32> to vector<1x32xf32>
    %13 = vector.extract_strided_slice %6 {offsets = [6, 0], sizes = [1, 32], strides = [1, 1]} : vector<8x96xf32> to vector<1x32xf32>
    %14 = vector.extract_strided_slice %6 {offsets = [7, 0], sizes = [1, 32], strides = [1, 1]} : vector<8x96xf32> to vector<1x32xf32>
    %15 = tpu.concatenate %2, %5 in 1 : vector<64x32xf32>, vector<64x32xf32> -> vector<64x64xf32>
    %16 = arith.truncf %15 : vector<64x64xf32> to vector<64x64xbf16>
    %c0_7 = arith.constant 0 : index
    %c0_8 = arith.constant 0 : index
    %17 = vector.load %arg3[%c0_7, %c0_8] : memref<64x96xbf16, #tpu.memory_space<vmem>>, vector<64x96xbf16>
    %cst = arith.constant dense<0.000000e+00> : vector<64x96xf32>
    %18 = tpu.matmul %16, %17, %cst {dimension_numbers = #tpu.dot_dimension_numbers<[1], [0], [0], [1], [0, 0, 1, 1], [], []>} : vector<64x64xbf16>, vector<64x96xbf16>, vector<64x96xf32> -> vector<64x96xf32>
    %19 = vector.broadcast %7 : vector<1x96xf32> to vector<64x96xf32>
    %20 = arith.addf %18, %19 : vector<64x96xf32>
    %21 = vector.extract_strided_slice %20 {offsets = [0, 0], sizes = [64, 32], strides = [1, 1]} : vector<64x96xf32> to vector<64x32xf32>
    %22 = vector.extract_strided_slice %20 {offsets = [0, 32], sizes = [64, 32], strides = [1, 1]} : vector<64x96xf32> to vector<64x32xf32>
    %23 = vector.extract_strided_slice %20 {offsets = [0, 64], sizes = [64, 32], strides = [1, 1]} : vector<64x96xf32> to vector<64x32xf32>
    %24 = vector.shape_cast %21 : vector<64x32xf32> to vector<64x4x8xf32>
    %25 = tpu.transpose %24, [1, 0, 2] : vector<64x4x8xf32> -> vector<4x64x8xf32>
    %26 = vector.shape_cast %25 : vector<4x64x8xf32> to vector<32x8x8xf32>
    %27 = arith.truncf %26 : vector<32x8x8xf32> to vector<32x8x8xbf16>
    %28 = vector.shape_cast %22 : vector<64x32xf32> to vector<64x4x8xf32>
    %29 = tpu.transpose %28, [1, 0, 2] : vector<64x4x8xf32> -> vector<4x64x8xf32>
    %30 = vector.shape_cast %29 : vector<4x64x8xf32> to vector<32x8x8xf32>
    %31 = arith.truncf %30 : vector<32x8x8xf32> to vector<32x8x8xbf16>
    %32 = vector.shape_cast %23 : vector<64x32xf32> to vector<64x4x8xf32>
    %33 = tpu.transpose %32, [1, 0, 2] : vector<64x4x8xf32> -> vector<4x64x8xf32>
    %34 = vector.shape_cast %33 : vector<4x64x8xf32> to vector<32x8x8xf32>
    %35 = arith.truncf %34 : vector<32x8x8xf32> to vector<32x8x8xbf16>
    "tpu.trace_start"() <{level = 10 : i32, message = "bqd,bkd->bqk"}> : () -> ()
    %cst_9 = arith.constant dense<0.000000e+00> : vector<32x8x8xf32>
    %36 = tpu.matmul %27, %31, %cst_9 {dimension_numbers = #tpu.dot_dimension_numbers<[2], [2], [1], [1], [0, 0, 0, 1, 1, 1], [0], [0]>} : vector<32x8x8xbf16>, vector<32x8x8xbf16>, vector<32x8x8xf32> -> vector<32x8x8xf32>
    "tpu.trace_stop"() : () -> ()
    %cst_10 = arith.constant dense<0xFF800000> : vector<32x8xf32>
    %37 = vector.multi_reduction <maximumf>, %36, %cst_10 [2] : vector<32x8x8xf32> to vector<32x8xf32>
    %38 = vector.shape_cast %37 : vector<32x8xf32> to vector<32x8x1xf32>
    %39 = vector.broadcast %38 : vector<32x8x1xf32> to vector<32x8x8xf32>
    %40 = arith.subf %36, %39 : vector<32x8x8xf32>
    %41 = math.exp %40 : vector<32x8x8xf32>
    %cst_11 = arith.constant dense<0.000000e+00> : vector<32x8xf32>
    %42 = vector.multi_reduction <add>, %41, %cst_11 [2] : vector<32x8x8xf32> to vector<32x8xf32>
    %43 = vector.shape_cast %42 : vector<32x8xf32> to vector<32x8x1xf32>
    %44 = tpu.reciprocal %43 {approx = true} : vector<32x8x1xf32> -> vector<32x8x1xf32>
    %45 = vector.broadcast %44 : vector<32x8x1xf32> to vector<32x8x8xf32>
    %46 = arith.mulf %41, %45 : vector<32x8x8xf32>
    %47 = arith.truncf %46 : vector<32x8x8xf32> to vector<32x8x8xbf16>
    "tpu.trace_start"() <{level = 10 : i32, message = "bqk,bkd->bqd"}> : () -> ()
    %cst_12 = arith.constant dense<0.000000e+00> : vector<32x8x8xf32>
    %48 = tpu.matmul %47, %35, %cst_12 {dimension_numbers = #tpu.dot_dimension_numbers<[2], [1], [1], [2], [0, 0, 0, 1, 1, 2], [0], [0]>} : vector<32x8x8xbf16>, vector<32x8x8xbf16>, vector<32x8x8xf32> -> vector<32x8x8xf32>
    "tpu.trace_stop"() : () -> ()
    %49 = vector.shape_cast %48 : vector<32x8x8xf32> to vector<4x64x8xf32>
    %50 = tpu.transpose %49, [1, 0, 2] : vector<4x64x8xf32> -> vector<64x4x8xf32>
    %51 = vector.shape_cast %50 : vector<64x4x8xf32> to vector<64x32xf32>
    %52 = arith.truncf %51 : vector<64x32xf32> to vector<64x32xbf16>
    %c0_13 = arith.constant 0 : index
    %c0_14 = arith.constant 0 : index
    %53 = vector.load %arg4[%c0_13, %c0_14] : memref<32x32xbf16, #tpu.memory_space<vmem>>, vector<32x32xbf16>
    %cst_15 = arith.constant dense<0.000000e+00> : vector<64x32xf32>
    %54 = tpu.matmul %52, %53, %cst_15 {dimension_numbers = #tpu.dot_dimension_numbers<[1], [0], [0], [1], [0, 0, 1, 1], [], []>} : vector<64x32xbf16>, vector<32x32xbf16>, vector<64x32xf32> -> vector<64x32xf32>
    %55 = vector.broadcast %9 : vector<1x32xf32> to vector<64x32xf32>
    %56 = arith.addf %54, %55 : vector<64x32xf32>
    %57 = arith.addf %5, %56 : vector<64x32xf32>
    %cst_16 = arith.constant dense<0.000000e+00> : vector<64xf32>
    %58 = vector.multi_reduction <add>, %57, %cst_16 [1] : vector<64x32xf32> to vector<64xf32>
    %59 = vector.shape_cast %58 : vector<64xf32> to vector<64x1xf32>
    %cst_17 = arith.constant 3.200000e+01 : f32
    %60 = vector.broadcast %cst_17 : f32 to vector<64x1xf32>
    %61 = arith.divf %59, %60 : vector<64x1xf32>
    %62 = vector.broadcast %61 : vector<64x1xf32> to vector<64x32xf32>
    %63 = arith.subf %57, %62 : vector<64x32xf32>
    %64 = arith.mulf %63, %63 : vector<64x32xf32>
    %cst_18 = arith.constant dense<0.000000e+00> : vector<64xf32>
    %65 = vector.multi_reduction <add>, %64, %cst_18 [1] : vector<64x32xf32> to vector<64xf32>
    %66 = vector.shape_cast %65 : vector<64xf32> to vector<64x1xf32>
    %cst_19 = arith.constant 3.200000e+01 : f32
    %67 = vector.broadcast %cst_19 : f32 to vector<64x1xf32>
    %68 = arith.divf %66, %67 : vector<64x1xf32>
    %69 = vector.broadcast %61 : vector<64x1xf32> to vector<64x32xf32>
    %70 = arith.subf %57, %69 : vector<64x32xf32>
    %cst_20 = arith.constant 9.99999974E-6 : f32
    %71 = vector.broadcast %cst_20 : f32 to vector<64x1xf32>
    %72 = arith.addf %68, %71 : vector<64x1xf32>
    %73 = math.rsqrt %72 : vector<64x1xf32>
    %74 = vector.broadcast %73 : vector<64x1xf32> to vector<64x32xf32>
    %75 = arith.mulf %70, %74 : vector<64x32xf32>
    %76 = vector.broadcast %11 : vector<1x32xf32> to vector<64x32xf32>
    %77 = arith.mulf %75, %76 : vector<64x32xf32>
    %78 = vector.broadcast %12 : vector<1x32xf32> to vector<64x32xf32>
    %79 = arith.addf %77, %78 : vector<64x32xf32>
    %80 = arith.truncf %79 : vector<64x32xf32> to vector<64x32xbf16>
    %c0_21 = arith.constant 0 : index
    %c0_22 = arith.constant 0 : index
    %81 = vector.load %arg5[%c0_21, %c0_22] : memref<32x64xbf16, #tpu.memory_space<vmem>>, vector<32x64xbf16>
    %cst_23 = arith.constant dense<0.000000e+00> : vector<64x64xf32>
    %82 = tpu.matmul %80, %81, %cst_23 {dimension_numbers = #tpu.dot_dimension_numbers<[1], [0], [0], [1], [0, 0, 1, 1], [], []>} : vector<64x32xbf16>, vector<32x64xbf16>, vector<64x64xf32> -> vector<64x64xf32>
    %83 = vector.broadcast %8 : vector<1x64xf32> to vector<64x64xf32>
    %84 = arith.addf %82, %83 : vector<64x64xf32>
    %cst_24 = arith.constant 5.000000e-01 : f32
    %85 = vector.broadcast %cst_24 : f32 to vector<64x64xf32>
    %86 = arith.mulf %85, %84 : vector<64x64xf32>
    %cst_25 = arith.constant 4.471500e-02 : f32
    %87 = vector.broadcast %cst_25 : f32 to vector<64x64xf32>
    %88 = arith.mulf %87, %84 : vector<64x64xf32>
    %89 = arith.mulf %88, %84 : vector<64x64xf32>
    %90 = arith.mulf %89, %84 : vector<64x64xf32>
    %91 = arith.addf %84, %90 : vector<64x64xf32>
    %cst_26 = arith.constant 0.797884583 : f32
    %92 = vector.broadcast %cst_26 : f32 to vector<64x64xf32>
    %93 = arith.mulf %92, %91 : vector<64x64xf32>
    %94 = math.tanh %93 : vector<64x64xf32>
    %cst_27 = arith.constant 1.000000e+00 : f32
    %95 = vector.broadcast %cst_27 : f32 to vector<64x64xf32>
    %96 = arith.addf %95, %94 : vector<64x64xf32>
    %97 = arith.mulf %86, %96 : vector<64x64xf32>
    %98 = arith.truncf %97 : vector<64x64xf32> to vector<64x64xbf16>
    %c0_28 = arith.constant 0 : index
    %c0_29 = arith.constant 0 : index
    %99 = vector.load %arg6[%c0_28, %c0_29] : memref<64x32xbf16, #tpu.memory_space<vmem>>, vector<64x32xbf16>
    %cst_30 = arith.constant dense<0.000000e+00> : vector<64x32xf32>
    %100 = tpu.matmul %98, %99, %cst_30 {dimension_numbers = #tpu.dot_dimension_numbers<[1], [0], [0], [1], [0, 0, 1, 1], [], []>} : vector<64x64xbf16>, vector<64x32xbf16>, vector<64x32xf32> -> vector<64x32xf32>
    %101 = vector.broadcast %10 : vector<1x32xf32> to vector<64x32xf32>
    %102 = arith.addf %100, %101 : vector<64x32xf32>
    %103 = arith.addf %79, %102 : vector<64x32xf32>
    %cst_31 = arith.constant dense<0.000000e+00> : vector<64xf32>
    %104 = vector.multi_reduction <add>, %103, %cst_31 [1] : vector<64x32xf32> to vector<64xf32>
    %105 = vector.shape_cast %104 : vector<64xf32> to vector<64x1xf32>
    %cst_32 = arith.constant 3.200000e+01 : f32
    %106 = vector.broadcast %cst_32 : f32 to vector<64x1xf32>
    %107 = arith.divf %105, %106 : vector<64x1xf32>
    %108 = vector.broadcast %107 : vector<64x1xf32> to vector<64x32xf32>
    %109 = arith.subf %103, %108 : vector<64x32xf32>
    %110 = arith.mulf %109, %109 : vector<64x32xf32>
    %cst_33 = arith.constant dense<0.000000e+00> : vector<64xf32>
    %111 = vector.multi_reduction <add>, %110, %cst_33 [1] : vector<64x32xf32> to vector<64xf32>
    %112 = vector.shape_cast %111 : vector<64xf32> to vector<64x1xf32>
    %cst_34 = arith.constant 3.200000e+01 : f32
    %113 = vector.broadcast %cst_34 : f32 to vector<64x1xf32>
    %114 = arith.divf %112, %113 : vector<64x1xf32>
    %115 = vector.broadcast %107 : vector<64x1xf32> to vector<64x32xf32>
    %116 = arith.subf %103, %115 : vector<64x32xf32>
    %cst_35 = arith.constant 9.99999974E-6 : f32
    %117 = vector.broadcast %cst_35 : f32 to vector<64x1xf32>
    %118 = arith.addf %114, %117 : vector<64x1xf32>
    %119 = math.rsqrt %118 : vector<64x1xf32>
    %120 = vector.broadcast %119 : vector<64x1xf32> to vector<64x32xf32>
    %121 = arith.mulf %116, %120 : vector<64x32xf32>
    %122 = vector.broadcast %13 : vector<1x32xf32> to vector<64x32xf32>
    %123 = arith.mulf %121, %122 : vector<64x32xf32>
    %124 = vector.broadcast %14 : vector<1x32xf32> to vector<64x32xf32>
    %125 = arith.addf %123, %124 : vector<64x32xf32>
    %126 = vector.shape_cast %125 : vector<64x32xf32> to vector<2x32x32xf32>
    %127 = tpu.transpose %126, [0, 2, 1] : vector<2x32x32xf32> -> vector<2x32x32xf32>
    %c0_36 = arith.constant 0 : index
    %c0_37 = arith.constant 0 : index
    %c0_38 = arith.constant 0 : index
    %128 = vector.load %arg8[%c0_36, %c0_37, %c0_38] : memref<2x32x32xf32, #tpu.memory_space<vmem>>, vector<2x32x32xf32>
    tpu.vector_store %arg8[%c0_36, %c0_37, %c0_38], %127 {strides = array<i32>} : memref<2x32x32xf32, #tpu.memory_space<vmem>>, vector<2x32x32xf32>,
    return
  }
  func.func @transform_0(%arg0: i32) -> (i32, i32, i32) {
    %c0_i32 = arith.constant 0 : i32
    %c0_i32_0 = arith.constant 0 : i32
    %c0_i32_1 = arith.constant 0 : i32
    %c0_i32_2 = arith.constant 0 : i32
    return %c0_i32, %c0_i32_0, %c0_i32_1 : i32, i32, i32
  }
  func.func @transform_1(%arg0: i32) -> (i32, i32, i32) {
    %c0_i32 = arith.constant 0 : i32
    %c0_i32_0 = arith.constant 0 : i32
    %c0_i32_1 = arith.constant 0 : i32
    %c0_i32_2 = arith.constant 0 : i32
    return %c0_i32, %c0_i32_0, %c0_i32_1 : i32, i32, i32
  }
  func.func @transform_2(%arg0: i32) -> (i32, i32) {
    %c0_i32 = arith.constant 0 : i32
    %c0_i32_0 = arith.constant 0 : i32
    %c0_i32_1 = arith.constant 0 : i32
    return %c0_i32, %c0_i32_0 : i32, i32
  }
  func.func @transform_3(%arg0: i32) -> (i32, i32) {
    %c0_i32 = arith.constant 0 : i32
    %c0_i32_0 = arith.constant 0 : i32
    %c0_i32_1 = arith.constant 0 : i32
    return %c0_i32, %c0_i32_0 : i32, i32
  }
  func.func @transform_4(%arg0: i32) -> (i32, i32) {
    %c0_i32 = arith.constant 0 : i32
    %c0_i32_0 = arith.constant 0 : i32
    %c0_i32_1 = arith.constant 0 : i32
    return %c0_i32, %c0_i32_0 : i32, i32
  }
  func.func @transform_5(%arg0: i32) -> (i32, i32) {
    %c0_i32 = arith.constant 0 : i32
    %c0_i32_0 = arith.constant 0 : i32
    %c0_i32_1 = arith.constant 0 : i32
    return %c0_i32, %c0_i32_0 : i32, i32
  }
  func.func @transform_6(%arg0: i32) -> (i32, i32) {
    %c0_i32 = arith.constant 0 : i32
    %c0_i32_0 = arith.constant 0 : i32
    %c0_i32_1 = arith.constant 0 : i32
    return %c0_i32, %c0_i32_0 : i32, i32
  }
  func.func @transform_7(%arg0: i32) -> (i32, i32, i32) {
    %c0_i32 = arith.constant 0 : i32
    %c0_i32_0 = arith.constant 0 : i32
    %c0_i32_1 = arith.constant 0 : i32
    %c0_i32_2 = arith.constant 0 : i32
    return %c0_i32, %c0_i32_0, %c0_i32_1 : i32, i32, i32
  }
}

</mosaic_0001>

<bundles_post_ra>
// kernel: tpu_custom_call.1
= control target key start
LH: loop header
LB: loop body
LE: loop exit
PB: predicated region body
PF: predicated region fallthrough
CT: control target
= control target key end

     0   :  { %12 = vsyncpa [#allocation3], 0  ;;  %s12299_s0 = inlined_call_operand.hbm [shape: f32[2,32,32], index: 0, kind: input, shape index: {}]   ;;  %s12300_s1 = inlined_call_operand.hbm [shape: f32[2,32,32], index: 1, kind: input, shape index: {}]   ;;  %s12301_s2 = inlined_call_operand.vmem [shape: bf16[64,96], index: 2, kind: input, shape index: {}]   ;;  %s12302_s3 = inlined_call_operand.vmem [shape: bf16[32,32], index: 3, kind: input, shape index: {}]   ;;  %s12303_s4 = inlined_call_operand.hbm [shape: bf16[32,64], index: 4, kind: input, shape index: {}]   ;;  %s12304_s5 = inlined_call_operand.vmem [shape: bf16[64,32], index: 5, kind: input, shape index: {}]   ;;  %s12305_s6 = inlined_call_operand.hbm [shape: f32[8,96], index: 6, kind: input, shape index: {}]   ;;  %s12306_s7 = inlined_call_operand.hbm [shape: f32[2,32,32], index: 7, kind: output, shape index: {}]  }
   0x1   :  { %13 = vsyncpa [#allocation6], 0 }
   0x2   :  { %14 = vsyncpa [#allocation9], 0 }
   0x3   :  { %15 = vsyncpa [#allocation4], 0  ;;  %s33_s26 = sshll.u32 %s12300_s1, 4  ;;  %s7540_s27 = smov [#allocation5]   ;;  %s34_s26 = int_to_ptr.hbm [resolvable:$true] %s33_s26 }
   0x4   :  { %s35_s28 = sshll.u32 %s7540_s27, 4  ;;  %s20_s8 = sshll.u32 %s12299_s0, 4  ;;  %s36_s28 = int_to_ptr.vmem [resolvable:$true] %s35_s28  ;;  %s21_s8 = int_to_ptr.hbm [resolvable:$true] %s20_s8 }
   0x5   :  { %s7541_s9 = smov 128   ;;  %s7542_s10 = smov 8  }
   0x6   :  { %41 = dma.hbm_to_vmem [thread:$0]  %s34_s26, 1024, %s36_s28, [#allocation6], %s7541_s9, %s7541_s9, %s7542_s10  }
   0x7   :  { %s7543_s11 = smov [#allocation2]   ;;  %s50_s1 = sshll.u32 %s12303_s4, 4  ;;  %s51_s1 = int_to_ptr.hbm [resolvable:$true] %s50_s1 }
   0x8   :  { %s22_s12 = sshll.u32 %s7543_s11, 4  ;;  %s7544_s0 = smov [#allocation7]   ;;  %s23_s12 = int_to_ptr.vmem [resolvable:$true] %s22_s12 }
   0x9   :  { %28 = dma.hbm_to_vmem [thread:$0]  %s21_s8, 1024, %s23_s12, [#allocation3], %s7541_s9, %s7541_s9, %s7542_s10  }
   0xa   :  { %s52_s15 = sshll.u32 %s7544_s0, 4  ;;  %s66_s18 = sshll.u32 %s12305_s6, 4  ;;  %s53_s15 = int_to_ptr.vmem [resolvable:$true] %s52_s15  ;;  %s67_s18 = int_to_ptr.hbm [resolvable:$true] %s66_s18 }
   0xb   :  { %s7545_s19 = smov 64   ;;  %s7546_s20 = smov 4  }
   0xc   :  { %58 = dma.hbm_to_vmem [thread:$0]  %s51_s1, 256, %s53_s15, [#allocation6], %s7545_s19, %s7545_s19, %s7546_s20  }
   0xd   :  { %s7547_s4 = smov [#allocation8]  }
   0xe   :  { %s68_s21 = sshll.u32 %s7547_s4, 4  ;;  %s69_s21 = int_to_ptr.vmem [resolvable:$true] %s68_s21 }
   0xf   :  { %71 = dma.hbm_to_vmem [thread:$0]  %s67_s18, 128, %s69_s21, [#allocation9]  }
  0x10   :  { %7532 = dma.done.wait [#allocation3], 1024  }
  0x11   :  { %7533 = vsyncadd [#allocation3], 4294966272 }
  0x12   :  { %7534 = dma.done.wait [#allocation6], 1280  }
  0x13   :  { %7535 = vsyncadd [#allocation6], 4294966016 }
  0x14   :  { %7536 = dma.done.wait [#allocation9], 128  }
  0x15   :  { %7537 = vsyncadd [#allocation9], 4294967168  ;;  %v161_v0 = vld [vmem:[#allocation5] sm:$0xff]  ;;  %v162_v1 = vld [vmem:[#allocation5 + $0x8] sm:$0xff]  ;;  %s7548_s6 = smov 32   ;;  %vm266_vm0 = vcmask 261120  }
  0x16   :  { %169 = vxpose.xlu0.b32.start [1/4] (short) (narrow) %v161_v0, 32  ;;  %v163_v2 = vld [vmem:[#allocation5 + $0x10] sm:$0xff]  ;;  %v164_v3 = vld [vmem:[#allocation5 + $0x18] sm:$0xff]  ;;  %v89_v10 = vld [vmem:[#allocation2] sm:$0xff]  ;;  %vm312_vm1 = vcmask 523264   ;;  %s7550_s30 = smov 112  }
  0x17   :  { %v93_v11 = vld [vmem:[#allocation2 + $0x20] sm:$0xff]  ;;  %v90_v14 = vld [vmem:[#allocation2 + $0x8] sm:$0xff]  ;;  %v91_v18 = vld [vmem:[#allocation2 + $0x10] sm:$0xff]  ;;  %s7551_s8 = smov 104   ;;  %s7552_s11 = smov 96   ;;  %vm435_vm2 = vcmask 1047556  }
  0x18   :  { %v165_v12 = vld [vmem:[#allocation5 + $0x20] sm:$0xff]  ;;  %v6915_v13 = vpack.i.bf16 %v93_v11, %v89_v10  ;;  %v94_v15 = vld [vmem:[#allocation2 + $0x28] sm:$0xff]  ;;  %v95_v19 = vld [vmem:[#allocation2 + $0x30] sm:$0xff]  ;;  %vm3363_vm3 = vcmask 64512   ;;  %vm4359_vm4 = vcmask 1043456   ;;  %s7555_s12 = smov 16  }
  0x19   :  { %v166_v16 = vld [vmem:[#allocation5 + $0x28] sm:$0xff]  ;;  %v6917_v17 = vpack.i.bf16 %v94_v15, %v90_v14  ;;  %v167_v20 = vld [vmem:[#allocation5 + $0x30] sm:$0xff]  ;;  %v6919_v21 = vpack.i.bf16 %v95_v19, %v91_v18  ;;  %v92_v22 = vld [vmem:[#allocation2 + $0x18] sm:$0xff]  ;;  %s7556_s13 = smov 24   ;;  %vm5949_vm5 = vcmask 130048   ;;  %vm5958_vm6 = vcmask 195584  }
  0x1a   :  { %v96_v23 = vld [vmem:[#allocation2 + $0x38] sm:$0xff]  ;;  %v6875_v27 = vld [vmem:[%s12301_s2 + $0x10] sm:$0xff]  ;;  %v6874_v28 = vld [vmem:[%s12301_s2 + $0x8] sm:$0xff]  ;;  %s6730_s24 = sshll.u32 %s12306_s7, 4  ;;  %s6731_s24 = int_to_ptr.hbm [resolvable:$true] %s6730_s24 }
  0x1b   :  { %v168_v24 = vld [vmem:[#allocation5 + $0x38] sm:$0xff]  ;;  %v6921_v25 = vpack.i.bf16 %v96_v23, %v92_v22  ;;  %v6873_v29 = vld [vmem:[%s12301_s2] sm:$0xff]  ;;  %v233_v15 = vld [vmem:[#allocation8] sm:$0xff] }
  0x1c   :  { %v6876_v26 = vld [vmem:[%s12301_s2 + $0x18] sm:$0xff]  ;;  %s7549_s2 = smov 120  }
  0x1d   :  { %329 = vmatpush.bf16.msra.mxu0 %v6876_v26 }
  0x1e   :  { %170 = vxpose.xlu0.b32.cont [2/4] (short) (narrow) %v162_v1, 32 }
  0x21   :  { %330 = vmatpush.bf16.msra.mxu0 %v6875_v27 }
  0x25   :  { %331 = vmatpush.bf16.msra.mxu0 %v6874_v28 }
  0x26   :  { %171 = vxpose.xlu0.b32.cont [3/4] (short) (narrow) %v163_v2, 32 }
  0x29   :  { %332 = vmatpush.bf16.msra.mxu0 %v6873_v29 }
  0x2e   :  { %172 = vxpose.xlu0.b32.end [4/4] (short) (narrow) %v164_v3, 32 }
  0xba   :  { %v7619_v4 = vpop.trf.xlu0 }
  0xbb   :  { %12456 = vst [vmem:[#allocation15_spill] sm:$0xff] %v7619_v4 }
  0xc2   :  { %v7621_v5 = vpop.trf.xlu0 }
  0xc3   :  { %12457 = vst [vmem:[#allocation16_spill] sm:$0xff] %v7621_v5  ;;  %v6905_v6 = vpack.i.bf16 %v7621_v5, %v7619_v4 }
  0xc5   :  { %6906 = vrot.lane.b32.xlu1 %v6905_v6, %s7548_s6 }
  0xca   :  { %v7626_v7 = vpop.trf.xlu0 }
  0xcb   :  { %12458 = vst [vmem:[#allocation17_spill] sm:$0xff] %v7626_v7 }
  0xd2   :  { %v7628_v8 = vpop.trf.xlu0 }
  0xd3   :  { %12459 = vst [vmem:[#allocation18_spill] sm:$0xff] %v7628_v8  ;;  %v6910_v9 = vpack.i.bf16 %v7628_v8, %v7626_v7 }
  0xd5   :  { %6911 = vrot.lane.b32.xlu2 %v6910_v9, %s7548_s6 }
  0xfa   :  { %201 = vxpose.xlu1.b32.start [1/4] (short) (narrow) %v165_v12, 32 }
  0xfb   :  { %6916 = vxpose.xlu2.b32.start [1/4] (short) (narrow) %v6915_v13, 32 }
 0x102   :  { %202 = vxpose.xlu1.b32.cont [2/4] (short) (narrow) %v166_v16, 32  ;;  %v287_v16 = vperm.slane %v233_v15, 0 }
 0x103   :  { %6918 = vxpose.xlu2.b32.cont [2/4] (short) (narrow) %v6917_v17, 32 }
 0x10a   :  { %203 = vxpose.xlu1.b32.cont [3/4] (short) (narrow) %v167_v20, 32 }
 0x10b   :  { %6920 = vxpose.xlu2.b32.cont [3/4] (short) (narrow) %v6919_v21, 32 }
 0x112   :  { %204 = vxpose.xlu1.b32.end [4/4] (short) (narrow) %v168_v24, 32 }
 0x113   :  { %6922 = vxpose.xlu2.b32.end [4/4] (short) (narrow) %v6921_v25, 32 }
 0x12f   :  { %v6912_v30 = vpop.permute.xlu2 %6911 }
 0x130   :  { %v6914_v46 = vunpack.i.h.bf16 %v6912_v30  ;;  %v6913_v48 = vunpack.i.l.bf16 %v6912_v30 }
 0x137   :  { %v6907_v32 = vpop.permute.xlu1 %6906 }
 0x138   :  { %v6909_v34 = vunpack.i.h.bf16 %v6907_v32  ;;  %v6908_v36 = vunpack.i.l.bf16 %v6907_v32 }
 0x194   :  { %v6923_v31 = vpop.trf.xlu2 }
 0x195   :  { %v6924_v33 = vunpack.i.l.bf16 %v6923_v31  ;;  %v6927_v57 = vunpack.i.h.bf16 %v6923_v31 }
 0x197   :  { %v267_v39 = vsel %vm266_vm0, %v6924_v33, %v6908_v36 }
 0x19c   :  { %v6928_v35 = vpop.trf.xlu2 }
 0x19d   :  { %v6929_v37 = vunpack.i.l.bf16 %v6928_v35  ;;  %v6932_v58 = vunpack.i.h.bf16 %v6928_v35 }
 0x19e   :  { %v7645_v38 = vpop.trf.xlu1 }
 0x19f   :  { %12460 = vst [vmem:[#allocation19_spill] sm:$0xff] %v7645_v38  ;;  %v268_v40 = vsel %vm266_vm0, %v6929_v37, %v6909_v34 }
 0x1a0   :  { %v275_v41 = vpack.c.bf16 %v268_v40, %v267_v39 }
 0x1a2   :  { %6761 = vmatmul.msk.bf16.vlgmr.msra.gmra.mxu0 %vm312_vm1, %v275_v41 }
 0x1a4   :  { %v6933_v42 = vpop.trf.xlu2 }
 0x1a5   :  { %v6934_v45 = vunpack.i.l.bf16 %v6933_v42  ;;  %v6937_v9 = vunpack.i.h.bf16 %v6933_v42 }
 0x1a6   :  { %v7650_v43 = vpop.trf.xlu1 }
 0x1a7   :  { %12461 = vst [vmem:[#allocation20_spill] sm:$0xff] %v7650_v43  ;;  %v6943_v44 = vpack.i.bf16 %v7650_v43, %v7645_v38  ;;  %v269_v51 = vsel %vm266_vm0, %v6934_v45, %v6913_v48 }
 0x1a9   :  { %6944 = vrot.lane.b32.xlu0 %v6943_v44, %s7548_s6 }
 0x1ac   :  { %v6938_v47 = vpop.trf.xlu2 }
 0x1ad   :  { %v6939_v49 = vunpack.i.l.bf16 %v6938_v47  ;;  %v6942_v10 = vunpack.i.h.bf16 %v6938_v47 }
 0x1ae   :  { %v7655_v50 = vpop.trf.xlu1 }
 0x1af   :  { %12462 = vst [vmem:[#allocation21_spill] sm:$0xff] %v7655_v50  ;;  %v270_v52 = vsel %vm266_vm0, %v6939_v49, %v6914_v46 }
 0x1b0   :  { %v276_v53 = vpack.c.bf16 %v270_v52, %v269_v51 }
 0x1b2   :  { %6762 = vmatmul.msk.bf16.gmra.mxu0 %vm312_vm1, %v276_v53 }
 0x1b6   :  { %v7660_v54 = vpop.trf.xlu1 }
 0x1b7   :  { %12463 = vst [vmem:[#allocation22_spill] sm:$0xff] %v7660_v54  ;;  %v6948_v55 = vpack.i.bf16 %v7660_v54, %v7655_v50 }
 0x1b9   :  { %6949 = vrot.lane.b32.xlu2 %v6948_v55, %s7548_s6 }
 0x213   :  { %v6950_v1 = vpop.permute.xlu2 %6949 }
 0x214   :  { %v6952_v3 = vunpack.i.h.bf16 %v6950_v1  ;;  %v6951_v6 = vunpack.i.l.bf16 %v6950_v1 }
 0x216   :  { %v273_v11 = vsel %vm266_vm0, %v6937_v9, %v6951_v6  ;;  %v274_v12 = vsel %vm266_vm0, %v6942_v10, %v6952_v3 }
 0x217   :  { %v278_v14 = vpack.c.bf16 %v274_v12, %v273_v11 }
 0x21b   :  { %v6945_v56 = vpop.permute.xlu0 %6944 }
 0x21c   :  { %v6947_v59 = vunpack.i.h.bf16 %v6945_v56  ;;  %v6946_v60 = vunpack.i.l.bf16 %v6945_v56 }
 0x21e   :  { %v271_v61 = vsel %vm266_vm0, %v6927_v57, %v6946_v60  ;;  %v272_v62 = vsel %vm266_vm0, %v6932_v58, %v6947_v59  ;;  %v7553_v60 = vmov 1983009808  }
 0x21f   :  { %v334_v63 = vpop.f32.mrf.mxu0  ;;  %v277_v0 = vpack.c.bf16 %v272_v62, %v271_v61  ;;  %v440_v61 = vunpack.c.l.s4 %v7553_v60 }
 0x220   :  { %v7680_v22 = vadd.f32 %v334_v63, %v287_v16 }
 0x221   :  { %6763 = vmatmul.msk.bf16.gmra.mxu0 %vm312_vm1, %v277_v0  ;;  %v7754_v3 = vunpack.c.0.s8 %v440_v61 }
 0x227   :  { %v336_v2 = vpop.f32.mrf.mxu0 }
 0x228   :  { %v7671_v18 = vadd.f32 %v336_v2, %v287_v16 }
 0x22a   :  { %v493_v6 = vrot.slane %v7671_v18, 4 }
 0x22f   :  { %v339_v13 = vpop.f32.mrf.mxu0 }
 0x230   :  { %v7686_v27 = vadd.f32 %v339_v13, %v287_v16 }
 0x231   :  { %6764 = vmatmul.msk.bf16.gmra.mxu0 %vm312_vm1, %v278_v14 }
 0x237   :  { %v341_v17 = vpop.f32.mrf.mxu0 }
 0x238   :  { %v7673_v19 = vadd.f32 %v341_v17, %v287_v16 }
 0x23a   :  { %12464 = vst [vmem:[#allocation23_spill] sm:$0xff] %v7673_v19  ;;  %v7677_v20 = vpack.i.bf16 %v7673_v19, %v7671_v18  ;;  %v605_v0 = vrot.slane %v7673_v19, 4 }
 0x23c   :  { %6959 = vrot.lane.b32.xlu0 %v7677_v20, %s7549_s2 }
 0x29e   :  { %v344_v21 = vpop.f32.mrf.mxu0 }
 0x29f   :  { %v7682_v23 = vadd.f32 %v344_v21, %v287_v16 }
 0x2a1   :  { %v6963_v24 = vpack.i.bf16 %v7682_v23, %v7680_v22 }
 0x2a3   :  { %6964 = vrot.lane.b32.xlu0 %v6963_v24, %s7550_s30  ;;  %6954 = vrot.lane.b32.xlu1 %v6963_v24, %s7549_s2 }
 0x2a6   :  { %v346_v25 = vpop.f32.mrf.mxu0 }
 0x2a7   :  { %v7696_v31 = vadd.f32 %v346_v25, %v287_v16  ;;  %v7554_v25 = vmov 1934713408  }
 0x2ab   :  { %6969 = vrot.lane.b32.xlu0 %v6963_v24, %s7551_s8 }
 0x2ae   :  { %v349_v26 = vpop.f32.mrf.mxu0  ;;  %v6960_v34 = vpop.permute.xlu0 %6959 }
 0x2af   :  { %v7688_v28 = vadd.f32 %v349_v26, %v287_v16  ;;  %v7705_v35 = vunpack.i.h.bf16 %v6960_v34  ;;  %v7707_v36 = vunpack.i.l.bf16 %v6960_v34  ;;  %v464_v26 = vunpack.c.l.s4 %v7554_v25 }
 0x2b1   :  { %v7692_v29 = vpack.i.bf16 %v7688_v28, %v7686_v27  ;;  %v505_v24 = vrot.slane %v7707_v36, 4 }
 0x2b3   :  { %6974 = vrot.lane.b32.xlu0 %v7677_v20, %s7550_s30  ;;  %6984 = vrot.lane.b32.xlu1 %v7692_v29, %s7549_s2 }
 0x2b6   :  { %v351_v30 = vpop.f32.mrf.mxu0 }
 0x2b7   :  { %v7698_v32 = vadd.f32 %v351_v30, %v287_v16  ;;  %v617_v16 = vrot.slane %v7705_v35, 4 }
 0x2b9   :  { %12465 = vst [vmem:[#allocation24_spill] sm:$0xff] %v7698_v32  ;;  %v6993_v33 = vpack.i.bf16 %v7698_v32, %v7696_v31  ;;  %v829_v4 = vrot.slane %v7698_v32, 4 }
 0x2bb   :  { %6994 = vrot.lane.b32.xlu2 %v6993_v33, %s7550_s30  ;;  %6979 = vrot.lane.b32.xlu0 %v7677_v20, %s7551_s8 }
 0x2bc   :  { %6989 = vrot.lane.b32.xlu1 %v6993_v33, %s7549_s2 }
 0x2c3   :  { %6999 = vrot.lane.b32.xlu2 %v7692_v29, %s7550_s30  ;;  %7004 = vrot.lane.b32.xlu0 %v6993_v33, %s7551_s8 }
 0x2cb   :  { %7009 = vrot.lane.b32.xlu0 %v7692_v29, %s7551_s8 }
 0x2d3   :  { %7029 = vrot.lane.b32.xlu0 %v6960_v34, %s7552_s11 }
 0x315   :  { %v7710_v37 = vpop.permute.xlu0 %6964  ;;  %v6955_v39 = vpop.permute.xlu1 %6954 }
 0x316   :  { %v7712_v40 = vunpack.i.h.bf16 %v6955_v39  ;;  %v6956_v41 = vunpack.i.l.bf16 %v6955_v39  ;;  %v7742_v59 = vunpack.i.l.bf16 %v7710_v37  ;;  %v7764_v13 = vpop.permute.xlu2 %6994 }
 0x318   :  { %v7043_v44 = vpack.i.bf16 %v7712_v40, %v7682_v23  ;;  %v7717_v45 = vpack.i.bf16 %v6956_v41, %v7680_v22  ;;  %v449_v48 = vrot.slane %v6956_v41, 4  ;;  %v673_v53 = vrot.slane %v7712_v40, 4 }
 0x31a   :  { %7044 = vrot.lane.b32.xlu0 %v7043_v44, %s7552_s11  ;;  %7014 = vrot.lane.b32.xlu1 %v7717_v45, %s7552_s11 }
 0x31d   :  { %v6970_v42 = vpop.permute.xlu0 %6969 }
 0x31e   :  { %v7720_v46 = vunpack.i.h.bf16 %v6970_v42  ;;  %v6971_v47 = vunpack.i.l.bf16 %v6970_v42 }
 0x320   :  { %12466 = vst [vmem:[#allocation25_spill] sm:$0xff] %v7720_v46  ;;  %v671_v49 = vrot.slane %v7720_v46, 4  ;;  %v447_v51 = vrot.slane %v6971_v47, 4  ;;  %v7726_v52 = vsel %vm435_vm2, %v6971_v47, %v449_v48  ;;  %v7738_v58 = vsel %vm435_vm2, %v7720_v46, %v673_v53 }
 0x321   :  { %v7745_v62 = vpack.i.bf16 %v6971_v47, %v7742_v59  ;;  %v7790_v53 = vunpack.c.0.s8 %v464_v26 }
 0x322   :  { %v7730_v55 = vsel %vm435_vm2, %v447_v51, %v6956_v41  ;;  %v7734_v56 = vsel %vm435_vm2, %v671_v49, %v7712_v40  ;;  %7049 = vrot.lane.b32.xlu0 %v6993_v33, %s7552_s11 }
 0x323   :  { %7019 = vrot.lane.b32.xlu2 %v7745_v62, %s7552_s11 }
 0x325   :  { %v6975_v57 = vpop.permute.xlu0 %6974  ;;  %v7757_v9 = vpop.permute.xlu1 %6984 }
 0x326   :  { %v7750_v1 = vunpack.i.h.bf16 %v6975_v57  ;;  %v7752_v2 = vunpack.i.l.bf16 %v6975_v57  ;;  %7034 = vrot.lane.b32.xlu1 %v6975_v57, %s7552_s11 }
 0x328   :  { %12467 = vst [vmem:[#allocation26_spill] sm:$0xff] %v7750_v1  ;;  %v606_v10 = vsel %vm435_vm2, %v7750_v1, %v605_v0  ;;  %v491_v11 = vrot.slane %v7752_v2, 4  ;;  %v494_v15 = vsel %vm435_vm2, %v7752_v2, %v493_v6 }
 0x329   :  { %v614_v14 = vperm.slane %v606_v10, %v7754_v3  ;;  %v502_v21 = vperm.slane %v494_v15, %v7754_v3 }
 0x32a   :  { %v492_v17 = vsel %vm435_vm2, %v491_v11, %v7671_v18 }
 0x32b   :  { %v641_v34 = vrot.slane %v614_v14, 4  ;;  %v498_v39 = vperm.slane %v492_v17, %v7754_v3  ;;  %7024 = vrot.lane.b32.xlu2 %v7677_v20, %s7552_s11  ;;  %v529_v47 = vrot.slane %v502_v21, 4  ;;  %v7805_v17 = vpop.permute.xlu2 %6999 }
 0x32d   :  { %v6980_v63 = vpop.permute.xlu0 %6979  ;;  %v517_v61 = vrot.slane %v498_v39, 4 }
 0x32e   :  { %v7762_v12 = vunpack.i.h.bf16 %v6980_v63  ;;  %v7776_v33 = vunpack.i.l.bf16 %v6980_v63  ;;  %v7796_v10 = vpop.permute.xlu1 %6989 }
 0x330   :  { %v618_v30 = vsel %vm435_vm2, %v7762_v12, %v617_v16  ;;  %v503_v42 = vrot.slane %v7776_v33, 4  ;;  %v506_v44 = vsel %vm435_vm2, %v7776_v33, %v505_v24  ;;  %v7803_v16 = vunpack.i.h.bf16 %v7710_v37 }
 0x331   :  { %v626_v41 = vperm.slane %v618_v30, %v7754_v3  ;;  %v514_v49 = vperm.slane %v506_v44, %v7754_v3 }
 0x332   :  { %v504_v57 = vsel %vm435_vm2, %v503_v42, %v7707_v36  ;;  %12468 = vst [vmem:[#allocation27_spill] sm:$0xff] %v7803_v16  ;;  %v7053_v37 = vpack.i.bf16 %v7720_v46, %v7803_v16  ;;  %v7821_v42 = vunpack.i.l.bf16 %v7805_v17 }
 0x333   :  { %v639_v48 = vrot.slane %v626_v41, 4  ;;  %v7788_v51 = vsel %vm435_vm2, %v626_v41, %v641_v34  ;;  %v510_v20 = vperm.slane %v504_v57, %v7754_v3  ;;  %v527_v0 = vrot.slane %v514_v49, 4  ;;  %7039 = vrot.lane.b32.xlu2 %v6980_v63, %s7552_s11 }
 0x334   :  { %v530_v6 = vsel %vm435_vm2, %v514_v49, %v529_v47  ;;  %v7813_v41 = vunpack.i.l.bf16 %v7796_v10  ;;  %7054 = vrot.lane.b32.xlu1 %v7053_v37, %s7552_s11  ;;  %v7834_v57 = vunpack.i.h.bf16 %v7764_v13  ;;  %v7858_v37 = vunpack.i.l.bf16 %v7757_v9 }
 0x335   :  { %v7005_v60 = vpop.permute.xlu0 %7004  ;;  %v538_v11 = vperm.slane %v530_v6, %v7790_v53  ;;  %v7800_v15 = vsel %vm435_vm2, %v639_v48, %v614_v14  ;;  %v515_v24 = vrot.slane %v510_v20, 4  ;;  %v7808_v25 = vsel %vm435_vm2, %v510_v20, %v517_v61 }
 0x336   :  { %v528_v26 = vsel %vm435_vm2, %v527_v0, %v502_v21  ;;  %v7829_v49 = vunpack.i.h.bf16 %v7005_v60  ;;  %12471 = vst [vmem:[#allocation30_spill] sm:$0xff] %v7834_v57  ;;  %v7837_v61 = vunpack.i.l.bf16 %v7764_v13  ;;  %v729_v63 = vrot.slane %v7813_v41, 4  ;;  %7079 = vrot.lane.b32.xlu0 %v7005_v60, %s7552_s11 }
 0x337   :  { %v534_v30 = vperm.slane %v528_v26, %v7790_v53  ;;  %v545_v34 = vrot.slane %v538_v11, 4  ;;  %v7816_v14 = vsel %vm435_vm2, %v515_v24, %v498_v39  ;;  %v7831_v39 = vunpack.i.l.bf16 %v7005_v60 }
 0x338   :  { %12469 = vst [vmem:[#allocation28_spill] sm:$0xff] %v7829_v49  ;;  %v547_v11 = vrot.slane %v7821_v42, 4 }
 0x339   :  { %v543_v44 = vrot.slane %v534_v30, 4  ;;  %v546_v47 = vsel %vm435_vm2, 0.0, %v545_v34  ;;  %v7826_v21 = vsel %vm435_vm2, %v545_v34, %v534_v30  ;;  %12470 = vst [vmem:[#allocation29_spill] sm:$0xff] %v7831_v39  ;;  %v727_v6 = vrot.slane %v7831_v39, 4 }
 0x33a   :  { %v953_v48 = vrot.slane %v546_v47, 4  ;;  %v7848_v24 = vsel %vm435_vm2, %v7831_v39, %v729_v63  ;;  %v549_v30 = vrot.slane %v7686_v27, 4  ;;  %v7877_v63 = vunpack.i.h.bf16 %v7757_v9 }
 0x33b   :  { %v544_v20 = vsel %vm435_vm2, 0.0, %v543_v44  ;;  %v7855_v34 = vsel %vm435_vm2, %v727_v6, %v7813_v41  ;;  %7069 = vrot.lane.b32.xlu2 %v7764_v13, %s7552_s11  ;;  %v561_v6 = vrot.slane %v7858_v37, 4  ;;  %v661_v13 = vrot.slane %v7682_v23, 4 }
 0x33c   :  { %v7842_v0 = vsel %vm435_vm2, %v953_v48, %v544_v20  ;;  %v550_v44 = vsel %vm435_vm2, %v7821_v42, %v549_v30  ;;  %v548_v20 = vsel %vm435_vm2, %v547_v11, %v7686_v27  ;;  %7059 = vrot.lane.b32.xlu1 %v7692_v29, %s7552_s11  ;;  %12475 = vst [vmem:[#allocation34_spill] sm:$0xff] %v7877_v63  ;;  %v437_v29 = vrot.slane %v7680_v22, 4 }
 0x33d   :  { %12472 = vst [vmem:[#allocation31_spill] sm:$0xff] %v7842_v0  ;;  %v7850_v26 = vpop.permute.xlu0 %7009  ;;  %v558_v60 = vperm.slane %v550_v44, %v7754_v3  ;;  %v554_v30 = vperm.slane %v548_v20, %v7754_v3  ;;  %v785_v44 = vrot.slane %v7877_v63, 4  ;;  %v717_v20 = vrot.slane %v7696_v31, 4 }
 0x33e   :  { %v7864_v47 = vunpack.i.h.bf16 %v7850_v26  ;;  %v7867_v48 = vunpack.i.l.bf16 %v7850_v26  ;;  %7084 = vrot.lane.b32.xlu0 %v7805_v17, %s7552_s11 }
 0x33f   :  { %v585_v43 = vrot.slane %v558_v60, 4  ;;  %v573_v7 = vrot.slane %v554_v30, 4 }
 0x340   :  { %12473 = vst [vmem:[#allocation32_spill] sm:$0xff] %v7864_v47  ;;  %v783_v54 = vrot.slane %v7864_v47, 4  ;;  %v559_v50 = vrot.slane %v7867_v48, 4  ;;  %v562_v11 = vsel %vm435_vm2, %v7867_v48, %v561_v6 }
 0x341   :  { %12474 = vst [vmem:[#allocation33_spill] sm:$0xff] %v7867_v48  ;;  %v570_v8 = vperm.slane %v562_v11, %v7754_v3  ;;  %v7901_v48 = vsel %vm435_vm2, %v7864_v47, %v785_v44  ;;  %v615_v44 = vrot.slane %v7762_v12, 4 }
 0x342   :  { %v560_v38 = vsel %vm435_vm2, %v559_v50, %v7858_v37  ;;  %v7895_v6 = vsel %vm435_vm2, %v783_v54, %v7877_v63  ;;  %v827_v54 = vrot.slane %v7834_v57, 4  ;;  %v830_v63 = vsel %vm435_vm2, %v7834_v57, %v829_v4 }
 0x343   :  { %v566_v5 = vperm.slane %v560_v38, %v7754_v3  ;;  %v583_v0 = vrot.slane %v570_v8, 4  ;;  %v586_v39 = vsel %vm435_vm2, %v570_v8, %v585_v43  ;;  %v434_v8 = vrot.slane %v7742_v59, 4  ;;  %7074 = vrot.lane.b32.xlu2 %v7757_v9, %s7552_s11 }
 0x344   :  { %v594_v46 = vperm.slane %v586_v39, %v7790_v53  ;;  %v715_v39 = vrot.slane %v7837_v61, 4  ;;  %v718_v38 = vsel %vm435_vm2, %v7837_v61, %v717_v20  ;;  %v7935_v20 = vunpack.i.h.bf16 %v7805_v17  ;;  %7064 = vrot.lane.b32.xlu1 %v7796_v10, %s7552_s11 }
 0x345   :  { %v571_v50 = vrot.slane %v566_v5, 4  ;;  %v7904_v11 = vsel %vm435_vm2, %v566_v5, %v573_v7  ;;  %v584_v43 = vsel %vm435_vm2, %v583_v0, %v558_v60  ;;  %v7927_v0 = vperm.slane %v830_v63, %v7754_v3 }
 0x346   :  { %12476 = vst [vmem:[#allocation35_spill] sm:$0xff] %v7904_v11  ;;  %v590_v5 = vperm.slane %v584_v43, %v7790_v53  ;;  %v601_v7 = vrot.slane %v594_v46, 4  ;;  %v662_v60 = vsel %vm435_vm2, %v7803_v16, %v661_v13  ;;  %v650_v43 = vperm.slane %v7788_v51, %v7790_v53 }
 0x347   :  { %v7916_v47 = vsel %vm435_vm2, %v571_v50, %v554_v30  ;;  %v603_v30 = vrot.slane %v7750_v1, 4  ;;  %v436_v50 = vsel %vm435_vm2, %v434_v8, %v7680_v22  ;;  %12478 = vst [vmem:[#allocation37_spill] sm:$0xff] %v7935_v20  ;;  %v828_v63 = vsel %vm435_vm2, %v827_v54, %v7698_v32 }
 0x348   :  { %12477 = vst [vmem:[#allocation36_spill] sm:$0xff] %v7916_v47  ;;  %v599_v46 = vrot.slane %v590_v5, 4  ;;  %v602_v57 = vsel %vm435_vm2, 0.0, %v601_v7  ;;  %v659_v4 = vrot.slane %v7803_v16, 4  ;;  %v616_v13 = vsel %vm435_vm2, %v615_v44, %v7705_v35 }
 0x349   :  { %v7946_v1 = vunpack.i.h.bf16 %v7796_v10  ;;  %v716_v22 = vsel %vm435_vm2, %v715_v39, %v7696_v31  ;;  %v438_v8 = vsel %vm435_vm2, %v7742_v59, %v437_v29  ;;  %v7954_v47 = vsel %vm435_vm2, %v601_v7, %v590_v5 }
 0x34a   :  { %v600_v51 = vsel %vm435_vm2, 0.0, %v599_v46  ;;  %12479 = vst [vmem:[#allocation38_spill] sm:$0xff] %v7954_v47  ;;  %v7957_v54 = vperm.slane %v662_v60, %v7754_v3  ;;  %v7960_v16 = vperm.slane %v436_v50, %v7754_v3  ;;  %v604_v44 = vsel %vm435_vm2, %v603_v30, %v7673_v19 }
 0x34b   :  { %v1007_v32 = vrot.slane %v602_v57, 4  ;;  %v622_v39 = vperm.slane %v616_v13, %v7754_v3  ;;  %v657_v11 = vrot.slane %v650_v43, 4  ;;  %v7966_v59 = vperm.slane %v438_v8, %v7754_v3  ;;  %7104 = vrot.lane.b32.xlu2 %v7717_v45, %s7545_s19 }
 0x34c   :  { %v526_v29 = vperm.slane %v7808_v25, %v7790_v53  ;;  %v660_v7 = vsel %vm435_vm2, %v659_v4, %v7682_v23  ;;  %v773_v60 = vrot.slane %v7688_v28, 4  ;;  %v610_v30 = vperm.slane %v604_v44, %v7754_v3  ;;  %7089 = vrot.lane.b32.xlu1 %v7850_v26, %s7552_s11 }
 0x34d   :  { %v7971_v5 = vsel %vm435_vm2, %v1007_v32, %v600_v51  ;;  %v646_v57 = vperm.slane %v7800_v15, %v7790_v53  ;;  %v7984_v25 = vperm.slane %v828_v63, %v7754_v3  ;;  %v7988_v4 = vperm.slane %v716_v22, %v7754_v3 }
 0x34e   :  { %12480 = vst [vmem:[#allocation39_spill] sm:$0xff] %v7971_v5  ;;  %v7991_v46 = vperm.slane %v718_v38, %v7754_v3  ;;  %v697_v15 = vrot.slane %v7957_v54, 4  ;;  %v774_v9 = vsel %vm435_vm2, %v7935_v20, %v773_v60  ;;  %v627_v17 = vrot.slane %v622_v39, 4 }
 0x34f   :  { %v658_v50 = vsel %vm435_vm2, 0.0, %v657_v11  ;;  %v8000_v43 = vperm.slane %v660_v7, %v7754_v3  ;;  %v461_v63 = vrot.slane %v7960_v16, 4  ;;  %v473_v13 = vrot.slane %v7966_v59, 4 }
 0x350   :  { %v541_v38 = vrot.slane %v526_v29, 4  ;;  %v771_v22 = vrot.slane %v7935_v20, 4  ;;  %v458_v10 = vperm.slane %v7726_v52, %v7754_v3  ;;  %v629_v8 = vrot.slane %v610_v30, 4 }
 0x351   :  { %v655_v51 = vrot.slane %v646_v57, 4  ;;  %v8008_v44 = vperm.slane %v774_v9, %v7754_v3  ;;  %v454_v60 = vperm.slane %v7730_v55, %v7754_v3  ;;  %v522_v7 = vperm.slane %v7816_v14, %v7790_v53 }
 0x352   :  { %v1061_v32 = vrot.slane %v658_v50, 4  ;;  %v7098_v29 = vpack.i.bf16 %v7776_v33, %v7752_v2  ;;  %v628_v5 = vsel %vm435_vm2, %v627_v17, %v610_v30  ;;  %v630_v20 = vsel %vm435_vm2, %v622_v39, %v629_v8 }
 0x353   :  { %v542_v52 = vsel %vm435_vm2, 0.0, %v541_v38  ;;  %v634_v47 = vperm.slane %v628_v5, %v7790_v53  ;;  %v638_v9 = vperm.slane %v630_v20, %v7790_v53  ;;  %v474_v19 = vsel %vm435_vm2, %v458_v10, %v473_v13  ;;  %7109 = vrot.lane.b32.xlu2 %v7745_v62, %s7545_s19 }
 0x354   :  { %v682_v55 = vperm.slane %v7738_v58, %v7754_v3  ;;  %7099 = vrot.lane.b32.xlu0 %v7098_v29, %s7545_s19  ;;  %v656_v2 = vsel %vm435_vm2, 0.0, %v655_v51  ;;  %v8029_v33 = vsel %vm435_vm2, %v657_v11, %v646_v57  ;;  %v539_v14 = vrot.slane %v522_v7, 4 }
 0x355   :  { %v839_v39 = vrot.slane %v7829_v49, 4  ;;  %v651_v20 = vrot.slane %v634_v47, 4  ;;  %v653_v5 = vrot.slane %v638_v9, 4  ;;  %v772_v58 = vsel %vm435_vm2, %v771_v22, %v7688_v28 }
 0x356   :  { %v471_v30 = vrot.slane %v458_v10, 4  ;;  %v942_v17 = vrot.slane %v542_v52, 4  ;;  %v8037_v45 = vsel %vm435_vm2, %v1061_v32, %v656_v2  ;;  %v459_v50 = vrot.slane %v454_v60, 4 }
 0x357   :  { %v482_v11 = vperm.slane %v474_v19, %v7790_v53  ;;  %v652_v57 = vsel %vm435_vm2, 0.0, %v651_v20  ;;  %v654_v13 = vsel %vm435_vm2, 0.0, %v653_v5  ;;  %v462_v8 = vsel %vm435_vm2, %v454_v60, %v461_v63 }
 0x358   :  { %v698_v26 = vsel %vm435_vm2, %v682_v55, %v697_v15  ;;  %v8045_v51 = vsel %vm435_vm2, %v653_v5, %v634_v47  ;;  %v1050_v22 = vrot.slane %v654_v13, 4  ;;  %v841_v10 = vrot.slane %v7946_v1, 4 }
 0x359   :  { %v840_v32 = vsel %vm435_vm2, %v839_v39, %v7946_v1  ;;  %v540_v29 = vsel %vm435_vm2, 0.0, %v539_v14  ;;  %v8052_v19 = vsel %vm435_vm2, %v541_v38, %v522_v7  ;;  %v7123_v52 = vpack.i.bf16 %v7837_v61, %v7821_v42 }
 0x35a   :  { %v8057_v63 = vsel %vm435_vm2, %v1050_v22, %v652_v57  ;;  %v8060_v47 = vsel %vm435_vm2, %v942_v17, %v540_v29  ;;  %v8063_v15 = vperm.slane %v772_v58, %v7754_v3  ;;  %v472_v60 = vsel %vm435_vm2, %v471_v30, %v7966_v59 }
 0x35b   :  { %v8069_v9 = vperm.slane %v7734_v56, %v7754_v3  ;;  %v842_v38 = vsel %vm435_vm2, %v7829_v49, %v841_v10  ;;  %v470_v42 = vperm.slane %v462_v8, %v7790_v53  ;;  %v695_v61 = vrot.slane %v682_v55, 4 }
 0x35c   :  { %v706_v7 = vperm.slane %v698_v26, %v7790_v53  ;;  %v738_v2 = vperm.slane %v7848_v24, %v7754_v3  ;;  %7124 = vrot.lane.b32.xlu0 %v7123_v52, %s7545_s19  ;;  %v853_v59 = vrot.slane %v7984_v25, 4  ;;  %v753_v56 = vrot.slane %v7991_v46, 4 }
 0x35d   :  { %v8082_v14 = vrot.slane %v482_v11, 4  ;;  %v846_v39 = vperm.slane %v840_v32, %v7754_v3  ;;  %v12481_v55 = vpack.i.bf16 %v7707_v36, %v7671_v18  ;;  %v741_v24 = vrot.slane %v7988_v4, 4 }
 0x35e   :  { %v460_v20 = vsel %vm435_vm2, %v459_v50, %v7960_v16  ;;  %v8093_v62 = vperm.slane %v472_v60, %v7790_v53  ;;  %v850_v5 = vperm.slane %v842_v38, %v7754_v3  ;;  %v685_v58 = vrot.slane %v8000_v43, 4 }
 0x35f   :  { %7094 = vrot.lane.b32.xlu1 %v12481_v55, %s7545_s19  ;;  %v797_v30 = vrot.slane %v8063_v15, 4  ;;  %v809_v17 = vrot.slane %v8008_v44, 4  ;;  %v683_v11 = vrot.slane %v8069_v9, 4  ;;  %v8100_v18 = vrot.slane %v470_v42, 4 }
 0x360   :  { %v696_v36 = vsel %vm435_vm2, %v695_v61, %v7957_v54  ;;  %v8104_v57 = vrot.slane %v706_v7, 4  ;;  %v754_v16 = vsel %vm435_vm2, %v738_v2, %v753_v56  ;;  %v8108_v50 = vperm.slane %v460_v20, %v7790_v53 }
 0x361   :  { %v8112_v13 = vsel %vm435_vm2, 0.0, %v8082_v14  ;;  %v751_v8 = vrot.slane %v738_v2, 4  ;;  %v851_v26 = vrot.slane %v846_v39, 4  ;;  %v487_v22 = vrot.slane %v8093_v62, 4 }
 0x362   :  { %v863_v10 = vrot.slane %v850_v5, 4  ;;  %v12482_v32 = vrot.slane %v7927_v0, 4  ;;  %v7138_v29 = vpack.i.bf16 %v7712_v40, %v7705_v35  ;;  %v686_v52 = vsel %vm435_vm2, %v8069_v9, %v685_v58 }
 0x363   :  { %v8123_v60 = vperm.slane %v696_v36, %v7790_v53  ;;  %v762_v38 = vperm.slane %v754_v16, %v7790_v53  ;;  %v7118_v42 = vpack.i.bf16 %v7813_v41, %v7858_v37  ;;  %v8130_v61 = vsel %vm435_vm2, 0.0, %v8100_v18 }
 0x364   :  { %v866_v54 = vsel %vm435_vm2, %v850_v5, %v12482_v32  ;;  %v8134_v7 = vsel %vm435_vm2, 0.0, %v8104_v57  ;;  %v899_v35 = vrot.slane %v8112_v13, 4  ;;  %v854_v40 = vsel %vm435_vm2, %v846_v39, %v853_v59  ;;  %7139 = vrot.lane.b32.xlu0 %v7138_v29, %s7545_s19 }
 0x365   :  { %v12483_v9 = vpack.i.bf16 %v7696_v31, %v7686_v27  ;;  %v752_v41 = vsel %vm435_vm2, %v751_v8, %v7991_v46  ;;  %v852_v37 = vsel %vm435_vm2, %v851_v26, %v7984_v25  ;;  %v874_v2 = vperm.slane %v866_v54, %v7790_v53 }
 0x366   :  { %v790_v56 = vperm.slane %v7895_v6, %v7754_v3  ;;  %v483_v59 = vrot.slane %v8108_v50, 4  ;;  %v488_v39 = vsel %vm435_vm2, 0.0, %v487_v22  ;;  %v8155_v27 = vperm.slane %v7855_v34, %v7754_v3  ;;  %v12491_v22 = vld [vmem:[#allocation33_spill] sm:$0xff] }
 0x367   :  { %7114 = vrot.lane.b32.xlu2 %v12483_v9, %s7545_s19  ;;  %7119 = vrot.lane.b32.xlu1 %v7118_v42, %s7545_s19  ;;  %v864_v31 = vsel %vm435_vm2, %v863_v10, %v7927_v0  ;;  %v711_v25 = vrot.slane %v8123_v60, 4  ;;  %v888_v46 = vrot.slane %v8130_v61, 4  ;;  %v8161_v55 = vrot.slane %v762_v38, 4  ;;  %v12492_v10 = vld [vmem:[#allocation29_spill] sm:$0xff] }
 0x368   :  { %v862_v6 = vperm.slane %v854_v40, %v7790_v53  ;;  %v1115_v20 = vrot.slane %v8134_v7, 4  ;;  %v8167_v5 = vperm.slane %v7826_v21, %v7754_v3  ;;  %v8170_v34 = vperm.slane %v752_v41, %v7790_v53  ;;  %v12490_v21 = vld [vmem:[#allocation25_spill] sm:$0xff]  ;;  %v12495_v7 = vld [vmem:[#allocation35_spill] sm:$0xff] }
 0x369   :  { %12484 = vst [vmem:[#allocation40_spill] sm:$0xff] %v8161_v55  ;;  %v8173_v58 = vperm.slane %v852_v37, %v7790_v53  ;;  %v8176_v0 = vperm.slane %v864_v31, %v7790_v53  ;;  %v8178_v36 = vrot.slane %v874_v2, 4  ;;  %v794_v16 = vperm.slane %v7901_v48, %v7754_v3  ;;  %v12497_v41 = vld [vmem:[#allocation23_spill] sm:$0xff] }
 0x36a   :  { %12485 = vst [vmem:[#allocation41_spill] sm:$0xff] %v8167_v5  ;;  %v795_v13 = vrot.slane %v790_v56, 4  ;;  %v7148_v26 = vpack.i.bf16 %v12490_v21, %v7762_v12  ;;  %v7128_v32 = vpack.i.bf16 %v12492_v10, %v12491_v22  ;;  %v694_v54 = vperm.slane %v686_v52, %v7790_v53 }
 0x36b   :  { %12486 = vst [vmem:[#allocation42_spill] sm:$0xff] %v8170_v34  ;;  %v8190_v29 = vsel %vm435_vm2, %v8155_v27, %v741_v24  ;;  %v8194_v38 = vsel %vm435_vm2, 0.0, %v8161_v55  ;;  %v8196_v48 = vrot.slane %v862_v6, 4  ;;  %v684_v42 = vsel %vm435_vm2, %v683_v11, %v8000_v43  ;;  %v12500_v6 = vld [vmem:[#allocation36_spill] sm:$0xff] }
 0x36c   :  { %12487 = vst [vmem:[#allocation43_spill] sm:$0xff] %v8173_v58  ;;  %v582_v52 = vperm.slane %v12495_v7, %v7790_v53  ;;  %v798_v40 = vsel %vm435_vm2, %v790_v56, %v797_v30  ;;  %7149 = vrot.lane.b32.xlu0 %v7148_v26, %s7545_s19  ;;  %v879_v24 = vrot.slane %v8176_v0, 4  ;;  %v8210_v9 = vsel %vm435_vm2, 0.0, %v8178_v36  ;;  %v12505_v7 = vld [vmem:[#allocation24_spill] sm:$0xff] }
 0x36d   :  { %12488 = vst [vmem:[#allocation44_spill] sm:$0xff] %v8176_v0  ;;  %v796_v43 = vsel %vm435_vm2, %v795_v13, %v8063_v15  ;;  %v807_v11 = vrot.slane %v794_v16, 4  ;;  %v12498_v37 = vpack.i.bf16 %v7682_v23, %v12497_v41  ;;  %v810_v2 = vsel %vm435_vm2, %v794_v16, %v809_v17  ;;  %v12509_v41 = vld [vmem:[#allocation27_spill] sm:$0xff] }
 0x36e   :  { %12489 = vst [vmem:[#allocation45_spill] sm:$0xff] %v8178_v36  ;;  %v8223_v56 = vperm.slane %v684_v42, %v7790_v53  ;;  %v8225_v31 = vrot.slane %v694_v54, 4  ;;  %v8229_v15 = vsel %vm435_vm2, 0.0, %v8196_v48  ;;  %v8233_v13 = vperm.slane %v12500_v6, %v7790_v53  ;;  %v12504_v54 = vld [vmem:[#allocation34_spill] sm:$0xff] }
 0x36f   :  { %12493 = vst [vmem:[#allocation25_spill] sm:$0xff] %v8194_v38  ;;  %7129 = vrot.lane.b32.xlu2 %v7128_v32, %s7545_s19  ;;  %7134 = vrot.lane.b32.xlu1 %v12498_v37, %s7545_s19  ;;  %v806_v23 = vperm.slane %v798_v40, %v7790_v53  ;;  %v900_v21 = vsel %vm435_vm2, %v899_v35, %v488_v39  ;;  %v8238_v17 = vrot.slane %v582_v52, 4  ;;  %v484_v22 = vsel %vm435_vm2, 0.0, %v483_v59 }
 0x370   :  { %12494 = vst [vmem:[#allocation33_spill] sm:$0xff] %v8196_v48  ;;  %v8241_v16 = vperm.slane %v796_v43, %v7790_v53  ;;  %v808_v10 = vsel %vm435_vm2, %v807_v11, %v8008_v44  ;;  %v818_v32 = vperm.slane %v810_v2, %v7790_v53  ;;  %v7153_v42 = vpack.i.bf16 %v12504_v54, %v7688_v28  ;;  %v12508_v11 = vld [vmem:[#allocation26_spill] sm:$0xff] }
 0x371   :  { %12496 = vst [vmem:[#allocation29_spill] sm:$0xff] %v8210_v9  ;;  %v7163_v35 = vpack.i.bf16 %v7946_v1, %v12505_v7  ;;  %v8252_v39 = vperm.slane %v900_v21, %v7754_v3  ;;  %v707_v52 = vrot.slane %v8223_v56, 4  ;;  %v710_v40 = vsel %vm435_vm2, 0.0, %v8225_v31  ;;  %v12527_v7 = vld [vmem:[#allocation32_spill] sm:$0xff] }
 0x372   :  { %12499 = vst [vmem:[#allocation35_spill] sm:$0xff] %v8229_v15  ;;  %v712_v59 = vsel %vm435_vm2, 0.0, %v711_v25  ;;  %v595_v44 = vrot.slane %v8233_v13, 4  ;;  %v8259_v43 = vrot.slane %v806_v23, 4  ;;  %v7143_v28 = vpack.i.bf16 %v12509_v41, %v12508_v11  ;;  %v12523_v11 = vld [vmem:[#allocation38_spill] sm:$0xff] }
 0x373   :  { %12501 = vst [vmem:[#allocation23_spill] sm:$0xff] %v8233_v13  ;;  %v889_v37 = vsel %vm435_vm2, %v888_v46, %v484_v22  ;;  %v8265_v1 = vsel %vm435_vm2, 0.0, %v879_v24  ;;  %v8270_v6 = vsel %vm435_vm2, 0.0, %v8238_v17  ;;  %v8273_v25 = vperm.slane %v808_v10, %v7790_v53 }
 0x374   :  { %12502 = vst [vmem:[#allocation36_spill] sm:$0xff] %v8238_v17  ;;  %7154 = vrot.lane.b32.xlu0 %v7153_v42, %s7545_s19  ;;  %v8277_v23 = vrot.slane %v818_v32, 4  ;;  %v894_v46 = vsel %vm435_vm2, %v8082_v14, %v8093_v62  ;;  %v1104_v24 = vrot.slane %v710_v40, 4  ;;  %v1116_v21 = vsel %vm435_vm2, %v1115_v20, %v712_v59 }
 0x375   :  { %12503 = vst [vmem:[#allocation46_spill] sm:$0xff] %v8241_v16  ;;  %v8285_v22 = vperm.slane %v889_v37, %v7754_v3  ;;  %v917_v10 = vrot.slane %v8252_v39, 4  ;;  %v8290_v54 = vperm.slane %v8037_v45, %v7754_v3  ;;  %v708_v32 = vsel %vm435_vm2, 0.0, %v707_v52 }
 0x376   :  { %12506 = vst [vmem:[#allocation34_spill] sm:$0xff] %v8252_v39  ;;  %v8294_v42 = vsel %vm435_vm2, 0.0, %v595_v44  ;;  %v8299_v14 = vsel %vm435_vm2, 0.0, %v8259_v43  ;;  %v883_v20 = vsel %vm435_vm2, %v8100_v18, %v8108_v50  ;;  %v8306_v45 = vperm.slane %v894_v46, %v7754_v3 }
 0x377   :  { %12507 = vst [vmem:[#allocation24_spill] sm:$0xff] %v8259_v43  ;;  %7164 = vrot.lane.b32.xlu2 %v7163_v35, %s7545_s19  ;;  %7144 = vrot.lane.b32.xlu1 %v7143_v28, %s7545_s19  ;;  %v12519_v35 = vld [vmem:[#allocation31_spill] sm:$0xff]  ;;  %v8313_v40 = vperm.slane %v1116_v21, %v7754_v3  ;;  %v823_v59 = vrot.slane %v8273_v25, 4  ;;  %v8318_v44 = vsel %vm435_vm2, 0.0, %v8277_v23  ;;  %v8322_v41 = vperm.slane %v12523_v11, %v7754_v3 }
 0x378   :  { %12510 = vst [vmem:[#allocation26_spill] sm:$0xff] %v8265_v1  ;;  %v8310_v52 = vperm.slane %v12519_v35, %v7754_v3  ;;  %v1105_v18 = vsel %vm435_vm2, %v1104_v24, %v708_v32  ;;  %v905_v28 = vrot.slane %v8285_v22, 4  ;;  %v918_v37 = vsel %vm435_vm2, %v917_v10, %v8306_v45  ;;  %v12526_v35 = vld [vmem:[#allocation37_spill] sm:$0xff]  ;;  %v8347_v32 = vpop.permute.xlu0 %7029 }
 0x379   :  { %12511 = vst [vmem:[#allocation27_spill] sm:$0xff] %v8270_v6  ;;  %v8332_v46 = vperm.slane %v8057_v63, %v7754_v3  ;;  %v1079_v21 = vrot.slane %v8290_v54, 4  ;;  %v7158_v62 = vpack.i.bf16 %v12527_v7, %v12526_v35  ;;  %v8338_v11 = vperm.slane %v883_v20, %v7754_v3 }
 0x37a   :  { %12512 = vst [vmem:[#allocation47_spill] sm:$0xff] %v8273_v25  ;;  %v8342_v24 = vperm.slane %v8029_v33, %v7754_v3  ;;  %v1110_v10 = vsel %vm435_vm2, %v8104_v57, %v8123_v60  ;;  %v8351_v63 = vperm.slane %v8060_v47, %v7754_v3  ;;  %v971_v26 = vrot.slane %v8310_v52, 4  ;;  %v12540_v57 = vld [vmem:[#allocation39_spill] sm:$0xff] }
 0x37b   :  { %12513 = vst [vmem:[#allocation48_spill] sm:$0xff] %v8277_v23  ;;  %v8355_v7 = vperm.slane %v1105_v18, %v7754_v3  ;;  %v1133_v20 = vrot.slane %v8313_v40, 4  ;;  %v8359_v33 = vsel %vm435_vm2, 0.0, %v823_v59  ;;  %v8365_v60 = vperm.slane %v918_v37, %v7790_v53 }
 0x37c   :  { %12514 = vst [vmem:[#allocation49_spill] sm:$0xff] %v8285_v22  ;;  %v906_v47 = vsel %vm435_vm2, %v905_v28, %v8338_v11  ;;  %v1067_v18 = vrot.slane %v8332_v46, 4  ;;  %v1080_v2 = vsel %vm435_vm2, %v1079_v21, %v8342_v24  ;;  %v8373_v59 = vperm.slane %v1110_v10, %v7754_v3 }
 0x37d   :  { %12515 = vst [vmem:[#allocation50_spill] sm:$0xff] %v8290_v54  ;;  %v8325_v50 = vpop.permute.xlu2 %7019  ;;  %v12330_v35 = vunpack.i.h.bf16 %v8347_v32  ;;  %v1099_v28 = vsel %vm435_vm2, %v8225_v31, %v8223_v56  ;;  %v959_v37 = vrot.slane %v8351_v63, 4  ;;  %v972_v21 = vsel %vm435_vm2, %v971_v26, %v8167_v5 }
 0x37e   :  { %12516 = vst [vmem:[#allocation51_spill] sm:$0xff] %v8294_v42  ;;  %v1121_v10 = vrot.slane %v8355_v7, 4  ;;  %v1134_v61 = vsel %vm435_vm2, %v1133_v20, %v8373_v59  ;;  %v8391_v30 = vperm.slane %v906_v47, %v7790_v53  ;;  %v8395_v12 = vperm.slane %v1080_v2, %v7790_v53 }
 0x37f   :  { %12517 = vst [vmem:[#allocation52_spill] sm:$0xff] %v8299_v14  ;;  %7159 = vrot.lane.b32.xlu1 %v7158_v62, %s7545_s19  ;;  %v8379_v62 = vperm.slane %v8045_v51, %v7754_v3  ;;  %v929_v51 = vrot.slane %v8365_v60, 4  ;;  %v8399_v56 = vperm.slane %v8052_v19, %v7754_v3  ;;  %v7022_v31 = vunpack.i.h.bf16 %v8325_v50 }
 0x380   :  { %12518 = vst [vmem:[#allocation53_spill] sm:$0xff] %v8306_v45  ;;  %v7021_v26 = vunpack.i.l.bf16 %v8325_v50  ;;  %v8408_v47 = vperm.slane %v1099_v28, %v7754_v3  ;;  %v8412_v2 = vperm.slane %v12540_v57, %v7754_v3  ;;  %v1625_v19 = vrot.slane %v12330_v35, 4 }
 0x381   :  { %12520 = vst [vmem:[#allocation31_spill] sm:$0xff] %v8310_v52  ;;  %v1068_v20 = vsel %vm435_vm2, %v1067_v18, %v8379_v62  ;;  %v8417_v49 = vperm.slane %v972_v21, %v7790_v53  ;;  %v8420_v50 = vperm.slane %v1134_v61, %v7790_v53  ;;  %v960_v28 = vsel %vm435_vm2, %v959_v37, %v8399_v56 }
 0x382   :  { %12521 = vst [vmem:[#allocation54_spill] sm:$0xff] %v8313_v40  ;;  %v12544_v40 = vunpack.i.l.bf16 %v8347_v32  ;;  %v1122_v57 = vsel %vm435_vm2, %v1121_v10, %v8408_v47  ;;  %v8432_v21 = vsel %vm435_vm2, %v929_v51, %v8391_v30  ;;  %v8435_v61 = vperm.slane %v1068_v20, %v7790_v53 }
 0x383   :  { %12522 = vst [vmem:[#allocation55_spill] sm:$0xff] %v8318_v44  ;;  %v1455_v22 = vrot.slane %v7022_v31, 4  ;;  %v1443_v18 = vrot.slane %v7021_v26, 4  ;;  %v8441_v10 = vperm.slane %v960_v28, %v7790_v53  ;;  %v983_v35 = vrot.slane %v8417_v49, 4 }
 0x384   :  { %12524 = vst [vmem:[#allocation38_spill] sm:$0xff] %v8322_v41  ;;  %v8445_v45 = vperm.slane %v1122_v57, %v7790_v53  ;;  %v1145_v51 = vrot.slane %v8420_v50, 4 }
 0x385   :  { %12525 = vst [vmem:[#allocation56_spill] sm:$0xff] %v8332_v46  ;;  %v8403_v8 = vpop.permute.xlu2 %7024 }
 0x386   :  { %12528 = vst [vmem:[#allocation37_spill] sm:$0xff] %v8338_v11 }
 0x387   :  { %12529 = vst [vmem:[#allocation32_spill] sm:$0xff] %v8342_v24 }
 0x388   :  { %12530 = vst [vmem:[#allocation57_spill] sm:$0xff] %v8351_v63 }
 0x389   :  { %12531 = vst [vmem:[#allocation58_spill] sm:$0xff] %v8355_v7  ;;  %v1513_v7 = vrot.slane %v12544_v40, 4  ;;  %v1091_v40 = vrot.slane %v8395_v12, 4 }
 0x38a   :  { %12532 = vst [vmem:[#allocation59_spill] sm:$0xff] %v8359_v33 }
 0x38b   :  { %12533 = vst [vmem:[#allocation60_spill] sm:$0xff] %v8365_v60 }
 0x38c   :  { %12534 = vst [vmem:[#allocation61_spill] sm:$0xff] %v8373_v59  ;;  %v7015_v39 = vpop.permute.xlu1 %7014  ;;  %v8438_v11 = vpop.permute.xlu0 %7044 }
 0x38d   :  { %12535 = vst [vmem:[#allocation62_spill] sm:$0xff] %v8379_v62  ;;  %v7017_v37 = vunpack.i.h.bf16 %v7015_v39  ;;  %v7016_v52 = vunpack.i.l.bf16 %v7015_v39 }
 0x38e   :  { %12536 = vst [vmem:[#allocation63_spill] sm:$0xff] %v8391_v30 }
 0x38f   :  { %12537 = vst [vmem:[#allocation64_spill] sm:$0xff] %v8395_v12  ;;  %v1456_v20 = vsel %vm435_vm2, %v1455_v22, %v7017_v37  ;;  %v1457_v63 = vrot.slane %v7017_v37, 4  ;;  %v1444_v5 = vsel %vm435_vm2, %v1443_v18, %v7016_v52  ;;  %v7040_v12 = vpop.permute.xlu2 %7039  ;;  %v8460_v18 = vsel %vm435_vm2, %v1091_v40, %v8435_v61 }
 0x390   :  { %12538 = vst [vmem:[#allocation65_spill] sm:$0xff] %v8399_v56  ;;  %v1445_v56 = vrot.slane %v7016_v52, 4  ;;  %v1462_v54 = vperm.slane %v1456_v20, %v7754_v3  ;;  %v1450_v39 = vperm.slane %v1444_v5, %v7754_v3  ;;  %v7042_v52 = vunpack.i.h.bf16 %v7040_v12 }
 0x391   :  { %12539 = vst [vmem:[#allocation66_spill] sm:$0xff] %v8408_v47  ;;  %v1458_v57 = vsel %vm435_vm2, %v7022_v31, %v1457_v63  ;;  %v7041_v37 = vunpack.i.l.bf16 %v7040_v12  ;;  %v8466_v63 = vsel %vm435_vm2, %v983_v35, %v8441_v10 }
 0x392   :  { %12541 = vst [vmem:[#allocation39_spill] sm:$0xff] %v8412_v2  ;;  %v1466_v5 = vperm.slane %v1458_v57, %v7754_v3  ;;  %v1467_v20 = vrot.slane %v1462_v54, 4  ;;  %v1469_v28 = vrot.slane %v1450_v39, 4  ;;  %v1623_v57 = vrot.slane %v7042_v52, 4 }
 0x393   :  { %12542 = vst [vmem:[#allocation67_spill] sm:$0xff] %v8417_v49  ;;  %v1446_v49 = vsel %vm435_vm2, %v7021_v26, %v1445_v56  ;;  %v8470_v56 = vsel %vm435_vm2, %v1145_v51, %v8445_v45  ;;  %v1511_v22 = vrot.slane %v7041_v37, 4  ;;  %v7027_v26 = vunpack.i.h.bf16 %v8403_v8 }
 0x394   :  { %12543 = vst [vmem:[#allocation68_spill] sm:$0xff] %v8420_v50  ;;  %v1454_v31 = vperm.slane %v1446_v49, %v7754_v3  ;;  %v1479_v46 = vrot.slane %v1466_v5, 4  ;;  %v1468_v24 = vsel %vm435_vm2, %v1467_v20, %v1450_v39  ;;  %v1470_v35 = vsel %vm435_vm2, %v1462_v54, %v1469_v28  ;;  %v7050_v47 = vpop.permute.xlu0 %7049 }
 0x395   :  { %12545 = vst [vmem:[#allocation69_spill] sm:$0xff] %v8435_v61  ;;  %v1626_v40 = vsel %vm435_vm2, %v7042_v52, %v1625_v19  ;;  %v1514_v59 = vsel %vm435_vm2, %v7041_v37, %v1513_v7  ;;  %v8489_v39 = vperm.slane %v1468_v24, %v7790_v53  ;;  %v1478_v54 = vperm.slane %v1470_v35, %v7790_v53 }
 0x396   :  { %12546 = vst [vmem:[#allocation70_spill] sm:$0xff] %v8441_v10  ;;  %v1480_v28 = vsel %vm435_vm2, %v1479_v46, %v1454_v31  ;;  %v1481_v20 = vrot.slane %v1454_v31, 4  ;;  %v12548_v50 = vunpack.i.h.bf16 %v8347_v32  ;;  %v12549_v51 = vunpack.i.l.bf16 %v8347_v32 }
 0x397   :  { %12547 = vst [vmem:[#allocation71_spill] sm:$0xff] %v8445_v45  ;;  %v8501_v7 = vperm.slane %v1480_v28, %v7790_v53  ;;  %v7070_v24 = vpop.permute.xlu2 %7069  ;;  %v7052_v31 = vunpack.i.h.bf16 %v7050_v47  ;;  %v1634_v35 = vperm.slane %v1626_v40, %v7754_v3  ;;  %v1491_v52 = vrot.slane %v8489_v39, 4 }
 0x398   :  { %v1624_v49 = vsel %vm435_vm2, %v1623_v57, %v12548_v50  ;;  %v1512_v12 = vsel %vm435_vm2, %v1511_v22, %v12549_v51  ;;  %v1482_v37 = vsel %vm435_vm2, %v1466_v5, %v1481_v20  ;;  %v7072_v46 = vunpack.i.h.bf16 %v7070_v24  ;;  %v7035_v44 = vpop.permute.xlu1 %7034 }
 0x399   :  { %v8507_v50 = vperm.slane %v1514_v59, %v7754_v3  ;;  %v1490_v32 = vperm.slane %v1482_v37, %v7790_v53  ;;  %v8510_v22 = vrot.slane %v1478_v54, 4  ;;  %v1613_v57 = vrot.slane %v7027_v26, 4 }
 0x39a   :  { %v1630_v51 = vperm.slane %v1624_v49, %v7754_v3  ;;  %v8514_v28 = vperm.slane %v1512_v12, %v7754_v3  ;;  %v12550_v5 = vunpack.i.l.bf16 %v8403_v8  ;;  %v1495_v40 = vrot.slane %v8501_v7, 4 }
 0x39b   :  { %v1835_v19 = vrot.slane %v7072_v46, 4  ;;  %v7071_v59 = vunpack.i.l.bf16 %v7070_v24  ;;  %v12551_v45 = vunpack.i.h.bf16 %v8438_v11  ;;  %v12552_v54 = vunpack.i.l.bf16 %v8438_v11 }
 0x39c   :  { %v1501_v20 = vrot.slane %v12550_v5, 4  ;;  %v1837_v49 = vrot.slane %v7052_v31, 4  ;;  %v7051_v12 = vunpack.i.l.bf16 %v7050_v47  ;;  %v1647_v61 = vrot.slane %v1634_v35, 4 }
 0x39d   :  { %v8522_v37 = vrot.slane %v12551_v45, 4  ;;  %v8526_v62 = vrot.slane %v12552_v54, 4  ;;  %v1535_v10 = vrot.slane %v8507_v50, 4  ;;  %v8531_v5 = vsel %vm435_vm2, 0.0, %v8510_v22 }
 0x39e   :  { %v8533_v60 = vrot.slane %v1490_v32, 4  ;;  %v1635_v24 = vrot.slane %v1630_v51, 4  ;;  %v1523_v30 = vrot.slane %v8514_v28, 4  ;;  %v8537_v45 = vsel %vm435_vm2, 0.0, %v1491_v52 }
 0x39f   :  { %v12553_v54 = vrot.slane %v8155_v27, 4  ;;  %v8544_v33 = vsel %vm435_vm2, 0.0, %v1495_v40  ;;  %v1723_v23 = vrot.slane %v7071_v59, 4  ;;  %v1836_v25 = vsel %vm435_vm2, %v1835_v19, %v7052_v31 }
 0x3a0   :  { %v7037_v32 = vunpack.i.h.bf16 %v7035_v44  ;;  %v1838_v43 = vsel %vm435_vm2, %v7072_v46, %v1837_v49  ;;  %v1725_v16 = vrot.slane %v7051_v12, 4  ;;  %v7036_v52 = vunpack.i.l.bf16 %v7035_v44 }
 0x3a1   :  { %v740_v47 = vsel %vm435_vm2, %v12553_v54, %v7988_v4  ;;  %v8551_v41 = vsel %vm435_vm2, 0.0, %v8533_v60  ;;  %v8556_v54 = vperm.slane %v1836_v25, %v7754_v3  ;;  %v8561_v46 = vperm.slane %v1838_v43, %v7754_v3 }
 0x3a2   :  { %v1611_v27 = vrot.slane %v7037_v32, 4  ;;  %v1614_v4 = vsel %vm435_vm2, %v7037_v32, %v1613_v57  ;;  %v746_v40 = vperm.slane %v740_v47, %v7790_v53  ;;  %v1499_v31 = vrot.slane %v7036_v52, 4 }
 0x3a3   :  { %v1622_v19 = vperm.slane %v1614_v4, %v7754_v3  ;;  %v1502_v14 = vsel %vm435_vm2, %v7036_v52, %v1501_v20  ;;  %v1724_v44 = vsel %vm435_vm2, %v1723_v23, %v7051_v12  ;;  %v1726_v57 = vsel %vm435_vm2, %v7071_v59, %v1725_v16 }
 0x3a4   :  { %v1612_v49 = vsel %vm435_vm2, %v1611_v27, %v7027_v26  ;;  %v1510_v2 = vperm.slane %v1502_v14, %v7754_v3  ;;  %v12554_v32 = vunpack.i.l.bf16 %v8403_v8  ;;  %v750_v23 = vperm.slane %v8190_v29, %v7790_v53 }
 0x3a5   :  { %v1618_v47 = vperm.slane %v1612_v49, %v7754_v3  ;;  %v1649_v25 = vrot.slane %v1622_v19, 4  ;;  %v8576_v26 = vperm.slane %v1724_v44, %v7754_v3  ;;  %v1648_v16 = vsel %vm435_vm2, %v1647_v61, %v1622_v19 }
 0x3a6   :  { %v1500_v4 = vsel %vm435_vm2, %v1499_v31, %v12554_v32  ;;  %v1537_v52 = vrot.slane %v1510_v2, 4  ;;  %v8582_v12 = vperm.slane %v1726_v57, %v7754_v3  ;;  %v7055_v61 = vpop.permute.xlu1 %7054  ;;  %v8592_v19 = vperm.slane %v1648_v16, %v7790_v53 }
 0x3a7   :  { %v1506_v43 = vperm.slane %v1500_v4, %v7754_v3  ;;  %v1637_v14 = vrot.slane %v1618_v47, 4  ;;  %v1650_v59 = vsel %vm435_vm2, %v1634_v35, %v1649_v25  ;;  %v1636_v27 = vsel %vm435_vm2, %v1635_v24, %v1618_v47  ;;  %v8601_v4 = vpop.permute.xlu2 %7074 }
 0x3a8   :  { %v1658_v31 = vperm.slane %v1650_v59, %v7790_v53  ;;  %v1538_v32 = vsel %vm435_vm2, %v8507_v50, %v1537_v52  ;;  %v763_v57 = vrot.slane %v746_v40, 4  ;;  %v765_v25 = vrot.slane %v750_v23, 4 }
 0x3a9   :  { %v1638_v49 = vsel %vm435_vm2, %v1630_v51, %v1637_v14  ;;  %v1524_v29 = vsel %vm435_vm2, %v1523_v30, %v1506_v43  ;;  %v1525_v44 = vrot.slane %v1506_v43, 4  ;;  %v8595_v24 = vperm.slane %v1636_v27, %v7790_v53 }
 0x3aa   :  { %v1536_v30 = vsel %vm435_vm2, %v1535_v10, %v1510_v2  ;;  %v1546_v47 = vperm.slane %v1538_v32, %v7790_v53  ;;  %v1646_v50 = vperm.slane %v1638_v49, %v7790_v53  ;;  %v8604_v43 = vrot.slane %v1658_v31, 4 }
 0x3ab   :  { %v1526_v51 = vsel %vm435_vm2, %v8514_v28, %v1525_v44  ;;  %v8607_v52 = vperm.slane %v1524_v29, %v7790_v53  ;;  %v7057_v23 = vunpack.i.h.bf16 %v7055_v61  ;;  %v12555_v2 = vrot.slane %v8170_v34, 4 }
 0x3ac   :  { %v1534_v28 = vperm.slane %v1526_v51, %v7790_v53  ;;  %v1663_v59 = vrot.slane %v8592_v19, 4  ;;  %v1542_v27 = vperm.slane %v1536_v30, %v7790_v53  ;;  %v1553_v31 = vrot.slane %v1546_v47, 4 }
 0x3ad   :  { %v8615_v10 = vsel %vm435_vm2, 0.0, %v12555_v2  ;;  %v8620_v49 = vsel %vm435_vm2, 0.0, %v763_v57  ;;  %v1679_v29 = vrot.slane %v7057_v23, 4  ;;  %v1682_v44 = vsel %vm435_vm2, %v7057_v23, %v8522_v37 }
 0x3ae   :  { %12556 = vst [vmem:[#allocation72_spill] sm:$0xff] %v8615_v10  ;;  %v8625_v32 = vsel %vm435_vm2, 0.0, %v765_v25  ;;  %v8628_v51 = vsel %vm435_vm2, %v765_v25, %v746_v40  ;;  %v8631_v16 = vrot.slane %v1646_v50, 4  ;;  %v8635_v30 = vsel %vm435_vm2, 0.0, %v8604_v43 }
 0x3af   :  { %12557 = vst [vmem:[#allocation73_spill] sm:$0xff] %v8628_v51  ;;  %v1547_v57 = vrot.slane %v8607_v52, 4  ;;  %v8638_v47 = vrot.slane %v1534_v28, 4  ;;  %v1554_v37 = vsel %vm435_vm2, 0.0, %v1553_v31  ;;  %v1690_v23 = vperm.slane %v1682_v44, %v7754_v3  ;;  %v8653_v44 = vpop.permute.xlu0 %7079  ;;  %v7105_v42 = vpop.permute.xlu2 %7104 }
 0x3b0   :  { %v7056_v14 = vunpack.i.l.bf16 %v7055_v61  ;;  %v8644_v25 = vsel %vm435_vm2, 0.0, %v1663_v59  ;;  %v1551_v50 = vrot.slane %v1542_v27, 4  ;;  %v12558_v2 = vunpack.i.h.bf16 %v8438_v11 }
 0x3b1   :  { %v8657_v61 = vsel %vm435_vm2, 0.0, %v8631_v16  ;;  %v8660_v59 = vsel %vm435_vm2, 0.0, %v1547_v57  ;;  %v1961_v40 = vrot.slane %v1554_v37, 4  ;;  %v12560_v9 = vunpack.i.h.bf16 %v8601_v4 }
 0x3b2   :  { %v1680_v35 = vsel %vm435_vm2, %v1679_v29, %v12558_v2  ;;  %v1667_v20 = vrot.slane %v7056_v14, 4  ;;  %v1670_v6 = vsel %vm435_vm2, %v7056_v14, %v8526_v62  ;;  %v8665_v2 = vsel %vm435_vm2, 0.0, %v8638_v47 }
 0x3b3   :  { %v1678_v29 = vperm.slane %v1670_v6, %v7754_v3  ;;  %v1686_v28 = vperm.slane %v1680_v35, %v7754_v3  ;;  %v1703_v62 = vrot.slane %v1690_v23, 4  ;;  %v12559_v14 = vunpack.i.l.bf16 %v8438_v11  ;;  %v8675_v6 = vpop.permute.xlu1 %7059 }
 0x3b4   :  { %v1552_v17 = vsel %vm435_vm2, 0.0, %v1551_v50  ;;  %v8679_v1 = vrot.slane %v12560_v9, 4  ;;  %v7107_v35 = vunpack.i.h.bf16 %v7105_v42  ;;  %v7106_v36 = vunpack.i.l.bf16 %v7105_v42 }
 0x3b5   :  { %v1668_v8 = vsel %vm435_vm2, %v1667_v20, %v12559_v14  ;;  %v1705_v0 = vrot.slane %v1678_v29, 4  ;;  %v12561_v11 = vunpack.i.l.bf16 %v8601_v4  ;;  %v8690_v14 = vsel %vm435_vm2, %v1961_v40, %v1552_v17 }
 0x3b6   :  { %v1674_v57 = vperm.slane %v1668_v8, %v7754_v3  ;;  %v8687_v8 = vsel %vm435_vm2, %v1553_v31, %v1542_v27  ;;  %v1691_v13 = vrot.slane %v1686_v28, 4  ;;  %v1704_v9 = vsel %vm435_vm2, %v1703_v62, %v1678_v29 }
 0x3b7   :  { %v8683_v20 = vrot.slane %v12561_v11, 4  ;;  %v12562_v42 = vunpack.i.h.bf16 %v8653_v44  ;;  %v12563_v11 = vunpack.i.l.bf16 %v8653_v44  ;;  %v12564_v27 = vrot.slane %v8531_v5, 4 }
 0x3b8   :  { %v1693_v37 = vrot.slane %v1674_v57, 4  ;;  %v12565_v31 = vrot.slane %v8551_v41, 4  ;;  %v2465_v29 = vrot.slane %v7107_v35, 4  ;;  %v2453_v62 = vrot.slane %v7106_v36, 4 }
 0x3b9   :  { %v8696_v15 = vrot.slane %v12562_v42, 4  ;;  %v8700_v58 = vrot.slane %v12563_v11, 4  ;;  %v1897_v17 = vsel %vm435_vm2, %v12564_v27, %v8537_v45  ;;  %v1706_v50 = vsel %vm435_vm2, %v1690_v23, %v1705_v0  ;;  %v7110_v11 = vpop.permute.xlu2 %7109 }
 0x3ba   :  { %v1908_v40 = vsel %vm435_vm2, %v12565_v31, %v8544_v33  ;;  %v8713_v48 = vperm.slane %v1704_v9, %v7790_v53  ;;  %v1891_v5 = vsel %vm435_vm2, %v8510_v22, %v8489_v39  ;;  %v8719_v45 = vperm.slane %v1897_v17, %v7754_v3 }
 0x3bb   :  { %v8722_v41 = vperm.slane %v1908_v40, %v7754_v3  ;;  %v1694_v33 = vsel %vm435_vm2, %v1686_v28, %v1693_v37  ;;  %v7112_v27 = vunpack.i.h.bf16 %v7110_v11  ;;  %v7111_v0 = vunpack.i.l.bf16 %v7110_v11 }
 0x3bc   :  { %12566 = vst [vmem:[#allocation74_spill] sm:$0xff] %v8719_v45  ;;  %v1902_v23 = vsel %vm435_vm2, %v8533_v60, %v8501_v7  ;;  %v1692_v9 = vsel %vm435_vm2, %v1691_v13, %v1674_v57  ;;  %v1714_v31 = vperm.slane %v1706_v50, %v7790_v53  ;;  %v1913_v39 = vrot.slane %v8719_v45, 4 }
 0x3bd   :  { %12567 = vst [vmem:[#allocation75_spill] sm:$0xff] %v8722_v41  ;;  %v1925_v22 = vrot.slane %v8722_v41, 4  ;;  %v2463_v17 = vrot.slane %v7112_v27, 4  ;;  %v2451_v42 = vrot.slane %v7111_v0, 4  ;;  %v2454_v40 = vsel %vm435_vm2, %v7111_v0, %v2453_v62 }
 0x3be   :  { %v8734_v28 = vperm.slane %v1891_v5, %v7754_v3  ;;  %v1702_v37 = vperm.slane %v1694_v33, %v7790_v53  ;;  %v2462_v11 = vperm.slane %v2454_v40, %v7754_v3  ;;  %v2466_v60 = vsel %vm435_vm2, %v7112_v27, %v2465_v29 }
 0x3bf   :  { %v8740_v13 = vperm.slane %v1902_v23, %v7754_v3  ;;  %v2452_v7 = vsel %vm435_vm2, %v2451_v42, %v7106_v36  ;;  %v2464_v57 = vsel %vm435_vm2, %v2463_v17, %v7107_v35  ;;  %v2474_v50 = vperm.slane %v2466_v60, %v7754_v3  ;;  %v7085_v60 = vpop.permute.xlu0 %7084 }
 0x3c0   :  { %12568 = vst [vmem:[#allocation76_spill] sm:$0xff] %v8734_v28  ;;  %v1914_v62 = vsel %vm435_vm2, %v1913_v39, %v8734_v28  ;;  %v2458_v5 = vperm.slane %v2452_v7, %v7754_v3  ;;  %v2470_v33 = vperm.slane %v2464_v57, %v7754_v3  ;;  %v2489_v0 = vrot.slane %v2462_v11, 4 }
 0x3c1   :  { %12569 = vst [vmem:[#allocation77_spill] sm:$0xff] %v8740_v13  ;;  %v1926_v29 = vsel %vm435_vm2, %v1925_v22, %v8740_v13  ;;  %v8752_v27 = vperm.slane %v1692_v9, %v7790_v53  ;;  %v8754_v23 = vrot.slane %v1714_v31, 4  ;;  %v2487_v36 = vrot.slane %v2474_v50, 4 }
 0x3c2   :  { %v8757_v35 = vperm.slane %v1926_v29, %v7790_v53  ;;  %v8759_v42 = vrot.slane %v1702_v37, 4  ;;  %v2475_v39 = vrot.slane %v2470_v33, 4  ;;  %v2477_v17 = vrot.slane %v2458_v5, 4 }
 0x3c3   :  { %v2490_v40 = vsel %vm435_vm2, %v2474_v50, %v2489_v0  ;;  %v2488_v7 = vsel %vm435_vm2, %v2487_v36, %v2462_v11  ;;  %v8765_v9 = vperm.slane %v1914_v62, %v7790_v53  ;;  %v7086_v41 = vunpack.i.l.bf16 %v7085_v60 }
 0x3c4   :  { %v2498_v22 = vperm.slane %v2490_v40, %v7790_v53  ;;  %v1937_v31 = vrot.slane %v8757_v35, 4  ;;  %v2476_v57 = vsel %vm435_vm2, %v2475_v39, %v2458_v5  ;;  %v2478_v29 = vsel %vm435_vm2, %v2470_v33, %v2477_v17 }
 0x3c5   :  { %v2494_v37 = vperm.slane %v2488_v7, %v7790_v53  ;;  %v1719_v45 = vrot.slane %v8713_v48, 4  ;;  %v8773_v50 = vperm.slane %v2476_v57, %v7790_v53  ;;  %v2486_v11 = vperm.slane %v2478_v29, %v7790_v53 }
 0x3c6   :  { %v1938_v62 = vsel %vm435_vm2, %v1937_v31, %v8765_v9  ;;  %v8780_v0 = vsel %vm435_vm2, 0.0, %v8754_v23  ;;  %v2505_v5 = vrot.slane %v2498_v22, 4  ;;  %v12571_v33 = vunpack.i.h.bf16 %v8675_v6 }
 0x3c7   :  { %12570 = vst [vmem:[#allocation78_spill] sm:$0xff] %v8773_v50  ;;  %v2323_v39 = vpack.c.bf16 %v1938_v62, %v1938_v62  ;;  %v8784_v17 = vrot.slane %v2486_v11, 4  ;;  %v7087_v40 = vunpack.i.h.bf16 %v7085_v60  ;;  %v1555_v7 = vrot.slane %v7086_v41, 4  ;;  %v7065_v60 = vpop.permute.xlu1 %7064 }
 0x3c8   :  { %v1781_v36 = vrot.slane %v12571_v33, 4  ;;  %v8788_v57 = vsel %vm435_vm2, 0.0, %v8759_v42  ;;  %v2503_v29 = vrot.slane %v2494_v37, 4  ;;  %v12573_v31 = vunpack.i.l.bf16 %v8675_v6 }
 0x3c9   :  { %12572 = vst [vmem:[#allocation79_spill] sm:$0xff] %v8784_v17  ;;  %v3368_v38 = vsel %vm3363_vm3, %v2323_v39, 0  ;;  %v8795_v33 = vsel %vm435_vm2, 0.0, %v1719_v45  ;;  %v2499_v11 = vrot.slane %v8773_v50, 4  ;;  %v1945_v62 = vsel %vm435_vm2, %v8638_v47, %v8607_v52 }
 0x3ca   :  { %v1557_v51 = vrot.slane %v12573_v31, 4  ;;  %3377 = vmatpush.bf16.xpose.msrb.mxu0 %v3368_v38  ;;  %v2506_v55 = vsel %vm435_vm2, 0.0, %v2505_v5  ;;  %v8808_v45 = vsel %vm435_vm2, 0.0, %v8784_v17  ;;  %v1779_v38 = vrot.slane %v7087_v40, 4 }
 0x3cb   :  { %12574 = vst [vmem:[#allocation80_spill] sm:$0xff] %v8808_v45  ;;  %v12575_v50 = vmov %v12573_v31  ;;  %v2504_v52 = vsel %vm435_vm2, 0.0, %v2503_v29  ;;  %v8815_v47 = vsel %vm435_vm2, %v2505_v5, %v2494_v37  ;;  %v7067_v10 = vunpack.i.h.bf16 %v7065_v60 }
 0x3cc   :  { %v1556_v34 = vsel %vm435_vm2, %v1555_v7, %v12575_v50  ;;  %12576 = vst [vmem:[#allocation81_spill] sm:$0xff] %v8815_v47  ;;  %v8818_v31 = vperm.slane %v1945_v62, %v7754_v3  ;;  %v8821_v39 = vsel %vm435_vm2, 0.0, %v2499_v11  ;;  %v2915_v22 = vrot.slane %v2506_v55, 4  ;;  %v8833_v62 = vpop.permute.xlu2 %7114 }
 0x3cd   :  { %12578 = vst [vmem:[#allocation83_spill] sm:$0xff] %v8821_v39  ;;  %v1558_v17 = vsel %vm435_vm2, %v7086_v41, %v1557_v51  ;;  %v7066_v13 = vunpack.i.l.bf16 %v7065_v60  ;;  %v8826_v50 = vperm.slane %v1556_v34, %v7754_v3  ;;  %v1848_v37 = vsel %vm435_vm2, %v8696_v15, %v7067_v10 }
 0x3ce   :  { %12577 = vst [vmem:[#allocation82_spill] sm:$0xff] %v8818_v31  ;;  %v1849_v5 = vrot.slane %v7067_v10, 4  ;;  %v12579_v7 = vunpack.i.h.bf16 %v8675_v6  ;;  %v1854_v55 = vperm.slane %v1848_v37, %v7754_v3  ;;  %v12580_v34 = vpack.c.bf16 %v8432_v21, %v8432_v21 }
 0x3cf   :  { %v1736_v51 = vsel %vm435_vm2, %v8700_v58, %v7066_v13  ;;  %v1737_v41 = vrot.slane %v7066_v13, 4  ;;  %v8843_v15 = vperm.slane %v1558_v17, %v7754_v3  ;;  %v1782_v10 = vsel %vm435_vm2, %v7087_v40, %v1781_v36 }
 0x3d0   :  { %v1780_v29 = vsel %vm435_vm2, %v1779_v38, %v12579_v7  ;;  %v12581_v6 = vunpack.i.h.bf16 %v8653_v44  ;;  %v1742_v60 = vperm.slane %v1736_v51, %v7754_v3  ;;  %v1859_v58 = vrot.slane %v1854_v55, 4 }
 0x3d1   :  { %6765 = vmatmul.msk.bf16.vlgmr.msrb.gmra.mxu0 %vm3363_vm3, %v12580_v34  ;;  %v12582_v13 = vrot.slane %v8556_v54, 4  ;;  %v12583_v37 = vunpack.i.l.bf16 %v8653_v44  ;;  %v8858_v7 = vperm.slane %v1780_v29, %v7754_v3  ;;  %v12380_v36 = vunpack.i.h.bf16 %v8833_v62 }
 0x3d2   :  { %v1850_v11 = vsel %vm435_vm2, %v12581_v6, %v1849_v5  ;;  %v12584_v5 = vrot.slane %v8665_v2, 4  ;;  %v8867_v34 = vsel %vm435_vm2, %v2915_v22, %v2504_v52  ;;  %v12586_v44 = vrot.slane %v8561_v46, 4 }
 0x3d3   :  { %v1858_v38 = vperm.slane %v1850_v11, %v7754_v3  ;;  %v1862_v21 = vsel %vm435_vm2, %v1854_v55, %v12582_v13  ;;  %v1738_v17 = vsel %vm435_vm2, %v12583_v37, %v1737_v41  ;;  %12585 = vst [vmem:[#allocation84_spill] sm:$0xff] %v8867_v34  ;;  %v1747_v6 = vrot.slane %v1742_v60, 4 }
 0x3d4   :  { %v1870_v40 = vperm.slane %v1862_v21, %v7790_v53  ;;  %v1951_v51 = vsel %vm435_vm2, %v12584_v5, %v8660_v59  ;;  %v8873_v29 = vperm.slane %v1782_v10, %v7754_v3  ;;  %v1860_v11 = vsel %vm435_vm2, %v1859_v58, %v8556_v54  ;;  %v9032_v39 = vpop.permute.xlu2 %7129 }
 0x3d5   :  { %v1871_v55 = vrot.slane %v1858_v38, 4  ;;  %v1874_v41 = vsel %vm435_vm2, %v1858_v38, %v12586_v44  ;;  %v1746_v2 = vperm.slane %v1738_v17, %v7754_v3  ;;  %v8883_v52 = vperm.slane %v1951_v51, %v7754_v3 }
 0x3d6   :  { %v8877_v13 = vrot.slane %v1870_v40, 4  ;;  %v1882_v22 = vperm.slane %v1874_v41, %v7790_v53  ;;  %v8887_v38 = vperm.slane %v8690_v14, %v7754_v3  ;;  %v8893_v54 = vrot.slane %v12380_v36, 4 }
 0x3d7   :  { %12587 = vst [vmem:[#allocation85_spill] sm:$0xff] %v8883_v52  ;;  %v12381_v58 = vunpack.i.l.bf16 %v8833_v62  ;;  %v8897_v37 = vperm.slane %v1860_v11, %v7790_v53  ;;  %v1872_v17 = vsel %vm435_vm2, %v1871_v55, %v8561_v46  ;;  %v1748_v14 = vsel %vm435_vm2, %v1747_v6, %v8576_v26 }
 0x3d8   :  { %12588 = vst [vmem:[#allocation86_spill] sm:$0xff] %v8887_v38  ;;  %v12589_v40 = vrot.slane %v8576_v26, 4  ;;  %v8909_v44 = vsel %vm435_vm2, 0.0, %v8877_v13  ;;  %v1759_v41 = vrot.slane %v1746_v2, 4  ;;  %v8913_v11 = vperm.slane %v8687_v8, %v7754_v3 }
 0x3d9   :  { %v8915_v28 = vrot.slane %v1882_v22, 4  ;;  %v12591_v46 = vrot.slane %v8582_v12, 4  ;;  %v1967_v26 = vrot.slane %v8883_v52, 4  ;;  %v8924_v6 = vrot.slane %v12381_v58, 4 }
 0x3da   :  { %v1750_v5 = vsel %vm435_vm2, %v1742_v60, %v12589_v40  ;;  %12590 = vst [vmem:[#allocation87_spill] sm:$0xff] %v8913_v11  ;;  %v1979_v60 = vrot.slane %v8887_v38, 4  ;;  %v8927_v40 = vperm.slane %v1872_v17, %v7790_v53  ;;  %v8930_v8 = vperm.slane %v1748_v14, %v7790_v53 }
 0x3db   :  { %v1762_v55 = vsel %vm435_vm2, %v1746_v2, %v12591_v46  ;;  %v1758_v22 = vperm.slane %v1750_v5, %v7790_v53  ;;  %v1968_v46 = vsel %vm435_vm2, %v1967_v26, %v8818_v31  ;;  %v1760_v58 = vsel %vm435_vm2, %v1759_v41, %v8582_v12 }
 0x3dc   :  { %v1980_v51 = vsel %vm435_vm2, %v1979_v60, %v8913_v11  ;;  %v1770_v17 = vperm.slane %v1762_v55, %v7790_v53  ;;  %v8943_v14 = vperm.slane %v1968_v46, %v7790_v53  ;;  %v8950_v2 = vsel %vm435_vm2, 0.0, %v8915_v28 }
 0x3dd   :  { %v8946_v5 = vperm.slane %v1980_v51, %v7790_v53  ;;  %v2058_v26 = vrot.slane %v8657_v61, 4  ;;  %v2064_v60 = vsel %vm435_vm2, %v8604_v43, %v8592_v19  ;;  %v12592_v12 = vrot.slane %v8635_v30, 4 }
 0x3de   :  { %v12593_v51 = vrot.slane %v8595_v24, 4  ;;  %v2053_v36 = vsel %vm435_vm2, %v8631_v16, %v8595_v24  ;;  %v8972_v30 = vrot.slane %v1758_v22, 4  ;;  %v8981_v24 = vperm.slane %v2064_v60, %v7754_v3 }
 0x3df   :  { %v2070_v41 = vsel %vm435_vm2, %v12592_v12, %v8644_v25  ;;  %v1991_v55 = vrot.slane %v8946_v5, 4  ;;  %v7090_v12 = vpop.permute.xlu1 %7089  ;;  %v8986_v19 = vperm.slane %v1760_v58, %v7790_v53  ;;  %v8998_v21 = vrot.slane %v1770_v17, 4 }
 0x3e0   :  { %v1660_v46 = vsel %vm435_vm2, 0.0, %v12593_v51  ;;  %v8968_v61 = vperm.slane %v2070_v41, %v7754_v3  ;;  %12596 = vst [vmem:[#allocation90_spill] sm:$0xff] %v8981_v24  ;;  %v7091_v43 = vunpack.i.l.bf16 %v7090_v12  ;;  %v8996_v60 = vsel %vm435_vm2, 0.0, %v8972_v30 }
 0x3e1   :  { %v2059_v25 = vsel %vm435_vm2, %v2058_v26, %v1660_v46  ;;  %v1992_v59 = vsel %vm435_vm2, %v1991_v55, %v8943_v14  ;;  %v8989_v26 = vperm.slane %v2053_v36, %v7754_v3 }
 0x3e2   :  { %12594 = vst [vmem:[#allocation88_spill] sm:$0xff] %v8968_v61  ;;  %v8978_v51 = vperm.slane %v2059_v25, %v7754_v3  ;;  %v2087_v16 = vrot.slane %v8968_v61, 4  ;;  %v2324_v22 = vpack.c.bf16 %v1992_v59, %v1992_v59  ;;  %v7092_v25 = vunpack.i.h.bf16 %v7090_v12 }
 0x3e3   :  { %12597 = vst [vmem:[#allocation91_spill] sm:$0xff] %v8989_v26  ;;  %v1567_v12 = vrot.slane %v7091_v43, 4 }
 0x3e4   :  { %12595 = vst [vmem:[#allocation89_spill] sm:$0xff] %v8978_v51  ;;  %v2075_v46 = vrot.slane %v8978_v51, 4  ;;  %v2088_v55 = vsel %vm435_vm2, %v2087_v16, %v8981_v24  ;;  %v3387_v58 = vsel %vm3363_vm3, %v2324_v22, 0  ;;  %v1791_v41 = vrot.slane %v7092_v25, 4 }
 0x3e5   :  { %v9002_v59 = vperm.slane %v2088_v55, %v7790_v53  ;;  %3396 = vmatpush.bf16.xpose.msra.mxu0 %v3387_v58  ;;  %v1794_v16 = vsel %vm435_vm2, %v7092_v25, %v8679_v1  ;;  %v1570_v22 = vsel %vm435_vm2, %v7091_v43, %v8683_v20  ;;  %v9016_v58 = vpop.permute.xlu0 %7099  ;;  %v12601_v1 = vunpack.i.l.bf16 %v8601_v4 }
 0x3e6   :  { %v2076_v36 = vsel %vm435_vm2, %v2075_v46, %v8989_v26  ;;  %v1802_v47 = vperm.slane %v1794_v16, %v7754_v3  ;;  %v12600_v46 = vunpack.i.h.bf16 %v8601_v4  ;;  %v9027_v16 = vsel %vm435_vm2, 0.0, %v8998_v21 }
 0x3e7   :  { %12598 = vst [vmem:[#allocation92_spill] sm:$0xff] %v9002_v59  ;;  %v9009_v10 = vperm.slane %v2076_v36, %v7790_v53  ;;  %v2099_v17 = vrot.slane %v9002_v59, 4  ;;  %v1568_v25 = vsel %vm435_vm2, %v1567_v12, %v12601_v1  ;;  %v1578_v36 = vperm.slane %v1570_v22, %v7754_v3 }
 0x3e8   :  { %v1792_v34 = vsel %vm435_vm2, %v1791_v41, %v12600_v46  ;;  %v1815_v55 = vrot.slane %v1802_v47, 4  ;;  %v1574_v41 = vperm.slane %v1568_v25, %v7754_v3  ;;  %v12602_v12 = vrot.slane %v8843_v15, 4 }
 0x3e9   :  { %12599 = vst [vmem:[#allocation93_spill] sm:$0xff] %v9009_v10  ;;  %v2100_v20 = vsel %vm435_vm2, %v2099_v17, %v9009_v10  ;;  %v1798_v43 = vperm.slane %v1792_v34, %v7754_v3  ;;  %v1591_v4 = vrot.slane %v1578_v36, 4  ;;  %v12389_v46 = vunpack.i.h.bf16 %v9016_v58 }
 0x3ea   :  { %v2326_v45 = vpack.c.bf16 %v2100_v20, %v2100_v20  ;;  %v1594_v22 = vsel %vm435_vm2, %v1578_v36, %v12602_v12  ;;  %v12603_v17 = vrot.slane %v8858_v7, 4  ;;  %v1579_v52 = vrot.slane %v1574_v41, 4 }
 0x3eb   :  { %v1602_v38 = vperm.slane %v1594_v22, %v7790_v53  ;;  %v1803_v11 = vrot.slane %v1798_v43, 4  ;;  %v12604_v25 = vrot.slane %v8826_v50, 4  ;;  %v12388_v36 = vunpack.i.h.bf16 %v9032_v39 }
 0x3ec   :  { %v1806_v34 = vsel %vm435_vm2, %v1798_v43, %v12603_v17  ;;  %v3425_v20 = vsel %vm3363_vm3, %v2326_v45, 0  ;;  %v12387_v12 = vunpack.i.l.bf16 %v9032_v39  ;;  %v1592_v22 = vsel %vm435_vm2, %v1591_v4, %v8843_v15 }
 0x3ed   :  { %v1582_v31 = vsel %vm435_vm2, %v1574_v41, %v12604_v25  ;;  %3434 = vmatpush.bf16.xpose.msra.mxu1 %v3425_v20  ;;  %v12605_v17 = vpack.c.bf16 %v8466_v63, %v8466_v63  ;;  %v1580_v45 = vsel %vm435_vm2, %v1579_v52, %v8826_v50  ;;  %v1814_v43 = vperm.slane %v1806_v34, %v7790_v53 }
 0x3ee   :  { %v1590_v1 = vperm.slane %v1582_v31, %v7790_v53  ;;  %v1816_v41 = vsel %vm435_vm2, %v1815_v55, %v8873_v29  ;;  %v12606_v20 = vrot.slane %v8873_v29, 4  ;;  %v1609_v4 = vrot.slane %v1602_v38, 4  ;;  %v7125_v38 = vpop.permute.xlu0 %7124 }
 0x3ef   :  { %6766 = vmatmul.msk.bf16.vlgmr.msra.gmra.mxu0 %vm3363_vm3, %v12605_v17  ;;  %v9069_v17 = vperm.slane %v1580_v45, %v7790_v53  ;;  %v1598_v50 = vperm.slane %v1592_v22, %v7790_v53  ;;  %v1804_v55 = vsel %vm435_vm2, %v1803_v11, %v8858_v7  ;;  %v9079_v29 = vperm.slane %v1816_v41, %v7790_v53 }
 0x3f0   :  { %v1818_v31 = vsel %vm435_vm2, %v1802_v47, %v12606_v20  ;;  %v9072_v52 = vrot.slane %v1590_v1, 4  ;;  %v2519_v47 = vrot.slane %v12389_v46, 4  ;;  %v9082_v20 = vrot.slane %v1814_v43, 4 }
 0x3f1   :  { %v1826_v34 = vperm.slane %v1818_v31, %v7790_v53  ;;  %v12607_v45 = vunpack.i.l.bf16 %v9016_v58  ;;  %v9089_v1 = vrot.slane %v12388_v36, 4  ;;  %v9093_v7 = vrot.slane %v12387_v12, 4 }
 0x3f2   :  { %v1610_v11 = vsel %vm435_vm2, 0.0, %v1609_v4  ;;  %v9097_v41 = vperm.slane %v1804_v55, %v7790_v53  ;;  %v12608_v43 = vrot.slane %v8752_v27, 4  ;;  %v1603_v63 = vrot.slane %v9069_v17, 4 }
 0x3f3   :  { %v2507_v22 = vrot.slane %v12607_v45, 4  ;;  %v2107_v45 = vsel %vm435_vm2, %v8759_v42, %v8752_v27  ;;  %v9108_v15 = vsel %vm435_vm2, 0.0, %v9072_v52  ;;  %v1607_v25 = vrot.slane %v1598_v50, 4 }
 0x3f4   :  { %v1716_v31 = vsel %vm435_vm2, 0.0, %v12608_v43  ;;  %v12609_v55 = vpack.c.bf16 %v8460_v18, %v8460_v18  ;;  %v12610_v12 = vrot.slane %v8788_v57, 4  ;;  %v9119_v27 = vsel %vm435_vm2, 0.0, %v9082_v20 }
 0x3f5   :  { %v1831_v42 = vrot.slane %v9079_v29, 4  ;;  %v9122_v36 = vrot.slane %v1826_v34, 4  ;;  %v2015_v61 = vrot.slane %v1610_v11, 4  ;;  %v2118_v18 = vsel %vm435_vm2, %v8754_v23, %v8713_v48 }
 0x3f6   :  { %6768 = vmatmul.msk.bf16.vlgmr.msra.gmra.mxu1 %vm3363_vm3, %v12609_v55  ;;  %v2113_v43 = vsel %vm435_vm2, %v12610_v12, %v1716_v31  ;;  %v12612_v57 = vrot.slane %v8780_v0, 4  ;;  %v7127_v31 = vunpack.i.h.bf16 %v7125_v38  ;;  %v7095_v55 = vpop.permute.xlu1 %7094  ;;  %v9135_v24 = vperm.slane %v2107_v45, %v7754_v3 }
 0x3f7   :  { %v9125_v46 = vperm.slane %v2113_v43, %v7754_v3  ;;  %v7126_v11 = vunpack.i.l.bf16 %v7125_v38  ;;  %v1608_v48 = vsel %vm435_vm2, 0.0, %v1607_v25  ;;  %v9145_v0 = vsel %vm435_vm2, %v1609_v4, %v1598_v50 }
 0x3f8   :  { %v2124_v12 = vsel %vm435_vm2, %v12612_v57, %v8795_v33  ;;  %12613 = vst [vmem:[#allocation95_spill] sm:$0xff] %v9135_v24  ;;  %v9149_v33 = vsel %vm435_vm2, 0.0, %v9122_v36  ;;  %v9152_v45 = vperm.slane %v2118_v18, %v7754_v3  ;;  %v2731_v50 = vrot.slane %v7127_v31, 4 }
 0x3f9   :  { %12611 = vst [vmem:[#allocation94_spill] sm:$0xff] %v9125_v46  ;;  %v9138_v34 = vperm.slane %v2124_v12, %v7754_v3  ;;  %v2129_v43 = vrot.slane %v9125_v46, 4  ;;  %v9158_v12 = vsel %vm435_vm2, 0.0, %v1603_v63  ;;  %v9163_v51 = vsel %vm435_vm2, 0.0, %v1831_v42 }
 0x3fa   :  { %12615 = vst [vmem:[#allocation97_spill] sm:$0xff] %v9152_v45  ;;  %v9166_v23 = vsel %vm435_vm2, %v2015_v61, %v1608_v48  ;;  %v2563_v25 = vrot.slane %v7126_v11, 4  ;;  %v7097_v48 = vunpack.i.h.bf16 %v7095_v55  ;;  %v7096_v46 = vunpack.i.l.bf16 %v7095_v55 }
 0x3fb   :  { %12614 = vst [vmem:[#allocation96_spill] sm:$0xff] %v9138_v34  ;;  %v2130_v57 = vsel %vm435_vm2, %v2129_v43, %v9135_v24  ;;  %v2141_v38 = vrot.slane %v9138_v34, 4  ;;  %v2566_v43 = vsel %vm435_vm2, %v7126_v11, %v8924_v6  ;;  %v12617_v6 = vunpack.i.h.bf16 %v8833_v62 }
 0x3fc   :  { %v9174_v34 = vperm.slane %v2130_v57, %v7790_v53  ;;  %v9183_v26 = vperm.slane %v2566_v43, %v7754_v3  ;;  %v2520_v11 = vsel %vm435_vm2, %v2519_v47, %v7097_v48  ;;  %v2521_v63 = vrot.slane %v7097_v48, 4 }
 0x3fd   :  { %v2142_v18 = vsel %vm435_vm2, %v2141_v38, %v9152_v45  ;;  %v2732_v57 = vsel %vm435_vm2, %v2731_v50, %v12617_v6  ;;  %v2508_v42 = vsel %vm435_vm2, %v2507_v22, %v7096_v46  ;;  %v2509_v61 = vrot.slane %v7096_v46, 4 }
 0x3fe   :  { %v9177_v4 = vperm.slane %v2142_v18, %v7790_v53  ;;  %v2734_v18 = vsel %vm435_vm2, %v7127_v31, %v8893_v54  ;;  %v12618_v45 = vunpack.i.l.bf16 %v8833_v62  ;;  %v2526_v24 = vperm.slane %v2520_v11, %v7754_v3  ;;  %v7120_v6 = vpop.permute.xlu1 %7119 }
 0x3ff   :  { %v2514_v50 = vperm.slane %v2508_v42, %v7754_v3  ;;  %v2738_v54 = vperm.slane %v2732_v57, %v7754_v3  ;;  %v12619_v47 = vunpack.i.h.bf16 %v9016_v58  ;;  %v12620_v46 = vunpack.i.l.bf16 %v9016_v58 }
 0x400   :  { %12616 = vst [vmem:[#allocation98_spill] sm:$0xff] %v9177_v4  ;;  %v2153_v38 = vrot.slane %v9177_v4, 4  ;;  %v2564_v43 = vsel %vm435_vm2, %v2563_v25, %v12618_v45  ;;  %v2531_v48 = vrot.slane %v2526_v24, 4  ;;  %v7122_v11 = vunpack.i.h.bf16 %v7120_v6 }
 0x401   :  { %v2522_v22 = vsel %vm435_vm2, %v12619_v47, %v2521_v63  ;;  %v2510_v31 = vsel %vm435_vm2, %v12620_v46, %v2509_v61  ;;  %v2533_v25 = vrot.slane %v2514_v50, 4  ;;  %v7121_v57 = vunpack.i.l.bf16 %v7120_v6  ;;  %v9212_v61 = vpop.permute.xlu0 %7139 }
 0x402   :  { %v2154_v55 = vsel %vm435_vm2, %v2153_v38, %v9174_v34  ;;  %v2530_v62 = vperm.slane %v2522_v22, %v7754_v3  ;;  %v2518_v45 = vperm.slane %v2510_v31, %v7754_v3  ;;  %v2742_v38 = vperm.slane %v2734_v18, %v7754_v3 }
 0x403   :  { %v2327_v4 = vpack.c.bf16 %v2154_v55, %v2154_v55  ;;  %v2532_v63 = vsel %vm435_vm2, %v2531_v48, %v2514_v50  ;;  %v2534_v58 = vsel %vm435_vm2, %v2526_v24, %v2533_v25  ;;  %v2570_v22 = vperm.slane %v2564_v43, %v7754_v3 }
 0x404   :  { %v2543_v55 = vrot.slane %v2530_v62, 4  ;;  %v2545_v47 = vrot.slane %v2518_v45, 4  ;;  %v2601_v46 = vrot.slane %v9183_v26, 4  ;;  %v2745_v31 = vrot.slane %v7122_v11, 4 }
 0x405   :  { %v3444_v42 = vsel %vm3363_vm3, %v2327_v4, 0  ;;  %v2744_v4 = vsel %vm435_vm2, %v9089_v1, %v7122_v11  ;;  %v2757_v18 = vrot.slane %v2738_v54, 4  ;;  %v2542_v6 = vperm.slane %v2534_v58, %v7790_v53 }
 0x406   :  { %3453 = vmatpush.bf16.xpose.msra.mxu2 %v3444_v42  ;;  %v2546_v42 = vsel %vm435_vm2, %v2530_v62, %v2545_v47  ;;  %v2750_v50 = vperm.slane %v2744_v4, %v7754_v3  ;;  %v9222_v24 = vperm.slane %v2532_v63, %v7790_v53  ;;  %v2544_v48 = vsel %vm435_vm2, %v2543_v55, %v2518_v45 }
 0x407   :  { %v2554_v43 = vperm.slane %v2546_v42, %v7790_v53  ;;  %v12401_v25 = vunpack.i.h.bf16 %v9212_v61  ;;  %v12622_v59 = vunpack.i.h.bf16 %v9032_v39  ;;  %v2577_v10 = vrot.slane %v7121_v57, 4 }
 0x408   :  { %12621 = vst [vmem:[#allocation99_spill] sm:$0xff] %v9222_v24  ;;  %v2755_v11 = vrot.slane %v2750_v50, 4  ;;  %v2758_v58 = vsel %vm435_vm2, %v2750_v50, %v2757_v18  ;;  %v2769_v47 = vrot.slane %v2742_v38, 4  ;;  %v12402_v63 = vunpack.i.l.bf16 %v9212_v61 }
 0x409   :  { %v2746_v1 = vsel %vm435_vm2, %v12622_v59, %v2745_v31  ;;  %v2576_v45 = vsel %vm435_vm2, %v9093_v7, %v7121_v57  ;;  %v9236_v55 = vperm.slane %v2544_v48, %v7790_v53  ;;  %v9238_v4 = vrot.slane %v2542_v6, 4 }
 0x40a   :  { %v2754_v42 = vperm.slane %v2746_v1, %v7754_v3  ;;  %v2756_v59 = vsel %vm435_vm2, %v2755_v11, %v2738_v54  ;;  %v2589_v31 = vrot.slane %v2570_v22, 4  ;;  %v2555_v18 = vrot.slane %v9222_v24, 4  ;;  %v12712_v24 = vld [vmem:[#allocation24_spill] sm:$0xff] }
 0x40b   :  { %12623 = vst [vmem:[#allocation100_spill] sm:$0xff] %v9236_v55  ;;  %v12625_v50 = vpack.c.bf16 %v8470_v56, %v8470_v56  ;;  %v2766_v62 = vperm.slane %v2758_v58, %v7790_v53  ;;  %v12626_v7 = vunpack.i.l.bf16 %v9032_v39  ;;  %v9251_v6 = vrot.slane %v2554_v43, 4 }
 0x40c   :  { %12624 = vst [vmem:[#allocation101_spill] sm:$0xff] %v9238_v4  ;;  %v9255_v48 = vrot.slane %v12401_v25, 4  ;;  %v2767_v54 = vrot.slane %v2754_v42, 4  ;;  %v2770_v1 = vsel %vm435_vm2, %v2754_v42, %v2769_v47  ;;  %v9259_v11 = vperm.slane %v2756_v59, %v7790_v53 }
 0x40d   :  { %6769 = vmatmul.msk.bf16.vlgmr.msra.gmra.mxu2 %vm3363_vm3, %v12625_v50  ;;  %v2578_v57 = vsel %vm435_vm2, %v12626_v7, %v2577_v10  ;;  %12627 = vst [vmem:[#allocation102_spill] sm:$0xff] %v9251_v6  ;;  %v2778_v56 = vperm.slane %v2770_v1, %v7790_v53  ;;  %v2582_v58 = vperm.slane %v2576_v45, %v7754_v3  ;;  %v9266_v10 = vsel %vm435_vm2, 0.0, %v9238_v4 }
 0x40e   :  { %12628 = vst [vmem:[#allocation103_spill] sm:$0xff] %v9259_v11  ;;  %v2586_v39 = vperm.slane %v2578_v57, %v7754_v3  ;;  %v2559_v43 = vrot.slane %v9236_v55, 4  ;;  %v9271_v50 = vrot.slane %v12402_v63, 4  ;;  %v12630_v47 = vrot.slane %v8930_v8, 4 }
 0x40f   :  { %12629 = vst [vmem:[#allocation104_spill] sm:$0xff] %v9266_v10  ;;  %v9277_v59 = vsel %vm435_vm2, 0.0, %v2555_v18  ;;  %v2768_v45 = vsel %vm435_vm2, %v2767_v54, %v2742_v38  ;;  %v9280_v7 = vrot.slane %v2766_v62, 4  ;;  %v9282_v57 = vrot.slane %v2778_v56, 4 }
 0x410   :  { %v1772_v42 = vsel %vm435_vm2, 0.0, %v12630_v47  ;;  %12631 = vst [vmem:[#allocation105_spill] sm:$0xff] %v9277_v59  ;;  %v9286_v1 = vsel %vm435_vm2, 0.0, %v9251_v6  ;;  %v2587_v25 = vrot.slane %v2582_v58, 4  ;;  %v2590_v63 = vsel %vm435_vm2, %v2582_v58, %v2589_v31 }
 0x411   :  { %12632 = vst [vmem:[#allocation106_spill] sm:$0xff] %v9280_v7  ;;  %v2599_v55 = vrot.slane %v2586_v39, 4  ;;  %v2779_v47 = vrot.slane %v9259_v11, 4  ;;  %v2602_v18 = vsel %vm435_vm2, %v2586_v39, %v2601_v46  ;;  %v12635_v38 = vrot.slane %v8986_v19, 4 }
 0x412   :  { %12633 = vst [vmem:[#allocation107_spill] sm:$0xff] %v9282_v57  ;;  %v9296_v54 = vsel %vm435_vm2, 0.0, %v2559_v43  ;;  %v9299_v56 = vperm.slane %v2768_v45, %v7790_v53  ;;  %v2588_v6 = vsel %vm435_vm2, %v2587_v25, %v2570_v22  ;;  %v2598_v31 = vperm.slane %v2590_v63, %v7790_v53 }
 0x413   :  { %12634 = vst [vmem:[#allocation108_spill] sm:$0xff] %v9286_v1  ;;  %v1776_v62 = vsel %vm435_vm2, 0.0, %v12635_v38  ;;  %v9306_v4 = vsel %vm435_vm2, 0.0, %v9280_v7  ;;  %v9310_v46 = vsel %vm435_vm2, 0.0, %v9282_v57  ;;  %v2161_v39 = vsel %vm435_vm2, %v8972_v30, %v8930_v8 }
 0x414   :  { %12636 = vst [vmem:[#allocation109_spill] sm:$0xff] %v9296_v54  ;;  %v2600_v43 = vsel %vm435_vm2, %v2599_v55, %v9183_v26  ;;  %v2610_v22 = vperm.slane %v2602_v18, %v7790_v53  ;;  %v12640_v25 = vrot.slane %v8996_v60, 4  ;;  %v12641_v45 = vrot.slane %v9027_v16, 4  ;;  %v7150_v60 = vpop.permute.xlu0 %7149 }
 0x415   :  { %12637 = vst [vmem:[#allocation110_spill] sm:$0xff] %v9299_v56  ;;  %v9325_v58 = vsel %vm435_vm2, 0.0, %v2779_v47  ;;  %v9328_v57 = vperm.slane %v2588_v6, %v7790_v53  ;;  %v2172_v30 = vsel %vm435_vm2, %v8998_v21, %v8986_v19  ;;  %v2783_v26 = vrot.slane %v9299_v56, 4 }
 0x416   :  { %12638 = vst [vmem:[#allocation111_spill] sm:$0xff] %v9306_v4  ;;  %v2167_v63 = vsel %vm435_vm2, %v12640_v25, %v1772_v42  ;;  %v2178_v38 = vsel %vm435_vm2, %v12641_v45, %v1776_v62  ;;  %v9338_v16 = vrot.slane %v2598_v31, 4  ;;  %v9345_v6 = vperm.slane %v2600_v43, %v7790_v53 }
 0x417   :  { %12639 = vst [vmem:[#allocation112_spill] sm:$0xff] %v9310_v46  ;;  %v9331_v8 = vperm.slane %v2167_v63, %v7754_v3  ;;  %v9341_v55 = vperm.slane %v2178_v38, %v7754_v3  ;;  %v9348_v47 = vperm.slane %v2161_v39, %v7754_v3  ;;  %v9351_v21 = vrot.slane %v2610_v22, 4 }
 0x418   :  { %12642 = vst [vmem:[#allocation113_spill] sm:$0xff] %v9325_v58  ;;  %v9354_v19 = vperm.slane %v2172_v30, %v7754_v3  ;;  %v12647_v31 = vrot.slane %v8897_v37, 4  ;;  %v2611_v63 = vrot.slane %v9328_v57, 4  ;;  %v12648_v43 = vrot.slane %v8927_v40, 4 }
 0x419   :  { %12643 = vst [vmem:[#allocation114_spill] sm:$0xff] %v9328_v57  ;;  %v2183_v18 = vrot.slane %v9331_v8, 4  ;;  %v2195_v62 = vrot.slane %v9341_v55, 4  ;;  %v2269_v22 = vsel %vm435_vm2, %v8877_v13, %v8897_v37  ;;  %v12649_v45 = vrot.slane %v8909_v44, 4 }
 0x41a   :  { %12644 = vst [vmem:[#allocation115_spill] sm:$0xff] %v9338_v16  ;;  %v1884_v25 = vsel %vm435_vm2, 0.0, %v12647_v31  ;;  %v1888_v39 = vsel %vm435_vm2, 0.0, %v12648_v43  ;;  %v9372_v30 = vsel %vm435_vm2, 0.0, %v9338_v16  ;;  %v2280_v37 = vsel %vm435_vm2, %v8915_v28, %v8927_v40 }
 0x41b   :  { %12645 = vst [vmem:[#allocation116_spill] sm:$0xff] %v9345_v6  ;;  %v2275_v38 = vsel %vm435_vm2, %v12649_v45, %v1884_v25  ;;  %v2184_v31 = vsel %vm435_vm2, %v2183_v18, %v9348_v47  ;;  %v2196_v42 = vsel %vm435_vm2, %v2195_v62, %v9354_v19  ;;  %v12651_v44 = vrot.slane %v8950_v2, 4 }
 0x41c   :  { %12646 = vst [vmem:[#allocation117_spill] sm:$0xff] %v9351_v21  ;;  %v9379_v43 = vperm.slane %v2275_v38, %v7754_v3  ;;  %v9382_v13 = vperm.slane %v2196_v42, %v7790_v53  ;;  %v1939_v18 = vrot.slane %v8765_v9, 4  ;;  %v2615_v45 = vrot.slane %v9345_v6, 4 }
 0x41d   :  { %12650 = vst [vmem:[#allocation118_spill] sm:$0xff] %v9372_v30  ;;  %v2286_v25 = vsel %vm435_vm2, %v12651_v44, %v1888_v39  ;;  %v9393_v62 = vperm.slane %v2269_v22, %v7754_v3  ;;  %v9400_v56 = vperm.slane %v2184_v31, %v7790_v53  ;;  %v7152_v2 = vunpack.i.h.bf16 %v7150_v60 }
 0x41e   :  { %v9396_v38 = vperm.slane %v2286_v25, %v7754_v3  ;;  %v2291_v42 = vrot.slane %v9379_v43, 4  ;;  %v2207_v28 = vrot.slane %v9382_v13, 4  ;;  %v1940_v40 = vsel %vm435_vm2, %v8757_v35, %v1939_v18 }
 0x41f   :  { %v9407_v9 = vsel %vm435_vm2, 0.0, %v9351_v21  ;;  %v9410_v39 = vperm.slane %v2280_v37, %v7754_v3  ;;  %v2331_v25 = vpack.c.bf16 %v1940_v40, %v1940_v40  ;;  %v2687_v46 = vrot.slane %v7152_v2, 4 }
 0x420   :  { %12652 = vst [vmem:[#allocation119_spill] sm:$0xff] %v9407_v9  ;;  %v2292_v22 = vsel %vm435_vm2, %v2291_v42, %v9393_v62  ;;  %v2303_v44 = vrot.slane %v9396_v38, 4  ;;  %v2208_v31 = vsel %vm435_vm2, %v2207_v28, %v9400_v56  ;;  %v7151_v4 = vunpack.i.l.bf16 %v7150_v60  ;;  %v12676_v9 = vld [vmem:[#allocation33_spill] sm:$0xff] }
 0x421   :  { %v9418_v35 = vsel %vm435_vm2, 0.0, %v2783_v26  ;;  %v2328_v58 = vpack.c.bf16 %v2208_v31, %v2208_v31  ;;  %v9424_v7 = vsel %vm435_vm2, 0.0, %v2611_v63  ;;  %v9427_v42 = vsel %vm435_vm2, 0.0, %v2615_v45  ;;  %v9466_v26 = vpop.permute.xlu1 %7134 }
 0x422   :  { %12653 = vst [vmem:[#allocation120_spill] sm:$0xff] %v9418_v35  ;;  %v2304_v37 = vsel %vm435_vm2, %v2303_v44, %v9410_v39  ;;  %v9430_v28 = vperm.slane %v2292_v22, %v7790_v53  ;;  %v2631_v31 = vrot.slane %v7151_v4, 4  ;;  %v2634_v44 = vsel %vm435_vm2, %v7151_v4, %v9271_v50  ;;  %v12665_v50 = vld [vmem:[#allocation72_spill] sm:$0xff]  ;;  %v12666_v4 = vld [vmem:[#allocation25_spill] sm:$0xff] }
 0x423   :  { %12654 = vst [vmem:[#allocation121_spill] sm:$0xff] %v9424_v7  ;;  %v9433_v60 = vperm.slane %v2304_v37, %v7790_v53  ;;  %v3463_v40 = vsel %vm3363_vm3, %v2328_v58, 0  ;;  %v3520_v45 = vsel %vm3363_vm3, %v2331_v25, 0  ;;  %v12656_v18 = vunpack.i.h.bf16 %v9212_v61  ;;  %v12691_v7 = vld [vmem:[#allocation51_spill] sm:$0xff] }
 0x424   :  { %12655 = vst [vmem:[#allocation122_spill] sm:$0xff] %v9427_v42  ;;  %3472 = vmatpush.bf16.xpose.msra.mxu3 %v3463_v40  ;;  %v2690_v37 = vsel %vm435_vm2, %v7152_v2, %v9255_v48  ;;  %v12657_v2 = vunpack.i.l.bf16 %v9212_v61  ;;  %v9477_v61 = vperm.slane %v9166_v23, %v7754_v3  ;;  %v12667_v35 = vrot.slane %v12666_v4, 4 }
 0x425   :  { %v2315_v63 = vrot.slane %v9433_v60, 4  ;;  %v2688_v22 = vsel %vm435_vm2, %v2687_v46, %v12656_v18  ;;  %v9455_v46 = vperm.slane %v2634_v44, %v7754_v3  ;;  %v12658_v44 = vrot.slane %v9108_v15, 4 }
 0x426   :  { %v2632_v18 = vsel %vm435_vm2, %v2631_v31, %v12657_v2  ;;  %v9461_v58 = vperm.slane %v2688_v22, %v7754_v3  ;;  %v12659_v31 = vrot.slane %v9097_v41, 4  ;;  %v12660_v15 = vrot.slane %v9119_v27, 4 }
 0x427   :  { %v2316_v25 = vsel %vm435_vm2, %v2315_v63, %v9430_v28  ;;  %v1999_v63 = vsel %vm435_vm2, %v9072_v52, %v9069_v17  ;;  %v2215_v17 = vsel %vm435_vm2, %v9082_v20, %v9097_v41  ;;  %v2226_v41 = vsel %vm435_vm2, %v9122_v36, %v9079_v29 }
 0x428   :  { %v2330_v48 = vpack.c.bf16 %v2316_v25, %v2316_v25  ;;  %v2005_v25 = vsel %vm435_vm2, %v12658_v44, %v9158_v12  ;;  %v1828_v22 = vsel %vm435_vm2, 0.0, %v12659_v31  ;;  %v9495_v12 = vperm.slane %v9145_v0, %v7754_v3 }
 0x429   :  { %v9484_v2 = vperm.slane %v2005_v25, %v7754_v3  ;;  %v2221_v52 = vsel %vm435_vm2, %v12660_v15, %v1828_v22  ;;  %v9502_v25 = vperm.slane %v1999_v63, %v7754_v3  ;;  %v12661_v27 = vrot.slane %v9149_v33, 4 }
 0x42a   :  { %v9499_v44 = vperm.slane %v2221_v52, %v7754_v3  ;;  %v9515_v22 = vperm.slane %v2215_v17, %v7754_v3  ;;  %v9522_v15 = vperm.slane %v2632_v18, %v7754_v3  ;;  %v9530_v17 = vperm.slane %v2226_v41, %v7754_v3  ;;  %v12663_v41 = vld [vmem:[#allocation42_spill] sm:$0xff] }
 0x42b   :  { %v2021_v20 = vrot.slane %v9484_v2, 4  ;;  %v2232_v0 = vsel %vm435_vm2, %v12661_v27, %v9163_v51  ;;  %v1158_v51 = vrot.slane %v8625_v32, 4  ;;  %v1170_v18 = vsel %vm435_vm2, %v12667_v35, %v12665_v50 }
 0x42c   :  { %3529 = vmatpush.bf16.xpose.msrb.mxu3 %v3520_v45  ;;  %v9464_v45 = vperm.slane %v2690_v37, %v7754_v3  ;;  %v3501_v37 = vsel %vm3363_vm3, %v2330_v48, 0  ;;  %v2033_v48 = vrot.slane %v9477_v61, 4  ;;  %v9518_v63 = vperm.slane %v2232_v0, %v7754_v3 }
 0x42d   :  { %3510 = vmatpush.bf16.xpose.msrb.mxu2 %v3501_v37  ;;  %v2237_v37 = vrot.slane %v9499_v44, 4  ;;  %v2022_v36 = vsel %vm435_vm2, %v2021_v20, %v9502_v25  ;;  %v1159_v20 = vsel %vm435_vm2, %v1158_v51, %v8620_v49  ;;  %v9559_v51 = vperm.slane %v1170_v18, %v7754_v3  ;;  %v12674_v18 = vld [vmem:[#allocation35_spill] sm:$0xff] }
 0x42e   :  { %v2034_v31 = vsel %vm435_vm2, %v2033_v48, %v9495_v12  ;;  %v2028_v33 = vperm.slane %v2022_v36, %v7790_v53  ;;  %v2249_v48 = vrot.slane %v9518_v63, 4  ;;  %v12664_v36 = vld [vmem:[#allocation40_spill] sm:$0xff]  ;;  %v12675_v40 = vrot.slane %v12674_v18, 4 }
 0x42f   :  { %v2040_v29 = vperm.slane %v2034_v31, %v7790_v53  ;;  %v2238_v52 = vsel %vm435_vm2, %v2237_v37, %v9515_v22  ;;  %v9542_v31 = vperm.slane %v1159_v20, %v7754_v3  ;;  %v1164_v37 = vsel %vm435_vm2, %v12664_v36, %v12663_v41  ;;  %12668 = vst [vmem:[#allocation42_spill] sm:$0xff] %v9559_v51  ;;  %v12669_v20 = vld [vmem:[#allocation73_spill] sm:$0xff]  ;;  %v12671_v36 = vld [vmem:[#allocation43_spill] sm:$0xff] }
 0x430   :  { %v2250_v32 = vsel %vm435_vm2, %v2249_v48, %v9530_v17  ;;  %v9553_v23 = vperm.slane %v2238_v52, %v7790_v53  ;;  %v9563_v41 = vperm.slane %v12669_v20, %v7754_v3  ;;  %v12672_v35 = vrot.slane %v12671_v36, 4 }
 0x431   :  { %v2045_v0 = vrot.slane %v2040_v29, 4  ;;  %12662 = vst [vmem:[#allocation123_spill] sm:$0xff] %v9542_v31  ;;  %v9556_v49 = vperm.slane %v2250_v32, %v7790_v53  ;;  %v1175_v4 = vrot.slane %v9542_v31, 4  ;;  %v1187_v32 = vrot.slane %v9559_v51, 4 }
 0x432   :  { %12670 = vst [vmem:[#allocation40_spill] sm:$0xff] %v9563_v41  ;;  %v876_v50 = vsel %vm435_vm2, 0.0, %v12672_v35  ;;  %v1261_v35 = vsel %vm435_vm2, %v12676_v9, %v12671_v36  ;;  %v12679_v36 = vld [vmem:[#allocation26_spill] sm:$0xff] }
 0x433   :  { %v2046_v27 = vsel %vm435_vm2, %v2045_v0, %v2028_v33  ;;  %v2261_v52 = vrot.slane %v9556_v49, 4  ;;  %v9571_v0 = vperm.slane %v1164_v37, %v7754_v3  ;;  %v1176_v11 = vsel %vm435_vm2, %v1175_v4, %v9563_v41 }
 0x434   :  { %v2325_v48 = vpack.c.bf16 %v2046_v27, %v2046_v27  ;;  %v1267_v27 = vsel %vm435_vm2, %v12675_v40, %v876_v50  ;;  %v12678_v50 = vld [vmem:[#allocation45_spill] sm:$0xff]  ;;  %v9595_v6 = vperm.slane %v1176_v11, %v7790_v53 }
 0x435   :  { %12673 = vst [vmem:[#allocation72_spill] sm:$0xff] %v9571_v0  ;;  %v9584_v42 = vperm.slane %v1267_v27, %v7754_v3  ;;  %v2262_v18 = vsel %vm435_vm2, %v2261_v52, %v9553_v23  ;;  %v1188_v40 = vsel %vm435_vm2, %v1187_v32, %v9571_v0  ;;  %v12680_v27 = vld [vmem:[#allocation29_spill] sm:$0xff]  ;;  %v9606_v32 = vperm.slane %v1261_v35, %v7754_v3 }
 0x436   :  { %v3406_v20 = vsel %vm3363_vm3, %v2325_v48, 0  ;;  %v12677_v48 = vld [vmem:[#allocation44_spill] sm:$0xff]  ;;  %v2329_v21 = vpack.c.bf16 %v2262_v18, %v2262_v18  ;;  %v9598_v9 = vperm.slane %v1188_v40, %v7790_v53 }
 0x437   :  { %3415 = vmatpush.bf16.xpose.msrb.mxu0 %v3406_v20  ;;  %v1272_v4 = vsel %vm435_vm2, %v12678_v50, %v12677_v48  ;;  %v12681_v20 = vrot.slane %v12680_v27, 4  ;;  %v1283_v18 = vrot.slane %v9584_v42, 4  ;;  %v1993_v50 = vrot.slane %v8943_v14, 4 }
 0x438   :  { %v3482_v11 = vsel %vm3363_vm3, %v2329_v21, 0  ;;  %v1199_v40 = vrot.slane %v9598_v9, 4  ;;  %v9615_v48 = vperm.slane %v1272_v4, %v7754_v3  ;;  %v12683_v21 = vunpack.i.h.bf16 %v9466_v26 }
 0x439   :  { %v1278_v37 = vsel %vm435_vm2, %v12681_v20, %v12679_v36  ;;  %3491 = vmatpush.bf16.xpose.msrb.mxu1 %v3482_v11  ;;  %v1284_v36 = vsel %vm435_vm2, %v1283_v18, %v9606_v32  ;;  %v2047_v20 = vrot.slane %v2028_v33, 4  ;;  %v1994_v14 = vsel %vm435_vm2, %v8946_v5, %v1993_v50 }
 0x43a   :  { %v9609_v16 = vperm.slane %v1278_v37, %v7754_v3  ;;  %v12682_v37 = vrot.slane %v9430_v28, 4  ;;  %v2677_v52 = vrot.slane %v12683_v21, 4  ;;  %v1200_v4 = vsel %vm435_vm2, %v1199_v40, %v9595_v6  ;;  %v7145_v21 = vpop.permute.xlu1 %7144 }
 0x43b   :  { %v1320_v57 = vpack.c.bf16 %v1200_v4, %v1200_v4  ;;  %v2332_v30 = vpack.c.bf16 %v1994_v14, %v1994_v14  ;;  %v2048_v28 = vsel %vm435_vm2, %v2040_v29, %v2047_v20  ;;  %v2643_v5 = vrot.slane %v9522_v15, 4  ;;  %v12686_v29 = vld [vmem:[#allocation92_spill] sm:$0xff] }
 0x43c   :  { %v1295_v35 = vrot.slane %v9609_v16, 4  ;;  %v2318_v27 = vsel %vm435_vm2, %v9433_v60, %v12682_v37  ;;  %v9635_v60 = vperm.slane %v1284_v36, %v7790_v53  ;;  %v2333_v40 = vpack.c.bf16 %v2048_v28, %v2048_v28 }
 0x43d   :  { %v2338_v11 = vpack.c.bf16 %v2318_v27, %v2318_v27  ;;  %6770 = vmatmul.msk.bf16.vlgmr.msra.gmra.mxu3 %vm3363_vm3, %v1320_v57  ;;  %v3539_v50 = vsel %vm3363_vm3, %v2332_v30, 0  ;;  %v12687_v20 = vrot.slane %v9400_v56, 4  ;;  %v12688_v30 = vunpack.i.l.bf16 %v9466_v26 }
 0x43e   :  { %v1296_v18 = vsel %vm435_vm2, %v1295_v35, %v9615_v48  ;;  %v12684_v35 = vld [vmem:[#allocation93_spill] sm:$0xff] }
 0x43f   :  { %v9638_v33 = vperm.slane %v1296_v18, %v7790_v53  ;;  %v3653_v37 = vsel %vm3363_vm3, %v2338_v11, 0  ;;  %v12685_v27 = vrot.slane %v12684_v35, 4  ;;  %v2210_v4 = vsel %vm435_vm2, %v9382_v13, %v12687_v20  ;;  %v12690_v20 = vld [vmem:[#allocation36_spill] sm:$0xff] }
 0x440   :  { %3662 = vmatpush.bf16.xpose.msra.mxu0 %v3653_v37  ;;  %v3558_v11 = vsel %vm3363_vm3, %v2333_v40, 0  ;;  %v2336_v57 = vpack.c.bf16 %v2210_v4, %v2210_v4  ;;  %v2621_v28 = vrot.slane %v12688_v30, 4  ;;  %v7147_v35 = vunpack.i.h.bf16 %v7145_v21 }
 0x441   :  { %v2102_v36 = vsel %vm435_vm2, %v12686_v29, %v12685_v27  ;;  %v1307_v14 = vrot.slane %v9638_v33, 4  ;;  %3548 = vmatpush.bf16.xpose.msra.mxu1 %v3539_v50  ;;  %3567 = vmatpush.bf16.xpose.msra.mxu2 %v3558_v11  ;;  %v7146_v27 = vunpack.i.l.bf16 %v7145_v21  ;;  %v12689_v50 = vld [vmem:[#allocation23_spill] sm:$0xff] }
 0x442   :  { %v2334_v18 = vpack.c.bf16 %v2102_v36, %v2102_v36  ;;  %v991_v40 = vsel %vm435_vm2, %v12690_v20, %v12689_v50  ;;  %v2675_v30 = vrot.slane %v7147_v35, 4  ;;  %v3615_v11 = vsel %vm3363_vm3, %v2336_v57, 0 }
 0x443   :  { %v1308_v13 = vsel %vm435_vm2, %v1307_v14, %v9635_v60  ;;  %v2619_v37 = vrot.slane %v7146_v27, 4  ;;  %v2622_v21 = vsel %vm435_vm2, %v7146_v27, %v2621_v28  ;;  %v2678_v56 = vsel %vm435_vm2, %v7147_v35, %v2677_v52  ;;  %v12692_v14 = vld [vmem:[#allocation27_spill] sm:$0xff]  ;;  %v12710_v27 = vld [vmem:[#allocation46_spill] sm:$0xff] }
 0x444   :  { %v3577_v29 = vsel %vm3363_vm3, %v2334_v18, 0  ;;  %v1322_v4 = vpack.c.bf16 %v1308_v13, %v1308_v13  ;;  %v12693_v1 = vrot.slane %v12692_v14, 4  ;;  %v12694_v50 = vunpack.i.l.bf16 %v9466_v26 }
 0x445   :  { %3586 = vmatpush.bf16.xpose.msra.mxu3 %v3577_v29  ;;  %v2630_v29 = vperm.slane %v2622_v21, %v7754_v3  ;;  %v12695_v20 = vunpack.i.h.bf16 %v9466_v26  ;;  %v2686_v28 = vperm.slane %v2678_v56, %v7754_v3 }
 0x446   :  { %v997_v18 = vsel %vm435_vm2, %v12693_v1, %v12691_v7  ;;  %6772 = vmatmul.msk.bf16.vlgmr.msrb.gmra.mxu2 %vm3363_vm3, %v1322_v4  ;;  %v2620_v13 = vsel %vm435_vm2, %v2619_v37, %v12694_v50  ;;  %v12696_v37 = vrot.slane %v9455_v46, 4 }
 0x447   :  { %v2676_v57 = vsel %vm435_vm2, %v2675_v30, %v12695_v20  ;;  %v2626_v7 = vperm.slane %v2620_v13, %v7754_v3  ;;  %v2657_v26 = vrot.slane %v2630_v29, 4  ;;  %v2713_v21 = vrot.slane %v2686_v28, 4  ;;  %v9689_v30 = vpop.permute.xlu0 %7154 }
 0x448   :  { %v2682_v1 = vperm.slane %v2676_v57, %v7754_v3  ;;  %v2656_v4 = vsel %vm435_vm2, %v12696_v37, %v2630_v29  ;;  %v12699_v29 = vrot.slane %v9464_v45, 4 }
 0x449   :  { %3624 = vmatpush.bf16.xpose.msrb.mxu2 %v3615_v11  ;;  %v2644_v56 = vsel %vm435_vm2, %v2643_v5, %v2626_v7  ;;  %v2645_v14 = vrot.slane %v2626_v7, 4  ;;  %v2662_v50 = vperm.slane %v2656_v4, %v7790_v53  ;;  %v12697_v11 = vrot.slane %v9461_v58, 4 }
 0x44a   :  { %v9697_v20 = vperm.slane %v2644_v56, %v7790_v53  ;;  %v2658_v57 = vsel %vm435_vm2, %v9455_v46, %v2657_v26  ;;  %v2701_v37 = vrot.slane %v2682_v1, 4  ;;  %v2712_v35 = vsel %vm435_vm2, %v12699_v29, %v2686_v28 }
 0x44b   :  { %v2700_v13 = vsel %vm435_vm2, %v12697_v11, %v2682_v1  ;;  %v2646_v5 = vsel %vm435_vm2, %v9522_v15, %v2645_v14  ;;  %v2666_v7 = vperm.slane %v2658_v57, %v7790_v53  ;;  %v2714_v56 = vsel %vm435_vm2, %v9464_v45, %v2713_v21 }
 0x44c   :  { %12698 = vst [vmem:[#allocation25_spill] sm:$0xff] %v9697_v20  ;;  %v9708_v4 = vperm.slane %v2700_v13, %v7790_v53  ;;  %v12420_v11 = vunpack.i.h.bf16 %v9689_v30  ;;  %v12419_v46 = vunpack.i.l.bf16 %v9689_v30  ;;  %v2654_v1 = vperm.slane %v2646_v5, %v7790_v53 }
 0x44d   :  { %v2702_v28 = vsel %vm435_vm2, %v9461_v58, %v2701_v37  ;;  %v2667_v26 = vrot.slane %v9697_v20, 4  ;;  %v2671_v15 = vrot.slane %v2662_v50, 4  ;;  %v2673_v14 = vrot.slane %v2666_v7, 4  ;;  %v12703_v37 = vld [vmem:[#allocation39_spill] sm:$0xff] }
 0x44e   :  { %12700 = vst [vmem:[#allocation73_spill] sm:$0xff] %v9708_v4  ;;  %v9719_v57 = vperm.slane %v2712_v35, %v7790_v53  ;;  %v2710_v45 = vperm.slane %v2702_v28, %v7790_v53  ;;  %v2722_v21 = vperm.slane %v2714_v56, %v7790_v53  ;;  %v9725_v29 = vperm.slane %v997_v18, %v7754_v3 }
 0x44f   :  { %v9728_v36 = vrot.slane %v2654_v1, 4  ;;  %v2723_v58 = vrot.slane %v9708_v4, 4  ;;  %v1025_v7 = vrot.slane %v12703_v37, 4  ;;  %v2801_v13 = vrot.slane %v12420_v11, 4  ;;  %v12709_v11 = vld [vmem:[#allocation38_spill] sm:$0xff]  ;;  %v12730_v37 = vld [vmem:[#allocation63_spill] sm:$0xff] }
 0x450   :  { %12701 = vst [vmem:[#allocation43_spill] sm:$0xff] %v9725_v29  ;;  %v2789_v28 = vrot.slane %v12419_v46, 4  ;;  %v9738_v56 = vperm.slane %v991_v40, %v7754_v3  ;;  %v9741_v18 = vsel %vm435_vm2, 0.0, %v2667_v26  ;;  %v9744_v1 = vsel %vm435_vm2, 0.0, %v2671_v15 }
 0x451   :  { %12702 = vst [vmem:[#allocation35_spill] sm:$0xff] %v9728_v36  ;;  %v9747_v5 = vsel %vm435_vm2, 0.0, %v2673_v14  ;;  %v9750_v35 = vrot.slane %v2710_v45, 4  ;;  %v9752_v52 = vrot.slane %v2722_v21, 4  ;;  %v9755_v46 = vsel %vm435_vm2, %v2673_v14, %v2662_v50 }
 0x452   :  { %12704 = vst [vmem:[#allocation33_spill] sm:$0xff] %v9738_v56  ;;  %v1013_v40 = vrot.slane %v9725_v29, 4  ;;  %v9760_v26 = vsel %vm435_vm2, 0.0, %v9728_v36  ;;  %v9763_v15 = vsel %vm435_vm2, 0.0, %v2723_v58  ;;  %v1026_v4 = vsel %vm435_vm2, %v1025_v7, %v12709_v11  ;;  %v12713_v7 = vld [vmem:[#allocation52_spill] sm:$0xff] }
 0x453   :  { %12705 = vst [vmem:[#allocation44_spill] sm:$0xff] %v9741_v18  ;;  %v12711_v45 = vrot.slane %v12710_v27, 4  ;;  %v9774_v14 = vperm.slane %v1026_v4, %v7790_v53  ;;  %v1207_v58 = vsel %vm435_vm2, %v12712_v24, %v12710_v27  ;;  %v12714_v10 = vrot.slane %v12713_v7, 4  ;;  %v12717_v18 = vld [vmem:[#allocation59_spill] sm:$0xff]  ;;  %v12724_v7 = vld [vmem:[#allocation89_spill] sm:$0xff] }
 0x454   :  { %12706 = vst [vmem:[#allocation45_spill] sm:$0xff] %v9750_v35  ;;  %v1014_v50 = vsel %vm435_vm2, %v1013_v40, %v9738_v56  ;;  %v12718_v40 = vld [vmem:[#allocation55_spill] sm:$0xff]  ;;  %v9794_v20 = vsel %vm435_vm2, 0.0, %v9750_v35  ;;  %v931_v29 = vrot.slane %v12730_v37, 4 }
 0x455   :  { %12707 = vst [vmem:[#allocation26_spill] sm:$0xff] %v9755_v46  ;;  %v820_v21 = vsel %vm435_vm2, 0.0, %v12711_v45  ;;  %v12715_v45 = vld [vmem:[#allocation47_spill] sm:$0xff]  ;;  %v12716_v46 = vld [vmem:[#allocation48_spill] sm:$0xff]  ;;  %v12719_v36 = vrot.slane %v12718_v40, 4  ;;  %v1037_v24 = vrot.slane %v9774_v14, 4 }
 0x456   :  { %12708 = vst [vmem:[#allocation29_spill] sm:$0xff] %v9763_v15  ;;  %v9780_v15 = vperm.slane %v1014_v50, %v7790_v53  ;;  %v1213_v59 = vsel %vm435_vm2, %v12714_v10, %v820_v21  ;;  %v1218_v54 = vsel %vm435_vm2, %v12716_v46, %v12715_v45  ;;  %v7160_v21 = vpop.permute.xlu1 %7159  ;;  %v9805_v46 = vsel %vm435_vm2, 0.0, %v9752_v52  ;;  %v12725_v40 = vld [vmem:[#allocation90_spill] sm:$0xff] }
 0x457   :  { %v1224_v4 = vsel %vm435_vm2, %v12719_v36, %v12717_v18  ;;  %v9798_v27 = vperm.slane %v1213_v59, %v7754_v3  ;;  %v9808_v50 = vperm.slane %v1207_v58, %v7754_v3  ;;  %v12722_v36 = vld [vmem:[#allocation91_spill] sm:$0xff]  ;;  %v12726_v35 = vrot.slane %v12725_v40, 4  ;;  %v12727_v59 = vld [vmem:[#allocation88_spill] sm:$0xff]  ;;  %v12729_v40 = vld [vmem:[#allocation98_spill] sm:$0xff] }
 0x458   :  { %v9801_v10 = vperm.slane %v1224_v4, %v7754_v3  ;;  %v12723_v18 = vrot.slane %v12722_v36, 4  ;;  %v1038_v4 = vsel %vm435_vm2, %v1037_v24, %v9780_v15  ;;  %v9821_v0 = vperm.slane %v1218_v54, %v7754_v3 }
 0x459   :  { %12720 = vst [vmem:[#allocation93_spill] sm:$0xff] %v9798_v27  ;;  %v2090_v51 = vsel %vm435_vm2, %v12727_v59, %v12726_v35  ;;  %v1229_v31 = vrot.slane %v9798_v27, 4  ;;  %v1317_v41 = vpack.c.bf16 %v1038_v4, %v1038_v4  ;;  %v12728_v54 = vrot.slane %v9174_v34, 4 }
 0x45a   :  { %12721 = vst [vmem:[#allocation92_spill] sm:$0xff] %v9801_v10  ;;  %v2078_v45 = vsel %vm435_vm2, %v12724_v7, %v12723_v18  ;;  %v1241_v58 = vrot.slane %v9801_v10, 4  ;;  %v9829_v18 = vperm.slane %v2090_v51, %v7790_v53  ;;  %v7162_v7 = vunpack.i.h.bf16 %v7160_v21 }
 0x45b   :  { %v9826_v36 = vperm.slane %v2078_v45, %v7790_v53  ;;  %v1230_v35 = vsel %vm435_vm2, %v1229_v31, %v9808_v50  ;;  %v2156_v59 = vsel %vm435_vm2, %v12729_v40, %v12728_v54  ;;  %v7161_v10 = vunpack.i.l.bf16 %v7160_v21  ;;  %6767 = vmatmul.msk.bf16.vlgmr.msrb.gmra.mxu0 %vm3363_vm3, %v1317_v41 }
 0x45c   :  { %v1242_v24 = vsel %vm435_vm2, %v1241_v58, %v9821_v0  ;;  %v9841_v45 = vperm.slane %v1230_v35, %v7790_v53  ;;  %v2103_v4 = vrot.slane %v9829_v18, 4  ;;  %v2799_v31 = vrot.slane %v7162_v7, 4 }
 0x45d   :  { %v9844_v51 = vperm.slane %v1242_v24, %v7790_v53  ;;  %v2802_v27 = vsel %vm435_vm2, %v7162_v7, %v2801_v13  ;;  %v2787_v58 = vrot.slane %v7161_v10, 4  ;;  %v2790_v34 = vsel %vm435_vm2, %v7161_v10, %v2789_v28 }
 0x45e   :  { %v2335_v54 = vpack.c.bf16 %v2156_v59, %v2156_v59  ;;  %v2104_v41 = vsel %vm435_vm2, %v2103_v4, %v9826_v36  ;;  %v12731_v35 = vunpack.i.h.bf16 %v9689_v30  ;;  %v2810_v13 = vperm.slane %v2802_v27, %v7754_v3  ;;  %v12733_v4 = vld [vmem:[#allocation60_spill] sm:$0xff] }
 0x45f   :  { %v1253_v21 = vrot.slane %v9844_v51, 4  ;;  %v2342_v40 = vpack.c.bf16 %v2104_v41, %v2104_v41  ;;  %v12732_v7 = vunpack.i.l.bf16 %v9689_v30  ;;  %v2798_v59 = vperm.slane %v2790_v34, %v7754_v3 }
 0x460   :  { %v2800_v24 = vsel %vm435_vm2, %v2799_v31, %v12731_v35  ;;  %v932_v56 = vsel %vm435_vm2, %v12733_v4, %v931_v29  ;;  %v3131_v31 = vrot.slane %v9805_v46, 4  ;;  %v3596_v30 = vsel %vm3363_vm3, %v2335_v54, 0 }
 0x461   :  { %v2806_v11 = vperm.slane %v2800_v24, %v7754_v3  ;;  %v2788_v28 = vsel %vm435_vm2, %v2787_v58, %v12732_v7  ;;  %v1254_v37 = vsel %vm435_vm2, %v1253_v21, %v9841_v45  ;;  %v3729_v35 = vsel %vm3363_vm3, %v2342_v40, 0 }
 0x462   :  { %v2794_v10 = vperm.slane %v2788_v28, %v7754_v3  ;;  %v1321_v41 = vpack.c.bf16 %v1254_v37, %v1254_v37  ;;  %3738 = vmatpush.bf16.xpose.msrb.mxu0 %v3729_v35  ;;  %v2823_v58 = vrot.slane %v2810_v13, 4  ;;  %v1039_v21 = vrot.slane %v9780_v15, 4 }
 0x463   :  { %v2811_v27 = vrot.slane %v2806_v11, 4  ;;  %v2825_v7 = vrot.slane %v2798_v59, 4  ;;  %v1323_v28 = vpack.c.bf16 %v932_v56, %v932_v56  ;;  %v12734_v29 = vrot.slane %v9553_v23, 4 }
 0x464   :  { %v2813_v24 = vrot.slane %v2794_v10, 4  ;;  %6771 = vmatmul.msk.bf16.vlgmr.msrb.gmra.mxu1 %vm3363_vm3, %v1321_v41  ;;  %v12735_v40 = vrot.slane %v9719_v57, 4  ;;  %v3066_v37 = vrot.slane %v9760_v26, 4  ;;  %v9884_v15 = vsel %vm435_vm2, %v9752_v52, %v9719_v57  ;;  %v12811_v26 = vld [vmem:[#allocation93_spill] sm:$0xff] }
 0x465   :  { %v2812_v34 = vsel %vm435_vm2, %v2811_v27, %v2794_v10  ;;  %v2264_v46 = vsel %vm435_vm2, %v9556_v49, %v12734_v29  ;;  %3605 = vmatpush.bf16.xpose.msrb.mxu1 %v3596_v30  ;;  %v12736_v10 = vld [vmem:[#allocation82_spill] sm:$0xff]  ;;  %v12737_v23 = vrot.slane %v9747_v5, 4  ;;  %6773 = vmatmul.msk.bf16.vlgmr.msrb.gmra.mxu3 %vm3363_vm3, %v1323_v28  ;;  %v1040_v41 = vsel %vm435_vm2, %v9774_v14, %v1039_v21  ;;  %v12749_v49 = vld [vmem:[#allocation75_spill] sm:$0xff] }
 0x466   :  { %v2728_v54 = vsel %vm435_vm2, 0.0, %v12735_v40  ;;  %v1969_v4 = vrot.slane %v12736_v10, 4  ;;  %v2337_v35 = vpack.c.bf16 %v2264_v46, %v2264_v46  ;;  %v9898_v52 = vsel %vm435_vm2, %v2806_v11, %v2813_v24  ;;  %v12738_v11 = vld [vmem:[#allocation85_spill] sm:$0xff] }
 0x467   :  { %v9891_v56 = vsel %vm435_vm2, %v12737_v23, %v9744_v1  ;;  %v9901_v57 = vperm.slane %v2812_v34, %v7790_v53  ;;  %v2824_v27 = vsel %vm435_vm2, %v2823_v58, %v2798_v59  ;;  %v1325_v5 = vpack.c.bf16 %v1040_v41, %v1040_v41  ;;  %v12739_v59 = vld [vmem:[#allocation87_spill] sm:$0xff]  ;;  %v12740_v34 = vld [vmem:[#allocation70_spill] sm:$0xff] }
 0x468   :  { %v9905_v1 = vsel %vm435_vm2, %v3131_v31, %v2728_v54  ;;  %v1231_v30 = vrot.slane %v9808_v50, 4  ;;  %v9909_v28 = vsel %vm435_vm2, %v2810_v13, %v2825_v7  ;;  %v3634_v14 = vsel %vm3363_vm3, %v2337_v35, 0  ;;  %v12743_v41 = vld [vmem:[#allocation67_spill] sm:$0xff] }
 0x469   :  { %v1243_v21 = vrot.slane %v9821_v0, 4  ;;  %6775 = vmatmul.msk.bf16.vlgmr.msra.gmra.mxu2 %vm3363_vm3, %v1325_v5  ;;  %3643 = vmatpush.bf16.xpose.msrb.mxu3 %v3634_v14  ;;  %v1970_v24 = vsel %vm435_vm2, %v12738_v11, %v1969_v4  ;;  %v1981_v58 = vrot.slane %v12739_v59, 4  ;;  %v985_v31 = vrot.slane %v12740_v34, 4  ;;  %v12742_v4 = vld [vmem:[#allocation86_spill] sm:$0xff]  ;;  %v12744_v14 = vld [vmem:[#allocation76_spill] sm:$0xff] }
 0x46a   :  { %v1255_v29 = vrot.slane %v9841_v45, 4  ;;  %v2822_v13 = vperm.slane %v9898_v52, %v7790_v53  ;;  %v9922_v7 = vperm.slane %v2824_v27, %v7790_v53  ;;  %v12741_v46 = vrot.slane %v9635_v60, 4  ;;  %v12746_v11 = vld [vmem:[#allocation74_spill] sm:$0xff] }
 0x46b   :  { %v2834_v54 = vperm.slane %v9909_v28, %v7790_v53  ;;  %v2835_v10 = vrot.slane %v9901_v57, 4  ;;  %v1982_v23 = vsel %vm435_vm2, %v12742_v4, %v1981_v58  ;;  %v986_v35 = vsel %vm435_vm2, %v12743_v41, %v985_v31  ;;  %v12747_v58 = vld [vmem:[#allocation77_spill] sm:$0xff] }
 0x46c   :  { %v1310_v40 = vsel %vm435_vm2, %v9638_v33, %v12741_v46  ;;  %v9936_v5 = vperm.slane %v1970_v24, %v7790_v53  ;;  %v9939_v27 = vperm.slane %v1982_v23, %v7790_v53  ;;  %v12745_v33 = vrot.slane %v12744_v14, 4 }
 0x46d   :  { %v1330_v60 = vpack.c.bf16 %v1310_v40, %v1310_v40  ;;  %v1324_v34 = vpack.c.bf16 %v986_v35, %v986_v35  ;;  %v12748_v4 = vrot.slane %v12747_v58, 4  ;;  %v12750_v24 = vrot.slane %v9393_v62, 4 }
 0x46e   :  { %v1916_v59 = vsel %vm435_vm2, %v12746_v11, %v12745_v33  ;;  %v1995_v40 = vrot.slane %v9939_v27, 4  ;;  %v12751_v14 = vrot.slane %v9410_v39, 4  ;;  %v12752_v33 = vld [vmem:[#allocation69_spill] sm:$0xff]  ;;  %v12754_v11 = vld [vmem:[#allocation64_spill] sm:$0xff] }
 0x46f   :  { %v9946_v46 = vperm.slane %v1916_v59, %v7790_v53  ;;  %v1928_v31 = vsel %vm435_vm2, %v12749_v49, %v12748_v4  ;;  %v2294_v23 = vsel %vm435_vm2, %v9379_v43, %v12750_v24  ;;  %6780 = vmatmul.msk.bf16.vlgmr.msra.gmra.mxu0 %vm3363_vm3, %v1330_v60  ;;  %v12753_v43 = vrot.slane %v12752_v33, 4 }
 0x470   :  { %v9959_v41 = vperm.slane %v1928_v31, %v7790_v53  ;;  %v9962_v35 = vperm.slane %v2294_v23, %v7790_v53  ;;  %v2306_v49 = vsel %vm435_vm2, %v9396_v38, %v12751_v14  ;;  %v12755_v60 = vrot.slane %v9595_v6, 4 }
 0x471   :  { %v9969_v62 = vperm.slane %v2306_v49, %v7790_v53  ;;  %v1094_v59 = vsel %vm435_vm2, %v12754_v11, %v12753_v43  ;;  %v2023_v4 = vrot.slane %v9502_v25, 4  ;;  %v1996_v39 = vsel %vm435_vm2, %v1995_v40, %v9936_v5 }
 0x472   :  { %v1202_v58 = vsel %vm435_vm2, %v9598_v9, %v12755_v60  ;;  %v1941_v38 = vrot.slane %v9959_v41, 4  ;;  %v1326_v31 = vpack.c.bf16 %v1094_v59, %v1094_v59  ;;  %v2340_v23 = vpack.c.bf16 %v1996_v39, %v1996_v39  ;;  %v12758_v39 = vld [vmem:[#allocation62_spill] sm:$0xff] }
 0x473   :  { %v1328_v24 = vpack.c.bf16 %v1202_v58, %v1202_v58  ;;  %v2319_v14 = vrot.slane %v9969_v62, 4  ;;  %v2024_v49 = vsel %vm435_vm2, %v9484_v2, %v2023_v4  ;;  %v2035_v6 = vrot.slane %v9495_v12, 4 }
 0x474   :  { %v1942_v9 = vsel %vm435_vm2, %v1941_v38, %v9946_v46  ;;  %v9990_v25 = vperm.slane %v2024_v49, %v7790_v53  ;;  %v12756_v40 = vrot.slane %v9348_v47, 4  ;;  %v12757_v43 = vrot.slane %v9354_v19, 4  ;;  %6774 = vmatmul.msk.bf16.vlgmr.msra.gmra.mxu1 %vm3363_vm3, %v1324_v34 }
 0x475   :  { %v3691_v2 = vsel %vm3363_vm3, %v2340_v23, 0  ;;  %v2339_v59 = vpack.c.bf16 %v1942_v9, %v1942_v9  ;;  %v2320_v12 = vsel %vm435_vm2, %v2319_v14, %v9962_v35  ;;  %v2036_v60 = vsel %vm435_vm2, %v9477_v61, %v2035_v6  ;;  %v12760_v61 = vld [vmem:[#allocation56_spill] sm:$0xff]  ;;  %6776 = vmatmul.msk.bf16.vlgmr.msra.gmra.mxu3 %vm3363_vm3, %v1326_v31  ;;  %v12761_v6 = vld [vmem:[#allocation71_spill] sm:$0xff] }
 0x476   :  { %v2186_v33 = vsel %vm435_vm2, %v9331_v8, %v12756_v40  ;;  %v2198_v11 = vsel %vm435_vm2, %v9341_v55, %v12757_v43  ;;  %v2839_v58 = vrot.slane %v9922_v7, 4  ;;  %3700 = vmatpush.bf16.xpose.msra.mxu2 %v3691_v2  ;;  %v2346_v8 = vpack.c.bf16 %v2320_v12, %v2320_v12  ;;  %v12763_v40 = vld [vmem:[#allocation68_spill] sm:$0xff] }
 0x477   :  { %v10008_v47 = vperm.slane %v2036_v60, %v7790_v53  ;;  %v10011_v55 = vperm.slane %v2186_v33, %v7790_v53  ;;  %v3672_v19 = vsel %vm3363_vm3, %v2339_v59, 0  ;;  %v10015_v4 = vperm.slane %v2198_v11, %v7790_v53  ;;  %v12764_v2 = vld [vmem:[#allocation32_spill] sm:$0xff]  ;;  %v12766_v59 = vld [vmem:[#allocation50_spill] sm:$0xff]  ;;  %v12767_v60 = vld [vmem:[#allocation95_spill] sm:$0xff] }
 0x478   :  { %v12759_v38 = vrot.slane %v12758_v39, 4  ;;  %v2105_v14 = vrot.slane %v9826_v36, 4  ;;  %3681 = vmatpush.bf16.xpose.msra.mxu1 %v3672_v19  ;;  %v3805_v34 = vsel %vm3363_vm3, %v2346_v8, 0  ;;  %v12762_v9 = vrot.slane %v12761_v6, 4  ;;  %v12769_v8 = vld [vmem:[#allocation94_spill] sm:$0xff]  ;;  %v12770_v39 = vld [vmem:[#allocation97_spill] sm:$0xff] }
 0x479   :  { %v2049_v49 = vrot.slane %v10008_v47, 4  ;;  %3814 = vmatpush.bf16.xpose.msra.mxu0 %v3805_v34  ;;  %v2211_v11 = vrot.slane %v10015_v4, 4  ;;  %v12765_v36 = vrot.slane %v12764_v2, 4  ;;  %v12768_v31 = vrot.slane %v12767_v60, 4  ;;  %6778 = vmatmul.msk.bf16.vlgmr.msrb.gmra.mxu2 %vm3363_vm3, %v1328_v24 }
 0x47a   :  { %v1070_v23 = vsel %vm435_vm2, %v12760_v61, %v12759_v38  ;;  %v1148_v33 = vsel %vm435_vm2, %v12763_v40, %v12762_v9  ;;  %v12771_v38 = vrot.slane %v12770_v39, 4  ;;  %v12772_v61 = vld [vmem:[#allocation96_spill] sm:$0xff] }
 0x47b   :  { %v10030_v43 = vperm.slane %v1070_v23, %v7790_v53  ;;  %v1082_v12 = vsel %vm435_vm2, %v12766_v59, %v12765_v36  ;;  %v2132_v19 = vsel %vm435_vm2, %v12769_v8, %v12768_v31  ;;  %v2050_v23 = vsel %vm435_vm2, %v2049_v49, %v9990_v25 }
 0x47c   :  { %v2144_v6 = vsel %vm435_vm2, %v12772_v61, %v12771_v38  ;;  %v10048_v34 = vperm.slane %v1082_v12, %v7790_v53  ;;  %v10051_v9 = vperm.slane %v2132_v19, %v7790_v53  ;;  %v2341_v2 = vpack.c.bf16 %v2050_v23, %v2050_v23  ;;  %v12773_v19 = vld [vmem:[#allocation65_spill] sm:$0xff]  ;;  %v12776_v23 = vld [vmem:[#allocation31_spill] sm:$0xff] }
 0x47d   :  { %v10054_v40 = vperm.slane %v2144_v6, %v7790_v53  ;;  %v2212_v36 = vsel %vm435_vm2, %v2211_v11, %v10011_v55  ;;  %v2106_v59 = vsel %vm435_vm2, %v9829_v18, %v2105_v14  ;;  %v1256_v49 = vsel %vm435_vm2, %v9844_v51, %v1255_v29  ;;  %v12774_v14 = vld [vmem:[#allocation41_spill] sm:$0xff] }
 0x47e   :  { %v10068_v12 = vrot.slane %v2822_v13, 4  ;;  %v2344_v60 = vpack.c.bf16 %v2212_v36, %v2212_v36  ;;  %v1095_v24 = vrot.slane %v10048_v34, 4  ;;  %v3710_v11 = vsel %vm3363_vm3, %v2341_v2, 0  ;;  %v12775_v61 = vld [vmem:[#allocation57_spill] sm:$0xff] }
 0x47f   :  { %v2157_v31 = vrot.slane %v10054_v40, 4  ;;  %v2350_v8 = vpack.c.bf16 %v2106_v59, %v2106_v59  ;;  %v961_v18 = vrot.slane %v12773_v19, 4  ;;  %v973_v45 = vrot.slane %v12774_v14, 4  ;;  %3719 = vmatpush.bf16.xpose.msra.mxu3 %v3710_v11  ;;  %v12779_v14 = vld [vmem:[#allocation37_spill] sm:$0xff] }
 0x480   :  { %v3767_v51 = vsel %vm3363_vm3, %v2344_v60, 0  ;;  %v1327_v29 = vpack.c.bf16 %v1148_v33, %v1148_v33  ;;  %v1096_v52 = vsel %vm435_vm2, %v1095_v24, %v10030_v43  ;;  %v12777_v59 = vrot.slane %v9515_v22, 4 }
 0x481   :  { %v2158_v13 = vsel %vm435_vm2, %v2157_v31, %v10051_v9  ;;  %3776 = vmatpush.bf16.xpose.msrb.mxu2 %v3767_v51  ;;  %v1334_v39 = vpack.c.bf16 %v1096_v52, %v1096_v52  ;;  %v962_v6 = vsel %vm435_vm2, %v12775_v61, %v961_v18  ;;  %v974_v2 = vsel %vm435_vm2, %v12776_v23, %v973_v45  ;;  %v12781_v45 = vld [vmem:[#allocation49_spill] sm:$0xff] }
 0x482   :  { %v2343_v38 = vpack.c.bf16 %v2158_v13, %v2158_v13  ;;  %v10085_v36 = vperm.slane %v962_v6, %v7790_v53  ;;  %v10088_v33 = vperm.slane %v974_v2, %v7790_v53  ;;  %v2240_v60 = vsel %vm435_vm2, %v9499_v44, %v12777_v59  ;;  %v12782_v51 = vld [vmem:[#allocation53_spill] sm:$0xff]  ;;  %v12784_v13 = vld [vmem:[#allocation34_spill] sm:$0xff] }
 0x483   :  { %v12778_v24 = vrot.slane %v9530_v17, 4  ;;  %6784 = vmatmul.msk.bf16.vlgmr.msrb.gmra.mxu0 %vm3363_vm3, %v1334_v39  ;;  %v3881_v11 = vsel %vm3363_vm3, %v2350_v8, 0  ;;  %v10101_v19 = vperm.slane %v2240_v60, %v7790_v53  ;;  %v1997_v22 = vrot.slane %v9936_v5, 4 }
 0x484   :  { %3890 = vmatpush.bf16.xpose.msrb.mxu0 %v3881_v11  ;;  %v987_v44 = vrot.slane %v10088_v33, 4  ;;  %v12780_v17 = vrot.slane %v12779_v14, 4  ;;  %v12783_v52 = vrot.slane %v12782_v51, 4  ;;  %v12785_v39 = vrot.slane %v9606_v32, 4  ;;  %6777 = vmatmul.msk.bf16.vlgmr.msrb.gmra.mxu1 %vm3363_vm3, %v1327_v29 }
 0x485   :  { %v2252_v31 = vsel %vm435_vm2, %v9518_v63, %v12778_v24  ;;  %v1998_v6 = vsel %vm435_vm2, %v9939_v27, %v1997_v22  ;;  %v3748_v59 = vsel %vm3363_vm3, %v2343_v38, 0  ;;  %v1329_v60 = vpack.c.bf16 %v1256_v49, %v1256_v49 }
 0x486   :  { %v10104_v18 = vperm.slane %v2252_v31, %v7790_v53  ;;  %v908_v63 = vsel %vm435_vm2, %v12781_v45, %v12780_v17  ;;  %v920_v8 = vsel %vm435_vm2, %v12784_v13, %v12783_v52  ;;  %v1286_v61 = vsel %vm435_vm2, %v9584_v42, %v12785_v39  ;;  %3757 = vmatpush.bf16.xpose.msrb.mxu1 %v3748_v59  ;;  %v12787_v17 = vld [vmem:[#allocation33_spill] sm:$0xff]  ;;  %v12793_v59 = vld [vmem:[#allocation123_spill] sm:$0xff] }
 0x487   :  { %v10124_v23 = vperm.slane %v908_v63, %v7790_v53  ;;  %v10127_v2 = vperm.slane %v920_v8, %v7790_v53  ;;  %v988_v32 = vsel %vm435_vm2, %v987_v44, %v10085_v36  ;;  %v12786_v24 = vrot.slane %v9615_v48, 4  ;;  %v12788_v63 = vld [vmem:[#allocation38_spill] sm:$0xff]  ;;  %6779 = vmatmul.msk.bf16.vlgmr.msrb.gmra.mxu3 %vm3363_vm3, %v1329_v60 }
 0x488   :  { %v2265_v5 = vrot.slane %v10104_v18, 4  ;;  %v10140_v11 = vperm.slane %v1286_v61, %v7790_v53  ;;  %v2348_v38 = vpack.c.bf16 %v1998_v6, %v1998_v6  ;;  %v1943_v48 = vrot.slane %v9946_v46, 4  ;;  %v12791_v6 = vld [vmem:[#allocation40_spill] sm:$0xff] }
 0x489   :  { %v1298_v42 = vsel %vm435_vm2, %v9609_v16, %v12786_v24  ;;  %v933_v31 = vrot.slane %v10127_v2, 4  ;;  %v2321_v44 = vrot.slane %v9962_v35, 4  ;;  %v1015_v45 = vrot.slane %v12787_v17, 4  ;;  %v12797_v17 = vld [vmem:[#allocation66_spill] sm:$0xff] }
 0x48a   :  { %v2266_v27 = vsel %vm435_vm2, %v2265_v5, %v10101_v19  ;;  %v10143_v22 = vperm.slane %v1298_v42, %v7790_v53  ;;  %v1027_v51 = vrot.slane %v12788_v63, 4  ;;  %v10158_v29 = vrot.slane %v2834_v54, 4  ;;  %v12789_v54 = vld [vmem:[#allocation43_spill] sm:$0xff]  ;;  %v12799_v63 = vld [vmem:[#allocation58_spill] sm:$0xff] }
 0x48b   :  { %v2345_v49 = vpack.c.bf16 %v2266_v27, %v2266_v27  ;;  %v10150_v16 = vsel %vm435_vm2, %v933_v31, %v10124_v23  ;;  %v1944_v35 = vsel %vm435_vm2, %v9959_v41, %v1943_v48  ;;  %v2322_v52 = vsel %vm435_vm2, %v9969_v62, %v2321_v44  ;;  %v12790_v62 = vld [vmem:[#allocation39_spill] sm:$0xff]  ;;  %v12794_v31 = vld [vmem:[#allocation72_spill] sm:$0xff] }
 0x48c   :  { %v1311_v14 = vrot.slane %v10143_v22, 4  ;;  %v10169_v13 = vsel %vm435_vm2, 0.0, %v2835_v10  ;;  %v1332_v8 = vpack.c.bf16 %v988_v32, %v988_v32  ;;  %v1016_v39 = vsel %vm435_vm2, %v12789_v54, %v1015_v45  ;;  %v12800_v54 = vld [vmem:[#allocation61_spill] sm:$0xff] }
 0x48d   :  { %v3786_v46 = vsel %vm3363_vm3, %v2345_v49, 0  ;;  %v10177_v61 = vsel %vm435_vm2, 0.0, %v10068_v12  ;;  %v3843_v41 = vsel %vm3363_vm3, %v2348_v38, 0  ;;  %v1028_v5 = vsel %vm435_vm2, %v12790_v62, %v1027_v51  ;;  %v12796_v38 = vld [vmem:[#allocation42_spill] sm:$0xff] }
 0x48e   :  { %3795 = vmatpush.bf16.xpose.msrb.mxu3 %v3786_v46  ;;  %v1312_v28 = vsel %vm435_vm2, %v1311_v14, %v10140_v11  ;;  %v12792_v10 = vrot.slane %v12791_v6, 4  ;;  %6782 = vmatmul.msk.bf16.vlgmr.msra.gmra.mxu2 %vm3363_vm3, %v1332_v8  ;;  %v2354_v32 = vpack.c.bf16 %v2322_v52, %v2322_v52  ;;  %v10188_v24 = vperm.slane %v1016_v39, %v7790_v53 }
 0x48f   :  { %v10191_v42 = vperm.slane %v1028_v5, %v7790_v53  ;;  %3852 = vmatpush.bf16.xpose.msra.mxu2 %v3843_v41  ;;  %v12795_v49 = vrot.slane %v12794_v31, 4  ;;  %v2051_v44 = vrot.slane %v9990_v25, 4  ;;  %v2213_v14 = vrot.slane %v10011_v55, 4  ;;  %v12802_v41 = vld [vmem:[#allocation54_spill] sm:$0xff] }
 0x490   :  { %v1178_v60 = vsel %vm435_vm2, %v12793_v59, %v12792_v10  ;;  %v12798_v45 = vrot.slane %v12797_v17, 4  ;;  %v12801_v39 = vrot.slane %v12800_v54, 4  ;;  %v1097_v6 = vrot.slane %v10030_v43, 4 }
 0x491   :  { %v10194_v27 = vperm.slane %v1178_v60, %v7790_v53  ;;  %v1190_v48 = vsel %vm435_vm2, %v12796_v38, %v12795_v49  ;;  %v1041_v46 = vrot.slane %v10191_v42, 4  ;;  %v2052_v55 = vsel %vm435_vm2, %v10008_v47, %v2051_v44  ;;  %v12803_v44 = vld [vmem:[#allocation25_spill] sm:$0xff] }
 0x492   :  { %v1124_v51 = vsel %vm435_vm2, %v12799_v63, %v12798_v45  ;;  %v10208_v52 = vperm.slane %v1190_v48, %v7790_v53  ;;  %v1136_v25 = vsel %vm435_vm2, %v12802_v41, %v12801_v39  ;;  %v2214_v62 = vsel %vm435_vm2, %v10015_v4, %v2213_v14  ;;  %v12804_v14 = vld [vmem:[#allocation35_spill] sm:$0xff] }
 0x493   :  { %v10211_v8 = vperm.slane %v1124_v51, %v7790_v53  ;;  %v10222_v5 = vperm.slane %v1136_v25, %v7790_v53  ;;  %v1338_v10 = vpack.c.bf16 %v1312_v28, %v1312_v28  ;;  %v2347_v59 = vpack.c.bf16 %v1944_v35, %v1944_v35  ;;  %v12805_v51 = vld [vmem:[#allocation44_spill] sm:$0xff]  ;;  %v12809_v25 = vld [vmem:[#allocation26_spill] sm:$0xff] }
 0x494   :  { %v1042_v60 = vsel %vm435_vm2, %v1041_v46, %v10188_v24  ;;  %v1203_v31 = vrot.slane %v10208_v52, 4  ;;  %v2349_v49 = vpack.c.bf16 %v2052_v55, %v2052_v55  ;;  %v10231_v47 = vsel %vm435_vm2, %v10048_v34, %v1097_v6 }
 0x495   :  { %v1149_v38 = vrot.slane %v10222_v5, 4  ;;  %v2159_v4 = vrot.slane %v10051_v9, 4  ;;  %v10237_v43 = vsel %vm435_vm2, 0.0, %v2839_v58  ;;  %v10241_v35 = vsel %vm435_vm2, 0.0, %v10158_v29  ;;  %6788 = vmatmul.msk.bf16.vlgmr.msra.gmra.mxu0 %vm3363_vm3, %v1338_v10 }
 0x496   :  { %v3957_v28 = vsel %vm3363_vm3, %v2354_v32, 0  ;;  %v1204_v48 = vsel %vm435_vm2, %v1203_v31, %v10194_v27  ;;  %v3061_v17 = vsel %vm435_vm2, %v12804_v14, %v12803_v44  ;;  %v1331_v32 = vpack.c.bf16 %v10150_v16, %v10150_v16  ;;  %v12814_v31 = vld [vmem:[#allocation104_spill] sm:$0xff] }
 0x497   :  { %3966 = vmatpush.bf16.xpose.msra.mxu0 %v3957_v28  ;;  %v10250_v9 = vsel %vm435_vm2, %v1149_v38, %v10211_v8  ;;  %v2160_v58 = vsel %vm435_vm2, %v10054_v40, %v2159_v4  ;;  %v3824_v45 = vsel %vm3363_vm3, %v2347_v59, 0  ;;  %v2352_v63 = vpack.c.bf16 %v2214_v62, %v2214_v62  ;;  %v12812_v62 = vld [vmem:[#allocation92_spill] sm:$0xff]  ;;  %v10304_v4 = vpop.f32.mrf.mxu0 }
 0x498   :  { %v3067_v46 = vsel %vm435_vm2, %v3066_v37, %v12805_v51  ;;  %v1333_v54 = vpack.c.bf16 %v1042_v60, %v1042_v60  ;;  %v3862_v39 = vsel %vm3363_vm3, %v2349_v49, 0  ;;  %v10270_v41 = vperm.slane %v9891_v56, %v7754_v3  ;;  %6781 = vmatmul.msk.bf16.vlgmr.msra.gmra.mxu1 %vm3363_vm3, %v1331_v32 }
 0x499   :  { %v10266_v40 = vperm.slane %v3067_v46, %v7754_v3  ;;  %v10273_v16 = vperm.slane %v3061_v17, %v7754_v3  ;;  %v10277_v55 = vperm.slane %v12809_v25, %v7754_v3  ;;  %v1232_v37 = vsel %vm435_vm2, %v12811_v26, %v1231_v30  ;;  %3833 = vmatpush.bf16.xpose.msra.mxu1 %v3824_v45  ;;  %v12817_v45 = vld [vmem:[#allocation101_spill] sm:$0xff]  ;;  %v12820_v25 = vld [vmem:[#allocation102_spill] sm:$0xff] }
 0x49a   :  { %12807 = vst [vmem:[#allocation36_spill] sm:$0xff] %v10270_v41  ;;  %v1244_v6 = vsel %vm435_vm2, %v12812_v62, %v1243_v21  ;;  %v3095_v10 = vrot.slane %v10270_v41, 4  ;;  %v10291_v59 = vperm.slane %v1232_v37, %v7790_v53  ;;  %v3919_v50 = vsel %vm3363_vm3, %v2352_v63, 0  ;;  %v12813_v21 = vld [vmem:[#allocation105_spill] sm:$0xff]  ;;  %6783 = vmatmul.msk.bf16.vlgmr.msra.gmra.mxu3 %vm3363_vm3, %v1333_v54 }
 0x49b   :  { %12806 = vst [vmem:[#allocation23_spill] sm:$0xff] %v10266_v40  ;;  %v3083_v56 = vrot.slane %v10266_v40, 4  ;;  %v10294_v60 = vperm.slane %v1244_v6, %v7790_v53  ;;  %v1342_v0 = vpack.c.bf16 %v10231_v47, %v10231_v47  ;;  %v2267_v30 = vrot.slane %v10101_v19, 4  ;;  %3871 = vmatpush.bf16.xpose.msra.mxu3 %v3862_v39  ;;  %v12819_v39 = vld [vmem:[#allocation100_spill] sm:$0xff]  ;;  %v12821_v62 = vld [vmem:[#allocation109_spill] sm:$0xff]  ;;  %v10480_v40 = vpop.f32.mrf.mxu2 }
 0x49c   :  { %12808 = vst [vmem:[#allocation51_spill] sm:$0xff] %v10273_v16  ;;  %v12815_v49 = vrot.slane %v12814_v31, 4  ;;  %v1336_v28 = vpack.c.bf16 %v1204_v48, %v1204_v48  ;;  %v3096_v14 = vsel %vm435_vm2, %v3095_v10, %v10277_v55  ;;  %v12816_v48 = vld [vmem:[#allocation99_spill] sm:$0xff]  ;;  %v1335_v51 = vpack.c.bf16 %v10250_v9, %v10250_v9  ;;  %v12822_v6 = vld [vmem:[#allocation108_spill] sm:$0xff] }
 0x49d   :  { %12810 = vst [vmem:[#allocation27_spill] sm:$0xff] %v10277_v55  ;;  %v3084_v44 = vsel %vm435_vm2, %v3083_v56, %v10273_v16  ;;  %v1257_v47 = vrot.slane %v10294_v60, 4  ;;  %v10316_v17 = vperm.slane %v3096_v14, %v7790_v53  ;;  %v10320_v32 = vsel %vm435_vm2, %v10104_v18, %v2267_v30 }
 0x49e   :  { %v2959_v38 = vsel %vm435_vm2, %v12815_v49, %v12813_v21  ;;  %v10313_v19 = vperm.slane %v3084_v44, %v7790_v53  ;;  %v2953_v63 = vsel %vm435_vm2, %v12817_v45, %v12816_v48  ;;  %v2964_v26 = vsel %vm435_vm2, %v12820_v25, %v12819_v39  ;;  %6786 = vmatmul.msk.bf16.vlgmr.msrb.gmra.mxu2 %vm3363_vm3, %v1336_v28  ;;  %v12827_v28 = vld [vmem:[#allocation83_spill] sm:$0xff]  ;;  %v12828_v44 = vld [vmem:[#allocation80_spill] sm:$0xff] }
 0x49f   :  { %v10329_v46 = vsel %vm435_vm2, %v1257_v47, %v10291_v59  ;;  %v10332_v54 = vperm.slane %v2959_v38, %v7754_v3  ;;  %v2351_v18 = vpack.c.bf16 %v2160_v58, %v2160_v58  ;;  %v3107_v37 = vrot.slane %v10316_v17, 4  ;;  %3928 = vmatpush.bf16.xpose.msrb.mxu2 %v3919_v50  ;;  %v10351_v58 = vpop.f32.mrf.mxu1 }
 0x4a0   :  { %v12823_v9 = vrot.slane %v12822_v6, 4  ;;  %v10344_v10 = vperm.slane %v2953_v63, %v7754_v3  ;;  %v935_v31 = vrot.slane %v10124_v23, 4  ;;  %v10356_v38 = vperm.slane %v2964_v26, %v7754_v3  ;;  %v12830_v26 = vld [vmem:[#allocation78_spill] sm:$0xff]  ;;  %v3381_v6 = vpop.f32.mrf.mxu0 }
 0x4a1   :  { %12818 = vst [vmem:[#allocation46_spill] sm:$0xff] %v10332_v54  ;;  %v2975_v21 = vrot.slane %v10332_v54, 4  ;;  %v3108_v49 = vsel %vm435_vm2, %v3107_v37, %v10313_v19  ;;  %v1313_v50 = vrot.slane %v10140_v11, 4  ;;  %v12829_v14 = vrot.slane %v12828_v44, 4  ;;  %v12831_v37 = vld [vmem:[#allocation79_spill] sm:$0xff] }
 0x4a2   :  { %v2970_v56 = vsel %vm435_vm2, %v12823_v9, %v12821_v62  ;;  %12824 = vst [vmem:[#allocation24_spill] sm:$0xff] %v10344_v10  ;;  %v3334_v48 = vpack.c.bf16 %v3108_v49, %v3108_v49  ;;  %v10368_v63 = vsel %vm435_vm2, %v10127_v2, %v935_v31  ;;  %v3900_v39 = vsel %vm3363_vm3, %v2351_v18, 0 }
 0x4a3   :  { %v10347_v30 = vperm.slane %v2970_v56, %v7754_v3  ;;  %12826 = vst [vmem:[#allocation47_spill] sm:$0xff] %v10356_v38  ;;  %v2905_v47 = vsel %vm435_vm2, %v12829_v14, %v12827_v28  ;;  %v2976_v45 = vsel %vm435_vm2, %v2975_v21, %v10344_v10  ;;  %v989_v25 = vrot.slane %v10085_v36, 4  ;;  %v12833_v21 = vld [vmem:[#allocation84_spill] sm:$0xff]  ;;  %v12835_v14 = vld [vmem:[#allocation81_spill] sm:$0xff] }
 0x4a4   :  { %v10374_v11 = vsel %vm435_vm2, %v10143_v22, %v1313_v50  ;;  %v2899_v62 = vsel %vm435_vm2, %v12831_v37, %v12830_v26  ;;  %v2353_v9 = vpack.c.bf16 %v10320_v32, %v10320_v32  ;;  %v10382_v56 = vperm.slane %v2976_v45, %v7790_v53  ;;  %v12836_v45 = vld [vmem:[#allocation121_spill] sm:$0xff] }
 0x4a5   :  { %12825 = vst [vmem:[#allocation52_spill] sm:$0xff] %v10347_v30  ;;  %v2987_v23 = vrot.slane %v10347_v30, 4  ;;  %v10387_v36 = vperm.slane %v2905_v47, %v7754_v3  ;;  %6792 = vmatmul.msk.bf16.vlgmr.msrb.gmra.mxu0 %vm3363_vm3, %v1342_v0  ;;  %v4418_v22 = vsel %vm4359_vm4, %v3334_v48, 0  ;;  %v10396_v31 = vperm.slane %v12833_v21, %v7754_v3 }
 0x4a6   :  { %v3972_v32 = vsel %vm3363_vm3, %v10304_v4, -inf  ;;  %4427 = vmatpush.bf16.msrb.mxu0 %v4418_v22  ;;  %v10401_v49 = vperm.slane %v2899_v62, %v7754_v3  ;;  %v1043_v0 = vrot.slane %v10188_v24, 4  ;;  %v1205_v28 = vrot.slane %v10194_v27, 4 }
 0x4a7   :  { %v2988_v2 = vsel %vm435_vm2, %v2987_v23, %v10356_v38  ;;  %12832 = vst [vmem:[#allocation48_spill] sm:$0xff] %v10387_v36  ;;  %v2921_v50 = vrot.slane %v10387_v36, 4  ;;  %3973 = vmax.xlane.f32.xlu0 %v3972_v32  ;;  %v10409_v47 = vperm.slane %v12835_v14, %v7754_v3  ;;  %v2933_v48 = vrot.slane %v10396_v31, 4  ;;  %v12837_v23 = vld [vmem:[#allocation118_spill] sm:$0xff]  ;;  %v12843_v14 = vld [vmem:[#allocation117_spill] sm:$0xff] }
 0x4a8   :  { %v10392_v18 = vperm.slane %v2988_v2, %v7790_v53  ;;  %12834 = vst [vmem:[#allocation59_spill] sm:$0xff] %v10396_v31  ;;  %v12838_v26 = vrot.slane %v12837_v23, 4  ;;  %v990_v62 = vsel %vm435_vm2, %v10088_v33, %v989_v25  ;;  %v10420_v24 = vsel %vm435_vm2, %v10191_v42, %v1043_v0  ;;  %v3438_v2 = vpop.f32.mrf.mxu1  ;;  %6785 = vmatmul.msk.bf16.vlgmr.msrb.gmra.mxu1 %vm3363_vm3, %v1335_v51  ;;  %v12840_v32 = vld [vmem:[#allocation114_spill] sm:$0xff]  ;;  %v12841_v0 = vld [vmem:[#allocation115_spill] sm:$0xff] }
 0x4a9   :  { %v10424_v27 = vsel %vm435_vm2, %v10208_v52, %v1205_v28  ;;  %v1337_v22 = vpack.c.bf16 %v10329_v46, %v10329_v46  ;;  %v2922_v33 = vsel %vm435_vm2, %v2921_v50, %v10401_v49  ;;  %v2934_v42 = vsel %vm435_vm2, %v2933_v48, %v10409_v47  ;;  %v12842_v46 = vld [vmem:[#allocation116_spill] sm:$0xff]  ;;  %3909 = vmatpush.bf16.xpose.msrb.mxu1 %v3900_v39  ;;  %v12844_v23 = vld [vmem:[#allocation122_spill] sm:$0xff]  ;;  %v12845_v48 = vld [vmem:[#allocation119_spill] sm:$0xff]  ;;  %v10453_v2 = vpop.f32.mrf.mxu0 }
 0x4aa   :  { %v2999_v44 = vrot.slane %v10392_v18, 4  ;;  %v3013_v37 = vsel %vm435_vm2, %v12838_v26, %v12836_v45  ;;  %v10439_v25 = vperm.slane %v2934_v42, %v7790_v53  ;;  %v3007_v28 = vsel %vm435_vm2, %v12841_v0, %v12840_v32  ;;  %v12873_v36 = vld [vmem:[#allocation30_spill] sm:$0xff] }
 0x4ab   :  { %v10427_v6 = vperm.slane %v3013_v37, %v7754_v3  ;;  %v1340_v45 = vpack.c.bf16 %v990_v62, %v990_v62  ;;  %v3938_v50 = vsel %vm3363_vm3, %v2353_v9, 0  ;;  %v12846_v26 = vrot.slane %v12845_v48, 4  ;;  %6787 = vmatmul.msk.bf16.vlgmr.msrb.gmra.mxu3 %vm3363_vm3, %v1337_v22  ;;  %v12848_v9 = vld [vmem:[#allocation103_spill] sm:$0xff]  ;;  %v12849_v62 = vld [vmem:[#allocation106_spill] sm:$0xff]  ;;  %v12852_v22 = vld [vmem:[#allocation113_spill] sm:$0xff] }
 0x4ac   :  { %v3000_v21 = vsel %vm435_vm2, %v2999_v44, %v10382_v56  ;;  %v3018_v44 = vsel %vm435_vm2, %v12843_v14, %v12842_v46  ;;  %v2945_v42 = vrot.slane %v10439_v25, 4  ;;  %v3169_v32 = vsel %vm435_vm2, %v12849_v62, %v12848_v9  ;;  %3947 = vmatpush.bf16.xpose.msrb.mxu3 %v3938_v50  ;;  %v12853_v14 = vld [vmem:[#allocation111_spill] sm:$0xff]  ;;  %v12855_v48 = vld [vmem:[#allocation120_spill] sm:$0xff] }
 0x4ad   :  { %12839 = vst [vmem:[#allocation55_spill] sm:$0xff] %v10427_v6  ;;  %v3332_v52 = vpack.c.bf16 %v3000_v21, %v3000_v21  ;;  %v3024_v51 = vsel %vm435_vm2, %v12846_v26, %v12844_v23  ;;  %v3029_v37 = vrot.slane %v10427_v6, 4  ;;  %v10457_v21 = vperm.slane %v2922_v33, %v7790_v53  ;;  %v12856_v26 = vld [vmem:[#allocation112_spill] sm:$0xff]  ;;  %v12859_v62 = vld [vmem:[#allocation107_spill] sm:$0xff] }
 0x4ae   :  { %v10461_v39 = vperm.slane %v3024_v51, %v7754_v3  ;;  %v10467_v0 = vperm.slane %v3007_v28, %v7754_v3  ;;  %v10470_v46 = vperm.slane %v3018_v44, %v7754_v3  ;;  %v12854_v33 = vrot.slane %v12853_v14, 4  ;;  %v12858_v44 = vld [vmem:[#allocation110_spill] sm:$0xff]  ;;  %6790 = vmatmul.msk.bf16.vlgmr.msra.gmra.mxu2 %vm3363_vm3, %v1340_v45 }
 0x4af   :  { %v12857_v51 = vrot.slane %v12856_v26, 4  ;;  %v4380_v50 = vsel %vm4359_vm4, %v3332_v52, 0  ;;  %v3180_v14 = vsel %vm435_vm2, %v12859_v62, %v12858_v44  ;;  %v1151_v52 = vrot.slane %v10211_v8, 4 }
 0x4b0   :  { %12847 = vst [vmem:[#allocation91_spill] sm:$0xff] %v10461_v39  ;;  %v3175_v23 = vsel %vm435_vm2, %v12854_v33, %v12852_v22  ;;  %v3041_v28 = vrot.slane %v10461_v39, 4  ;;  %v3030_v22 = vsel %vm435_vm2, %v3029_v37, %v10467_v0  ;;  %v10494_v33 = vperm.slane %v3169_v32, %v7754_v3  ;;  %4389 = vmatpush.bf16.msra.mxu2 %v4380_v50  ;;  %v10706_v39 = vpop.permute.xlu2 %7164 }
 0x4b1   :  { %12850 = vst [vmem:[#allocation89_spill] sm:$0xff] %v10467_v0  ;;  %v3186_v34 = vsel %vm435_vm2, %v12857_v51, %v12855_v48  ;;  %v10485_v9 = vperm.slane %v3175_v23, %v7754_v3  ;;  %v2946_v23 = vsel %vm435_vm2, %v2945_v42, %v10457_v21  ;;  %v12860_v51 = vld [vmem:[#allocation29_spill] sm:$0xff]  ;;  %v12861_v37 = vrot.slane %v9794_v20, 4 }
 0x4b2   :  { %12851 = vst [vmem:[#allocation90_spill] sm:$0xff] %v10470_v46  ;;  %v10497_v48 = vperm.slane %v3186_v34, %v7754_v3  ;;  %v3042_v26 = vsel %vm435_vm2, %v3041_v28, %v10470_v46  ;;  %v10513_v34 = vperm.slane %v3180_v14, %v7754_v3  ;;  %v10518_v42 = vsel %vm435_vm2, %v10222_v5, %v1151_v52  ;;  %v3400_v52 = vpop.f32.mrf.mxu0 }
 0x4b3   :  { %v3191_v45 = vrot.slane %v10485_v9, 4  ;;  %v3121_v32 = vsel %vm435_vm2, %v12861_v37, %v12860_v51  ;;  %v10510_v44 = vperm.slane %v3042_v26, %v7790_v53  ;;  %v3239_v50 = vrot.slane %v10241_v35, 4  ;;  %v12863_v37 = vld [vmem:[#allocation45_spill] sm:$0xff] }
 0x4b4   :  { %v3203_v8 = vrot.slane %v10497_v48, 4  ;;  %v1346_v28 = vpack.c.bf16 %v10374_v11, %v10374_v11  ;;  %v10526_v62 = vperm.slane %v3121_v32, %v7754_v3  ;;  %v3331_v26 = vpack.c.bf16 %v2946_v23, %v2946_v23  ;;  %v12862_v11 = vld [vmem:[#allocation73_spill] sm:$0xff] }
 0x4b5   :  { %v3192_v20 = vsel %vm435_vm2, %v3191_v45, %v10494_v33  ;;  %v10529_v14 = vperm.slane %v3030_v22, %v7790_v53  ;;  %v3053_v51 = vrot.slane %v10510_v44, 4  ;;  %v3115_v45 = vsel %vm435_vm2, %v12863_v37, %v12862_v11  ;;  %v3457_v11 = vpop.f32.mrf.mxu2 }
 0x4b6   :  { %v3204_v5 = vsel %vm435_vm2, %v3203_v8, %v10513_v34  ;;  %v10542_v32 = vperm.slane %v9905_v1, %v7754_v3  ;;  %v3981_v22 = vsel %vm3363_vm3, %v10351_v58, -inf  ;;  %6796 = vmatmul.msk.bf16.vlgmr.msra.gmra.mxu0 %vm3363_vm3, %v1346_v28  ;;  %v10550_v8 = vperm.slane %v3192_v20, %v7790_v53 }
 0x4b7   :  { %v10535_v35 = vperm.slane %v3204_v5, %v7790_v53  ;;  %v3054_v23 = vsel %vm435_vm2, %v3053_v51, %v10529_v14  ;;  %3982 = vmax.xlane.f32.xlu0 %v3981_v22  ;;  %v3975_v5 = vsel %vm3363_vm3, %v10453_v2, -inf  ;;  %v1259_v52 = vrot.slane %v10291_v59, 4 }
 0x4b8   :  { %v10558_v37 = vperm.slane %v9884_v15, %v7754_v3  ;;  %v3137_v28 = vrot.slane %v10526_v62, 4  ;;  %v3149_v51 = vrot.slane %v10542_v32, 4  ;;  %3976 = vmax.xlane.f32.xlu2 %v3975_v5  ;;  %v3240_v20 = vsel %vm435_vm2, %v3239_v50, %v10237_v43 }
 0x4b9   :  { %v3215_v1 = vrot.slane %v10535_v35, 4  ;;  %v1339_v22 = vpack.c.bf16 %v10368_v63, %v10368_v63  ;;  %v1260_v59 = vsel %vm435_vm2, %v10294_v60, %v1259_v52  ;;  %v12864_v11 = vrot.slane %v10177_v61, 4 }
 0x4ba   :  { %v3333_v41 = vpack.c.bf16 %v3054_v23, %v3054_v23  ;;  %v10575_v5 = vperm.slane %v3115_v45, %v7754_v3  ;;  %v3150_v43 = vsel %vm435_vm2, %v3149_v51, %v10558_v37  ;;  %v3234_v63 = vsel %vm435_vm2, %v10158_v29, %v9922_v7 }
 0x4bb   :  { %v3229_v15 = vsel %vm435_vm2, %v12864_v11, %v10169_v13  ;;  %v3216_v16 = vsel %vm435_vm2, %v3215_v1, %v10550_v8  ;;  %v3223_v61 = vsel %vm435_vm2, %v10068_v12, %v9901_v57  ;;  %6789 = vmatmul.msk.bf16.vlgmr.msra.gmra.mxu1 %vm3363_vm3, %v1339_v22  ;;  %v4361_v60 = vsel %vm4359_vm4, %v3331_v26, 0 }
 0x4bc   :  { %v10586_v13 = vperm.slane %v3229_v15, %v7754_v3  ;;  %v1341_v50 = vpack.c.bf16 %v10420_v24, %v10420_v24  ;;  %v3138_v45 = vsel %vm435_vm2, %v3137_v28, %v10575_v5  ;;  %v10595_v23 = vperm.slane %v3240_v20, %v7754_v3  ;;  %4370 = vmatpush.bf16.msra.mxu1 %v4361_v60 }
 0x4bd   :  { %v3336_v7 = vpack.c.bf16 %v3216_v16, %v3216_v16  ;;  %v10598_v57 = vperm.slane %v3150_v43, %v7790_v53  ;;  %v3984_v29 = vsel %vm3363_vm3, %v10480_v40, -inf  ;;  %v4399_v24 = vsel %vm4359_vm4, %v3333_v41, 0 }
 0x4be   :  { %12865 = vst [vmem:[#allocation88_spill] sm:$0xff] %v10586_v13  ;;  %v3245_v12 = vrot.slane %v10586_v13, 4  ;;  %6791 = vmatmul.msk.bf16.vlgmr.msra.gmra.mxu3 %vm3363_vm3, %v1341_v50  ;;  %v10606_v26 = vperm.slane %v3223_v61, %v7754_v3  ;;  %v10609_v52 = vperm.slane %v3234_v63, %v7754_v3  ;;  %v3257_v16 = vrot.slane %v10595_v23, 4 }
 0x4bf   :  { %12866 = vst [vmem:[#allocation98_spill] sm:$0xff] %v10595_v23  ;;  %v1344_v1 = vpack.c.bf16 %v10424_v27, %v10424_v27  ;;  %4408 = vmatpush.bf16.msra.mxu3 %v4399_v24  ;;  %v4456_v41 = vsel %vm4359_vm4, %v3336_v7, 0  ;;  %v10621_v20 = vperm.slane %v3138_v45, %v7790_v53  ;;  %v3161_v22 = vrot.slane %v10598_v57, 4 }
 0x4c0   :  { %12867 = vst [vmem:[#allocation63_spill] sm:$0xff] %v10606_v26  ;;  %v3246_v28 = vsel %vm435_vm2, %v3245_v12, %v10606_v26  ;;  %v3258_v51 = vsel %vm435_vm2, %v3257_v16, %v10609_v52  ;;  %3985 = vmax.xlane.f32.xlu2 %v3984_v29  ;;  %v1343_v60 = vpack.c.bf16 %v10518_v42, %v10518_v42  ;;  %v10639_v12 = vpop.f32.mrf.mxu3 }
 0x4c1   :  { %12868 = vst [vmem:[#allocation60_spill] sm:$0xff] %v10609_v52  ;;  %6794 = vmatmul.msk.bf16.vlgmr.msrb.gmra.mxu2 %vm3363_vm3, %v1344_v1  ;;  %v10625_v11 = vperm.slane %v3258_v51, %v7790_v53  ;;  %v10628_v27 = vperm.slane %v3246_v28, %v7790_v53  ;;  %v3162_v43 = vsel %vm435_vm2, %v3161_v22, %v10621_v20  ;;  %v3987_v24 = vsel %vm3363_vm3, %v10639_v12, -inf }
 0x4c2   :  { %4465 = vmatpush.bf16.msrb.mxu2 %v4456_v41  ;;  %v3335_v61 = vpack.c.bf16 %v3162_v43, %v3162_v43  ;;  %v1345_v7 = vpack.c.bf16 %v1260_v59, %v1260_v59 }
 0x4c3   :  { %12869 = vst [vmem:[#allocation82_spill] sm:$0xff] %v10625_v11  ;;  %v3269_v15 = vrot.slane %v10625_v11, 4 }
 0x4c4   :  { %12870 = vst [vmem:[#allocation85_spill] sm:$0xff] %v10628_v27  ;;  %v4437_v45 = vsel %vm4359_vm4, %v3335_v61, 0 }
 0x4c5   :  { %v3270_v63 = vsel %vm435_vm2, %v3269_v15, %v10628_v27 }
 0x4c6   :  { %v3337_v50 = vpack.c.bf16 %v3270_v63, %v3270_v63 }
 0x4c8   :  { %v4475_v29 = vsel %vm4359_vm4, %v3337_v50, 0  ;;  %3988 = vmax.xlane.f32.xlu2 %v3987_v24  ;;  %v3476_v42 = vpop.f32.mrf.mxu3 }
 0x4c9   :  { %v10645_v16 = vpop.f32.mrf.mxu2 }
 0x4ca   :  { %v3993_v15 = vsel %vm3363_vm3, %v10645_v16, -inf }
 0x4cb   :  { %6793 = vmatmul.msk.bf16.vlgmr.msrb.gmra.mxu1 %vm3363_vm3, %v1343_v60 }
 0x4cc   :  { %4446 = vmatpush.bf16.msrb.mxu1 %v4437_v45 }
 0x4ce   :  { %6795 = vmatmul.msk.bf16.vlgmr.msrb.gmra.mxu3 %vm3363_vm3, %v1345_v7 }
 0x4cf   :  { %4484 = vmatpush.bf16.msrb.mxu3 %v4475_v29 }
 0x4d1   :  { %v3514_v1 = vpop.f32.mrf.mxu2 }
 0x4d8   :  { %v10647_v28 = vpop.f32.mrf.mxu0 }
 0x4d9   :  { %v3978_v59 = vsel %vm3363_vm3, %v10647_v28, -inf }
 0x4da   :  { %3979 = vmax.xlane.f32.xlu1 %v3978_v59 }
 0x4e0   :  { %v3419_v22 = vpop.f32.mrf.mxu0 }
 0x4e1   :  { %v10651_v51 = vpop.f32.mrf.mxu1 }
 0x4e2   :  { %v3990_v41 = vsel %vm3363_vm3, %v10651_v51, -inf  ;;  %3994 = vmax.xlane.f32.xlu1 %v3993_v15 }
 0x4e3   :  { %3991 = vmax.xlane.f32.xlu0 %v3990_v41 }
 0x4e8   :  { %v10657_v63 = vpop.f32.mrf.mxu3 }
 0x4e9   :  { %v3495_v43 = vpop.f32.mrf.mxu1  ;;  %v3996_v61 = vsel %vm3363_vm3, %v10657_v63, -inf }
 0x4eb   :  { %3997 = vmax.xlane.f32.xlu0 %v3996_v61 }
 0x4ec   :  { %v10661_v60 = vpop.f32.mrf.mxu0  ;;  %v10663_v50 = vpop.f32.mrf.mxu2 }
 0x4ed   :  { %v4017_v45 = vsel %vm3363_vm3, %v10661_v60, -inf  ;;  %v4002_v61 = vsel %vm3363_vm3, %v10663_v50, -inf }
 0x4ee   :  { %4018 = vmax.xlane.f32.xlu2 %v4017_v45 }
 0x4f0   :  { %v3533_v29 = vpop.f32.mrf.mxu3 }
 0x4f1   :  { %v10667_v7 = vpop.f32.mrf.mxu1 }
 0x4f2   :  { %v3999_v1 = vsel %vm3363_vm3, %v10667_v7, -inf }
 0x4f4   :  { %v3666_v24 = vpop.f32.mrf.mxu0  ;;  %v3571_v42 = vpop.f32.mrf.mxu2 }
 0x4f6   :  { %4000 = vmax.xlane.f32.xlu2 %v3999_v1 }
 0x4f8   :  { %v10671_v41 = vpop.f32.mrf.mxu3 }
 0x4f9   :  { %v3552_v59 = vpop.f32.mrf.mxu1  ;;  %v4005_v22 = vsel %vm3363_vm3, %v10671_v41, -inf }
 0x4fa   :  { %4006 = vmax.xlane.f32.xlu1 %v4005_v22 }
 0x4fc   :  { %v10675_v15 = vpop.f32.mrf.mxu2 }
 0x4fd   :  { %v4011_v24 = vsel %vm3363_vm3, %v10675_v15, -inf }
 0x4fe   :  { %4003 = vmax.xlane.f32.xlu2 %v4002_v61 }
 0x500   :  { %v10677_v43 = vpop.f32.mrf.mxu0  ;;  %v3590_v29 = vpop.f32.mrf.mxu3 }
 0x501   :  { %v10681_v45 = vpop.f32.mrf.mxu1 }
 0x502   :  { %4012 = vmax.xlane.f32.xlu1 %v4011_v24  ;;  %v4008_v59 = vsel %vm3363_vm3, %v10681_v45, -inf }
 0x504   :  { %v3628_v42 = vpop.f32.mrf.mxu2 }
 0x506   :  { %4009 = vmax.xlane.f32.xlu2 %v4008_v59 }
 0x508   :  { %v3742_v1 = vpop.f32.mrf.mxu0 }
 0x509   :  { %v3609_v22 = vpop.f32.mrf.mxu1 }
 0x50a   :  { %v10687_v13 = vpop.f32.mrf.mxu3 }
 0x50b   :  { %v4014_v23 = vsel %vm3363_vm3, %v10687_v13, -inf }
 0x50e   :  { %4015 = vmax.xlane.f32.xlu2 %v4014_v23 }
 0x511   :  { %v10691_v61 = vpop.f32.mrf.mxu2 }
 0x512   :  { %v10693_v26 = vpop.f32.mrf.mxu0  ;;  %v3647_v24 = vpop.f32.mrf.mxu3  ;;  %v4023_v23 = vsel %vm3363_vm3, %v10691_v61, -inf }
 0x515   :  { %v10695_v29 = vpop.f32.mrf.mxu1 }
 0x516   :  { %v4020_v42 = vsel %vm3363_vm3, %v10695_v29, -inf }
 0x517   :  { %4021 = vmax.xlane.f32.xlu0 %v4020_v42 }
 0x519   :  { %v3704_v59 = vpop.f32.mrf.mxu2 }
 0x51a   :  { %v3974_v1 = vpop.xlane.xlu0 %3973  ;;  %v3818_v22 = vpop.f32.mrf.mxu0 }
 0x51b   :  { %v4068_v52 = vsub.f32 %v10304_v4, %v3974_v1  ;;  %v4029_v1 = vsel %vm3363_vm3, %v10677_v43, -inf }
 0x51d   :  { %v4100_v55 = vmul.f32 1.442695, %v4068_v52  ;;  %v3685_v6 = vpop.f32.mrf.mxu1  ;;  %v10700_v0 = vpop.f32.mrf.mxu3 }
 0x51e   :  { %v4026_v24 = vsel %vm3363_vm3, %v10700_v0, -inf }
 0x51f   :  { %7233 = vpow2.f32 %v4100_v55  ;;  %4024 = vmax.xlane.f32.xlu0 %v4023_v23  ;;  %4027 = vmax.xlane.f32.xlu1 %v4026_v24 }
 0x521   :  { %v10708_v42 = vpop.f32.mrf.mxu2 }
 0x522   :  { %v10710_v59 = vpop.f32.mrf.mxu0 }
 0x525   :  { %v10712_v4 = vpop.eup %7233  ;;  %v10716_v6 = vpop.f32.mrf.mxu1 }
 0x526   :  { %v4164_v55 = vsel %vm3363_vm3, %v10712_v4, 0.0  ;;  %12871 = vst [vmem:[#allocation87_spill] sm:$0xff] %v10716_v6  ;;  %v3723_v52 = vpop.f32.mrf.mxu3 }
 0x527   :  { %4165 = vadd.xlane.f32.xlu2 %v4164_v55  ;;  %4030 = vmax.xlane.f32.xlu1 %v4029_v1  ;;  %v4032_v55 = vsel %vm3363_vm3, %v10716_v6, -inf }
 0x529   :  { %v3780_v54 = vpop.f32.mrf.mxu2 }
 0x52a   :  { %v3983_v22 = vpop.xlane.xlu0 %3982  ;;  %v3894_v46 = vpop.f32.mrf.mxu0 }
 0x52b   :  { %v4071_v23 = vsub.f32 %v10351_v58, %v3983_v22  ;;  %v3977_v24 = vpop.xlane.xlu2 %3976 }
 0x52c   :  { %v4069_v10 = vsub.f32 %v10453_v2, %v3977_v24 }
 0x52d   :  { %v4106_v11 = vmul.f32 1.442695, %v4071_v23  ;;  %v3761_v52 = vpop.f32.mrf.mxu1 }
 0x52e   :  { %v4102_v30 = vmul.f32 1.442695, %v4069_v10  ;;  %v10724_v27 = vpop.f32.mrf.mxu3 }
 0x52f   :  { %7235 = vpow2.f32 %v4106_v11  ;;  %4033 = vmax.xlane.f32.xlu2 %v4032_v55 }
 0x530   :  { %7237 = vpow2.f32 %v4102_v30 }
 0x531   :  { %v10726_v1 = vpop.f32.mrf.mxu2 }
 0x533   :  { %v3986_v38 = vpop.xlane.xlu2 %3985  ;;  %v10728_v58 = vpop.f32.mrf.mxu0 }
 0x534   :  { %v4072_v54 = vsub.f32 %v10480_v40, %v3986_v38  ;;  %v3193_v38 = vrot.slane %v10494_v33, 4 }
 0x535   :  { %v10731_v46 = vpop.eup %7235 }
 0x536   :  { %v10733_v2 = vpop.eup %7237  ;;  %v4173_v10 = vsel %vm3363_vm3, %v10731_v46, 0.0  ;;  %v4108_v11 = vmul.f32 1.442695, %v4072_v54  ;;  %v3799_v23 = vpop.f32.mrf.mxu3  ;;  %v3205_v54 = vrot.slane %v10513_v34, 4 }
 0x537   :  { %4174 = vadd.xlane.f32.xlu1 %v4173_v10  ;;  %v4167_v30 = vsel %vm3363_vm3, %v10733_v2, 0.0 }
 0x538   :  { %7239 = vpow2.f32 %v4108_v11  ;;  %4168 = vadd.xlane.f32.xlu0 %v4167_v30  ;;  %v10739_v22 = vpop.f32.mrf.mxu1  ;;  %v3194_v11 = vsel %vm435_vm2, %v10485_v9, %v3193_v38 }
 0x539   :  { %v3856_v24 = vpop.f32.mrf.mxu2  ;;  %v10752_v30 = vperm.slane %v3194_v11, %v7790_v53 }
 0x53a   :  { %v3206_v24 = vsel %vm435_vm2, %v10497_v48, %v3205_v54  ;;  %v12874_v48 = vld [vmem:[#allocation28_spill] sm:$0xff] }
 0x53b   :  { %v3970_v55 = vpop.f32.mrf.mxu0  ;;  %v3989_v23 = vpop.xlane.xlu2 %3988  ;;  %v3221_v34 = vrot.slane %v10752_v30, 4  ;;  %v7168_v54 = vpack.i.bf16 %v12874_v48, %v12873_v36  ;;  %v4038_v48 = vsel %vm3363_vm3, %v10724_v27, -inf }
 0x53c   :  { %v4073_v55 = vsub.f32 %v10639_v12, %v3989_v23 }
 0x53e   :  { %v10741_v40 = vpop.eup %7239 }
 0x53f   :  { %v4176_v52 = vsel %vm3363_vm3, %v10741_v40, 0.0 }
 0x540   :  { %4177 = vadd.xlane.f32.xlu1 %v4176_v52  ;;  %v3837_v10 = vpop.f32.mrf.mxu1  ;;  %v10760_v52 = vperm.slane %v3206_v24, %v7790_v53 }
 0x541   :  { %v10747_v6 = vpop.f32.mrf.mxu3  ;;  %v4110_v10 = vmul.f32 1.442695, %v4073_v55 }
 0x542   :  { %v10765_v9 = vsel %vm435_vm2, %v10760_v52, %v3221_v34  ;;  %v3139_v34 = vrot.slane %v10575_v5, 4 }
 0x543   :  { %12872 = vst [vmem:[#allocation70_spill] sm:$0xff] %v10765_v9  ;;  %7241 = vpow2.f32 %v4110_v10 }
 0x544   :  { %v10756_v33 = vpop.f32.mrf.mxu2  ;;  %v3140_v10 = vsel %vm435_vm2, %v10526_v62, %v3139_v34 }
 0x545   :  { %v10783_v36 = vperm.slane %v3140_v10, %v7790_v53 }
 0x547   :  { %v3167_v9 = vrot.slane %v10783_v36, 4 }
 0x548   :  { %v10767_v38 = vpop.f32.mrf.mxu1 }
 0x549   :  { %v3875_v11 = vpop.f32.mrf.mxu3  ;;  %v10772_v12 = vpop.eup %7241 }
 0x54a   :  { %v4179_v23 = vsel %vm3363_vm3, %v10772_v12, 0.0  ;;  %v3151_v11 = vrot.slane %v10558_v37, 4 }
 0x54b   :  { %4180 = vadd.xlane.f32.xlu1 %v4179_v23 }
 0x54c   :  { %v3932_v31 = vpop.f32.mrf.mxu2  ;;  %7169 = vrot.lane.b32.xlu0 %v7168_v54, %s7545_s19 }
 0x54d   :  { %v3980_v31 = vpop.xlane.xlu1 %3979 }
 0x54e   :  { %v4070_v54 = vsub.f32 %v10647_v28, %v3980_v31 }
 0x550   :  { %v3913_v24 = vpop.f32.mrf.mxu1  ;;  %v4104_v5 = vmul.f32 1.442695, %v4070_v54 }
 0x551   :  { %v10776_v55 = vpop.f32.mrf.mxu3  ;;  %v3152_v24 = vsel %vm435_vm2, %v10542_v32, %v3151_v11 }
 0x552   :  { %7243 = vpow2.f32 %v4104_v5  ;;  %v10792_v62 = vperm.slane %v3152_v24, %v7790_v53 }
 0x553   :  { %4039 = vmax.xlane.f32.xlu1 %v4038_v48 }
 0x554   :  { %v10796_v34 = vsel %vm435_vm2, %v10792_v62, %v3167_v9 }
 0x555   :  { %12875 = vst [vmem:[#allocation86_spill] sm:$0xff] %v10796_v34  ;;  %v3995_v28 = vpop.xlane.xlu1 %3994 }
 0x556   :  { %v3992_v37 = vpop.xlane.xlu0 %3991  ;;  %v4075_v48 = vsub.f32 %v10645_v16, %v3995_v28 }
 0x557   :  { %v4074_v10 = vsub.f32 %v10651_v51, %v3992_v37 }
 0x558   :  { %v4114_v11 = vmul.f32 1.442695, %v4075_v48 }
 0x559   :  { %v3951_v23 = vpop.f32.mrf.mxu3  ;;  %v4112_v31 = vmul.f32 1.442695, %v4074_v10 }
 0x55a   :  { %v10800_v23 = vpop.eup %7243 }
 0x55b   :  { %7245 = vpow2.f32 %v4112_v31  ;;  %v4170_v32 = vsel %vm3363_vm3, %v10800_v23, 0.0 }
 0x55c   :  { %4171 = vadd.xlane.f32.xlu2 %v4170_v32  ;;  %7247 = vpow2.f32 %v4114_v11  ;;  %v4035_v11 = vsel %vm3363_vm3, %v10708_v42, -inf }
 0x55e   :  { %v3998_v54 = vpop.xlane.xlu0 %3997 }
 0x55f   :  { %v4076_v24 = vsub.f32 %v10657_v63, %v3998_v54 }
 0x561   :  { %v10805_v5 = vpop.xlane.xlu2 %4018  ;;  %v10807_v9 = vpop.eup %7245  ;;  %v4116_v51 = vmul.f32 1.442695, %v4076_v24 }
 0x562   :  { %v4182_v16 = vsel %vm3363_vm3, %v10807_v9, 0.0  ;;  %v10811_v37 = vpop.eup %7247 }
 0x563   :  { %7249 = vpow2.f32 %v4116_v51  ;;  %4183 = vadd.xlane.f32.xlu1 %v4182_v16  ;;  %v4185_v48 = vsel %vm3363_vm3, %v10811_v37, 0.0 }
 0x569   :  { %v4001_v10 = vpop.xlane.xlu2 %4000  ;;  %v10813_v28 = vpop.eup %7249 }
 0x56a   :  { %v4077_v31 = vsub.f32 %v10667_v7, %v4001_v10  ;;  %v4188_v63 = vsel %vm3363_vm3, %v10813_v28, 0.0 }
 0x56b   :  { %4189 = vadd.xlane.f32.xlu2 %v4188_v63  ;;  %4186 = vadd.xlane.f32.xlu1 %v4185_v48 }
 0x56c   :  { %v4118_v32 = vmul.f32 1.442695, %v4077_v31  ;;  %v4041_v31 = vsel %vm3363_vm3, %v10693_v26, -inf }
 0x56d   :  { %v4007_v54 = vpop.xlane.xlu1 %4006 }
 0x56e   :  { %7251 = vpow2.f32 %v4118_v32 }
 0x571   :  { %v4004_v24 = vpop.xlane.xlu2 %4003 }
 0x572   :  { %v4078_v51 = vsub.f32 %v10663_v50, %v4004_v24  ;;  %v4079_v24 = vsub.f32 %v10671_v41, %v4007_v54 }
 0x574   :  { %v10823_v16 = vpop.eup %7251  ;;  %v4120_v7 = vmul.f32 1.442695, %v4078_v51 }
 0x575   :  { %v4191_v10 = vsel %vm3363_vm3, %v10823_v16, 0.0  ;;  %v4013_v63 = vpop.xlane.xlu1 %4012 }
 0x576   :  { %4036 = vmax.xlane.f32.xlu0 %v4035_v11  ;;  %7253 = vpow2.f32 %v4120_v7  ;;  %4192 = vadd.xlane.f32.xlu2 %v4191_v10  ;;  %v4081_v48 = vsub.f32 %v10675_v15, %v4013_v63  ;;  %v4047_v7 = vsel %vm3363_vm3, %v10726_v1, -inf  ;;  %v4122_v15 = vmul.f32 1.442695, %v4079_v24 }
 0x578   :  { %v4126_v11 = vmul.f32 1.442695, %v4081_v48 }
 0x579   :  { %v4010_v32 = vpop.xlane.xlu2 %4009 }
 0x57a   :  { %v4080_v34 = vsub.f32 %v10681_v45, %v4010_v32  ;;  %7255 = vpow2.f32 %v4126_v11 }
 0x57c   :  { %v10831_v50 = vpop.eup %7253  ;;  %v4124_v51 = vmul.f32 1.442695, %v4080_v34  ;;  %v4044_v34 = vsel %vm3363_vm3, %v10739_v22, -inf }
 0x57d   :  { %v4194_v10 = vsel %vm3363_vm3, %v10831_v50, 0.0 }
 0x57e   :  { %4042 = vmax.xlane.f32.xlu0 %v4041_v31  ;;  %7257 = vpow2.f32 %v4124_v51  ;;  %4048 = vmax.xlane.f32.xlu2 %v4047_v7  ;;  %v4083_v51 = vsub.f32 %v10661_v60, %v10805_v5  ;;  %v4050_v7 = vsel %vm3363_vm3, %v10747_v6, -inf }
 0x57f   :  { %4195 = vadd.xlane.f32.xlu1 %v4194_v10  ;;  %7259 = vpow2.f32 %v4122_v15 }
 0x580   :  { %v10838_v63 = vpop.eup %7255  ;;  %v4130_v10 = vmul.f32 1.442695, %v4083_v51  ;;  %v4053_v51 = vsel %vm3363_vm3, %v10710_v59, -inf }
 0x581   :  { %v4016_v31 = vpop.xlane.xlu2 %4015  ;;  %v4203_v45 = vsel %vm3363_vm3, %v10838_v63, 0.0 }
 0x582   :  { %v4082_v41 = vsub.f32 %v10687_v13, %v4016_v31 }
 0x584   :  { %v10842_v48 = vpop.eup %7257  ;;  %v4128_v11 = vmul.f32 1.442695, %v4082_v41 }
 0x585   :  { %v4200_v54 = vsel %vm3363_vm3, %v10842_v48, 0.0  ;;  %v10849_v24 = vpop.eup %7259 }
 0x586   :  { %4204 = vadd.xlane.f32.xlu2 %v4203_v45  ;;  %4201 = vadd.xlane.f32.xlu0 %v4200_v54  ;;  %7261 = vpow2.f32 %v4128_v11  ;;  %v4197_v13 = vsel %vm3363_vm3, %v10849_v24, 0.0 }
 0x587   :  { %4045 = vmax.xlane.f32.xlu1 %v4044_v34  ;;  %7263 = vpow2.f32 %v4130_v10 }
 0x58a   :  { %v4022_v32 = vpop.xlane.xlu0 %4021 }
 0x58b   :  { %v4084_v34 = vsub.f32 %v10695_v29, %v4022_v32 }
 0x58c   :  { %v10858_v41 = vpop.eup %7261 }
 0x58d   :  { %v4206_v11 = vsel %vm3363_vm3, %v10858_v41, 0.0  ;;  %v10867_v32 = vpop.eup %7263 }
 0x58e   :  { %4198 = vadd.xlane.f32.xlu2 %v4197_v13  ;;  %v4132_v13 = vmul.f32 1.442695, %v4084_v34  ;;  %v4059_v34 = vsel %vm3363_vm3, %v10756_v33, -inf }
 0x58f   :  { %4051 = vmax.xlane.f32.xlu1 %v4050_v7 }
 0x592   :  { %v4025_v15 = vpop.xlane.xlu0 %4024  ;;  %v4028_v31 = vpop.xlane.xlu1 %4027 }
 0x593   :  { %v4085_v45 = vsub.f32 %v10691_v61, %v4025_v15  ;;  %v4086_v60 = vsub.f32 %v10700_v0, %v4028_v31  ;;  %v2947_v61 = vrot.slane %v10457_v21, 4  ;;  %v4209_v21 = vsel %vm3363_vm3, %v10867_v32, 0.0 }
 0x595   :  { %v4134_v54 = vmul.f32 1.442695, %v4085_v45  ;;  %v4136_v7 = vmul.f32 1.442695, %v4086_v60  ;;  %v2948_v0 = vsel %vm435_vm2, %v10439_v25, %v2947_v61 }
 0x596   :  { %4207 = vadd.xlane.f32.xlu2 %v4206_v11  ;;  %v3339_v60 = vpack.c.bf16 %v2948_v0, %v2948_v0  ;;  %v3001_v0 = vrot.slane %v10382_v56, 4 }
 0x597   :  { %7265 = vpow2.f32 %v4134_v54  ;;  %4054 = vmax.xlane.f32.xlu1 %v4053_v51 }
 0x59a   :  { %v4166_v5 = vpop.xlane.xlu2 %4165  ;;  %v4031_v29 = vpop.xlane.xlu1 %4030 }
 0x59b   :  { %7267 = vrcp.f32 %v4166_v5  ;;  %v4087_v31 = vsub.f32 %v10677_v43, %v4031_v29  ;;  %v4513_v43 = vsel %vm4359_vm4, %v3339_v60, 0  ;;  %v4056_v29 = vsel %vm3363_vm3, %v10767_v38, -inf }
 0x59c   :  { %7269 = vpow2.f32 %v4132_v13 }
 0x59d   :  { %v10869_v10 = vpop.eup %7265  ;;  %7271 = vpow2.f32 %v4136_v7  ;;  %v4138_v25 = vmul.f32 1.442695, %v4087_v31  ;;  %v3002_v31 = vsel %vm435_vm2, %v10392_v18, %v3001_v0  ;;  %v4065_v0 = vsel %vm3363_vm3, %v10728_v58, -inf }
 0x59e   :  { %v4215_v15 = vsel %vm3363_vm3, %v10869_v10, 0.0  ;;  %4210 = vadd.xlane.f32.xlu2 %v4209_v21  ;;  %v3340_v60 = vpack.c.bf16 %v3002_v31, %v3002_v31 }
 0x59f   :  { %4216 = vadd.xlane.f32.xlu0 %v4215_v15  ;;  %4060 = vmax.xlane.f32.xlu1 %v4059_v34  ;;  %7273 = vpow2.f32 %v4138_v25 }
 0x5a1   :  { %v7268_v45 = vpop.eup %7267 }
 0x5a2   :  { %v4292_v54 = vmul.f32 %v7268_v45, %v10712_v4  ;;  %v10881_v11 = vpop.eup %7269 }
 0x5a3   :  { %v10885_v51 = vpop.eup %7271  ;;  %v4212_v13 = vsel %vm3363_vm3, %v10881_v11, 0.0 }
 0x5a4   :  { %v4324_v5 = vpack.c.bf16 %v4292_v54, %v4292_v54  ;;  %v4218_v7 = vsel %vm3363_vm3, %v10885_v51, 0.0 }
 0x5a5   :  { %v10894_v15 = vpop.eup %7273 }
 0x5a6   :  { %6797 = vmatmul.msk.bf16.vlgmr.msra.gmra.mxu1 %vm3363_vm3, %v4324_v5  ;;  %4219 = vadd.xlane.f32.xlu2 %v4218_v7  ;;  %v3163_v5 = vrot.slane %v10621_v20, 4  ;;  %v4221_v56 = vsel %vm3363_vm3, %v10894_v15, 0.0 }
 0x5a7   :  { %4522 = vmatpush.bf16.msra.mxu1 %v4513_v43  ;;  %4213 = vadd.xlane.f32.xlu0 %v4212_v13  ;;  %v4062_v43 = vsel %vm3363_vm3, %v10776_v55, -inf }
 0x5a8   :  { %4057 = vmax.xlane.f32.xlu1 %v4056_v29  ;;  %v3164_v20 = vsel %vm435_vm2, %v10598_v57, %v3163_v5 }
 0x5a9   :  { %v3343_v29 = vpack.c.bf16 %v3164_v20, %v3164_v20  ;;  %v3217_v20 = vrot.slane %v10550_v8, 4 }
 0x5aa   :  { %v4175_v61 = vpop.xlane.xlu1 %4174 }
 0x5ab   :  { %7275 = vrcp.f32 %v4175_v61  ;;  %v4169_v4 = vpop.xlane.xlu0 %4168  ;;  %v7167_v61 = vunpack.i.h.bf16 %v10706_v39  ;;  %v4589_v57 = vsel %vm4359_vm4, %v3343_v29, 0 }
 0x5ac   :  { %7277 = vrcp.f32 %v4169_v4  ;;  %v7166_v4 = vunpack.i.l.bf16 %v10706_v39 }
 0x5ae   :  { %4222 = vadd.xlane.f32.xlu2 %v4221_v56 }
 0x5b0   :  { %4063 = vmax.xlane.f32.xlu1 %v4062_v43 }
 0x5b1   :  { %v7276_v45 = vpop.eup %7275 }
 0x5b2   :  { %v7278_v21 = vpop.eup %7277  ;;  %v4295_v34 = vmul.f32 %v7276_v45, %v10731_v46  ;;  %v4532_v46 = vsel %vm4359_vm4, %v3340_v60, 0  ;;  %v2857_v45 = vrot.slane %v7167_v61, 4 }
 0x5b3   :  { %v4293_v54 = vmul.f32 %v7278_v21, %v10733_v2  ;;  %v4178_v25 = vpop.xlane.xlu1 %4177 }
 0x5b4   :  { %v4327_v13 = vpack.c.bf16 %v4295_v34, %v4295_v34  ;;  %7279 = vrcp.f32 %v4178_v25  ;;  %v2845_v34 = vrot.slane %v7166_v4, 4 }
 0x5b5   :  { %v4325_v18 = vpack.c.bf16 %v4293_v54, %v4293_v54 }
 0x5b6   :  { %6800 = vmatmul.msk.bf16.vlgmr.msrb.gmra.mxu0 %vm3363_vm3, %v4327_v13 }
 0x5b7   :  { %6798 = vmatmul.msk.bf16.vlgmr.msra.gmra.mxu2 %vm3363_vm3, %v4325_v18 }
 0x5b8   :  { %4541 = vmatpush.bf16.msra.mxu2 %v4532_v46  ;;  %4066 = vmax.xlane.f32.xlu1 %v4065_v0 }
 0x5ba   :  { %v7280_v2 = vpop.eup %7279 }
 0x5bb   :  { %v4296_v7 = vmul.f32 %v7280_v2, %v10741_v40 }
 0x5bd   :  { %v4328_v31 = vpack.c.bf16 %v4296_v7, %v4296_v7 }
 0x5be   :  { %v7170_v21 = vpop.permute.xlu0 %7169  ;;  %v4181_v46 = vpop.xlane.xlu1 %4180 }
 0x5bf   :  { %v7172_v54 = vunpack.i.h.bf16 %v7170_v21  ;;  %v7171_v60 = vunpack.i.l.bf16 %v7170_v21  ;;  %6801 = vmatmul.msk.bf16.vlgmr.msrb.gmra.mxu1 %vm3363_vm3, %v4328_v31  ;;  %7281 = vrcp.f32 %v4181_v46 }
 0x5c0   :  { %4598 = vmatpush.bf16.msrb.mxu1 %v4589_v57 }
 0x5c1   :  { %v2855_v25 = vrot.slane %v7172_v54, 4  ;;  %v2858_v39 = vsel %vm435_vm2, %v7172_v54, %v2857_v45  ;;  %v2843_v40 = vrot.slane %v7171_v60, 4  ;;  %v2846_v5 = vsel %vm435_vm2, %v7171_v60, %v2845_v34 }
 0x5c2   :  { %v2866_v56 = vperm.slane %v2858_v39, %v7754_v3  ;;  %v2854_v43 = vperm.slane %v2846_v5, %v7754_v3  ;;  %v3218_v60 = vsel %vm435_vm2, %v10535_v35, %v3217_v20 }
 0x5c3   :  { %v2856_v13 = vsel %vm435_vm2, %v2855_v25, %v7167_v61  ;;  %v2844_v18 = vsel %vm435_vm2, %v2843_v40, %v7166_v4  ;;  %v3344_v46 = vpack.c.bf16 %v3218_v60, %v3218_v60 }
 0x5c4   :  { %v2862_v2 = vperm.slane %v2856_v13, %v7754_v3  ;;  %v2879_v7 = vrot.slane %v2866_v56, 4  ;;  %v2850_v29 = vperm.slane %v2844_v18, %v7754_v3  ;;  %v2881_v0 = vrot.slane %v2854_v43, 4 }
 0x5c5   :  { %v7282_v5 = vpop.eup %7281 }
 0x5c6   :  { %v2867_v31 = vrot.slane %v2862_v2, 4  ;;  %v2869_v45 = vrot.slane %v2850_v29, 4  ;;  %v2880_v21 = vsel %vm435_vm2, %v2879_v7, %v2854_v43  ;;  %v2882_v34 = vsel %vm435_vm2, %v2866_v56, %v2881_v0  ;;  %v4040_v18 = vpop.xlane.xlu1 %4039 }
 0x5c7   :  { %v2886_v61 = vperm.slane %v2880_v21, %v7790_v53  ;;  %v2890_v4 = vperm.slane %v2882_v34, %v7790_v53  ;;  %v10942_v34 = vpop.xlane.xlu2 %4033 }
 0x5c8   :  { %v2868_v54 = vsel %vm435_vm2, %v2867_v31, %v2850_v29  ;;  %v2870_v8 = vsel %vm435_vm2, %v2862_v2, %v2869_v45  ;;  %v4297_v29 = vmul.f32 %v7282_v5, %v10772_v12  ;;  %v4090_v2 = vsub.f32 %v10724_v27, %v4040_v18 }
 0x5c9   :  { %v2874_v57 = vperm.slane %v2868_v54, %v7790_v53  ;;  %v2878_v25 = vperm.slane %v2870_v8, %v7790_v53  ;;  %v2895_v39 = vrot.slane %v2886_v61, 4  ;;  %v2897_v40 = vrot.slane %v2890_v4, 4 }
 0x5ca   :  { %v4329_v45 = vpack.c.bf16 %v4297_v29, %v4297_v29  ;;  %v4144_v21 = vmul.f32 1.442695, %v4090_v2  ;;  %v4608_v54 = vsel %vm4359_vm4, %v3344_v46, 0  ;;  %v3055_v2 = vrot.slane %v10529_v14, 4 }
 0x5cb   :  { %v2891_v43 = vrot.slane %v2874_v57, 4  ;;  %v2893_v56 = vrot.slane %v2878_v25, 4  ;;  %v2898_v13 = vsel %vm435_vm2, 0.0, %v2897_v40  ;;  %v2896_v20 = vsel %vm435_vm2, 0.0, %v2895_v39 }
 0x5cc   :  { %v3293_v7 = vrot.slane %v2898_v13, 4  ;;  %v3288_v8 = vsel %vm435_vm2, %v2897_v40, %v2886_v61  ;;  %7283 = vpow2.f32 %v4144_v21  ;;  %6802 = vmatmul.msk.bf16.vlgmr.msrb.gmra.mxu2 %vm3363_vm3, %v4329_v45  ;;  %v3109_v39 = vrot.slane %v10313_v19, 4 }
 0x5cd   :  { %v2894_v35 = vsel %vm435_vm2, 0.0, %v2893_v56  ;;  %v2892_v4 = vsel %vm435_vm2, 0.0, %v2891_v43  ;;  %v3277_v27 = vsel %vm435_vm2, %v2893_v56, %v2874_v57  ;;  %4617 = vmatpush.bf16.msrb.mxu2 %v4608_v54  ;;  %v10961_v61 = vperm.slane %v3288_v8, %v7754_v3 }
 0x5ce   :  { %v3282_v0 = vrot.slane %v2894_v35, 4  ;;  %v3294_v31 = vsel %vm435_vm2, %v3293_v7, %v2896_v20  ;;  %v10958_v5 = vperm.slane %v3277_v27, %v7754_v3  ;;  %v3110_v29 = vsel %vm435_vm2, %v10316_v17, %v3109_v39  ;;  %v12876_v39 = vld [vmem:[#allocation59_spill] sm:$0xff] }
 0x5cf   :  { %v10954_v25 = vperm.slane %v3294_v31, %v7754_v3  ;;  %v4172_v46 = vpop.xlane.xlu2 %4171  ;;  %v3056_v45 = vsel %vm435_vm2, %v10510_v44, %v3055_v2  ;;  %v2935_v21 = vrot.slane %v10409_v47, 4 }
 0x5d0   :  { %v3283_v12 = vsel %vm435_vm2, %v3282_v0, %v2892_v4  ;;  %7285 = vrcp.f32 %v4172_v46  ;;  %v3342_v0 = vpack.c.bf16 %v3110_v29, %v3110_v29  ;;  %v3341_v27 = vpack.c.bf16 %v3056_v45, %v3056_v45 }
 0x5d1   :  { %v10951_v60 = vperm.slane %v3283_v12, %v7754_v3  ;;  %v3311_v57 = vrot.slane %v10954_v25, 4  ;;  %v2923_v12 = vrot.slane %v10401_v49, 4 }
 0x5d2   :  { %v10969_v13 = vpop.eup %7283  ;;  %v4570_v17 = vsel %vm4359_vm4, %v3342_v0, 0  ;;  %v4551_v47 = vsel %vm4359_vm4, %v3341_v27, 0 }
 0x5d3   :  { %v3299_v40 = vrot.slane %v10951_v60, 4  ;;  %v3312_v56 = vsel %vm435_vm2, %v3311_v57, %v10961_v61  ;;  %v4230_v7 = vsel %vm3363_vm3, %v10969_v13, 0.0 }
 0x5d4   :  { %v3318_v18 = vperm.slane %v3312_v56, %v7790_v53  ;;  %4231 = vadd.xlane.f32.xlu2 %v4230_v7  ;;  %v12878_v7 = vld [vmem:[#allocation47_spill] sm:$0xff] }
 0x5d5   :  { %v3300_v43 = vsel %vm435_vm2, %v3299_v40, %v10958_v5  ;;  %v2936_v40 = vsel %vm435_vm2, %v12876_v39, %v2935_v21  ;;  %v2989_v49 = vrot.slane %v12878_v7, 4 }
 0x5d6   :  { %v3306_v19 = vperm.slane %v3300_v43, %v7790_v53  ;;  %v3323_v35 = vrot.slane %v3318_v18, 4  ;;  %v7286_v54 = vpop.eup %7285  ;;  %v4184_v8 = vpop.xlane.xlu1 %4183  ;;  %v10991_v44 = vperm.slane %v2936_v40, %v7790_v53  ;;  %v12877_v43 = vld [vmem:[#allocation48_spill] sm:$0xff] }
 0x5d7   :  { %v4294_v14 = vmul.f32 %v7286_v54, %v10800_v23  ;;  %7287 = vrcp.f32 %v4184_v8  ;;  %v2924_v23 = vsel %vm435_vm2, %v12877_v43, %v2923_v12  ;;  %v12882_v12 = vld [vmem:[#allocation82_spill] sm:$0xff] }
 0x5d8   :  { %v3324_v20 = vsel %vm435_vm2, %v3323_v35, %v3306_v19  ;;  %v10997_v29 = vperm.slane %v2924_v23, %v7790_v53  ;;  %v2949_v2 = vrot.slane %v10991_v44, 4  ;;  %v3325_v45 = vrot.slane %v3306_v19, 4  ;;  %v12884_v23 = vld [vmem:[#allocation90_spill] sm:$0xff] }
 0x5d9   :  { %v3338_v31 = vpack.c.bf16 %v3324_v20, %v3324_v20  ;;  %v4326_v57 = vpack.c.bf16 %v4294_v14, %v4294_v14  ;;  %v12879_v20 = vld [vmem:[#allocation85_spill] sm:$0xff]  ;;  %v12881_v14 = vld [vmem:[#allocation87_spill] sm:$0xff] }
 0x5da   :  { %v3271_v0 = vrot.slane %v12879_v20, 4  ;;  %v4088_v27 = vsub.f32 %v12881_v14, %v10942_v34  ;;  %v12886_v14 = vld [vmem:[#allocation91_spill] sm:$0xff] }
 0x5db   :  { %v4494_v4 = vsel %vm4359_vm4, %v3338_v31, 0  ;;  %6799 = vmatmul.msk.bf16.vlgmr.msra.gmra.mxu3 %vm3363_vm3, %v4326_v57  ;;  %v12883_v57 = vld [vmem:[#allocation24_spill] sm:$0xff] }
 0x5dc   :  { %4503 = vmatpush.bf16.msra.mxu0 %v4494_v4  ;;  %4560 = vmatpush.bf16.msra.mxu3 %v4551_v47  ;;  %v12880_v4 = vld [vmem:[#allocation52_spill] sm:$0xff]  ;;  %v3272_v39 = vsel %vm435_vm2, %v12882_v12, %v3271_v0  ;;  %v2977_v47 = vrot.slane %v12883_v57, 4  ;;  %v12887_v12 = vld [vmem:[#allocation89_spill] sm:$0xff] }
 0x5dd   :  { %v7288_v35 = vpop.eup %7287  ;;  %v2990_v54 = vsel %vm435_vm2, %v12880_v4, %v2989_v49 }
 0x5de   :  { %v4190_v56 = vpop.xlane.xlu2 %4189  ;;  %v4187_v46 = vpop.xlane.xlu1 %4186  ;;  %v4298_v8 = vmul.f32 %v7288_v35, %v10807_v9  ;;  %v11014_v43 = vperm.slane %v2990_v54, %v7790_v53  ;;  %v3043_v9 = vrot.slane %v12884_v23, 4  ;;  %v4140_v35 = vmul.f32 1.442695, %v4088_v27 }
 0x5df   :  { %7289 = vrcp.f32 %v4190_v56 }
 0x5e0   :  { %4579 = vmatpush.bf16.msrb.mxu0 %v4570_v17  ;;  %7291 = vrcp.f32 %v4187_v46  ;;  %v2950_v17 = vsel %vm435_vm2, %v2949_v2, %v10997_v29  ;;  %v4330_v34 = vpack.c.bf16 %v4298_v8, %v4298_v8  ;;  %v3345_v2 = vpack.c.bf16 %v3272_v39, %v3272_v39 }
 0x5e1   :  { %v3347_v7 = vpack.c.bf16 %v2950_v17, %v2950_v17  ;;  %v3003_v4 = vrot.slane %v11014_v43, 4  ;;  %v3031_v39 = vrot.slane %v12887_v12, 4 }
 0x5e2   :  { %v4627_v17 = vsel %vm4359_vm4, %v3345_v2, 0 }
 0x5e5   :  { %v7290_v19 = vpop.eup %7289 }
 0x5e6   :  { %v7292_v56 = vpop.eup %7291  ;;  %v4300_v46 = vmul.f32 %v7290_v19, %v10813_v28  ;;  %v3044_v28 = vsel %vm435_vm2, %v12886_v14, %v3043_v9  ;;  %v12888_v9 = vld [vmem:[#allocation55_spill] sm:$0xff] }
 0x5e7   :  { %v4299_v49 = vmul.f32 %v7292_v56, %v10811_v37  ;;  %v4665_v37 = vsel %vm4359_vm4, %v3347_v7, 0  ;;  %v3032_v56 = vsel %vm435_vm2, %v12888_v9, %v3031_v39  ;;  %v3219_v39 = vrot.slane %v10760_v52, 4 }
 0x5e8   :  { %v4332_v20 = vpack.c.bf16 %v4300_v46, %v4300_v46 }
 0x5e9   :  { %v4037_v31 = vpop.xlane.xlu0 %4036  ;;  %v4193_v0 = vpop.xlane.xlu2 %4192 }
 0x5ea   :  { %v4089_v21 = vsub.f32 %v10708_v42, %v4037_v31  ;;  %v3326_v42 = vsel %vm435_vm2, %v3318_v18, %v3325_v45  ;;  %v4331_v45 = vpack.c.bf16 %v4299_v49, %v4299_v49  ;;  %6805 = vmatmul.msk.bf16.vlgmr.msra.gmra.mxu1 %vm3363_vm3, %v4332_v20 }
 0x5eb   :  { %v3346_v31 = vpack.c.bf16 %v3326_v42, %v3326_v42  ;;  %6803 = vmatmul.msk.bf16.vlgmr.msrb.gmra.mxu3 %vm3363_vm3, %v4330_v34  ;;  %4674 = vmatpush.bf16.msra.mxu1 %v4665_v37 }
 0x5ec   :  { %v4142_v40 = vmul.f32 1.442695, %v4089_v21  ;;  %v12885_v21 = vld [vmem:[#allocation46_spill] sm:$0xff]  ;;  %4636 = vmatpush.bf16.msrb.mxu3 %v4627_v17  ;;  %6804 = vmatmul.msk.bf16.vlgmr.msra.gmra.mxu0 %vm3363_vm3, %v4331_v45 }
 0x5ed   :  { %v2978_v18 = vsel %vm435_vm2, %v12885_v21, %v2977_v47  ;;  %v4646_v57 = vsel %vm4359_vm4, %v3346_v31, 0  ;;  %v11052_v31 = vperm.slane %v3032_v56, %v7790_v53  ;;  %v3165_v56 = vrot.slane %v10792_v62, 4 }
 0x5ee   :  { %7293 = vpow2.f32 %v4142_v40  ;;  %v11030_v27 = vperm.slane %v2978_v18, %v7790_v53  ;;  %4655 = vmatpush.bf16.msra.mxu0 %v4646_v57  ;;  %v12890_v57 = vld [vmem:[#allocation51_spill] sm:$0xff] }
 0x5ef   :  { %7295 = vrcp.f32 %v4193_v0 }
 0x5f0   :  { %7297 = vpow2.f32 %v4140_v35  ;;  %v3004_v19 = vsel %vm435_vm2, %v3003_v4, %v11030_v27 }
 0x5f1   :  { %v4043_v54 = vpop.xlane.xlu0 %4042  ;;  %v4049_v7 = vpop.xlane.xlu2 %4048  ;;  %v3348_v49 = vpack.c.bf16 %v3004_v19, %v3004_v19 }
 0x5f2   :  { %v4091_v8 = vsub.f32 %v10693_v26, %v4043_v54  ;;  %v11038_v26 = vperm.slane %v3044_v28, %v7790_v53  ;;  %v4196_v34 = vpop.xlane.xlu1 %4195  ;;  %v4093_v35 = vsub.f32 %v10726_v1, %v4049_v7  ;;  %v12889_v54 = vld [vmem:[#allocation27_spill] sm:$0xff] }
 0x5f3   :  { %v3097_v14 = vrot.slane %v12889_v54, 4 }
 0x5f4   :  { %v11033_v40 = vpop.eup %7293  ;;  %v4146_v47 = vmul.f32 1.442695, %v4091_v8  ;;  %v3057_v2 = vrot.slane %v11038_v26, 4  ;;  %v4150_v21 = vmul.f32 1.442695, %v4093_v35 }
 0x5f5   :  { %v4227_v42 = vsel %vm3363_vm3, %v11033_v40, 0.0  ;;  %v7296_v23 = vpop.eup %7295 }
 0x5f6   :  { %7299 = vpow2.f32 %v4146_v47  ;;  %4228 = vadd.xlane.f32.xlu0 %v4227_v42  ;;  %v4301_v46 = vmul.f32 %v7296_v23, %v10823_v16  ;;  %v11049_v20 = vpop.eup %7297  ;;  %v4684_v16 = vsel %vm4359_vm4, %v3348_v49, 0  ;;  %v3058_v45 = vsel %vm435_vm2, %v3057_v2, %v11052_v31  ;;  %v12891_v23 = vld [vmem:[#allocation36_spill] sm:$0xff]  ;;  %v12892_v49 = vld [vmem:[#allocation23_spill] sm:$0xff] }
 0x5f7   :  { %7301 = vrcp.f32 %v4196_v34  ;;  %v4224_v1 = vsel %vm3363_vm3, %v11049_v20, 0.0  ;;  %v3349_v12 = vpack.c.bf16 %v3058_v45, %v3058_v45  ;;  %v3085_v47 = vrot.slane %v12890_v57, 4  ;;  %v12895_v57 = vld [vmem:[#allocation98_spill] sm:$0xff] }
 0x5f8   :  { %v4333_v0 = vpack.c.bf16 %v4301_v46, %v4301_v46  ;;  %7303 = vpow2.f32 %v4150_v21  ;;  %v3098_v9 = vsel %vm435_vm2, %v12891_v23, %v3097_v14  ;;  %v3220_v34 = vsel %vm435_vm2, %v3219_v39, %v10752_v30 }
 0x5f9   :  { %v4205_v8 = vpop.xlane.xlu2 %4204  ;;  %v4202_v42 = vpop.xlane.xlu0 %4201  ;;  %v4703_v52 = vsel %vm4359_vm4, %v3349_v12, 0  ;;  %v3086_v62 = vsel %vm435_vm2, %v12892_v49, %v3085_v47  ;;  %v3166_v2 = vsel %vm435_vm2, %v3165_v56, %v10783_v36  ;;  %v3352_v45 = vpack.c.bf16 %v3220_v34, %v3220_v34 }
 0x5fa   :  { %6806 = vmatmul.msk.bf16.vlgmr.msra.gmra.mxu2 %vm3363_vm3, %v4333_v0  ;;  %v4046_v17 = vpop.xlane.xlu1 %4045  ;;  %7305 = vrcp.f32 %v4205_v8  ;;  %v12893_v0 = vld [vmem:[#allocation60_spill] sm:$0xff]  ;;  %v11090_v14 = vperm.slane %v3086_v62, %v7790_v53 }
 0x5fb   :  { %4693 = vmatpush.bf16.msra.mxu2 %v4684_v16  ;;  %v4092_v19 = vsub.f32 %v10739_v22, %v4046_v17  ;;  %7307 = vrcp.f32 %v4202_v42  ;;  %v11079_v22 = vperm.slane %v3098_v9, %v7790_v53  ;;  %v3259_v21 = vrot.slane %v12893_v0, 4  ;;  %v12894_v17 = vld [vmem:[#allocation63_spill] sm:$0xff] }
 0x5fc   :  { %v11054_v18 = vpop.eup %7299  ;;  %v3247_v12 = vrot.slane %v12894_v17, 4 }
 0x5fd   :  { %v4233_v4 = vsel %vm3363_vm3, %v11054_v18, 0.0  ;;  %v7302_v28 = vpop.eup %7301  ;;  %v3260_v47 = vsel %vm435_vm2, %v12895_v57, %v3259_v21 }
 0x5fe   :  { %4225 = vadd.xlane.f32.xlu0 %v4224_v1  ;;  %4234 = vadd.xlane.f32.xlu2 %v4233_v4  ;;  %v4302_v37 = vmul.f32 %v7302_v28, %v10831_v50  ;;  %v11072_v7 = vpop.eup %7303  ;;  %v4148_v50 = vmul.f32 1.442695, %v4092_v19  ;;  %v3111_v28 = vrot.slane %v11079_v22, 4  ;;  %v3313_v19 = vrot.slane %v10961_v61, 4 }
 0x5ff   :  { %v4239_v35 = vsel %vm3363_vm3, %v11072_v7, 0.0  ;;  %v11113_v61 = vperm.slane %v3260_v47, %v7790_v53 }
 0x600   :  { %v4334_v46 = vpack.c.bf16 %v4302_v37, %v4302_v37  ;;  %7309 = vpow2.f32 %v4148_v50  ;;  %v7306_v16 = vpop.eup %7305  ;;  %v3351_v37 = vpack.c.bf16 %v3166_v2, %v3166_v2 }
 0x601   :  { %v7308_v30 = vpop.eup %7307  ;;  %v4305_v1 = vmul.f32 %v7306_v16, %v10838_v63  ;;  %v4199_v4 = vpop.xlane.xlu2 %4198  ;;  %v3301_v63 = vrot.slane %v10958_v5, 4  ;;  %v3273_v21 = vrot.slane %v11113_v61, 4 }
 0x602   :  { %6807 = vmatmul.msk.bf16.vlgmr.msra.gmra.mxu3 %vm3363_vm3, %v4334_v46  ;;  %v4052_v54 = vpop.xlane.xlu1 %4051  ;;  %7311 = vrcp.f32 %v4199_v4  ;;  %v4304_v8 = vmul.f32 %v7308_v30, %v10842_v48  ;;  %v3112_v48 = vsel %vm435_vm2, %v3111_v28, %v11090_v14  ;;  %v3314_v46 = vsel %vm435_vm2, %v10954_v25, %v3313_v19 }
 0x603   :  { %4712 = vmatpush.bf16.msra.mxu3 %v4703_v52  ;;  %v4094_v36 = vsub.f32 %v10747_v6, %v4052_v54  ;;  %v4337_v39 = vpack.c.bf16 %v4305_v1, %v4305_v1  ;;  %v4760_v6 = vsel %vm4359_vm4, %v3352_v45, 0  ;;  %v3302_v56 = vsel %vm435_vm2, %v10951_v60, %v3301_v63  ;;  %v12896_v52 = vld [vmem:[#allocation88_spill] sm:$0xff] }
 0x604   :  { %v4336_v9 = vpack.c.bf16 %v4304_v8, %v4304_v8  ;;  %v4741_v5 = vsel %vm4359_vm4, %v3351_v37, 0  ;;  %v3248_v34 = vsel %vm435_vm2, %v12896_v52, %v3247_v12  ;;  %v3350_v2 = vpack.c.bf16 %v3112_v48, %v3112_v48 }
 0x605   :  { %v4152_v23 = vmul.f32 1.442695, %v4094_v36  ;;  %v11122_v0 = vperm.slane %v3248_v34, %v7790_v53  ;;  %v11134_v4 = vperm.slane %v3314_v46, %v7790_v53  ;;  %v3005_v37 = vrot.slane %v11030_v27, 4 }
 0x606   :  { %4240 = vadd.xlane.f32.xlu0 %v4239_v35  ;;  %v11100_v42 = vpop.eup %7309  ;;  %6809 = vmatmul.msk.bf16.vlgmr.msrb.gmra.mxu1 %vm3363_vm3, %v4336_v9  ;;  %v4722_v1 = vsel %vm4359_vm4, %v3350_v2, 0  ;;  %v11140_v57 = vperm.slane %v3302_v56, %v7790_v53 }
 0x607   :  { %7313 = vpow2.f32 %v4152_v23  ;;  %v4236_v50 = vsel %vm3363_vm3, %v11100_v42, 0.0  ;;  %4750 = vmatpush.bf16.msrb.mxu1 %v4741_v5  ;;  %v3327_v47 = vrot.slane %v11134_v4, 4  ;;  %v3006_v27 = vsel %vm435_vm2, %v11014_v43, %v3005_v37 }
 0x608   :  { %v7312_v60 = vpop.eup %7311  ;;  %v3356_v46 = vpack.c.bf16 %v3006_v27, %v3006_v27  ;;  %v2951_v43 = vrot.slane %v10997_v29, 4 }
 0x609   :  { %v4303_v25 = vmul.f32 %v7312_v60, %v10849_v24  ;;  %v4208_v49 = vpop.xlane.xlu2 %4207 }
 0x60a   :  { %6810 = vmatmul.msk.bf16.vlgmr.msrb.gmra.mxu2 %vm3363_vm3, %v4337_v39  ;;  %v4055_v62 = vpop.xlane.xlu1 %4054  ;;  %7315 = vrcp.f32 %v4208_v49 }
 0x60b   :  { %4769 = vmatpush.bf16.msrb.mxu2 %v4760_v6  ;;  %v4095_v35 = vsub.f32 %v10710_v59, %v4055_v62  ;;  %v4335_v16 = vpack.c.bf16 %v4303_v25, %v4303_v25  ;;  %v3274_v59 = vsel %vm435_vm2, %v3273_v21, %v11122_v0  ;;  %v3328_v6 = vsel %vm435_vm2, %v3327_v47, %v11140_v57 }
 0x60c   :  { %v3353_v12 = vpack.c.bf16 %v3274_v59, %v3274_v59  ;;  %v3354_v25 = vpack.c.bf16 %v3328_v6, %v3328_v6  ;;  %v3059_v62 = vrot.slane %v11052_v31, 4 }
 0x60d   :  { %v11125_v45 = vpop.eup %7313  ;;  %v4154_v30 = vmul.f32 1.442695, %v4095_v35  ;;  %6808 = vmatmul.msk.bf16.vlgmr.msrb.gmra.mxu0 %vm3363_vm3, %v4335_v16 }
 0x60e   :  { %4237 = vadd.xlane.f32.xlu0 %v4236_v50  ;;  %v4242_v24 = vsel %vm3363_vm3, %v11125_v45, 0.0  ;;  %4731 = vmatpush.bf16.msrb.mxu0 %v4722_v1  ;;  %v4798_v21 = vsel %vm4359_vm4, %v3354_v25, 0  ;;  %v3060_v16 = vsel %vm435_vm2, %v11038_v26, %v3059_v62  ;;  %v3275_v25 = vrot.slane %v11122_v0, 4 }
 0x60f   :  { %7317 = vpow2.f32 %v4154_v30  ;;  %4243 = vadd.xlane.f32.xlu1 %v4242_v24 }
 0x610   :  { %v7316_v28 = vpop.eup %7315 }
 0x611   :  { %v4306_v36 = vmul.f32 %v7316_v28, %v10858_v41  ;;  %v4211_v8 = vpop.xlane.xlu2 %4210  ;;  %v4779_v41 = vsel %vm4359_vm4, %v3353_v12, 0 }
 0x612   :  { %v4217_v54 = vpop.xlane.xlu0 %4216  ;;  %v4061_v17 = vpop.xlane.xlu1 %4060 }
 0x613   :  { %7319 = vrcp.f32 %v4217_v54  ;;  %v4097_v39 = vsub.f32 %v10756_v33, %v4061_v17  ;;  %v4338_v63 = vpack.c.bf16 %v4306_v36, %v4306_v36  ;;  %v3357_v36 = vpack.c.bf16 %v3060_v16, %v3060_v16 }
 0x614   :  { %7321 = vrcp.f32 %v4211_v8  ;;  %v3113_v17 = vrot.slane %v11090_v14, 4 }
 0x615   :  { %v11143_v19 = vpop.eup %7317  ;;  %v4158_v23 = vmul.f32 1.442695, %v4097_v39  ;;  %6811 = vmatmul.msk.bf16.vlgmr.msrb.gmra.mxu3 %vm3363_vm3, %v4338_v63 }
 0x616   :  { %v4245_v9 = vsel %vm3363_vm3, %v11143_v19, 0.0  ;;  %4788 = vmatpush.bf16.msrb.mxu3 %v4779_v41 }
 0x617   :  { %7323 = vpow2.f32 %v4158_v23  ;;  %4246 = vadd.xlane.f32.xlu2 %v4245_v9 }
 0x619   :  { %v7320_v33 = vpop.eup %7319  ;;  %v4220_v34 = vpop.xlane.xlu2 %4219 }
 0x61a   :  { %v4309_v48 = vmul.f32 %v7320_v33, %v10869_v10  ;;  %v4214_v56 = vpop.xlane.xlu0 %4213  ;;  %v7322_v5 = vpop.eup %7321  ;;  %v4836_v10 = vsel %vm4359_vm4, %v3356_v46, 0 }
 0x61b   :  { %7325 = vrcp.f32 %v4214_v56  ;;  %v4307_v52 = vmul.f32 %v7322_v5, %v10867_v32  ;;  %v4058_v60 = vpop.xlane.xlu1 %4057  ;;  %v2952_v32 = vsel %vm435_vm2, %v10991_v44, %v2951_v43 }
 0x61c   :  { %v4341_v50 = vpack.c.bf16 %v4309_v48, %v4309_v48  ;;  %7327 = vrcp.f32 %v4220_v34  ;;  %v4096_v49 = vsub.f32 %v10767_v38, %v4058_v60  ;;  %v3355_v24 = vpack.c.bf16 %v2952_v32, %v2952_v32 }
 0x61d   :  { %v4339_v2 = vpack.c.bf16 %v4307_v52, %v4307_v52  ;;  %v11160_v35 = vpop.eup %7323 }
 0x61e   :  { %6814 = vmatmul.msk.bf16.vlgmr.msra.gmra.mxu2 %vm3363_vm3, %v4341_v50  ;;  %v4156_v29 = vmul.f32 1.442695, %v4096_v49  ;;  %v4251_v38 = vsel %vm3363_vm3, %v11160_v35, 0.0  ;;  %v4817_v26 = vsel %vm4359_vm4, %v3355_v24, 0  ;;  %v3276_v49 = vsel %vm435_vm2, %v11113_v61, %v3275_v25 }
 0x61f   :  { %4845 = vmatpush.bf16.msra.mxu2 %v4836_v10  ;;  %6812 = vmatmul.msk.bf16.vlgmr.msra.gmra.mxu0 %vm3363_vm3, %v4339_v2 }
 0x620   :  { %7329 = vpow2.f32 %v4156_v29  ;;  %4807 = vmatpush.bf16.msra.mxu0 %v4798_v21  ;;  %4252 = vadd.xlane.f32.xlu0 %v4251_v38  ;;  %v3361_v29 = vpack.c.bf16 %v3276_v49, %v3276_v49 }
 0x621   :  { %v7326_v31 = vpop.eup %7325  ;;  %v4223_v28 = vpop.xlane.xlu2 %4222 }
 0x622   :  { %v4308_v1 = vmul.f32 %v7326_v31, %v10881_v11  ;;  %v7328_v44 = vpop.eup %7327  ;;  %7331 = vrcp.f32 %v4223_v28  ;;  %v4931_v21 = vsel %vm4359_vm4, %v3361_v29, 0 }
 0x623   :  { %v11170_v30 = vpop.f32.mrf.mxu1  ;;  %v4310_v54 = vmul.f32 %v7328_v44, %v10885_v51  ;;  %v4064_v37 = vpop.xlane.xlu1 %4063  ;;  %v4855_v51 = vsel %vm4359_vm4, %v3357_v36, 0 }
 0x624   :  { %v4340_v59 = vpack.c.bf16 %v4308_v1, %v4308_v1  ;;  %v4098_v8 = vsub.f32 %v10776_v55, %v4064_v37  ;;  %v3114_v55 = vsel %vm435_vm2, %v11079_v22, %v3113_v17  ;;  %v3329_v37 = vrot.slane %v11140_v57, 4 }
 0x625   :  { %v4342_v12 = vpack.c.bf16 %v4310_v54, %v4310_v54  ;;  %v3358_v41 = vpack.c.bf16 %v3114_v55, %v3114_v55 }
 0x626   :  { %6813 = vmatmul.msk.bf16.vlgmr.msra.gmra.mxu1 %vm3363_vm3, %v4340_v59  ;;  %v11178_v39 = vpop.eup %7329  ;;  %v4160_v11 = vmul.f32 1.442695, %v4098_v8  ;;  %v12897_v59 = vld [vmem:[#allocation70_spill] sm:$0xff] }
 0x627   :  { %4826 = vmatpush.bf16.msra.mxu1 %v4817_v26  ;;  %6815 = vmatmul.msk.bf16.vlgmr.msra.gmra.mxu3 %vm3363_vm3, %v4342_v12  ;;  %v4248_v47 = vsel %vm3363_vm3, %v11178_v39, 0.0  ;;  %v4874_v46 = vsel %vm4359_vm4, %v3358_v41, 0  ;;  %v3360_v54 = vpack.c.bf16 %v12897_v59, %v12897_v59 }
 0x628   :  { %7333 = vpow2.f32 %v4160_v11  ;;  %4864 = vmatpush.bf16.msra.mxu3 %v4855_v51  ;;  %4249 = vadd.xlane.f32.xlu1 %v4248_v47  ;;  %v7332_v63 = vpop.eup %7331 }
 0x629   :  { %v4311_v23 = vmul.f32 %v7332_v63, %v10894_v15  ;;  %v4912_v8 = vsel %vm4359_vm4, %v3360_v54, 0  ;;  %v12898_v63 = vld [vmem:[#allocation86_spill] sm:$0xff] }
 0x62b   :  { %v4374_v14 = vpop.f32.mrf.mxu1  ;;  %v4067_v27 = vpop.xlane.xlu1 %4066  ;;  %v4343_v33 = vpack.c.bf16 %v4311_v23, %v4311_v23  ;;  %v3359_v23 = vpack.c.bf16 %v12898_v63, %v12898_v63 }
 0x62c   :  { %v4099_v9 = vsub.f32 %v10728_v58, %v4067_v27 }
 0x62e   :  { %v11188_v6 = vpop.eup %7333  ;;  %v4162_v48 = vmul.f32 1.442695, %v4099_v9 }
 0x62f   :  { %6816 = vmatmul.msk.bf16.vlgmr.msrb.gmra.mxu0 %vm3363_vm3, %v4343_v33  ;;  %v4254_v22 = vsel %vm3363_vm3, %v11188_v6, 0.0  ;;  %v4893_v33 = vsel %vm4359_vm4, %v3359_v23, 0 }
 0x630   :  { %7335 = vpow2.f32 %v4162_v48  ;;  %4883 = vmatpush.bf16.msrb.mxu0 %v4874_v46  ;;  %4255 = vadd.xlane.f32.xlu2 %v4254_v22 }
 0x633   :  { %v11190_v56 = vpop.f32.mrf.mxu0 }
 0x636   :  { %v11198_v5 = vpop.eup %7335 }
 0x637   :  { %v4257_v43 = vsel %vm3363_vm3, %v11198_v5, 0.0 }
 0x638   :  { %4258 = vadd.xlane.f32.xlu0 %v4257_v43 }
 0x63a   :  { %v11196_v15 = vpop.f32.mrf.mxu2 }
 0x63b   :  { %v4431_v58 = vpop.f32.mrf.mxu0 }
 0x63c   :  { %v11202_v50 = vpop.f32.mrf.mxu1 }
 0x642   :  { %v4393_v52 = vpop.f32.mrf.mxu2 }
 0x644   :  { %v4450_v34 = vpop.f32.mrf.mxu1 }
 0x647   :  { %v4232_v60 = vpop.xlane.xlu2 %4231 }
 0x648   :  { %7337 = vrcp.f32 %v4232_v60 }
 0x64e   :  { %v7338_v62 = vpop.eup %7337 }
 0x64f   :  { %v4314_v2 = vmul.f32 %v7338_v62, %v10969_v13  ;;  %v11208_v10 = vpop.f32.mrf.mxu2 }
 0x651   :  { %v4346_v32 = vpack.c.bf16 %v4314_v2, %v4314_v2 }
 0x653   :  { %6819 = vmatmul.msk.bf16.vlgmr.msrb.gmra.mxu3 %vm3363_vm3, %v4346_v32 }
 0x654   :  { %4940 = vmatpush.bf16.msrb.mxu3 %v4931_v21 }
 0x657   :  { %v4469_v38 = vpop.f32.mrf.mxu2 }
 0x65e   :  { %v11212_v31 = vpop.f32.mrf.mxu3 }
 0x666   :  { %v4412_v0 = vpop.f32.mrf.mxu3 }
 0x667   :  { %v11214_v1 = vpop.f32.mrf.mxu1 }
 0x669   :  { %v4229_v16 = vpop.xlane.xlu0 %4228  ;;  %v11216_v24 = vpop.f32.mrf.mxu0 }
 0x66a   :  { %7339 = vrcp.f32 %v4229_v16 }
 0x66e   :  { %v11224_v17 = vpop.f32.mrf.mxu3 }
 0x66f   :  { %v4526_v12 = vpop.f32.mrf.mxu1 }
 0x670   :  { %v7340_v61 = vpop.eup %7339 }
 0x671   :  { %v4313_v13 = vmul.f32 %v7340_v61, %v11033_v40  ;;  %v4235_v44 = vpop.xlane.xlu2 %4234  ;;  %v4226_v28 = vpop.xlane.xlu0 %4225  ;;  %v3330_v40 = vsel %vm435_vm2, %v11134_v4, %v3329_v37 }
 0x672   :  { %7341 = vrcp.f32 %v4235_v44  ;;  %v4507_v51 = vpop.f32.mrf.mxu0  ;;  %v3362_v55 = vpack.c.bf16 %v3330_v40, %v3330_v40 }
 0x673   :  { %v4345_v36 = vpack.c.bf16 %v4313_v13, %v4313_v13  ;;  %7343 = vrcp.f32 %v4226_v28 }
 0x674   :  { %v4950_v4 = vsel %vm4359_vm4, %v3362_v55, 0 }
 0x675   :  { %6818 = vmatmul.msk.bf16.vlgmr.msrb.gmra.mxu2 %vm3363_vm3, %v4345_v36 }
 0x676   :  { %4921 = vmatpush.bf16.msrb.mxu2 %v4912_v8  ;;  %v4488_v9 = vpop.f32.mrf.mxu3 }
 0x678   :  { %v7342_v26 = vpop.eup %7341 }
 0x679   :  { %v7344_v11 = vpop.eup %7343  ;;  %v4315_v47 = vmul.f32 %v7342_v26, %v11054_v18  ;;  %v4241_v14 = vpop.xlane.xlu0 %4240 }
 0x67a   :  { %v4312_v57 = vmul.f32 %v7344_v11, %v11049_v20  ;;  %7345 = vrcp.f32 %v4241_v14 }
 0x67b   :  { %v4347_v27 = vpack.c.bf16 %v4315_v47, %v4315_v47 }
 0x67c   :  { %v4344_v41 = vpack.c.bf16 %v4312_v57, %v4312_v57 }
 0x67d   :  { %6820 = vmatmul.msk.bf16.vlgmr.msra.gmra.mxu0 %vm3363_vm3, %v4347_v27  ;;  %v11236_v18 = vpop.f32.mrf.mxu2 }
 0x67e   :  { %6817 = vmatmul.msk.bf16.vlgmr.msrb.gmra.mxu1 %vm3363_vm3, %v4344_v41  ;;  %4959 = vmatpush.bf16.msra.mxu0 %v4950_v4 }
 0x67f   :  { %4902 = vmatpush.bf16.msrb.mxu1 %v4893_v33 }
 0x680   :  { %v7346_v20 = vpop.eup %7345 }
 0x681   :  { %v4317_v48 = vmul.f32 %v7346_v20, %v11072_v7  ;;  %v4238_v46 = vpop.xlane.xlu0 %4237 }
 0x682   :  { %7347 = vrcp.f32 %v4238_v46  ;;  %v4244_v52 = vpop.xlane.xlu1 %4243 }
 0x683   :  { %v4349_v22 = vpack.c.bf16 %v4317_v48, %v4317_v48  ;;  %7349 = vrcp.f32 %v4244_v52  ;;  %v11243_v25 = vpop.f32.mrf.mxu1 }
 0x685   :  { %6822 = vmatmul.msk.bf16.vlgmr.msra.gmra.mxu2 %vm3363_vm3, %v4349_v22  ;;  %v4545_v58 = vpop.f32.mrf.mxu2  ;;  %v11240_v43 = vpop.f32.mrf.mxu3 }
 0x688   :  { %v7348_v34 = vpop.eup %7347 }
 0x689   :  { %v4316_v60 = vmul.f32 %v7348_v34, %v11100_v42  ;;  %v7350_v62 = vpop.eup %7349 }
 0x68a   :  { %v4318_v29 = vmul.f32 %v7350_v62, %v11125_v45  ;;  %v4247_v32 = vpop.xlane.xlu2 %4246  ;;  %v11249_v21 = vpop.f32.mrf.mxu0  ;;  %v5023_v62 = vrot.slane %v11196_v15, 4 }
 0x68b   :  { %v4348_v49 = vpack.c.bf16 %v4316_v60, %v4316_v60  ;;  %7351 = vrcp.f32 %v4247_v32  ;;  %v4602_v16 = vpop.f32.mrf.mxu1  ;;  %v4967_v60 = vrot.slane %v11170_v30, 4  ;;  %v5247_v32 = vrot.slane %v11208_v10, 4 }
 0x68c   :  { %v4350_v38 = vpack.c.bf16 %v4318_v29, %v4318_v29  ;;  %v5079_v29 = vrot.slane %v11212_v31, 4 }
 0x68d   :  { %v4564_v7 = vpop.f32.mrf.mxu3  ;;  %v11246_v2 = vpop.f32.mrf.mxu2 }
 0x68e   :  { %6821 = vmatmul.msk.bf16.vlgmr.msra.gmra.mxu1 %vm3363_vm3, %v4348_v49  ;;  %6823 = vmatmul.msk.bf16.vlgmr.msra.gmra.mxu3 %vm3363_vm3, %v4350_v38  ;;  %v5135_v49 = vrot.slane %v11190_v56, 4 }
 0x691   :  { %v7352_v42 = vpop.eup %7351 }
 0x692   :  { %v4319_v61 = vmul.f32 %v7352_v42, %v11143_v19  ;;  %v4583_v44 = vpop.f32.mrf.mxu0 }
 0x693   :  { %v4253_v13 = vpop.xlane.xlu0 %4252  ;;  %v5303_v44 = vrot.slane %v11224_v17, 4 }
 0x694   :  { %7353 = vrcp.f32 %v4253_v13  ;;  %v4351_v59 = vpack.c.bf16 %v4319_v61, %v4319_v61  ;;  %v4979_v13 = vrot.slane %v11214_v1, 4 }
 0x695   :  { %v4621_v0 = vpop.f32.mrf.mxu2 }
 0x696   :  { %6824 = vmatmul.msk.bf16.vlgmr.msrb.gmra.mxu0 %vm3363_vm3, %v4351_v59  ;;  %v5359_v59 = vrot.slane %v11216_v24, 4 }
 0x698   :  { %v11254_v45 = vpop.f32.mrf.mxu3 }
 0x69a   :  { %v7354_v54 = vpop.eup %7353 }
 0x69b   :  { %v4321_v28 = vmul.f32 %v7354_v54, %v11160_v35  ;;  %v4250_v37 = vpop.xlane.xlu1 %4249  ;;  %v5035_v54 = vrot.slane %v11236_v18, 4 }
 0x69c   :  { %7355 = vrcp.f32 %v4250_v37  ;;  %v11257_v36 = vpop.f32.mrf.mxu0 }
 0x69d   :  { %v4353_v8 = vpack.c.bf16 %v4321_v28, %v4321_v28  ;;  %v5091_v28 = vrot.slane %v11240_v43, 4 }
 0x69f   :  { %6826 = vmatmul.msk.bf16.vlgmr.msrb.gmra.mxu2 %vm3363_vm3, %v4353_v8 }
 0x6a0   :  { %v4640_v26 = vpop.f32.mrf.mxu3 }
 0x6a1   :  { %v4695_v40 = vpop.f32.mrf.mxu2 }
 0x6a2   :  { %v7356_v19 = vpop.eup %7355  ;;  %v5021_v52 = vrot.slane %v4695_v40, 4  ;;  %v5024_v42 = vsel %vm435_vm2, %v4695_v40, %v5023_v62 }
 0x6a3   :  { %v4676_v12 = vpop.f32.mrf.mxu1  ;;  %v4320_v11 = vmul.f32 %v7356_v19, %v11178_v39  ;;  %v4256_v51 = vpop.xlane.xlu2 %4255  ;;  %v5203_v19 = vrot.slane %v11243_v25, 4 }
 0x6a4   :  { %7357 = vrcp.f32 %v4256_v51  ;;  %v4659_v47 = vpop.f32.mrf.mxu0  ;;  %v4965_v7 = vrot.slane %v4676_v12, 4  ;;  %v5022_v16 = vsel %vm435_vm2, %v5021_v52, %v11196_v15  ;;  %v4968_v8 = vsel %vm435_vm2, %v4676_v12, %v4967_v60 }
 0x6a5   :  { %v4352_v55 = vpack.c.bf16 %v4320_v11, %v4320_v11  ;;  %v11290_v26 = vperm.slane %v5022_v16, %v7754_v3  ;;  %v5032_v11 = vperm.slane %v5024_v42, %v7754_v3 }
 0x6a6   :  { %v4966_v37 = vsel %vm435_vm2, %v4965_v7, %v11170_v30 }
 0x6a7   :  { %6825 = vmatmul.msk.bf16.vlgmr.msrb.gmra.mxu1 %vm3363_vm3, %v4352_v55 }
 0x6a9   :  { %v4697_v35 = vpop.f32.mrf.mxu2 }
 0x6aa   :  { %v7358_v57 = vpop.eup %7357  ;;  %v4714_v63 = vpop.f32.mrf.mxu3 }
 0x6ab   :  { %v4678_v14 = vpop.f32.mrf.mxu1  ;;  %v4322_v23 = vmul.f32 %v7358_v57, %v11188_v6  ;;  %v4259_v27 = vpop.xlane.xlu0 %4258  ;;  %v5077_v38 = vrot.slane %v4714_v63, 4  ;;  %v5080_v15 = vsel %vm435_vm2, %v4714_v63, %v5079_v29  ;;  %v5259_v57 = vrot.slane %v11246_v2, 4 }
 0x6ac   :  { %7359 = vrcp.f32 %v4259_v27  ;;  %v4733_v41 = vpop.f32.mrf.mxu0  ;;  %v11303_v14 = vperm.slane %v4966_v37, %v7754_v3  ;;  %v11306_v63 = vperm.slane %v4968_v8, %v7754_v3 }
 0x6ad   :  { %v4354_v4 = vpack.c.bf16 %v4322_v23, %v4322_v23  ;;  %v5133_v0 = vrot.slane %v4733_v41, 4  ;;  %v5078_v51 = vsel %vm435_vm2, %v5077_v38, %v11212_v31  ;;  %v5136_v30 = vsel %vm435_vm2, %v4733_v41, %v5135_v49 }
 0x6ae   :  { %v11309_v31 = vperm.slane %v5080_v15, %v7754_v3  ;;  %v5147_v23 = vrot.slane %v11249_v21, 4  ;;  %v11313_v27 = vperm.slane %v5078_v51, %v7754_v3  ;;  %v5003_v52 = vrot.slane %v11306_v63, 4 }
 0x6af   :  { %6827 = vmatmul.msk.bf16.vlgmr.msrb.gmra.mxu3 %vm3363_vm3, %v4354_v4  ;;  %v5134_v47 = vsel %vm435_vm2, %v5133_v0, %v11190_v56 }
 0x6b0   :  { %v11317_v4 = vperm.slane %v5134_v47, %v7754_v3  ;;  %v5115_v60 = vrot.slane %v11309_v31, 4  ;;  %v5103_v62 = vrot.slane %v11313_v27, 4 }
 0x6b2   :  { %v7360_v9 = vpop.eup %7359  ;;  %v4716_v39 = vpop.f32.mrf.mxu3  ;;  %v5159_v38 = vrot.slane %v11317_v4, 4 }
 0x6b3   :  { %v4323_v33 = vmul.f32 %v7360_v9, %v11198_v5  ;;  %v5191_v5 = vrot.slane %v11202_v50, 4  ;;  %v11320_v9 = vperm.slane %v5136_v30, %v7754_v3 }
 0x6b4   :  { %v4735_v20 = vpop.f32.mrf.mxu0 }
 0x6b5   :  { %v4355_v48 = vpack.c.bf16 %v4323_v33, %v4323_v33  ;;  %v5315_v20 = vrot.slane %v11254_v45, 4  ;;  %v5171_v16 = vrot.slane %v11320_v9, 4 }
 0x6b7   :  { %6828 = vmatmul.msk.bf16.vlgmr.msra.gmra.mxu0 %vm3363_vm3, %v4355_v48  ;;  %v5371_v48 = vrot.slane %v11257_v36, 4 }
 0x6d6   :  { %v4790_v46 = vpop.f32.mrf.mxu3 }
 0x6d7   :  { %v5301_v61 = vrot.slane %v4790_v46, 4  ;;  %v5304_v55 = vsel %vm435_vm2, %v4790_v46, %v5303_v44  ;;  %v5047_v46 = vrot.slane %v11290_v26, 4 }
 0x6d8   :  { %v11326_v33 = vperm.slane %v5304_v55, %v7754_v3 }
 0x6d9   :  { %v5302_v12 = vsel %vm435_vm2, %v5301_v61, %v11224_v17 }
 0x6da   :  { %v11323_v39 = vperm.slane %v5302_v12, %v7754_v3  ;;  %v5339_v0 = vrot.slane %v11326_v33, 4 }
 0x6dc   :  { %v5327_v42 = vrot.slane %v11323_v39, 4 }
 0x6de   :  { %v4792_v22 = vpop.f32.mrf.mxu3 }
 0x6df   :  { %v5059_v22 = vrot.slane %v5032_v11, 4 }
 0x6f8   :  { %v4771_v58 = vpop.f32.mrf.mxu2 }
 0x6f9   :  { %v5245_v17 = vrot.slane %v4771_v58, 4  ;;  %v5248_v41 = vsel %vm435_vm2, %v4771_v58, %v5247_v32  ;;  %v4991_v58 = vrot.slane %v11303_v14, 4 }
 0x6fa   :  { %v11266_v34 = vpop.f32.mrf.mxu0  ;;  %v11335_v49 = vperm.slane %v5248_v41, %v7754_v3 }
 0x6fb   :  { %v11268_v6 = vpop.f32.mrf.mxu1  ;;  %v5246_v7 = vsel %vm435_vm2, %v5245_v17, %v11208_v10  ;;  %v5357_v32 = vrot.slane %v11266_v34, 4  ;;  %v5360_v37 = vsel %vm435_vm2, %v11266_v34, %v5359_v59 }
 0x6fc   :  { %v5192_v29 = vsel %vm435_vm2, %v11268_v6, %v5191_v5  ;;  %v5189_v44 = vrot.slane %v11268_v6, 4  ;;  %v11352_v5 = vperm.slane %v5246_v7, %v7754_v3  ;;  %v5283_v15 = vrot.slane %v11335_v49, 4 }
 0x6fd   :  { %v5358_v6 = vsel %vm435_vm2, %v5357_v32, %v11216_v24  ;;  %v11365_v30 = vperm.slane %v5360_v37, %v7754_v3 }
 0x6fe   :  { %v5271_v32 = vrot.slane %v11352_v5, 4 }
 0x700   :  { %v4773_v40 = vpop.f32.mrf.mxu2 }
 0x701   :  { %v11356_v40 = vperm.slane %v5192_v29, %v7754_v3 }
 0x702   :  { %v4811_v35 = vpop.f32.mrf.mxu0 }
 0x703   :  { %v4754_v56 = vpop.f32.mrf.mxu1 }
 0x704   :  { %v5190_v56 = vsel %vm435_vm2, %v5189_v44, %v11202_v50 }
 0x705   :  { %v11382_v44 = vperm.slane %v5190_v56, %v7754_v3 }
 0x708   :  { %v4847_v61 = vpop.f32.mrf.mxu2 }
 0x709   :  { %v5033_v10 = vrot.slane %v4847_v61, 4  ;;  %v5036_v8 = vsel %vm435_vm2, %v4847_v61, %v5035_v54 }
 0x70a   :  { %v5044_v51 = vperm.slane %v5036_v8, %v7754_v3 }
 0x70b   :  { %v4828_v47 = vpop.f32.mrf.mxu1  ;;  %v5034_v34 = vsel %vm435_vm2, %v5033_v10, %v11236_v18 }
 0x70c   :  { %v4977_v59 = vrot.slane %v4828_v47, 4  ;;  %v4980_v54 = vsel %vm435_vm2, %v4828_v47, %v4979_v13  ;;  %v5040_v12 = vperm.slane %v5034_v34, %v7754_v3  ;;  %v5057_v55 = vrot.slane %v5044_v51, 4 }
 0x70d   :  { %v5060_v35 = vsel %vm435_vm2, %v5044_v51, %v5059_v22  ;;  %v4988_v18 = vperm.slane %v4980_v54, %v7754_v3 }
 0x70e   :  { %v5068_v17 = vperm.slane %v5060_v35, %v7790_v53  ;;  %v4978_v24 = vsel %vm435_vm2, %v4977_v59, %v11214_v1  ;;  %v5045_v41 = vrot.slane %v5040_v12, 4  ;;  %v5048_v13 = vsel %vm435_vm2, %v5040_v12, %v5047_v46 }
 0x70f   :  { %v5058_v7 = vsel %vm435_vm2, %v5057_v55, %v5032_v11  ;;  %v4984_v29 = vperm.slane %v4978_v24, %v7754_v3  ;;  %v5056_v22 = vperm.slane %v5048_v13, %v7790_v53  ;;  %v11385_v1 = vperm.slane %v5358_v6, %v7754_v3 }
 0x710   :  { %v5064_v50 = vperm.slane %v5058_v7, %v7790_v53  ;;  %v5075_v61 = vrot.slane %v5068_v17, 4  ;;  %v5046_v46 = vsel %vm435_vm2, %v5045_v41, %v11290_v26  ;;  %v4849_v11 = vpop.f32.mrf.mxu2  ;;  %v5001_v47 = vrot.slane %v4988_v18, 4 }
 0x711   :  { %v4989_v37 = vrot.slane %v4984_v29, 4  ;;  %v5071_v10 = vrot.slane %v5056_v22, 4  ;;  %v11391_v34 = vperm.slane %v5046_v46, %v7790_v53  ;;  %v4992_v54 = vsel %vm435_vm2, %v4984_v29, %v4991_v58  ;;  %v4866_v29 = vpop.f32.mrf.mxu3 }
 0x712   :  { %v5073_v8 = vrot.slane %v5064_v50, 4  ;;  %v5076_v51 = vsel %vm435_vm2, 0.0, %v5075_v61  ;;  %v5004_v12 = vsel %vm435_vm2, %v4988_v18, %v5003_v52  ;;  %v5227_v55 = vrot.slane %v11356_v40, 4 }
 0x713   :  { %v5483_v59 = vrot.slane %v5076_v51, 4  ;;  %v4830_v6 = vpop.f32.mrf.mxu1  ;;  %v5395_v26 = vrot.slane %v11365_v30, 4  ;;  %v5478_v56 = vsel %vm435_vm2, %v5075_v61, %v5064_v50  ;;  %v5215_v17 = vrot.slane %v11382_v44, 4 }
 0x714   :  { %v5074_v35 = vsel %vm435_vm2, 0.0, %v5073_v8  ;;  %v5383_v24 = vrot.slane %v11385_v1, 4  ;;  %v11402_v41 = vsel %vm435_vm2, 0.0, %v5071_v10  ;;  %v4990_v58 = vsel %vm435_vm2, %v4989_v37, %v11303_v14 }
 0x715   :  { %v5484_v52 = vsel %vm435_vm2, %v5483_v59, %v5074_v35  ;;  %v5000_v18 = vperm.slane %v4992_v54, %v7790_v53  ;;  %v5002_v13 = vsel %vm435_vm2, %v5001_v47, %v11306_v63  ;;  %v5012_v7 = vperm.slane %v5004_v12, %v7790_v53  ;;  %v4885_v59 = vpop.f32.mrf.mxu0 }
 0x716   :  { %v5069_v22 = vrot.slane %v11391_v34, 4  ;;  %v11414_v50 = vsel %vm435_vm2, %v5071_v10, %v11391_v34  ;;  %v11417_v61 = vperm.slane %v5478_v56, %v7754_v3  ;;  %v5008_v14 = vperm.slane %v5002_v13, %v7790_v53 }
 0x717   :  { %v5089_v46 = vrot.slane %v4866_v29, 4  ;;  %v5092_v37 = vsel %vm435_vm2, %v4866_v29, %v5091_v28  ;;  %v5472_v63 = vrot.slane %v11402_v41, 4  ;;  %v5019_v11 = vrot.slane %v5012_v7, 4 }
 0x718   :  { %v5100_v8 = vperm.slane %v5092_v37, %v7754_v3  ;;  %v11426_v51 = vperm.slane %v5484_v52, %v7754_v3  ;;  %v4996_v10 = vperm.slane %v4990_v58, %v7790_v53  ;;  %v5017_v47 = vrot.slane %v5008_v14, 4 }
 0x719   :  { %v5090_v54 = vsel %vm435_vm2, %v5089_v46, %v11240_v43  ;;  %v5015_v12 = vrot.slane %v5000_v18, 4  ;;  %v5020_v6 = vsel %vm435_vm2, 0.0, %v5019_v11  ;;  %v5145_v35 = vrot.slane %v4885_v59, 4 }
 0x71a   :  { %v5096_v28 = vperm.slane %v5090_v54, %v7754_v3  ;;  %v5113_v56 = vrot.slane %v5100_v8, 4  ;;  %v5116_v13 = vsel %vm435_vm2, %v5100_v8, %v5115_v60  ;;  %v5503_v52 = vrot.slane %v11417_v61, 4 }
 0x71b   :  { %v5124_v58 = vperm.slane %v5116_v13, %v7790_v53  ;;  %v5424_v7 = vsel %vm435_vm2, %v5019_v11, %v5008_v14  ;;  %v5429_v29 = vrot.slane %v5020_v6, 4  ;;  %v5146_v43 = vsel %vm435_vm2, %v5145_v35, %v11249_v21 }
 0x71c   :  { %v5101_v18 = vrot.slane %v5096_v28, 4  ;;  %v5104_v46 = vsel %vm435_vm2, %v5096_v28, %v5103_v62  ;;  %v5114_v37 = vsel %vm435_vm2, %v5113_v56, %v11309_v31  ;;  %v5018_v60 = vsel %vm435_vm2, 0.0, %v5017_v47  ;;  %v4868_v47 = vpop.f32.mrf.mxu3 }
 0x71d   :  { %v5112_v8 = vperm.slane %v5104_v46, %v7790_v53  ;;  %v5120_v54 = vperm.slane %v5114_v37, %v7790_v53  ;;  %v5131_v13 = vrot.slane %v5124_v58, 4  ;;  %v5148_v14 = vsel %vm435_vm2, %v4885_v59, %v5147_v23 }
 0x71e   :  { %v5102_v11 = vsel %vm435_vm2, %v5101_v18, %v11313_v27  ;;  %v5016_v6 = vsel %vm435_vm2, 0.0, %v5015_v12  ;;  %v11456_v62 = vperm.slane %v5424_v7, %v7754_v3  ;;  %v5152_v31 = vperm.slane %v5146_v43, %v7754_v3  ;;  %v4887_v27 = vpop.f32.mrf.mxu0 }
 0x71f   :  { %v5127_v35 = vrot.slane %v5112_v8, 4  ;;  %v5129_v28 = vrot.slane %v5120_v54, 4  ;;  %v5132_v56 = vsel %vm435_vm2, 0.0, %v5131_v13  ;;  %v5430_v58 = vsel %vm435_vm2, %v5429_v29, %v5018_v60 }
 0x720   :  { %v5537_v21 = vrot.slane %v5132_v56, 4  ;;  %v5013_v46 = vrot.slane %v4996_v10, 4  ;;  %v5156_v23 = vperm.slane %v5148_v14, %v7754_v3  ;;  %v5157_v59 = vrot.slane %v5152_v31, 4 }
 0x721   :  { %v11463_v18 = vperm.slane %v5102_v11, %v7790_v53  ;;  %v5130_v7 = vsel %vm435_vm2, 0.0, %v5129_v28  ;;  %v5532_v43 = vsel %vm435_vm2, %v5131_v13, %v5120_v54  ;;  %v5413_v37 = vsel %vm435_vm2, %v5015_v12, %v4996_v10 }
 0x722   :  { %v5418_v8 = vrot.slane %v5016_v6, 4  ;;  %v11469_v47 = vperm.slane %v5430_v58, %v7754_v3  ;;  %v5449_v29 = vrot.slane %v11456_v62, 4  ;;  %v5158_v60 = vsel %vm435_vm2, %v5157_v59, %v11317_v4 }
 0x723   :  { %v11475_v14 = vsel %vm435_vm2, 0.0, %v5127_v35  ;;  %v5538_v11 = vsel %vm435_vm2, %v5537_v21, %v5130_v7  ;;  %v5160_v54 = vsel %vm435_vm2, %v5152_v31, %v5159_v38  ;;  %v5169_v13 = vrot.slane %v5156_v23, 4 }
 0x724   :  { %v11482_v10 = vperm.slane %v5532_v43, %v7754_v3  ;;  %v5168_v12 = vperm.slane %v5160_v54, %v7790_v53  ;;  %v5172_v6 = vsel %vm435_vm2, %v5156_v23, %v5171_v16  ;;  %v5014_v28 = vsel %vm435_vm2, 0.0, %v5013_v46  ;;  %v4923_v23 = vpop.f32.mrf.mxu2 }
 0x725   :  { %v5125_v56 = vrot.slane %v11463_v18, 4  ;;  %v11491_v58 = vperm.slane %v5158_v60, %v7790_v53  ;;  %v5170_v4 = vsel %vm435_vm2, %v5169_v13, %v11320_v9  ;;  %v5180_v38 = vperm.slane %v5172_v6, %v7790_v53  ;;  %v4904_v13 = vpop.f32.mrf.mxu1 }
 0x726   :  { %v11498_v31 = vsel %vm435_vm2, %v5127_v35, %v11463_v18  ;;  %v11502_v16 = vperm.slane %v5538_v11, %v7754_v3  ;;  %v5176_v46 = vperm.slane %v5170_v4, %v7790_v53  ;;  %v5257_v27 = vrot.slane %v4923_v23, 4 }
 0x727   :  { %v5187_v59 = vrot.slane %v5180_v38, 4  ;;  %v5260_v9 = vsel %vm435_vm2, %v4923_v23, %v5259_v57  ;;  %v5419_v7 = vsel %vm435_vm2, %v5418_v8, %v5014_v28  ;;  %v5183_v35 = vrot.slane %v5168_v12, 4 }
 0x728   :  { %v5185_v60 = vrot.slane %v5176_v46, 4  ;;  %v5268_v54 = vperm.slane %v5260_v9, %v7754_v3  ;;  %v5258_v6 = vsel %vm435_vm2, %v5257_v27, %v11246_v2  ;;  %v5070_v4 = vsel %vm435_vm2, 0.0, %v5069_v22 }
 0x729   :  { %v11518_v57 = vperm.slane %v5413_v37, %v7754_v3  ;;  %v5188_v8 = vsel %vm435_vm2, 0.0, %v5187_v59  ;;  %v5586_v12 = vsel %vm435_vm2, %v5187_v59, %v5176_v46  ;;  %v5264_v28 = vperm.slane %v5258_v6, %v7754_v3 }
 0x72a   :  { %v11524_v38 = vperm.slane %v5419_v7, %v7754_v3  ;;  %v5281_v23 = vrot.slane %v5268_v54, 4  ;;  %v5284_v2 = vsel %vm435_vm2, %v5268_v54, %v5283_v15  ;;  %v5201_v34 = vrot.slane %v4904_v13, 4 }
 0x72b   :  { %v5204_v22 = vsel %vm435_vm2, %v4904_v13, %v5203_v19  ;;  %v11533_v37 = vsel %vm435_vm2, 0.0, %v5183_v35  ;;  %v5186_v46 = vsel %vm435_vm2, 0.0, %v5185_v60  ;;  %v5269_v59 = vrot.slane %v5264_v28, 4 }
 0x72c   :  { %v5272_v27 = vsel %vm435_vm2, %v5264_v28, %v5271_v32  ;;  %v5591_v9 = vrot.slane %v5188_v8, 4  ;;  %v5282_v15 = vsel %vm435_vm2, %v5281_v23, %v11335_v49  ;;  %v5292_v54 = vperm.slane %v5284_v2, %v7790_v53  ;;  %v4925_v43 = vpop.f32.mrf.mxu2 }
 0x72d   :  { %v5280_v7 = vperm.slane %v5272_v27, %v7790_v53  ;;  %v11544_v19 = vperm.slane %v5586_v12, %v7754_v3  ;;  %v5288_v13 = vperm.slane %v5282_v15, %v7790_v53  ;;  %v5202_v60 = vsel %vm435_vm2, %v5201_v34, %v11243_v25  ;;  %v4906_v15 = vpop.f32.mrf.mxu1 }
 0x72e   :  { %v5212_v6 = vperm.slane %v5204_v22, %v7754_v3  ;;  %v11552_v32 = vsel %vm435_vm2, %v5183_v35, %v11491_v58  ;;  %v5299_v49 = vrot.slane %v5292_v54, 4  ;;  %v5208_v28 = vperm.slane %v5202_v60, %v7754_v3 }
 0x72f   :  { %v5270_v12 = vsel %vm435_vm2, %v5269_v59, %v11352_v5  ;;  %v5295_v23 = vrot.slane %v5280_v7, 4  ;;  %v5297_v2 = vrot.slane %v5288_v13, 4  ;;  %v5592_v25 = vsel %vm435_vm2, %v5591_v9, %v5186_v46 }
 0x730   :  { %v5225_v27 = vrot.slane %v5212_v6, 4  ;;  %v5300_v43 = vsel %vm435_vm2, 0.0, %v5299_v49  ;;  %v5228_v35 = vsel %vm435_vm2, %v5212_v6, %v5227_v55  ;;  %v5437_v34 = vrot.slane %v11518_v57, 4 }
 0x731   :  { %v5298_v54 = vsel %vm435_vm2, 0.0, %v5297_v2  ;;  %v5694_v5 = vsel %vm435_vm2, %v5299_v49, %v5288_v13  ;;  %v5699_v59 = vrot.slane %v5300_v43, 4  ;;  %v11568_v7 = vperm.slane %v5270_v12, %v7790_v53 }
 0x732   :  { %v5213_v60 = vrot.slane %v5208_v28, 4  ;;  %v5216_v46 = vsel %vm435_vm2, %v5208_v28, %v5215_v17  ;;  %v5226_v55 = vsel %vm435_vm2, %v5225_v27, %v11356_v40  ;;  %v11576_v9 = vsel %vm435_vm2, 0.0, %v5295_v23 }
 0x733   :  { %v5224_v6 = vperm.slane %v5216_v46, %v7790_v53  ;;  %v5232_v2 = vperm.slane %v5226_v55, %v7790_v53  ;;  %v5236_v13 = vperm.slane %v5228_v35, %v7790_v53  ;;  %v11582_v49 = vperm.slane %v5694_v5, %v7754_v3  ;;  %v4942_v46 = vpop.f32.mrf.mxu3 }
 0x734   :  { %v5700_v12 = vsel %vm435_vm2, %v5699_v59, %v5298_v54  ;;  %v5214_v17 = vsel %vm435_vm2, %v5213_v60, %v11382_v44  ;;  %v5438_v40 = vsel %vm435_vm2, %v11524_v38, %v5437_v34  ;;  %v5450_v54 = vsel %vm435_vm2, %v11469_v47, %v5449_v29 }
 0x735   :  { %v11590_v28 = vperm.slane %v5214_v17, %v7790_v53  ;;  %v5239_v27 = vrot.slane %v5224_v6, 4  ;;  %v5241_v15 = vrot.slane %v5232_v2, 4  ;;  %v5243_v43 = vrot.slane %v5236_v13, 4  ;;  %v11611_v6 = vpop.f32.mrf.mxu0 }
 0x736   :  { %v5446_v35 = vperm.slane %v5438_v40, %v7790_v53  ;;  %v5471_v44 = vperm.slane %v11414_v50, %v7754_v3  ;;  %v5473_v34 = vsel %vm435_vm2, %v5472_v63, %v5070_v4  ;;  %v11603_v5 = vperm.slane %v5592_v25, %v7754_v3 }
 0x737   :  { %v11608_v60 = vsel %vm435_vm2, %v5295_v23, %v11568_v7  ;;  %v11614_v29 = vperm.slane %v5700_v12, %v7754_v3  ;;  %v5244_v63 = vsel %vm435_vm2, 0.0, %v5243_v43  ;;  %v11620_v4 = vsel %vm435_vm2, 0.0, %v5239_v27 }
 0x738   :  { %v5458_v25 = vperm.slane %v5450_v54, %v7790_v53  ;;  %v5477_v23 = vperm.slane %v5473_v34, %v7754_v3  ;;  %v5491_v13 = vrot.slane %v5471_v44, 4  ;;  %v5242_v17 = vsel %vm435_vm2, 0.0, %v5241_v15 }
 0x739   :  { %v5504_v12 = vsel %vm435_vm2, %v11426_v51, %v5503_v52  ;;  %v5465_v40 = vrot.slane %v5446_v35, 4  ;;  %v5435_v41 = vrot.slane %v11524_v38, 4  ;;  %v5640_v55 = vsel %vm435_vm2, %v5243_v43, %v5232_v2 }
 0x73a   :  { %v5645_v59 = vrot.slane %v5244_v63, 4  ;;  %v5463_v50 = vrot.slane %v5458_v25, 4  ;;  %v5492_v22 = vsel %vm435_vm2, %v5477_v23, %v5491_v13  ;;  %v5512_v34 = vperm.slane %v5504_v12, %v7790_v53 }
 0x73b   :  { %v5500_v54 = vperm.slane %v5492_v22, %v7790_v53  ;;  %v5466_v15 = vsel %vm435_vm2, %v5458_v25, %v5465_v40  ;;  %v5436_v8 = vsel %vm435_vm2, %v5435_v41, %v11518_v57  ;;  %v5447_v38 = vrot.slane %v11469_v47, 4  ;;  %v4944_v43 = vpop.f32.mrf.mxu3 }
 0x73c   :  { %v5464_v52 = vsel %vm435_vm2, %v5463_v50, %v5446_v35  ;;  %v11639_v21 = vperm.slane %v5436_v8, %v7790_v53  ;;  %v5489_v2 = vrot.slane %v5477_v23, 4  ;;  %v5517_v63 = vrot.slane %v5512_v34, 4 }
 0x73d   :  { %v5519_v13 = vrot.slane %v5500_v54, 4  ;;  %v5501_v22 = vrot.slane %v11426_v51, 4  ;;  %v5313_v11 = vrot.slane %v4942_v46, 4  ;;  %v5448_v25 = vsel %vm435_vm2, %v5447_v38, %v11456_v62  ;;  %v4963_v35 = vpop.f32.mrf.mxu0 }
 0x73e   :  { %v5461_v12 = vrot.slane %v11639_v21, 4  ;;  %v5490_v57 = vsel %vm435_vm2, %v5489_v2, %v5471_v44  ;;  %v5316_v8 = vsel %vm435_vm2, %v4942_v46, %v5315_v20  ;;  %v5518_v47 = vsel %vm435_vm2, %v5517_v63, %v5500_v54 }
 0x73f   :  { %v5520_v41 = vsel %vm435_vm2, %v5512_v34, %v5519_v13  ;;  %v11653_v50 = vperm.slane %v5448_v25, %v7790_v53  ;;  %v11656_v51 = vperm.slane %v5490_v57, %v7790_v53  ;;  %v7178_v62 = vpack.i.bf16 %v5518_v47, %v5464_v52 }
 0x740   :  { %v7183_v23 = vpack.i.bf16 %v5520_v41, %v5466_v15  ;;  %v5502_v44 = vsel %vm435_vm2, %v5501_v22, %v11417_v61  ;;  %v5314_v40 = vsel %vm435_vm2, %v5313_v11, %v11254_v45  ;;  %v11664_v20 = vsel %vm435_vm2, %v5239_v27, %v11590_v28 }
 0x741   :  { %v5462_v46 = vsel %vm435_vm2, %v11653_v50, %v5461_v12  ;;  %v11669_v54 = vperm.slane %v5502_v44, %v7790_v53  ;;  %v5515_v34 = vrot.slane %v11656_v51, 4  ;;  %7179 = vrot.lane.b32.xlu2 %v7178_v62, %s7555_s12  ;;  %v5320_v45 = vperm.slane %v5314_v40, %v7754_v3 }
 0x742   :  { %7184 = vrot.lane.b32.xlu0 %v7183_v23, %s7556_s13  ;;  %v5324_v61 = vperm.slane %v5316_v8, %v7754_v3  ;;  %v5369_v11 = vrot.slane %v11611_v6, 4  ;;  %v5372_v27 = vsel %vm435_vm2, %v11611_v6, %v5371_v48  ;;  %v11682_v15 = vperm.slane %v5640_v55, %v7754_v3 }
 0x743   :  { %v5646_v52 = vsel %vm435_vm2, %v5645_v59, %v5242_v17  ;;  %v5516_v38 = vsel %vm435_vm2, %v11669_v54, %v5515_v34  ;;  %v5380_v2 = vperm.slane %v5372_v27, %v7754_v3  ;;  %v5325_v63 = vrot.slane %v5320_v45, 4 }
 0x744   :  { %v7173_v43 = vpack.i.bf16 %v5516_v38, %v5462_v46  ;;  %v5328_v13 = vsel %vm435_vm2, %v5320_v45, %v5327_v42  ;;  %v5337_v22 = vrot.slane %v5324_v61, 4  ;;  %v5340_v48 = vsel %vm435_vm2, %v5324_v61, %v5339_v0 }
 0x745   :  { %v5336_v25 = vperm.slane %v5328_v13, %v7790_v53  ;;  %v5370_v59 = vsel %vm435_vm2, %v5369_v11, %v11257_v36  ;;  %v5393_v55 = vrot.slane %v5380_v2, 4  ;;  %v5326_v6 = vsel %vm435_vm2, %v5325_v63, %v11323_v39 }
 0x746   :  { %7174 = vrot.lane.b32.xlu1 %v7173_v43, %s7542_s10  ;;  %v5338_v17 = vsel %vm435_vm2, %v5337_v22, %v11326_v33  ;;  %v5348_v42 = vperm.slane %v5340_v48, %v7790_v53  ;;  %v5376_v12 = vperm.slane %v5370_v59, %v7754_v3  ;;  %v5634_v57 = vrot.slane %v11620_v4, 4 }
 0x747   :  { %v11706_v0 = vperm.slane %v5646_v52, %v7754_v3  ;;  %v11709_v36 = vperm.slane %v5326_v6, %v7790_v53  ;;  %v5344_v8 = vperm.slane %v5338_v17, %v7790_v53  ;;  %v5665_v35 = vrot.slane %v11682_v15, 4 }
 0x748   :  { %v5351_v39 = vrot.slane %v5336_v25, 4  ;;  %v5355_v47 = vrot.slane %v5348_v42, 4  ;;  %v5381_v41 = vrot.slane %v5376_v12, 4  ;;  %v5384_v62 = vsel %vm435_vm2, %v5376_v12, %v5383_v24 }
 0x749   :  { %v5353_v33 = vrot.slane %v5344_v8, 4  ;;  %v5394_v23 = vsel %vm435_vm2, %v5393_v55, %v11365_v30  ;;  %v5396_v44 = vsel %vm435_vm2, %v5380_v2, %v5395_v26  ;;  %v5126_v45 = vsel %vm435_vm2, 0.0, %v5125_v56 }
 0x74a   :  { %v5356_v40 = vsel %vm435_vm2, 0.0, %v5355_v47  ;;  %v5748_v46 = vsel %vm435_vm2, %v5355_v47, %v5344_v8  ;;  %v5382_v34 = vsel %vm435_vm2, %v5381_v41, %v11385_v1  ;;  %v5349_v24 = vrot.slane %v11709_v36, 4 }
 0x74b   :  { %v5354_v61 = vsel %vm435_vm2, 0.0, %v5353_v33  ;;  %v11731_v11 = vperm.slane %v5748_v46, %v7754_v3  ;;  %v5753_v30 = vrot.slane %v5356_v40, 4  ;;  %v11734_v26 = vperm.slane %v5382_v34, %v7790_v53 }
 0x74c   :  { %v5392_v27 = vperm.slane %v5384_v62, %v7790_v53  ;;  %v5400_v52 = vperm.slane %v5394_v23, %v7790_v53  ;;  %v5404_v1 = vperm.slane %v5396_v44, %v7790_v53  ;;  %v11740_v18 = vsel %vm435_vm2, 0.0, %v5351_v39 }
 0x74d   :  { %v11744_v56 = vsel %vm435_vm2, %v5351_v39, %v11709_v36  ;;  %v12899_v38 = vrot.slane %v11491_v58, 4  ;;  %v5525_v43 = vperm.slane %v11498_v31, %v7754_v3  ;;  %v5754_v63 = vsel %vm435_vm2, %v5753_v30, %v5354_v61 }
 0x74e   :  { %v5407_v13 = vrot.slane %v5392_v27, 4  ;;  %v5409_v22 = vrot.slane %v5400_v52, 4  ;;  %v5411_v25 = vrot.slane %v5404_v1, 4  ;;  %v12900_v48 = vrot.slane %v11475_v14, 4 }
 0x74f   :  { %v5182_v2 = vsel %vm435_vm2, 0.0, %v12899_v38  ;;  %v5545_v55 = vrot.slane %v5525_v43, 4  ;;  %v12901_v6 = vrot.slane %v11482_v10, 4  ;;  %v5579_v17 = vperm.slane %v11552_v32, %v7754_v3 }
 0x750   :  { %v5527_v59 = vsel %vm435_vm2, %v12900_v48, %v5126_v45  ;;  %v5742_v31 = vrot.slane %v11740_v18, 4  ;;  %v5773_v42 = vrot.slane %v11731_v11, 4  ;;  %v5405_v12 = vrot.slane %v11734_v26, 4 }
 0x751   :  { %v5558_v58 = vsel %vm435_vm2, %v11502_v16, %v12901_v6  ;;  %v5412_v8 = vsel %vm435_vm2, 0.0, %v5411_v25  ;;  %v11766_v14 = vperm.slane %v5754_v63, %v7754_v3  ;;  %v11769_v39 = vsel %vm435_vm2, 0.0, %v5407_v13 }
 0x752   :  { %v5410_v47 = vsel %vm435_vm2, 0.0, %v5409_v22  ;;  %v5531_v41 = vperm.slane %v5527_v59, %v7754_v3  ;;  %v5802_v32 = vsel %vm435_vm2, %v5411_v25, %v5400_v52  ;;  %v5566_v33 = vperm.slane %v5558_v58, %v7790_v53 }
 0x753   :  { %v12902_v62 = vrot.slane %v11533_v37, 4  ;;  %v5599_v44 = vrot.slane %v5579_v17, 4  ;;  %v5807_v40 = vrot.slane %v5412_v8, 4  ;;  %v12903_v45 = vrot.slane %v11544_v19, 4 }
 0x754   :  { %v5546_v46 = vsel %vm435_vm2, %v5531_v41, %v5545_v55  ;;  %v11786_v30 = vsel %vm435_vm2, %v5407_v13, %v11734_v26  ;;  %v5796_v27 = vrot.slane %v11769_v39, 4  ;;  %v5571_v52 = vrot.slane %v5566_v33, 4 }
 0x755   :  { %v5581_v23 = vsel %vm435_vm2, %v12902_v62, %v5182_v2  ;;  %v5612_v61 = vsel %vm435_vm2, %v11603_v5, %v12903_v45  ;;  %v5554_v37 = vperm.slane %v5546_v46, %v7790_v53  ;;  %v5543_v2 = vrot.slane %v5531_v41, 4 }
 0x756   :  { %v5585_v34 = vperm.slane %v5581_v23, %v7754_v3  ;;  %v5620_v38 = vperm.slane %v5612_v61, %v7790_v53  ;;  %v5555_v63 = vrot.slane %v11502_v16, 4  ;;  %v11794_v22 = vperm.slane %v5802_v32, %v7754_v3 }
 0x757   :  { %v5573_v48 = vrot.slane %v5554_v37, 4  ;;  %v5808_v59 = vsel %vm435_vm2, %v5807_v40, %v5410_v47  ;;  %v5544_v6 = vsel %vm435_vm2, %v5543_v2, %v5525_v43  ;;  %v5609_v58 = vrot.slane %v11603_v5, 4 }
 0x758   :  { %v5600_v1 = vsel %vm435_vm2, %v5585_v34, %v5599_v44  ;;  %v5597_v13 = vrot.slane %v5585_v34, 4  ;;  %v5625_v55 = vrot.slane %v5620_v38, 4  ;;  %v5572_v8 = vsel %vm435_vm2, %v5571_v52, %v5554_v37 }
 0x759   :  { %v5608_v25 = vperm.slane %v5600_v1, %v7790_v53  ;;  %v11802_v41 = vperm.slane %v5544_v6, %v7790_v53  ;;  %v5556_v16 = vsel %vm435_vm2, %v5555_v63, %v11482_v10  ;;  %v5610_v47 = vsel %vm435_vm2, %v5609_v58, %v11544_v19 }
 0x75a   :  { %v5598_v23 = vsel %vm435_vm2, %v5597_v13, %v5579_v17  ;;  %v12904_v43 = vrot.slane %v11590_v28, 4  ;;  %v5574_v40 = vsel %vm435_vm2, %v5566_v33, %v5573_v48  ;;  %v11817_v10 = vperm.slane %v5556_v16, %v7790_v53 }
 0x75b   :  { %v5627_v62 = vrot.slane %v5608_v25, 4  ;;  %v5626_v32 = vsel %vm435_vm2, %v5625_v55, %v5608_v25  ;;  %v5569_v34 = vrot.slane %v11802_v41, 4  ;;  %v11820_v17 = vperm.slane %v5598_v23, %v7790_v53 }
 0x75c   :  { %v5238_v5 = vsel %vm435_vm2, 0.0, %v12904_v43  ;;  %v7193_v44 = vpack.i.bf16 %v5626_v32, %v5572_v8  ;;  %v12905_v19 = vrot.slane %v11568_v7, 4  ;;  %v11827_v61 = vperm.slane %v5610_v47, %v7790_v53 }
 0x75d   :  { %v5628_v46 = vsel %vm435_vm2, %v5620_v38, %v5627_v62  ;;  %v5633_v33 = vperm.slane %v11664_v20, %v7754_v3  ;;  %v5635_v37 = vsel %vm435_vm2, %v5634_v57, %v5238_v5  ;;  %v5666_v52 = vsel %vm435_vm2, %v11706_v0, %v5665_v35 }
 0x75e   :  { %v7198_v45 = vpack.i.bf16 %v5628_v46, %v5574_v40  ;;  %v5294_v28 = vsel %vm435_vm2, 0.0, %v12905_v19  ;;  %7194 = vrot.lane.b32.xlu2 %v7193_v44, %s7555_s12  ;;  %v5570_v7 = vsel %vm435_vm2, %v11817_v10, %v5569_v34  ;;  %v5623_v1 = vrot.slane %v11820_v17, 4 }
 0x75f   :  { %v5639_v38 = vperm.slane %v5635_v37, %v7754_v3  ;;  %v5674_v20 = vperm.slane %v5666_v52, %v7790_v53  ;;  %v5653_v2 = vrot.slane %v5633_v33, 4  ;;  %v5687_v4 = vperm.slane %v11608_v60, %v7754_v3 }
 0x760   :  { %7199 = vrot.lane.b32.xlu0 %v7198_v45, %s7556_s13  ;;  %v12906_v57 = vrot.slane %v11576_v9, 4  ;;  %v12907_v35 = vrot.slane %v11582_v49, 4  ;;  %v5624_v48 = vsel %vm435_vm2, %v11827_v61, %v5623_v1  ;;  %v5663_v32 = vrot.slane %v11706_v0, 4 }
 0x761   :  { %v5679_v13 = vrot.slane %v5674_v20, 4  ;;  %v7188_v58 = vpack.i.bf16 %v5624_v48, %v5570_v7  ;;  %v5654_v60 = vsel %vm435_vm2, %v5639_v38, %v5653_v2  ;;  %v5707_v8 = vrot.slane %v5687_v4, 4 }
 0x762   :  { %v5689_v63 = vsel %vm435_vm2, %v12906_v57, %v5294_v28  ;;  %v5720_v25 = vsel %vm435_vm2, %v11614_v29, %v12907_v35  ;;  %v5651_v9 = vrot.slane %v5639_v38, 4  ;;  %v5662_v62 = vperm.slane %v5654_v60, %v7790_v53 }
 0x763   :  { %v5693_v55 = vperm.slane %v5689_v63, %v7754_v3  ;;  %v5728_v6 = vperm.slane %v5720_v25, %v7790_v53  ;;  %v11861_v47 = vperm.slane %v5808_v59, %v7754_v3  ;;  %7189 = vrot.lane.b32.xlu1 %v7188_v58, %s7542_s10  ;;  %v5717_v44 = vrot.slane %v11614_v29, 4 }
 0x764   :  { %v5652_v5 = vsel %vm435_vm2, %v5651_v9, %v5633_v33  ;;  %v5680_v40 = vsel %vm435_vm2, %v5679_v13, %v5662_v62  ;;  %v5681_v34 = vrot.slane %v5662_v62, 4  ;;  %v5827_v0 = vrot.slane %v11794_v22, 4 }
 0x765   :  { %v5733_v16 = vrot.slane %v5728_v6, 4  ;;  %v5705_v23 = vrot.slane %v5693_v55, 4  ;;  %v5708_v43 = vsel %vm435_vm2, %v5693_v55, %v5707_v8  ;;  %v11870_v45 = vperm.slane %v5652_v5, %v7790_v53 }
 0x766   :  { %v5716_v46 = vperm.slane %v5708_v43, %v7790_v53  ;;  %v5664_v59 = vsel %vm435_vm2, %v5663_v32, %v11682_v15  ;;  %v5350_v28 = vsel %vm435_vm2, 0.0, %v5349_v24  ;;  %v5682_v33 = vsel %vm435_vm2, %v5674_v20, %v5681_v34 }
 0x767   :  { %v5706_v19 = vsel %vm435_vm2, %v5705_v23, %v5687_v4  ;;  %v5718_v52 = vsel %vm435_vm2, %v5717_v44, %v11582_v49  ;;  %v11884_v1 = vperm.slane %v5664_v59, %v7790_v53  ;;  %v5677_v15 = vrot.slane %v11870_v45, 4 }
 0x768   :  { %v5734_v29 = vsel %vm435_vm2, %v5733_v16, %v5716_v46  ;;  %v5735_v37 = vrot.slane %v5716_v46, 4  ;;  %v11888_v38 = vperm.slane %v5706_v19, %v7790_v53  ;;  %v5406_v24 = vsel %vm435_vm2, 0.0, %v5405_v12 }
 0x769   :  { %v7208_v7 = vpack.i.bf16 %v5734_v29, %v5680_v40  ;;  %v5741_v20 = vperm.slane %v11744_v56, %v7754_v3  ;;  %v5743_v49 = vsel %vm435_vm2, %v5742_v31, %v5350_v28  ;;  %v5678_v4 = vsel %vm435_vm2, %v11884_v1, %v5677_v15  ;;  %v6878_v15 = vld [vmem:[%s12302_s3 + $0x8] sm:$0xff] }
 0x76a   :  { %v5736_v36 = vsel %vm435_vm2, %v5728_v6, %v5735_v37  ;;  %v11903_v57 = vperm.slane %v5718_v52, %v7790_v53  ;;  %v5731_v26 = vrot.slane %v11888_v38, 4  ;;  %v5747_v12 = vperm.slane %v5743_v49, %v7754_v3  ;;  %6006 = vmatpush.bf16.msra.mxu1 %v6878_v15 }
 0x76b   :  { %7209 = vrot.lane.b32.xlu2 %v7208_v7, %s7555_s12  ;;  %v7213_v2 = vpack.i.bf16 %v5736_v36, %v5682_v33  ;;  %v5761_v63 = vrot.slane %v5741_v20, 4  ;;  %v5774_v18 = vsel %vm435_vm2, %v11766_v14, %v5773_v42  ;;  %v5795_v56 = vperm.slane %v11786_v30, %v7754_v3 }
 0x76c   :  { %v5732_v31 = vsel %vm435_vm2, %v11903_v57, %v5731_v26  ;;  %v5782_v35 = vperm.slane %v5774_v18, %v7790_v53  ;;  %v5797_v25 = vsel %vm435_vm2, %v5796_v27, %v5406_v24  ;;  %v5828_v48 = vsel %vm435_vm2, %v11861_v47, %v5827_v0 }
 0x76d   :  { %7214 = vrot.lane.b32.xlu0 %v7213_v2, %s7556_s13  ;;  %v7203_v13 = vpack.i.bf16 %v5732_v31, %v5678_v4  ;;  %v5762_v42 = vsel %vm435_vm2, %v5747_v12, %v5761_v63  ;;  %v5801_v55 = vperm.slane %v5797_v25, %v7754_v3  ;;  %v5815_v30 = vrot.slane %v5795_v56, 4 }
 0x76e   :  { %v5770_v6 = vperm.slane %v5762_v42, %v7790_v53  ;;  %v5787_v58 = vrot.slane %v5782_v35, 4  ;;  %v5836_v60 = vperm.slane %v5828_v48, %v7790_v53  ;;  %v5759_v8 = vrot.slane %v5747_v12, 4 }
 0x76f   :  { %7204 = vrot.lane.b32.xlu1 %v7203_v13, %s7542_s10  ;;  %v5816_v39 = vsel %vm435_vm2, %v5801_v55, %v5815_v30  ;;  %v5771_v27 = vrot.slane %v11766_v14, 4  ;;  %v5813_v9 = vrot.slane %v5801_v55, 4  ;;  %v5825_v62 = vrot.slane %v11861_v47, 4 }
 0x770   :  { %v5824_v16 = vperm.slane %v5816_v39, %v7790_v53  ;;  %v5841_v32 = vrot.slane %v5836_v60, 4  ;;  %v5789_v3 = vrot.slane %v5770_v6, 4  ;;  %v5788_v23 = vsel %vm435_vm2, %v5787_v58, %v5770_v6 }
 0x771   :  { %v5760_v43 = vsel %vm435_vm2, %v5759_v8, %v5741_v20  ;;  %v5772_v5 = vsel %vm435_vm2, %v5771_v27, %v11731_v11  ;;  %v5814_v44 = vsel %vm435_vm2, %v5813_v9, %v5795_v56  ;;  %v5826_v47 = vsel %vm435_vm2, %v5825_v62, %v11794_v22 }
 0x772   :  { %v5842_v40 = vsel %vm435_vm2, %v5841_v32, %v5824_v16  ;;  %v5843_v46 = vrot.slane %v5824_v16, 4  ;;  %v11938_v14 = vperm.slane %v5760_v43, %v7790_v53  ;;  %v11943_v0 = vperm.slane %v5814_v44, %v7790_v53 }
 0x773   :  { %v7223_v34 = vpack.i.bf16 %v5842_v40, %v5788_v23  ;;  %v5790_v59 = vsel %vm435_vm2, %v5782_v35, %v5789_v3  ;;  %v11950_v29 = vperm.slane %v5772_v5, %v7790_v53  ;;  %v11953_v33 = vperm.slane %v5826_v47, %v7790_v53  ;;  %v6877_v53 = vld [vmem:[%s12302_s3] sm:$0xff] }
 0x774   :  { %v5844_v19 = vsel %vm435_vm2, %v5836_v60, %v5843_v46  ;;  %v5785_v11 = vrot.slane %v11938_v14, 4  ;;  %v5839_v22 = vrot.slane %v11943_v0, 4  ;;  %6007 = vmatpush.bf16.msra.mxu1 %v6877_v53  ;;  %v5459_v36 = vrot.slane %v11653_v50, 4 }
 0x775   :  { %7224 = vrot.lane.b32.xlu2 %v7223_v34, %s7555_s12  ;;  %v7228_v28 = vpack.i.bf16 %v5844_v19, %v5790_v59  ;;  %v5513_v24 = vrot.slane %v11669_v54, 4 }
 0x776   :  { %v5786_v37 = vsel %vm435_vm2, %v11950_v29, %v5785_v11  ;;  %v5840_v52 = vsel %vm435_vm2, %v11953_v33, %v5839_v22  ;;  %v5460_v18 = vsel %vm435_vm2, %v5459_v36, %v11639_v21  ;;  %v5567_v21 = vrot.slane %v11817_v10, 4 }
 0x777   :  { %7229 = vrot.lane.b32.xlu0 %v7228_v28, %s7556_s13  ;;  %v7218_v7 = vpack.i.bf16 %v5840_v52, %v5786_v37  ;;  %v5514_v56 = vsel %vm435_vm2, %v5513_v24, %v11656_v51  ;;  %v5621_v51 = vrot.slane %v11827_v61, 4 }
 0x778   :  { %v5568_v9 = vsel %vm435_vm2, %v5567_v21, %v11802_v41  ;;  %v5675_v41 = vrot.slane %v11884_v1, 4  ;;  %v12908_v21 = vld [vmem:[#allocation15_spill] sm:$0xff] }
 0x779   :  { %7219 = vrot.lane.b32.xlu1 %v7218_v7, %s7542_s10  ;;  %v5622_v62 = vsel %vm435_vm2, %v5621_v51, %v11820_v17  ;;  %v5729_v17 = vrot.slane %v11903_v57, 4 }
 0x77a   :  { %v5676_v28 = vsel %vm435_vm2, %v5675_v41, %v11870_v45  ;;  %v5783_v45 = vrot.slane %v11950_v29, 4  ;;  %v12912_v41 = vld [vmem:[#allocation19_spill] sm:$0xff] }
 0x77b   :  { %v5730_v22 = vsel %vm435_vm2, %v5729_v17, %v11888_v38 }
 0x79b   :  { %v7180_v20 = vpop.permute.xlu2 %7179 }
 0x79c   :  { %v7182_v4 = vunpack.i.h.bf16 %v7180_v20  ;;  %v7181_v63 = vunpack.i.l.bf16 %v7180_v20  ;;  %v5837_v20 = vrot.slane %v11953_v33, 4 }
 0x7b4   :  { %v7185_v49 = vpop.permute.xlu0 %7184 }
 0x7b5   :  { %v7187_v31 = vunpack.i.h.bf16 %v7185_v49  ;;  %v7186_v35 = vunpack.i.l.bf16 %v7185_v49 }
 0x7b8   :  { %v7175_v2 = vpop.permute.xlu1 %7174  ;;  %v7195_v30 = vpop.permute.xlu2 %7194 }
 0x7b9   :  { %v7177_v26 = vunpack.i.h.bf16 %v7175_v2  ;;  %v7176_v12 = vunpack.i.l.bf16 %v7175_v2  ;;  %v7197_v39 = vunpack.i.h.bf16 %v7195_v30  ;;  %v7196_v27 = vunpack.i.l.bf16 %v7195_v30 }
 0x7bb   :  { %v5942_v50 = vsel %vm3363_vm3, %v5514_v56, %v7177_v26  ;;  %v5941_v54 = vsel %vm3363_vm3, %v5460_v18, %v7176_v12  ;;  %v5784_v18 = vsel %vm435_vm2, %v5783_v45, %v11938_v14  ;;  %v5838_v56 = vsel %vm435_vm2, %v5837_v20, %v11943_v0  ;;  %v12020_v0 = vld [vmem:[#allocation8] sm:$0xff] }
 0x7bc   :  { %v5951_v25 = vsel %vm5949_vm5, %v5942_v50, %v7182_v4  ;;  %v5950_v48 = vsel %vm5949_vm5, %v5941_v54, %v7181_v63 }
 0x7bd   :  { %v5960_v13 = vsel %vm5958_vm6, %v5951_v25, %v7187_v31  ;;  %v5959_v42 = vsel %vm5958_vm6, %v5950_v48, %v7186_v35 }
 0x7be   :  { %v5967_v55 = vpack.c.bf16 %v5960_v13, %v5959_v42  ;;  %v5975_v13 = vperm.slane %v12020_v0, 2 }
 0x7c0   :  { %6837 = vmatmul.msk.bf16.vlgmr.msra.gmra.mxu1 %vm266_vm0, %v5967_v55 }
 0x7c5   :  { %v7210_v40 = vpop.permute.xlu2 %7209 }
 0x7c6   :  { %v7212_v19 = vunpack.i.h.bf16 %v7210_v40  ;;  %v7211_v11 = vunpack.i.l.bf16 %v7210_v40 }
 0x7cf   :  { %v7225_v38 = vpop.permute.xlu2 %7224 }
 0x7d0   :  { %v7227_v12 = vunpack.i.h.bf16 %v7225_v38  ;;  %v7226_v63 = vunpack.i.l.bf16 %v7225_v38 }
 0x7d2   :  { %v7200_v6 = vpop.permute.xlu0 %7199 }
 0x7d3   :  { %v7202_v16 = vunpack.i.h.bf16 %v7200_v6  ;;  %v7201_v32 = vunpack.i.l.bf16 %v7200_v6 }
 0x7d5   :  { %v7190_v58 = vpop.permute.xlu1 %7189 }
 0x7d6   :  { %v7192_v60 = vunpack.i.h.bf16 %v7190_v58  ;;  %v7191_v8 = vunpack.i.l.bf16 %v7190_v58 }
 0x7d8   :  { %v5943_v3 = vsel %vm3363_vm3, %v5568_v9, %v7191_v8  ;;  %v5944_v10 = vsel %vm3363_vm3, %v5622_v62, %v7192_v60  ;;  %v12909_v60 = vld [vmem:[#allocation16_spill] sm:$0xff]  ;;  %v12910_v62 = vld [vmem:[#allocation17_spill] sm:$0xff] }
 0x7d9   :  { %v5952_v61 = vsel %vm5949_vm5, %v5943_v3, %v7196_v27  ;;  %v5953_v23 = vsel %vm5949_vm5, %v5944_v10, %v7197_v39 }
 0x7da   :  { %v5961_v43 = vsel %vm5958_vm6, %v5952_v61, %v7201_v32  ;;  %v5962_v5 = vsel %vm5958_vm6, %v5953_v23, %v7202_v16  ;;  %v12911_v61 = vld [vmem:[#allocation18_spill] sm:$0xff] }
 0x7db   :  { %v5968_v44 = vpack.c.bf16 %v5962_v5, %v5961_v43 }
 0x7dd   :  { %6838 = vmatmul.msk.bf16.gmra.mxu1 %vm266_vm0, %v5968_v44 }
 0x7df   :  { %v7215_v46 = vpop.permute.xlu0 %7214 }
 0x7e0   :  { %v7217_v37 = vunpack.i.h.bf16 %v7215_v46  ;;  %v7216_v52 = vunpack.i.l.bf16 %v7215_v46 }
 0x7e1   :  { %v7205_v47 = vpop.permute.xlu1 %7204 }
 0x7e2   :  { %v7207_v34 = vunpack.i.h.bf16 %v7205_v47  ;;  %v7206_v59 = vunpack.i.l.bf16 %v7205_v47 }
 0x7e4   :  { %v5946_v7 = vsel %vm3363_vm3, %v5730_v22, %v7207_v34  ;;  %v5945_v1 = vsel %vm3363_vm3, %v5676_v28, %v7206_v59  ;;  %v12913_v34 = vld [vmem:[#allocation20_spill] sm:$0xff]  ;;  %v12914_v22 = vld [vmem:[#allocation21_spill] sm:$0xff] }
 0x7e5   :  { %v5955_v57 = vsel %vm5949_vm5, %v5946_v7, %v7212_v19  ;;  %v5954_v15 = vsel %vm5949_vm5, %v5945_v1, %v7211_v11  ;;  %v7557_v7 = vmov 32.0  }
 0x7e6   :  { %v5963_v53 = vsel %vm5958_vm6, %v5954_v15, %v7216_v52  ;;  %v5964_v36 = vsel %vm5958_vm6, %v5955_v57, %v7217_v37  ;;  %7361 = vrcp.f32 %v7557_v7 }
 0x7e7   :  { %v5969_v24 = vpack.c.bf16 %v5964_v36, %v5963_v53 }
 0x7e9   :  { %v7230_v49 = vpop.permute.xlu0 %7229 }
 0x7ea   :  { %v7232_v31 = vunpack.i.h.bf16 %v7230_v49  ;;  %v7231_v35 = vunpack.i.l.bf16 %v7230_v49 }
 0x7eb   :  { %v7220_v2 = vpop.permute.xlu1 %7219 }
 0x7ec   :  { %v7222_v4 = vunpack.i.h.bf16 %v7220_v2  ;;  %v7221_v26 = vunpack.i.l.bf16 %v7220_v2  ;;  %v7362_v1 = vpop.eup %7361 }
 0x7ed   :  { %6839 = vmatmul.msk.bf16.gmra.mxu1 %vm266_vm0, %v5969_v24  ;;  %v6062_v57 = vmul.f32 32.0, %v7362_v1  ;;  %vm6066_vm7 = vweird.f32 %v7362_v1 }
 0x7ee   :  { %v5947_v29 = vsel %vm3363_vm3, %v5784_v18, %v7221_v26  ;;  %v5948_v33 = vsel %vm3363_vm3, %v5838_v56, %v7222_v4  ;;  %v12915_v18 = vld [vmem:[#allocation22_spill] sm:$0xff] }
 0x7ef   :  { %v5956_v50 = vsel %vm5949_vm5, %v5947_v29, %v7226_v63  ;;  %v5957_v54 = vsel %vm5949_vm5, %v5948_v33, %v7227_v12  ;;  %v6063_v15 = vsub.f32 1.0, %v6062_v57 }
 0x7f0   :  { %v5965_v25 = vsel %vm5958_vm6, %v5956_v50, %v7231_v35  ;;  %v5966_v48 = vsel %vm5958_vm6, %v5957_v54, %v7232_v31 }
 0x7f1   :  { %v5970_v14 = vpack.c.bf16 %v5966_v48, %v5965_v25  ;;  %v6064_v53 = vmul.f32 %v7362_v1, %v6063_v15 }
 0x7f3   :  { %v6065_v36 = vadd.f32 %v7362_v1, %v6064_v53 }
 0x7f5   :  { %v12037_v24 = vsel %vm6066_vm7, %v7362_v1, %v6065_v36 }
 0x7fd   :  { %6840 = vmatmul.msk.bf16.gmra.mxu1 %vm266_vm0, %v5970_v14 }
 0x83d   :  { %v6009_v42 = vpop.f32.mrf.mxu1 }
 0x83e   :  { %v6010_v55 = vadd.f32 %v6009_v42, %v5975_v13 }
 0x840   :  { %v6029_v51 = vadd.f32 %v6010_v55, %v12908_v21 }
 0x842   :  { %v6037_v30 = vsel %vm266_vm0, %v6029_v51, 0.0 }
 0x843   :  { %6038 = vadd.xlane.f32.xlu1 %v6037_v30 }
 0x845   :  { %v6011_v6 = vpop.f32.mrf.mxu1 }
 0x846   :  { %v6012_v58 = vadd.f32 %v6011_v6, %v5975_v13 }
 0x848   :  { %v6030_v8 = vadd.f32 %v6012_v58, %v12909_v60 }
 0x84a   :  { %v6040_v39 = vsel %vm266_vm0, %v6030_v8, 0.0 }
 0x84b   :  { %6041 = vadd.xlane.f32.xlu2 %v6040_v39 }
 0x85a   :  { %v6014_v27 = vpop.f32.mrf.mxu1 }
 0x85b   :  { %v6015_v9 = vadd.f32 %v6014_v27, %v5975_v13 }
 0x85d   :  { %v6031_v16 = vadd.f32 %v6015_v9, %v12910_v62 }
 0x85f   :  { %v6043_v32 = vsel %vm266_vm0, %v6031_v16, 0.0 }
 0x860   :  { %6044 = vadd.xlane.f32.xlu0 %v6043_v32 }
 0x862   :  { %v6016_v3 = vpop.f32.mrf.mxu1 }
 0x863   :  { %v6017_v10 = vadd.f32 %v6016_v3, %v5975_v13 }
 0x865   :  { %v6032_v23 = vadd.f32 %v6017_v10, %v12911_v61 }
 0x867   :  { %v6046_v43 = vsel %vm266_vm0, %v6032_v23, 0.0 }
 0x868   :  { %6047 = vadd.xlane.f32.xlu2 %v6046_v43 }
 0x86a   :  { %v6019_v5 = vpop.f32.mrf.mxu1 }
 0x86b   :  { %v6020_v44 = vadd.f32 %v6019_v5, %v5975_v13 }
 0x86d   :  { %v6033_v17 = vadd.f32 %v6020_v44, %v12912_v41 }
 0x86f   :  { %v6049_v40 = vsel %vm266_vm0, %v6033_v17, 0.0 }
 0x870   :  { %6050 = vadd.xlane.f32.xlu1 %v6049_v40 }
 0x872   :  { %v6021_v46 = vpop.f32.mrf.mxu1 }
 0x873   :  { %v6022_v47 = vadd.f32 %v6021_v46, %v5975_v13 }
 0x875   :  { %v6034_v59 = vadd.f32 %v6022_v47, %v12913_v34 }
 0x877   :  { %v6052_v19 = vsel %vm266_vm0, %v6034_v59, 0.0 }
 0x878   :  { %6053 = vadd.xlane.f32.xlu0 %v6052_v19 }
 0x87a   :  { %v6024_v11 = vpop.f32.mrf.mxu1 }
 0x87b   :  { %v6025_v28 = vadd.f32 %v6024_v11, %v5975_v13 }
 0x87d   :  { %v6035_v37 = vadd.f32 %v6025_v28, %v12914_v22 }
 0x87f   :  { %v6055_v52 = vsel %vm266_vm0, %v6035_v37, 0.0 }
 0x880   :  { %6056 = vadd.xlane.f32.xlu0 %v6055_v52 }
 0x882   :  { %v6026_v49 = vpop.f32.mrf.mxu1 }
 0x883   :  { %v6027_v4 = vadd.f32 %v6026_v49, %v5975_v13 }
 0x885   :  { %v6036_v56 = vadd.f32 %v6027_v4, %v12915_v18  ;;  %v12097_v18 = vperm.slane %v12020_v0, 5 }
 0x887   :  { %v6058_v33 = vsel %vm266_vm0, %v6036_v56, 0.0 }
 0x8b6   :  { %v6039_v45 = vpop.xlane.xlu1 %6038 }
 0x8b7   :  { %v6068_v20 = vmul.f32 %v12037_v24, %v6039_v45 }
 0x8b9   :  { %v12040_v38 = vsub.f32 %v6029_v51, %v6068_v20  ;;  %v12092_v20 = vperm.slane %v12020_v0, 4 }
 0x8bb   :  { %v6084_v2 = vmul.f32 %v12040_v38, %v12040_v38 }
 0x8bd   :  { %v6092_v26 = vsel %vm266_vm0, %v6084_v2, 0.0  ;;  %v6880_v2 = vld [vmem:[#allocation7 + $0x8] sm:$0xff] }
 0x8be   :  { %v6042_v12 = vpop.xlane.xlu2 %6041  ;;  %6093 = vadd.xlane.f32.xlu2 %v6092_v26  ;;  %6277 = vmatpush.bf16.msra.mxu2 %v6880_v2 }
 0x8bf   :  { %v6069_v63 = vmul.f32 %v12037_v24, %v6042_v12 }
 0x8c1   :  { %v12047_v31 = vsub.f32 %v6030_v8, %v6069_v63 }
 0x8c3   :  { %v6085_v35 = vmul.f32 %v12047_v31, %v12047_v31 }
 0x8c5   :  { %v6095_v29 = vsel %vm266_vm0, %v6085_v35, 0.0 }
 0x8c6   :  { %6096 = vadd.xlane.f32.xlu1 %v6095_v29  ;;  %6059 = vadd.xlane.f32.xlu2 %v6058_v33 }
 0x8d3   :  { %v6045_v50 = vpop.xlane.xlu0 %6044 }
 0x8d4   :  { %v6070_v54 = vmul.f32 %v12037_v24, %v6045_v50 }
 0x8d6   :  { %v12054_v25 = vsub.f32 %v6031_v16, %v6070_v54  ;;  %v6879_v54 = vld [vmem:[#allocation7] sm:$0xff] }
 0x8d7   :  { %6278 = vmatpush.bf16.msra.mxu2 %v6879_v54 }
 0x8d8   :  { %v6086_v48 = vmul.f32 %v12054_v25, %v12054_v25 }
 0x8da   :  { %v6098_v14 = vsel %vm266_vm0, %v6086_v48, 0.0 }
 0x8db   :  { %v6048_v13 = vpop.xlane.xlu2 %6047  ;;  %6099 = vadd.xlane.f32.xlu1 %v6098_v14 }
 0x8dc   :  { %v6071_v42 = vmul.f32 %v12037_v24, %v6048_v13 }
 0x8de   :  { %v12060_v55 = vsub.f32 %v6032_v23, %v6071_v42 }
 0x8e0   :  { %v6087_v21 = vmul.f32 %v12060_v55, %v12060_v55 }
 0x8e2   :  { %v6101_v51 = vsel %vm266_vm0, %v6087_v21, 0.0 }
 0x8e3   :  { %v6051_v30 = vpop.xlane.xlu1 %6050  ;;  %6102 = vadd.xlane.f32.xlu0 %v6101_v51 }
 0x8e4   :  { %v6072_v6 = vmul.f32 %v12037_v24, %v6051_v30 }
 0x8e6   :  { %v12066_v58 = vsub.f32 %v6033_v17, %v6072_v6 }
 0x8e8   :  { %v6088_v60 = vmul.f32 %v12066_v58, %v12066_v58 }
 0x8ea   :  { %v6104_v8 = vsel %vm266_vm0, %v6088_v60, 0.0 }
 0x8eb   :  { %v6054_v39 = vpop.xlane.xlu0 %6053  ;;  %6105 = vadd.xlane.f32.xlu2 %v6104_v8 }
 0x8ec   :  { %v6073_v27 = vmul.f32 %v12037_v24, %v6054_v39 }
 0x8ee   :  { %v12072_v9 = vsub.f32 %v6034_v59, %v6073_v27 }
 0x8f0   :  { %v6089_v62 = vmul.f32 %v12072_v9, %v12072_v9 }
 0x8f2   :  { %v6107_v16 = vsel %vm266_vm0, %v6089_v62, 0.0 }
 0x8f3   :  { %6108 = vadd.xlane.f32.xlu1 %v6107_v16  ;;  %v6057_v32 = vpop.xlane.xlu0 %6056 }
 0x8f4   :  { %v6074_v3 = vmul.f32 %v12037_v24, %v6057_v32 }
 0x8f6   :  { %v12078_v10 = vsub.f32 %v6035_v37, %v6074_v3 }
 0x8f8   :  { %v6090_v61 = vmul.f32 %v12078_v10, %v12078_v10 }
 0x8fa   :  { %v6110_v23 = vsel %vm266_vm0, %v6090_v61, 0.0 }
 0x8fb   :  { %6111 = vadd.xlane.f32.xlu0 %v6110_v23 }
 0x931   :  { %v6094_v43 = vpop.xlane.xlu2 %6093 }
 0x932   :  { %v6116_v5 = vmul.f32 %v6094_v43, %v12037_v24 }
 0x934   :  { %v6124_v44 = vadd.f32 1e-05, %v6116_v5 }
 0x936   :  { %7363 = vrsqrt.f32 %v6124_v44  ;;  %vm6138_vm9 = vweird.f32 %v6124_v44 }
 0x939   :  { %v6097_v41 = vpop.xlane.xlu1 %6096  ;;  %v6060_v17 = vpop.xlane.xlu2 %6059 }
 0x93a   :  { %v6117_v40 = vmul.f32 %v6097_v41, %v12037_v24  ;;  %v6075_v34 = vmul.f32 %v12037_v24, %v6060_v17 }
 0x93c   :  { %v7364_v46 = vpop.eup %7363  ;;  %v6125_v47 = vadd.f32 1e-05, %v6117_v40  ;;  %v12086_v11 = vsub.f32 %v6036_v56, %v6075_v34 }
 0x93d   :  { %v6133_v59 = vmul.f32 %v7364_v46, %v6124_v44  ;;  %vm6139_vm8 = vweird.f32 %v7364_v46 }
 0x93e   :  { %7365 = vrsqrt.f32 %v6125_v47  ;;  %v6091_v52 = vmul.f32 %v12086_v11, %v12086_v11  ;;  %vm6140_vm10 = vmor %vm6138_vm9, %vm6139_vm8  ;;  %vm6148_vm12 = vweird.f32 %v6125_v47 }
 0x93f   :  { %v6134_v19 = vmul.f32 %v7364_v46, %v6133_v59 }
 0x940   :  { %v6113_v57 = vsel %vm266_vm0, %v6091_v52, 0.0 }
 0x941   :  { %v6135_v28 = vmul.f32 0.5, %v6134_v19  ;;  %6114 = vadd.xlane.f32.xlu2 %v6113_v57 }
 0x943   :  { %v6136_v22 = vsub.f32 1.5, %v6135_v28 }
 0x944   :  { %v7366_v37 = vpop.eup %7365 }
 0x945   :  { %v6137_v7 = vmul.f32 %v7364_v46, %v6136_v22  ;;  %v6143_v1 = vmul.f32 %v7366_v37, %v6125_v47  ;;  %vm6149_vm11 = vweird.f32 %v7366_v37 }
 0x946   :  { %vm6150_vm13 = vmor %vm6148_vm12, %vm6149_vm11 }
 0x947   :  { %v6144_v15 = vmul.f32 %v7366_v37, %v6143_v1  ;;  %v6141_v53 = vsel %vm6140_vm10, %v7364_v46, %v6137_v7 }
 0x948   :  { %v6212_v49 = vmul.f32 %v6141_v53, %v12040_v38 }
 0x949   :  { %v6145_v36 = vmul.f32 0.5, %v6144_v15 }
 0x94a   :  { %v6221_v56 = vmul.f32 %v12092_v20, %v6212_v49 }
 0x94b   :  { %v6146_v45 = vsub.f32 1.5, %v6145_v36 }
 0x94c   :  { %v12103_v38 = vadd.f32 %v12097_v18, %v6221_v56 }
 0x94d   :  { %v6147_v4 = vmul.f32 %v7366_v37, %v6146_v45 }
 0x94e   :  { %v6100_v26 = vpop.xlane.xlu1 %6099 }
 0x94f   :  { %v6118_v12 = vmul.f32 %v6100_v26, %v12037_v24  ;;  %v6151_v63 = vsel %vm6150_vm13, %v7366_v37, %v6147_v4 }
 0x950   :  { %v6213_v35 = vmul.f32 %v6151_v63, %v12047_v31 }
 0x951   :  { %v6126_v29 = vadd.f32 1e-05, %v6118_v12 }
 0x952   :  { %v6222_v33 = vmul.f32 %v12092_v20, %v6213_v35 }
 0x953   :  { %7367 = vrsqrt.f32 %v6126_v29  ;;  %vm6158_vm15 = vweird.f32 %v6126_v29 }
 0x954   :  { %v12106_v50 = vadd.f32 %v12097_v18, %v6222_v33 }
 0x956   :  { %v6103_v48 = vpop.xlane.xlu0 %6102  ;;  %v6238_v14 = vpack.c.bf16 %v12106_v50, %v12103_v38 }
 0x957   :  { %v6119_v13 = vmul.f32 %v6103_v48, %v12037_v24 }
 0x958   :  { %6849 = vmatmul.msk.bf16.vlgmr.msra.gmra.mxu2 %vm266_vm0, %v6238_v14 }
 0x959   :  { %v7368_v42 = vpop.eup %7367  ;;  %v6127_v31 = vadd.f32 1e-05, %v6119_v13 }
 0x95a   :  { %v6153_v21 = vmul.f32 %v7368_v42, %v6126_v29  ;;  %vm6159_vm14 = vweird.f32 %v7368_v42 }
 0x95b   :  { %7369 = vrsqrt.f32 %v6127_v31  ;;  %vm6160_vm2 = vmor %vm6158_vm15, %vm6159_vm14  ;;  %vm6168_vm4 = vweird.f32 %v6127_v31 }
 0x95c   :  { %v6154_v51 = vmul.f32 %v7368_v42, %v6153_v21 }
 0x95e   :  { %v6155_v30 = vmul.f32 0.5, %v6154_v51  ;;  %v6106_v6 = vpop.xlane.xlu2 %6105 }
 0x95f   :  { %v6120_v60 = vmul.f32 %v6106_v6, %v12037_v24 }
 0x960   :  { %v6156_v8 = vsub.f32 1.5, %v6155_v30 }
 0x961   :  { %v7370_v39 = vpop.eup %7369  ;;  %v6128_v27 = vadd.f32 1e-05, %v6120_v60 }
 0x962   :  { %v6157_v62 = vmul.f32 %v7368_v42, %v6156_v8  ;;  %v6163_v16 = vmul.f32 %v7370_v39, %v6127_v31  ;;  %vm6169_vm3 = vweird.f32 %v7370_v39 }
 0x963   :  { %7371 = vrsqrt.f32 %v6128_v27  ;;  %vm6170_vm5 = vmor %vm6168_vm4, %vm6169_vm3  ;;  %vm6178_vm7 = vweird.f32 %v6128_v27 }
 0x964   :  { %v6164_v32 = vmul.f32 %v7370_v39, %v6163_v16  ;;  %v6161_v3 = vsel %vm6160_vm2, %v7368_v42, %v6157_v62 }
 0x965   :  { %v6214_v41 = vmul.f32 %v6161_v3, %v12054_v25 }
 0x966   :  { %v6165_v61 = vmul.f32 0.5, %v6164_v32  ;;  %v6109_v23 = vpop.xlane.xlu1 %6108 }
 0x967   :  { %v6121_v43 = vmul.f32 %v6109_v23, %v12037_v24  ;;  %v6223_v19 = vmul.f32 %v12092_v20, %v6214_v41 }
 0x968   :  { %v6166_v5 = vsub.f32 1.5, %v6165_v61 }
 0x969   :  { %v7372_v44 = vpop.eup %7371  ;;  %v6129_v17 = vadd.f32 1e-05, %v6121_v43  ;;  %v12119_v7 = vadd.f32 %v12097_v18, %v6223_v19 }
 0x96a   :  { %v6167_v40 = vmul.f32 %v7370_v39, %v6166_v5  ;;  %v6173_v46 = vmul.f32 %v7372_v44, %v6128_v27  ;;  %vm6179_vm6 = vweird.f32 %v7372_v44 }
 0x96b   :  { %7373 = vrsqrt.f32 %v6129_v17  ;;  %vm6180_vm8 = vmor %vm6178_vm7, %vm6179_vm6  ;;  %vm6188_vm10 = vweird.f32 %v6129_v17 }
 0x96c   :  { %v6171_v47 = vsel %vm6170_vm5, %v7370_v39, %v6167_v40  ;;  %v6174_v34 = vmul.f32 %v7372_v44, %v6173_v46 }
 0x96d   :  { %v6215_v59 = vmul.f32 %v6171_v47, %v12060_v55 }
 0x96e   :  { %v6175_v28 = vmul.f32 0.5, %v6174_v34  ;;  %v6883_v34 = vld [vmem:[%s12304_s5 + $0x10] sm:$0xff] }
 0x96f   :  { %v6224_v22 = vmul.f32 %v12092_v20, %v6215_v59 }
 0x970   :  { %v6176_v37 = vsub.f32 1.5, %v6175_v28 }
 0x971   :  { %v7374_v52 = vpop.eup %7373  ;;  %v12122_v25 = vadd.f32 %v12097_v18, %v6224_v22 }
 0x972   :  { %v6177_v1 = vmul.f32 %v7372_v44, %v6176_v37  ;;  %v6183_v57 = vmul.f32 %v7374_v52, %v6129_v17  ;;  %vm6189_vm9 = vweird.f32 %v7374_v52 }
 0x973   :  { %v6239_v15 = vpack.c.bf16 %v12122_v25, %v12119_v7  ;;  %vm6190_vm11 = vmor %vm6188_vm10, %vm6189_vm9 }
 0x974   :  { %v6184_v55 = vmul.f32 %v7374_v52, %v6183_v57  ;;  %v6181_v53 = vsel %vm6180_vm8, %v7372_v44, %v6177_v1  ;;  %v6881_v57 = vld [vmem:[%s12304_s5] sm:$0xff] }
 0x975   :  { %6850 = vmatmul.msk.bf16.gmra.mxu2 %vm266_vm0, %v6239_v15  ;;  %v6216_v49 = vmul.f32 %v6181_v53, %v12066_v58  ;;  %v6112_v58 = vpop.xlane.xlu0 %6111 }
 0x976   :  { %v6185_v36 = vmul.f32 0.5, %v6184_v55  ;;  %v6122_v33 = vmul.f32 %v6112_v58, %v12037_v24 }
 0x977   :  { %v6225_v12 = vmul.f32 %v12092_v20, %v6216_v49 }
 0x978   :  { %v6186_v45 = vsub.f32 1.5, %v6185_v36  ;;  %v6130_v54 = vadd.f32 1e-05, %v6122_v33 }
 0x979   :  { %v12132_v56 = vadd.f32 %v12097_v18, %v6225_v12 }
 0x97a   :  { %v6187_v2 = vmul.f32 %v7374_v52, %v6186_v45  ;;  %7375 = vrsqrt.f32 %v6130_v54  ;;  %vm6198_vm13 = vweird.f32 %v6130_v54 }
 0x97c   :  { %v6191_v4 = vsel %vm6190_vm11, %v7374_v52, %v6187_v2  ;;  %v6882_v52 = vld [vmem:[%s12304_s5 + $0x8] sm:$0xff] }
 0x97d   :  { %v6217_v26 = vmul.f32 %v6191_v4, %v12072_v9 }
 0x97f   :  { %v6226_v63 = vmul.f32 %v12092_v20, %v6217_v26 }
 0x980   :  { %v7376_v9 = vpop.eup %7375 }
 0x981   :  { %v12135_v35 = vadd.f32 %v12097_v18, %v6226_v63  ;;  %v6193_v48 = vmul.f32 %v7376_v9, %v6130_v54  ;;  %vm6199_vm12 = vweird.f32 %v7376_v9 }
 0x982   :  { %vm6200_vm14 = vmor %vm6198_vm13, %vm6199_vm12 }
 0x983   :  { %v6240_v29 = vpack.c.bf16 %v12135_v35, %v12132_v56  ;;  %v6194_v14 = vmul.f32 %v7376_v9, %v6193_v48 }
 0x985   :  { %6851 = vmatmul.msk.bf16.gmra.mxu2 %vm266_vm0, %v6240_v29  ;;  %v6195_v21 = vmul.f32 0.5, %v6194_v14 }
 0x987   :  { %v6196_v51 = vsub.f32 1.5, %v6195_v21 }
 0x989   :  { %v6197_v6 = vmul.f32 %v7376_v9, %v6196_v51 }
 0x98b   :  { %v6201_v39 = vsel %vm6200_vm14, %v7376_v9, %v6197_v6 }
 0x98c   :  { %v6218_v16 = vmul.f32 %v6201_v39, %v12078_v10  ;;  %v12156_v10 = vperm.slane %v12020_v0, 1 }
 0x98e   :  { %v6227_v23 = vmul.f32 %v12092_v20, %v6218_v16 }
 0x990   :  { %v12147_v5 = vadd.f32 %v12097_v18, %v6227_v23 }
 0x9b4   :  { %v6115_v13 = vpop.xlane.xlu2 %6114 }
 0x9b5   :  { %v6123_v42 = vmul.f32 %v6115_v13, %v12037_v24 }
 0x9b7   :  { %v6131_v31 = vadd.f32 1e-05, %v6123_v42 }
 0x9b9   :  { %7377 = vrsqrt.f32 %v6131_v31  ;;  %vm6208_vm2 = vweird.f32 %v6131_v31 }
 0x9bf   :  { %v7378_v30 = vpop.eup %7377 }
 0x9c0   :  { %v6203_v60 = vmul.f32 %v7378_v30, %v6131_v31  ;;  %vm6209_vm15 = vweird.f32 %v7378_v30 }
 0x9c1   :  { %vm6210_vm3 = vmor %vm6208_vm2, %vm6209_vm15 }
 0x9c2   :  { %v6204_v8 = vmul.f32 %v7378_v30, %v6203_v60 }
 0x9c4   :  { %v6205_v27 = vmul.f32 0.5, %v6204_v8 }
 0x9c6   :  { %v6206_v62 = vsub.f32 1.5, %v6205_v27 }
 0x9c8   :  { %v6207_v32 = vmul.f32 %v7378_v30, %v6206_v62 }
 0x9ca   :  { %v6211_v3 = vsel %vm6210_vm3, %v7378_v30, %v6207_v32 }
 0x9cb   :  { %v6219_v61 = vmul.f32 %v6211_v3, %v12086_v11 }
 0x9cd   :  { %v6228_v43 = vmul.f32 %v12092_v20, %v6219_v61  ;;  %v6884_v20 = vld [vmem:[%s12304_s5 + $0x18] sm:$0xff]  ;;  %s7558_s5 = smov [#allocation10]  }
 0x9ce   :  { %6425 = vmatpush.bf16.msra.mxu3 %v6884_v20  ;;  %s6728_s6 = sshll.u32 %s7558_s5, 4  ;;  %s6729_s6 = int_to_ptr.vmem [resolvable:$true] %s6728_s6 }
 0x9cf   :  { %v12150_v44 = vadd.f32 %v12097_v18, %v6228_v43 }
 0x9d1   :  { %v6241_v41 = vpack.c.bf16 %v12150_v44, %v12147_v5 }
 0x9d2   :  { %6426 = vmatpush.bf16.msra.mxu3 %v6883_v34 }
 0x9d3   :  { %6852 = vmatmul.msk.bf16.gmra.mxu2 %vm266_vm0, %v6241_v41 }
 0x9d6   :  { %6427 = vmatpush.bf16.msra.mxu3 %v6882_v52 }
 0x9da   :  { %6428 = vmatpush.bf16.msra.mxu3 %v6881_v57 }
 0x9db   :  { %v6280_v17 = vpop.f32.mrf.mxu2 }
 0x9dc   :  { %v6281_v11 = vadd.f32 %v6280_v17, %v12156_v10 }
 0x9de   :  { %v6308_v40 = vmul.f32 0.044715, %v6281_v11  ;;  %v6300_v2 = vmul.f32 0.5, %v6281_v11 }
 0x9e0   :  { %v6316_v46 = vmul.f32 %v6308_v40, %v6281_v11 }
 0x9e2   :  { %v6324_v47 = vmul.f32 %v6316_v46, %v6281_v11 }
 0x9e3   :  { %v6282_v18 = vpop.f32.mrf.mxu2 }
 0x9e4   :  { %v6332_v59 = vadd.f32 %v6324_v47, %v6281_v11  ;;  %v6283_v19 = vadd.f32 %v6282_v18, %v12156_v10 }
 0x9e6   :  { %v6309_v28 = vmul.f32 0.044715, %v6283_v19  ;;  %v6340_v22 = vmul.f32 0.7978846, %v6332_v59  ;;  %v6301_v4 = vmul.f32 0.5, %v6283_v19 }
 0x9e8   :  { %v6317_v37 = vmul.f32 %v6309_v28, %v6283_v19  ;;  %7379 = vtanh.f32 %v6340_v22 }
 0x9ea   :  { %v6325_v1 = vmul.f32 %v6317_v37, %v6283_v19 }
 0x9ec   :  { %v6333_v15 = vadd.f32 %v6325_v1, %v6283_v19 }
 0x9ee   :  { %v6341_v55 = vmul.f32 0.7978846, %v6333_v15  ;;  %v7380_v53 = vpop.eup %7379 }
 0x9ef   :  { %v6356_v36 = vadd.f32 1.0, %v7380_v53 }
 0x9f0   :  { %7381 = vtanh.f32 %v6341_v55 }
 0x9f1   :  { %v6364_v63 = vmul.f32 %v6356_v36, %v6300_v2 }
 0x9f6   :  { %v7382_v45 = vpop.eup %7381 }
 0x9f7   :  { %v6357_v26 = vadd.f32 1.0, %v7382_v45 }
 0x9f8   :  { %v6285_v49 = vpop.f32.mrf.mxu2 }
 0x9f9   :  { %v6286_v12 = vadd.f32 %v6285_v49, %v12156_v10  ;;  %v6365_v29 = vmul.f32 %v6357_v26, %v6301_v4 }
 0x9fb   :  { %v6310_v58 = vmul.f32 0.044715, %v6286_v12  ;;  %v6372_v33 = vpack.c.bf16 %v6365_v29, %v6364_v63  ;;  %v6302_v17 = vmul.f32 0.5, %v6286_v12 }
 0x9fd   :  { %v6318_v54 = vmul.f32 %v6310_v58, %v6286_v12  ;;  %6869 = vmatmul.msk.bf16.vlgmr.msra.gmra.mxu3 %vm312_vm1, %v6372_v33 }
 0x9ff   :  { %v6326_v9 = vmul.f32 %v6318_v54, %v6286_v12 }
 0xa00   :  { %v6287_v48 = vpop.f32.mrf.mxu2 }
 0xa01   :  { %v6334_v14 = vadd.f32 %v6326_v9, %v6286_v12  ;;  %v6288_v13 = vadd.f32 %v6287_v48, %v12156_v10 }
 0xa03   :  { %v6311_v42 = vmul.f32 0.044715, %v6288_v13  ;;  %v6342_v31 = vmul.f32 0.7978846, %v6334_v14  ;;  %v6303_v11 = vmul.f32 0.5, %v6288_v13 }
 0xa05   :  { %v6319_v21 = vmul.f32 %v6311_v42, %v6288_v13  ;;  %7383 = vtanh.f32 %v6342_v31 }
 0xa07   :  { %v6327_v51 = vmul.f32 %v6319_v21, %v6288_v13 }
 0xa08   :  { %v6290_v30 = vpop.f32.mrf.mxu2 }
 0xa09   :  { %v6335_v6 = vadd.f32 %v6327_v51, %v6288_v13  ;;  %v6291_v60 = vadd.f32 %v6290_v30, %v12156_v10 }
 0xa0b   :  { %v6343_v8 = vmul.f32 0.7978846, %v6335_v6  ;;  %v6312_v39 = vmul.f32 0.044715, %v6291_v60  ;;  %v7384_v62 = vpop.eup %7383  ;;  %v6304_v1 = vmul.f32 0.5, %v6291_v60 }
 0xa0c   :  { %v6358_v23 = vadd.f32 1.0, %v7384_v62 }
 0xa0d   :  { %v6320_v27 = vmul.f32 %v6312_v39, %v6291_v60  ;;  %7385 = vtanh.f32 %v6343_v8 }
 0xa0e   :  { %v6366_v47 = vmul.f32 %v6358_v23, %v6302_v17 }
 0xa0f   :  { %v6328_v16 = vmul.f32 %v6320_v27, %v6291_v60 }
 0xa10   :  { %v6292_v32 = vpop.f32.mrf.mxu2 }
 0xa11   :  { %v6336_v3 = vadd.f32 %v6328_v16, %v6291_v60  ;;  %v6293_v61 = vadd.f32 %v6292_v32, %v12156_v10 }
 0xa13   :  { %v7386_v43 = vpop.eup %7385  ;;  %v6313_v41 = vmul.f32 0.044715, %v6293_v61  ;;  %v6344_v46 = vmul.f32 0.7978846, %v6336_v3  ;;  %v6305_v57 = vmul.f32 0.5, %v6293_v61 }
 0xa14   :  { %v6359_v40 = vadd.f32 1.0, %v7386_v43 }
 0xa15   :  { %v6321_v20 = vmul.f32 %v6313_v41, %v6293_v61  ;;  %7387 = vtanh.f32 %v6344_v46 }
 0xa16   :  { %v6367_v18 = vmul.f32 %v6359_v40, %v6303_v11 }
 0xa17   :  { %v6329_v34 = vmul.f32 %v6321_v20, %v6293_v61 }
 0xa18   :  { %v6373_v59 = vpack.c.bf16 %v6367_v18, %v6366_v47 }
 0xa19   :  { %v6337_v19 = vadd.f32 %v6329_v34, %v6293_v61 }
 0xa1a   :  { %6870 = vmatmul.msk.bf16.gmra.mxu3 %vm312_vm1, %v6373_v59 }
 0xa1b   :  { %v6345_v28 = vmul.f32 0.7978846, %v6337_v19  ;;  %v7388_v22 = vpop.eup %7387 }
 0xa1c   :  { %v6360_v37 = vadd.f32 1.0, %v7388_v22 }
 0xa1d   :  { %7389 = vtanh.f32 %v6345_v28 }
 0xa1e   :  { %v6368_v55 = vmul.f32 %v6360_v37, %v6304_v1 }
 0xa23   :  { %v7390_v52 = vpop.eup %7389 }
 0xa24   :  { %v6361_v15 = vadd.f32 1.0, %v7390_v52 }
 0xa26   :  { %v6369_v53 = vmul.f32 %v6361_v15, %v6305_v57 }
 0xa28   :  { %v6374_v36 = vpack.c.bf16 %v6369_v53, %v6368_v55 }
 0xa2a   :  { %6871 = vmatmul.msk.bf16.gmra.mxu3 %vm312_vm1, %v6374_v36 }
 0xa56   :  { %v6295_v45 = vpop.f32.mrf.mxu2 }
 0xa57   :  { %v6296_v49 = vadd.f32 %v6295_v45, %v12156_v10 }
 0xa59   :  { %v6314_v2 = vmul.f32 0.044715, %v6296_v49  ;;  %v6306_v21 = vmul.f32 0.5, %v6296_v49 }
 0xa5b   :  { %v6322_v4 = vmul.f32 %v6314_v2, %v6296_v49 }
 0xa5d   :  { %v6330_v26 = vmul.f32 %v6322_v4, %v6296_v49 }
 0xa5e   :  { %v6297_v12 = vpop.f32.mrf.mxu2 }
 0xa5f   :  { %v6338_v63 = vadd.f32 %v6330_v26, %v6296_v49  ;;  %v6298_v29 = vadd.f32 %v6297_v12, %v12156_v10  ;;  %v6384_v10 = vperm.slane %v12020_v0, 3 }
 0xa61   :  { %v6315_v58 = vmul.f32 0.044715, %v6298_v29  ;;  %v6346_v33 = vmul.f32 0.7978846, %v6338_v63  ;;  %v6307_v51 = vmul.f32 0.5, %v6298_v29 }
 0xa63   :  { %v6323_v54 = vmul.f32 %v6315_v58, %v6298_v29  ;;  %7391 = vtanh.f32 %v6346_v33 }
 0xa65   :  { %v6331_v9 = vmul.f32 %v6323_v54, %v6298_v29 }
 0xa67   :  { %v6339_v48 = vadd.f32 %v6331_v9, %v6298_v29 }
 0xa69   :  { %v6347_v14 = vmul.f32 0.7978846, %v6339_v48  ;;  %v7392_v13 = vpop.eup %7391 }
 0xa6a   :  { %v6362_v42 = vadd.f32 1.0, %v7392_v13 }
 0xa6b   :  { %7393 = vtanh.f32 %v6347_v14 }
 0xa6c   :  { %v6370_v6 = vmul.f32 %v6362_v42, %v6306_v21 }
 0xa71   :  { %v7394_v31 = vpop.eup %7393 }
 0xa72   :  { %v6363_v30 = vadd.f32 1.0, %v7394_v31 }
 0xa74   :  { %v6371_v60 = vmul.f32 %v6363_v30, %v6307_v51 }
 0xa76   :  { %v6375_v8 = vpack.c.bf16 %v6371_v60, %v6370_v6 }
 0xa78   :  { %6872 = vmatmul.msk.bf16.gmra.mxu3 %vm312_vm1, %v6375_v8 }
 0xa80   :  { %v6430_v39 = vpop.f32.mrf.mxu3 }
 0xa81   :  { %v6431_v27 = vadd.f32 %v6430_v39, %v6384_v10 }
 0xa83   :  { %v6450_v62 = vadd.f32 %v6431_v27, %v12103_v38 }
 0xa85   :  { %v6458_v16 = vsel %vm266_vm0, %v6450_v62, 0.0 }
 0xa86   :  { %6459 = vadd.xlane.f32.xlu1 %v6458_v16 }
 0xa88   :  { %v6432_v32 = vpop.f32.mrf.mxu3 }
 0xa89   :  { %v6433_v3 = vadd.f32 %v6432_v32, %v6384_v10 }
 0xa8b   :  { %v6451_v61 = vadd.f32 %v6433_v3, %v12106_v50 }
 0xa8d   :  { %v6461_v23 = vsel %vm266_vm0, %v6451_v61, 0.0 }
 0xa8e   :  { %6462 = vadd.xlane.f32.xlu2 %v6461_v23 }
 0xa9d   :  { %v6435_v43 = vpop.f32.mrf.mxu3 }
 0xa9e   :  { %v6436_v46 = vadd.f32 %v6435_v43, %v6384_v10 }
 0xaa0   :  { %v6452_v47 = vadd.f32 %v6436_v46, %v12119_v7 }
 0xaa2   :  { %v6464_v19 = vsel %vm266_vm0, %v6452_v47, 0.0 }
 0xaa5   :  { %v6437_v41 = vpop.f32.mrf.mxu3 }
 0xaa6   :  { %v6438_v50 = vadd.f32 %v6437_v41, %v6384_v10 }
 0xaa8   :  { %v6453_v28 = vadd.f32 %v6438_v50, %v12122_v25 }
 0xaad   :  { %v6440_v17 = vpop.f32.mrf.mxu3 }
 0xaae   :  { %v6441_v11 = vadd.f32 %v6440_v17, %v6384_v10 }
 0xab0   :  { %v6454_v40 = vadd.f32 %v6441_v11, %v12132_v56  ;;  %v6467_v56 = vsel %vm266_vm0, %v6453_v28, 0.0 }
 0xab2   :  { %v6470_v20 = vsel %vm266_vm0, %v6454_v40, 0.0 }
 0xab3   :  { %6471 = vadd.xlane.f32.xlu0 %v6470_v20 }
 0xab5   :  { %v6442_v38 = vpop.f32.mrf.mxu3 }
 0xab6   :  { %v6443_v18 = vadd.f32 %v6442_v38, %v6384_v10 }
 0xab8   :  { %v6455_v34 = vadd.f32 %v6443_v18, %v12135_v35 }
 0xaba   :  { %v6473_v59 = vsel %vm266_vm0, %v6455_v34, 0.0 }
 0xabb   :  { %6474 = vadd.xlane.f32.xlu1 %v6473_v59  ;;  %6465 = vadd.xlane.f32.xlu0 %v6464_v19 }
 0xac3   :  { %6468 = vadd.xlane.f32.xlu1 %v6467_v56 }
 0xaf9   :  { %v6460_v22 = vpop.xlane.xlu1 %6459 }
 0xafa   :  { %v6482_v52 = vmul.f32 %v6460_v22, %v12037_v24 }
 0xafb   :  { %v6445_v37 = vpop.f32.mrf.mxu3 }
 0xafc   :  { %v6446_v7 = vadd.f32 %v6445_v37, %v6384_v10  ;;  %v12197_v35 = vsub.f32 %v6450_v62, %v6482_v52 }
 0xafe   :  { %v6456_v1 = vadd.f32 %v6446_v7, %v12147_v5  ;;  %v6498_v36 = vmul.f32 %v12197_v35, %v12197_v35 }
 0xb00   :  { %v6476_v57 = vsel %vm266_vm0, %v6456_v1, 0.0  ;;  %v6506_v5 = vsel %vm266_vm0, %v6498_v36, 0.0  ;;  %v12255_v36 = vperm.slane %v12020_v0, 7 }
 0xb01   :  { %v6463_v15 = vpop.xlane.xlu2 %6462  ;;  %6477 = vadd.xlane.f32.xlu2 %v6476_v57 }
 0xb02   :  { %v6483_v53 = vmul.f32 %v6463_v15, %v12037_v24 }
 0xb03   :  { %v6447_v55 = vpop.f32.mrf.mxu3 }
 0xb04   :  { %v6448_v25 = vadd.f32 %v6447_v55, %v6384_v10  ;;  %v12204_v49 = vsub.f32 %v6451_v61, %v6483_v53 }
 0xb06   :  { %v6457_v45 = vadd.f32 %v6448_v25, %v12150_v44  ;;  %v6499_v4 = vmul.f32 %v12204_v49, %v12204_v49  ;;  %v12252_v25 = vperm.slane %v12020_v0, 6 }
 0xb08   :  { %v6479_v2 = vsel %vm266_vm0, %v6457_v45, 0.0  ;;  %v6509_v26 = vsel %vm266_vm0, %v6499_v4, 0.0 }
 0xb09   :  { %6480 = vadd.xlane.f32.xlu0 %v6479_v2  ;;  %6507 = vadd.xlane.f32.xlu2 %v6506_v5 }
 0xb11   :  { %6510 = vadd.xlane.f32.xlu0 %v6509_v26 }
 0xb26   :  { %v6472_v12 = vpop.xlane.xlu0 %6471 }
 0xb27   :  { %v6486_v63 = vmul.f32 %v6472_v12, %v12037_v24 }
 0xb29   :  { %v12212_v29 = vsub.f32 %v6454_v40, %v6486_v63 }
 0xb2b   :  { %v6502_v44 = vmul.f32 %v12212_v29, %v12212_v29 }
 0xb2d   :  { %v6518_v58 = vsel %vm266_vm0, %v6502_v44, 0.0 }
 0xb2e   :  { %v6475_v33 = vpop.xlane.xlu1 %6474  ;;  %6519 = vadd.xlane.f32.xlu1 %v6518_v58  ;;  %v6466_v54 = vpop.xlane.xlu0 %6465 }
 0xb2f   :  { %v6487_v9 = vmul.f32 %v6475_v33, %v12037_v24  ;;  %v6484_v48 = vmul.f32 %v6466_v54, %v12037_v24 }
 0xb31   :  { %v12219_v14 = vsub.f32 %v6455_v34, %v6487_v9  ;;  %v12221_v13 = vsub.f32 %v6452_v47, %v6484_v48 }
 0xb33   :  { %v6503_v42 = vmul.f32 %v12219_v14, %v12219_v14  ;;  %v6500_v31 = vmul.f32 %v12221_v13, %v12221_v13 }
 0xb35   :  { %v6521_v21 = vsel %vm266_vm0, %v6503_v42, 0.0  ;;  %v6512_v51 = vsel %vm266_vm0, %v6500_v31, 0.0 }
 0xb36   :  { %v6469_v30 = vpop.xlane.xlu1 %6468  ;;  %6522 = vadd.xlane.f32.xlu2 %v6521_v21  ;;  %6513 = vadd.xlane.f32.xlu1 %v6512_v51 }
 0xb37   :  { %v6485_v6 = vmul.f32 %v6469_v30, %v12037_v24 }
 0xb39   :  { %v12230_v60 = vsub.f32 %v6453_v28, %v6485_v6 }
 0xb3b   :  { %v6501_v8 = vmul.f32 %v12230_v60, %v12230_v60 }
 0xb3d   :  { %v6515_v10 = vsel %vm266_vm0, %v6501_v8, 0.0 }
 0xb3e   :  { %6516 = vadd.xlane.f32.xlu2 %v6515_v10 }
 0xb74   :  { %v6478_v39 = vpop.xlane.xlu2 %6477 }
 0xb75   :  { %v6488_v27 = vmul.f32 %v6478_v39, %v12037_v24 }
 0xb77   :  { %v12236_v62 = vsub.f32 %v6456_v1, %v6488_v27 }
 0xb79   :  { %v6504_v16 = vmul.f32 %v12236_v62, %v12236_v62 }
 0xb7b   :  { %v6524_v32 = vsel %vm266_vm0, %v6504_v16, 0.0 }
 0xb7c   :  { %6525 = vadd.xlane.f32.xlu0 %v6524_v32  ;;  %v6508_v3 = vpop.xlane.xlu2 %6507  ;;  %v6481_v61 = vpop.xlane.xlu0 %6480 }
 0xb7d   :  { %v6530_v23 = vmul.f32 %v6508_v3, %v12037_v24  ;;  %v6489_v43 = vmul.f32 %v6481_v61, %v12037_v24 }
 0xb7f   :  { %v6538_v41 = vadd.f32 1e-05, %v6530_v23  ;;  %v12243_v17 = vsub.f32 %v6457_v45, %v6489_v43 }
 0xb81   :  { %7395 = vrsqrt.f32 %v6538_v41  ;;  %v6505_v11 = vmul.f32 %v12243_v17, %v12243_v17  ;;  %vm6552_vm4 = vweird.f32 %v6538_v41 }
 0xb83   :  { %v6527_v40 = vsel %vm266_vm0, %v6505_v11, 0.0 }
 0xb84   :  { %6528 = vadd.xlane.f32.xlu1 %v6527_v40  ;;  %v6511_v46 = vpop.xlane.xlu0 %6510 }
 0xb85   :  { %v6531_v20 = vmul.f32 %v6511_v46, %v12037_v24 }
 0xb87   :  { %v7396_v38 = vpop.eup %7395  ;;  %v6539_v47 = vadd.f32 1e-05, %v6531_v20 }
 0xb88   :  { %v6547_v18 = vmul.f32 %v7396_v38, %v6538_v41  ;;  %vm6553_vm1 = vweird.f32 %v7396_v38 }
 0xb89   :  { %7397 = vrsqrt.f32 %v6539_v47  ;;  %vm6554_vm5 = vmor %vm6552_vm4, %vm6553_vm1  ;;  %vm6562_vm7 = vweird.f32 %v6539_v47 }
 0xb8a   :  { %v6548_v34 = vmul.f32 %v7396_v38, %v6547_v18 }
 0xb8c   :  { %v6549_v59 = vmul.f32 0.5, %v6548_v34 }
 0xb8e   :  { %v6550_v56 = vsub.f32 1.5, %v6549_v59 }
 0xb8f   :  { %v7398_v50 = vpop.eup %7397 }
 0xb90   :  { %v6557_v19 = vmul.f32 %v7398_v50, %v6539_v47  ;;  %v6551_v37 = vmul.f32 %v7396_v38, %v6550_v56  ;;  %vm6563_vm6 = vweird.f32 %v7398_v50 }
 0xb91   :  { %vm6564_vm8 = vmor %vm6562_vm7, %vm6563_vm6 }
 0xb92   :  { %v6558_v28 = vmul.f32 %v7398_v50, %v6557_v19  ;;  %v6555_v57 = vsel %vm6554_vm5, %v7396_v38, %v6551_v37 }
 0xb93   :  { %v6626_v53 = vmul.f32 %v6555_v57, %v12197_v35 }
 0xb94   :  { %v6559_v22 = vmul.f32 0.5, %v6558_v28 }
 0xb95   :  { %v6635_v12 = vmul.f32 %v12252_v25, %v6626_v53 }
 0xb96   :  { %v6560_v52 = vsub.f32 1.5, %v6559_v22 }
 0xb97   :  { %v6644_v33 = vadd.f32 %v12255_v36, %v6635_v12 }
 0xb98   :  { %v6561_v55 = vmul.f32 %v7398_v50, %v6560_v52 }
 0xb9a   :  { %v6565_v45 = vsel %vm6564_vm8, %v7398_v50, %v6561_v55 }
 0xb9b   :  { %v6627_v35 = vmul.f32 %v6565_v45, %v12204_v49 }
 0xb9d   :  { %v6636_v9 = vmul.f32 %v12252_v25, %v6627_v35 }
 0xb9f   :  { %v6645_v49 = vadd.f32 %v12255_v36, %v6636_v9 }
 0xba1   :  { %v6520_v7 = vpop.xlane.xlu1 %6519 }
 0xba2   :  { %v6534_v1 = vmul.f32 %v6520_v7, %v12037_v24 }
 0xba4   :  { %v6542_v15 = vadd.f32 1e-05, %v6534_v1 }
 0xba5   :  { %6652 = vxpose.xlu0.b32.start [1/4] (short) (narrow) %v6644_v33, 32 }
 0xba6   :  { %7399 = vrsqrt.f32 %v6542_v15  ;;  %vm6592_vm10 = vweird.f32 %v6542_v15 }
 0xba9   :  { %v6523_v2 = vpop.xlane.xlu2 %6522  ;;  %v6514_v5 = vpop.xlane.xlu1 %6513 }
 0xbaa   :  { %v6535_v4 = vmul.f32 %v6523_v2, %v12037_v24  ;;  %v6532_v26 = vmul.f32 %v6514_v5, %v12037_v24 }
 0xbac   :  { %v7400_v63 = vpop.eup %7399  ;;  %v6543_v44 = vadd.f32 1e-05, %v6535_v4  ;;  %v6540_v58 = vadd.f32 1e-05, %v6532_v26 }
 0xbad   :  { %v6587_v54 = vmul.f32 %v7400_v63, %v6542_v15  ;;  %vm6593_vm9 = vweird.f32 %v7400_v63  ;;  %6653 = vxpose.xlu0.b32.cont [2/4] (short) (narrow) %v6645_v49, 32 }
 0xbae   :  { %7401 = vrsqrt.f32 %v6543_v44  ;;  %vm6594_vm11 = vmor %vm6592_vm10, %vm6593_vm9  ;;  %vm6602_vm14 = vweird.f32 %v6543_v44  ;;  %vm6572_vm2 = vweird.f32 %v6540_v58 }
 0xbaf   :  { %v6588_v0 = vmul.f32 %v7400_v63, %v6587_v54  ;;  %7403 = vrsqrt.f32 %v6540_v58 }
 0xbb1   :  { %v6589_v48 = vmul.f32 0.5, %v6588_v0  ;;  %v6517_v42 = vpop.xlane.xlu2 %6516 }
 0xbb2   :  { %v6533_v31 = vmul.f32 %v6517_v42, %v12037_v24 }
 0xbb3   :  { %v6590_v21 = vsub.f32 1.5, %v6589_v48 }
 0xbb4   :  { %v7402_v51 = vpop.eup %7401  ;;  %v6541_v30 = vadd.f32 1e-05, %v6533_v31 }
 0xbb5   :  { %v7404_v6 = vpop.eup %7403  ;;  %v6591_v8 = vmul.f32 %v7400_v63, %v6590_v21  ;;  %v6597_v10 = vmul.f32 %v7402_v51, %v6543_v44  ;;  %vm6603_vm12 = vweird.f32 %v7402_v51 }
 0xbb6   :  { %v6567_v39 = vmul.f32 %v7404_v6, %v6540_v58  ;;  %7405 = vrsqrt.f32 %v6541_v30  ;;  %vm6573_vm13 = vweird.f32 %v7404_v6  ;;  %vm6604_vm15 = vmor %vm6602_vm14, %vm6603_vm12  ;;  %vm6582_vm4 = vweird.f32 %v6541_v30 }
 0xbb7   :  { %v6595_v27 = vsel %vm6594_vm11, %v7400_v63, %v6591_v8  ;;  %v6598_v16 = vmul.f32 %v7402_v51, %v6597_v10  ;;  %vm6574_vm3 = vmor %vm6572_vm2, %vm6573_vm13 }
 0xbb8   :  { %v6630_v32 = vmul.f32 %v6595_v27, %v12212_v29  ;;  %v6568_v3 = vmul.f32 %v7404_v6, %v6567_v39 }
 0xbb9   :  { %v6599_v61 = vmul.f32 0.5, %v6598_v16 }
 0xbba   :  { %v6569_v23 = vmul.f32 0.5, %v6568_v3  ;;  %v6639_v43 = vmul.f32 %v12252_v25, %v6630_v32 }
 0xbbb   :  { %v6600_v41 = vsub.f32 1.5, %v6599_v61 }
 0xbbc   :  { %v7406_v11 = vpop.eup %7405  ;;  %v6570_v40 = vsub.f32 1.5, %v6569_v23  ;;  %v6648_v46 = vadd.f32 %v12255_v36, %v6639_v43 }
 0xbbd   :  { %v6601_v20 = vmul.f32 %v7402_v51, %v6600_v41  ;;  %v6577_v38 = vmul.f32 %v7406_v11, %v6541_v30  ;;  %vm6583_vm1 = vweird.f32 %v7406_v11 }
 0xbbe   :  { %v6571_v47 = vmul.f32 %v7404_v6, %v6570_v40  ;;  %6684 = vxpose.xlu2.b32.start [1/4] (short) (narrow) %v6648_v46, 32  ;;  %vm6584_vm5 = vmor %vm6582_vm4, %vm6583_vm1 }
 0xbbf   :  { %v6605_v29 = vsel %vm6604_vm15, %v7402_v51, %v6601_v20  ;;  %v6578_v18 = vmul.f32 %v7406_v11, %v6577_v38 }
 0xbc0   :  { %v6631_v34 = vmul.f32 %v6605_v29, %v12219_v14  ;;  %v6575_v50 = vsel %vm6574_vm3, %v7404_v6, %v6571_v47 }
 0xbc1   :  { %v6628_v59 = vmul.f32 %v6575_v50, %v12221_v13  ;;  %v6579_v19 = vmul.f32 0.5, %v6578_v18 }
 0xbc2   :  { %v6640_v28 = vmul.f32 %v12252_v25, %v6631_v34 }
 0xbc3   :  { %v6580_v56 = vsub.f32 1.5, %v6579_v19  ;;  %v6637_v22 = vmul.f32 %v12252_v25, %v6628_v59 }
 0xbc4   :  { %v6649_v37 = vadd.f32 %v12255_v36, %v6640_v28 }
 0xbc5   :  { %v6581_v52 = vmul.f32 %v7406_v11, %v6580_v56  ;;  %v6646_v7 = vadd.f32 %v12255_v36, %v6637_v22 }
 0xbc6   :  { %6685 = vxpose.xlu2.b32.cont [2/4] (short) (narrow) %v6649_v37, 32 }
 0xbc7   :  { %v6585_v1 = vsel %vm6584_vm5, %v7406_v11, %v6581_v52  ;;  %6654 = vxpose.xlu0.b32.cont [3/4] (short) (narrow) %v6646_v7, 32 }
 0xbc8   :  { %v6629_v14 = vmul.f32 %v6585_v1, %v12230_v60 }
 0xbca   :  { %v6638_v13 = vmul.f32 %v12252_v25, %v6629_v14 }
 0xbcc   :  { %v6647_v57 = vadd.f32 %v12255_v36, %v6638_v13 }
 0xbcf   :  { %6655 = vxpose.xlu0.b32.end [4/4] (short) (narrow) %v6647_v57, 32 }
 0xbef   :  { %v6526_v15 = vpop.xlane.xlu0 %6525 }
 0xbf0   :  { %v6536_v55 = vmul.f32 %v6526_v15, %v12037_v24 }
 0xbf2   :  { %v6544_v53 = vadd.f32 1e-05, %v6536_v55 }
 0xbf4   :  { %7407 = vrsqrt.f32 %v6544_v53  ;;  %vm6612_vm7 = vweird.f32 %v6544_v53 }
 0xbf7   :  { %v6529_v45 = vpop.xlane.xlu1 %6528 }
 0xbf8   :  { %v6537_v2 = vmul.f32 %v6529_v45, %v12037_v24 }
 0xbfa   :  { %v7408_v5 = vpop.eup %7407  ;;  %v6545_v4 = vadd.f32 1e-05, %v6537_v2 }
 0xbfb   :  { %v6607_v26 = vmul.f32 %v7408_v5, %v6544_v53  ;;  %vm6613_vm6 = vweird.f32 %v7408_v5 }
 0xbfc   :  { %7409 = vrsqrt.f32 %v6545_v4  ;;  %vm6614_vm8 = vmor %vm6612_vm7, %vm6613_vm6  ;;  %vm6622_vm10 = vweird.f32 %v6545_v4 }
 0xbfd   :  { %v6608_v12 = vmul.f32 %v7408_v5, %v6607_v26 }
 0xbff   :  { %v6609_v63 = vmul.f32 0.5, %v6608_v12 }
 0xc01   :  { %v6610_v60 = vsub.f32 1.5, %v6609_v63 }
 0xc02   :  { %v7410_v35 = vpop.eup %7409 }
 0xc03   :  { %v6611_v44 = vmul.f32 %v7408_v5, %v6610_v60  ;;  %v6617_v58 = vmul.f32 %v7410_v35, %v6545_v4  ;;  %vm6623_vm9 = vweird.f32 %v7410_v35 }
 0xc04   :  { %vm6624_vm11 = vmor %vm6622_vm10, %vm6623_vm9 }
 0xc05   :  { %v6615_v33 = vsel %vm6614_vm8, %v7408_v5, %v6611_v44  ;;  %v6618_v54 = vmul.f32 %v7410_v35, %v6617_v58 }
 0xc06   :  { %v6632_v0 = vmul.f32 %v6615_v33, %v12236_v62 }
 0xc07   :  { %v6619_v9 = vmul.f32 0.5, %v6618_v54 }
 0xc08   :  { %v6641_v24 = vmul.f32 %v12252_v25, %v6632_v0 }
 0xc09   :  { %v6620_v48 = vsub.f32 1.5, %v6619_v9 }
 0xc0a   :  { %v6650_v42 = vadd.f32 %v12255_v36, %v6641_v24 }
 0xc0b   :  { %v6621_v31 = vmul.f32 %v7410_v35, %v6620_v48 }
 0xc0c   :  { %6686 = vxpose.xlu2.b32.cont [3/4] (short) (narrow) %v6650_v42, 32 }
 0xc0d   :  { %v6625_v21 = vsel %vm6624_vm11, %v7410_v35, %v6621_v31 }
 0xc0e   :  { %v6633_v51 = vmul.f32 %v6625_v21, %v12243_v17 }
 0xc10   :  { %v6642_v30 = vmul.f32 %v12252_v25, %v6633_v51 }
 0xc12   :  { %v6651_v49 = vadd.f32 %v12255_v36, %v6642_v30 }
 0xc14   :  { %6687 = vxpose.xlu2.b32.end [4/4] (short) (narrow) %v6651_v49, 32 }
 0xc5b   :  { %v6668_v62 = vpop.trf.xlu0 }
 0xc5c   :  { %6716 = vst.msk [vmem:[#allocation10] sm:$0xff] %vm266_vm0, %v6668_v62 }
 0xc63   :  { %v6669_v6 = vpop.trf.xlu0 }
 0xc64   :  { %6717 = vst.msk [vmem:[#allocation10 + $0x8] sm:$0xff] %vm266_vm0, %v6669_v6 }
 0xc6b   :  { %v6670_v8 = vpop.trf.xlu0 }
 0xc6c   :  { %6718 = vst.msk [vmem:[#allocation10 + $0x10] sm:$0xff] %vm266_vm0, %v6670_v8 }
 0xc73   :  { %v6671_v10 = vpop.trf.xlu0 }
 0xc74   :  { %6719 = vst.msk [vmem:[#allocation10 + $0x18] sm:$0xff] %vm266_vm0, %v6671_v10 }
 0xc95   :  { %v6700_v39 = vpop.trf.xlu2 }
 0xc96   :  { %6720 = vst.msk [vmem:[#allocation10 + $0x20] sm:$0xff] %vm266_vm0, %v6700_v39 }
 0xc9d   :  { %v6701_v17 = vpop.trf.xlu2 }
 0xc9e   :  { %6721 = vst.msk [vmem:[#allocation10 + $0x28] sm:$0xff] %vm266_vm0, %v6701_v17 }
 0xca5   :  { %v6702_v25 = vpop.trf.xlu2 }
 0xca6   :  { %6722 = vst.msk [vmem:[#allocation10 + $0x30] sm:$0xff] %vm266_vm0, %v6702_v25 }
 0xcad   :  { %v6703_v36 = vpop.trf.xlu2 }
 0xcae   :  { %6723 = vst.msk [vmem:[#allocation10 + $0x38] sm:$0xff] %vm266_vm0, %v6703_v36 }
 0xcaf   :  { %6736 = dma.vmem_to_hbm [thread:$0]  %s6729_s6, 1024, %s6731_s24, [#allocation4], %s7541_s9, %s7541_s9, %s7542_s10  }
 0xcb0   :  { %7538 = dma.done.wait [#allocation4], 1024  }
 0xcb1   :  { %7539 = vsyncadd [#allocation4], 4294966272 }
 0xcb2   :  { %6741 = vsyncpa [#allocation3], 1 }
 0xcb3   :  { %6742 = vsyncpa [#allocation6], 1 }
 0xcb4   :  { %6743 = vsyncpa [#allocation9], 1 }
 0xcb5   :  { %6744 = vsyncpa [#allocation4], 1 }

</bundles_post_ra>
